<compile_context>
chip_gen: v6e
topology: v6e:2x2x1
jax: 0.10.0
libtpu: 0.0.40
codegen_flags: <defaults>
</compile_context>

<pallas_src>
import functools

import jax
import jax.numpy as jnp
from jax.experimental import pallas as pl
from jax.experimental.pallas import tpu as pltpu


# ----------------------------------------------------------------------------
# Generation-aware VMEM sizing
# ----------------------------------------------------------------------------
def _vmem_limit_bytes():
    cap = 128 * 1024 * 1024
    try:
        cap = int(pltpu.get_tpu_info().vmem_capacity_bytes)
    except Exception:
        pass
    # ~65% of physical VMEM, clamped: ~41 MiB on v7x (64 MiB/TC), ~83 MiB on v5e/v6e.
    return max(32 * 1024 * 1024, min(int(cap * 0.65), 100 * 1024 * 1024))


_VMEM_LIMIT = _vmem_limit_bytes()
_CONV_TILE_BUDGET = int(_VMEM_LIMIT * 0.45)


def _r8(x):
    return ((x + 7) // 8) * 8


def _r128(x):
    return ((x + 127) // 128) * 128


# ----------------------------------------------------------------------------
# Tile-size helpers (host-side Python on static shapes)
# ----------------------------------------------------------------------------
def _pick_tile(dim, target, align):
    """Largest divisor of `dim` that is <= target, preferring multiples of `align`."""
    target = max(1, min(dim, target))
    divs = [d for d in range(1, dim + 1) if dim % d == 0]
    aligned = [d for d in divs if d <= target and d % align == 0]
    if aligned:
        return max(aligned)
    fitting = [d for d in divs if d <= target]
    if fitting:
        return max(fitting)
    return dim


def _conv_vmem_bytes(R, W, Cin, Cout, pool):
    """Lane-padding-aware VMEM estimate for one conv tile (all resident pieces)."""
    cin_l = _r128(Cin)
    k_l = _r128(3 * Cin)
    cout_l = _r128(Cout)
    in_blk = 2 * (R + 2) * _r8(W + 2) * cin_l * 2        # double-buffered bf16 input
    wgt = 2 * _r8(3 * Cin) * 3 * cout_l * 2              # resident bf16 weight (x2 headroom)
    a_tmp = (R + 2) * W * k_l * 2                        # kw-tap concat temp (bf16)
    acc = R * W * cout_l * 4                             # f32 accumulator value
    out_rows = (R // 2) * (W // 2) if pool else R * W
    out_blk = 2 * _r8(out_rows) * cout_l * 2             # double-buffered bf16 output
    epi = R * W * cout_l * 2                             # epilogue temporaries
    pool_scr = ((R // 2) * W * cout_l * 4) if pool else 0
    return in_blk + wgt + a_tmp + acc + out_blk + epi + pool_scr


def _conv_row_tile(H, W, Cin, Cout, pool, budget):
    """Pick #image rows per conv tile: biggest valid divisor of H under the budget."""
    valid = []
    for R in range(H, 0, -1):
        if H % R:
            continue
        if pool:
            if R % 2:
                continue
            if ((R // 2) * (W // 2)) % 8 != 0:
                continue
        valid.append(R)
    if not valid:
        return None
    for R in valid:                      # descending: biggest tile first
        if _conv_vmem_bytes(R, W, Cin, Cout, pool) <= budget:
            return R
    return valid[-1]                     # smallest valid tile as last resort


# ----------------------------------------------------------------------------
# Kernel 1: tiled K-accumulating matmul + bias (+ReLU) epilogue (fallback path)
# ----------------------------------------------------------------------------
def _matmul_bias_act_kernel(a_ref, b_ref, bias_ref, o_ref, acc_ref, *, relu):
    k = pl.program_id(2)

    @pl.when(k == 0)
    def _init():
        acc_ref[...] = jnp.zeros_like(acc_ref)

    acc_ref[...] += jnp.dot(a_ref[...], b_ref[...],
                            preferred_element_type=jnp.float32)

    @pl.when(k == pl.num_programs(2) - 1)
    def _fin():
        out = acc_ref[...] + bias_ref[...]          # f32 epilogue
        if relu:
            out = jnp.maximum(out, 0.0)
        o_ref[...] = out.astype(o_ref.dtype)


def matmul_bias_act(a, bmat, bias, relu):
    """a: (M, K), bmat: (K, N) -> (M, N) bf16; bf16 matmul, f32 accumulation."""
    M, K = a.shape
    _, N = bmat.shape
    a = a.astype(jnp.bfloat16)
    bmat = bmat.astype(jnp.bfloat16)
    bias2 = bias.reshape(1, N).astype(jnp.float32)

    tm = _pick_tile(M, 512, 16)                     # 16-aligned for bf16 packing
    tn = _pick_tile(N, 256, 128)
    tk = _pick_tile(K, 512, 128)
    grid = (M // tm, N // tn, K // tk)

    flops = 2 * M * K * N
    bytes_accessed = M * K * 2 + K * N * 2 + M * N * 2 + N * 4

    return pl.pallas_call(
        functools.partial(_matmul_bias_act_kernel, relu=relu),
        out_shape=jax.ShapeDtypeStruct((M, N), jnp.bfloat16),
        grid=grid,
        in_specs=[
            pl.BlockSpec((tm, tk), lambda i, j, k: (i, k)),
            pl.BlockSpec((tk, tn), lambda i, j, k: (k, j)),
            pl.BlockSpec((1, tn), lambda i, j, k: (0, j)),
        ],
        out_specs=pl.BlockSpec((tm, tn), lambda i, j, k: (i, j)),
        scratch_shapes=[pltpu.VMEM((tm, tn), jnp.float32)],
        compiler_params=pltpu.CompilerParams(
            dimension_semantics=("parallel", "parallel", "arbitrary"),
            vmem_limit_bytes=_VMEM_LIMIT),
        cost_estimate=pl.CostEstimate(flops=flops, transcendentals=0,
                                      bytes_accessed=bytes_accessed),
    )(a, bmat, bias2)


# ----------------------------------------------------------------------------
# Kernel 2: fused ReflectionPad(1) + Conv3x3 + ReLU (+ optional fused 2x2 MaxPool)
#   grid = (row_tiles,), weight/bias VMEM-resident (constant block index),
#   3 kh taps = 3 accumulating MXU matmuls in-kernel, input read exactly once.
# ----------------------------------------------------------------------------
def _conv3x3_accum(x_ref, w_ref, b_ref, *, R, W, Cin, relu):
    x = x_ref[0]                                        # (R+2, W+2, Cin) bf16
    # Build the 3 kw taps once per tile (lane-dim concat).
    a = jnp.concatenate([x[:, 0:W, :], x[:, 1:W + 1, :], x[:, 2:W + 2, :]],
                        axis=-1)                        # (R+2, W, 3*Cin)
    K = 3 * Cin
    acc = jnp.dot(a[0:R].reshape(R * W, K), w_ref[0],
                  preferred_element_type=jnp.float32)
    acc = acc + jnp.dot(a[1:R + 1].reshape(R * W, K), w_ref[1],
                        preferred_element_type=jnp.float32)
    acc = acc + jnp.dot(a[2:R + 2].reshape(R * W, K), w_ref[2],
                        preferred_element_type=jnp.float32)
    out = acc + b_ref[...]                              # (R*W, Cout) f32
    if relu:
        out = jnp.maximum(out, 0.0)
    return out


def _conv3x3_kernel(x_ref, w_ref, b_ref, o_ref, *, R, W, Cin, relu):
    out = _conv3x3_accum(x_ref, w_ref, b_ref, R=R, W=W, Cin=Cin, relu=relu)
    o_ref[...] = out.astype(o_ref.dtype)


def _conv3x3_pool_kernel(x_ref, w_ref, b_ref, o_ref, hp_ref, *, R, W, Cin, relu):
    out = _conv3x3_accum(x_ref, w_ref, b_ref, R=R, W=W, Cin=Cin, relu=relu)
    Cout = o_ref.shape[-1]
    # ---- 2x2 / stride-2 max-pool fused into the epilogue ----
    # Pool over row pairs: aligned second-minor slices (W % 8 == 0).
    t = out.reshape(R // 2, 2 * W, Cout)
    hp = jnp.maximum(t[:, :W, :], t[:, W:, :])          # (R//2, W, Cout)
    hp_ref[...] = hp.reshape((R // 2) * W, Cout)
    # Pool over column pairs: stride-2 row loads from the VMEM scratch.
    n_out = (R // 2) * (W // 2)
    even = hp_ref[pl.ds(0, n_out, stride=2), :]
    odd = hp_ref[pl.ds(1, n_out, stride=2), :]
    o_ref[...] = jnp.maximum(even, odd).astype(o_ref.dtype)


def conv3x3_reflect_relu(x, wgt, b, relu=True, pool=False):
    """ReflectionPad2d(1) + Conv2d(3x3, stride 1) (+ ReLU) (+ optional 2x2 MaxPool).

    x: NHWC bf16; wgt: (Cout, Cin, 3, 3) f32 PyTorch layout; b: (Cout,) f32.
    """
    N, H, W, Cin = x.shape
    Cout = wgt.shape[0]
    if pool:
        # TODO(synk): ceil_mode=True would add an extra output row/col for odd H/W.
        assert H % 2 == 0 and W % 2 == 0

    xp = jnp.pad(x, ((0, 0), (1, 1), (1, 1), (0, 0)), mode="reflect")  # (N,H+2,W+2,Cin)

    fuse_pool = False
    R = None
    if W % 8 == 0:
        if pool:
            R = _conv_row_tile(H, W, Cin, Cout, True, _CONV_TILE_BUDGET)
            fuse_pool = R is not None
        if R is None:
            R = _conv_row_tile(H, W, Cin, Cout, False, _CONV_TILE_BUDGET)

    if R is None:
        # Tiny / misaligned widths (only the deepest layers at small inputs):
        # im2col + tiled matmul; negligible cost at these sizes.
        patches = [xp[:, di:di + H, dj:dj + W, :] for di in range(3) for dj in range(3)]
        a = jnp.concatenate(patches, axis=-1).reshape(N * H * W, 9 * Cin)
        bmat = jnp.transpose(wgt, (2, 3, 1, 0)).reshape(9 * Cin, Cout)
        out = matmul_bias_act(a, bmat, b, relu=relu).reshape(N, H, W, Cout)
        return maxpool2x2(out) if pool else out

    G = N * (H // R)
    if R == H:
        xg = xp                                          # (N, H+2, W+2, Cin): no copy
    else:
        # Overlapping row groups (2-row halo per R rows).  One cheap extra pass in
        # HBM, but the kernel then reads each group exactly once (vs. 3x kh slabs
        # + per-Cout-tile re-reads previously).
        xf = xp.reshape(N * (H + 2), W + 2, Cin)
        g = jnp.arange(G, dtype=jnp.int32)
        base = (g // (H // R)) * (H + 2) + (g % (H // R)) * R
        idx = base[:, None] + jnp.arange(R + 2, dtype=jnp.int32)[None, :]
        xg = jnp.take(xf, idx.reshape(-1), axis=0).reshape(G, R + 2, W + 2, Cin)

    # weight (Cout, Cin, kh, kw) -> (kh, kw, Cin, Cout) -> (3, 3*Cin, Cout)
    wmat = jnp.transpose(wgt, (2, 3, 1, 0)).reshape(3, 3 * Cin, Cout).astype(jnp.bfloat16)
    bias2 = b.reshape(1, Cout).astype(jnp.float32)

    out_rows_blk = (R // 2) * (W // 2) if fuse_pool else R * W
    M_out = G * out_rows_blk

    flops = 2 * N * H * W * 9 * Cin * Cout
    bytes_accessed = xg.size * 2 + wmat.size * 2 + M_out * Cout * 2 + bias2.size * 4

    if fuse_pool:
        kern = functools.partial(_conv3x3_pool_kernel, R=R, W=W, Cin=Cin, relu=relu)
        scratch = [pltpu.VMEM(((R // 2) * W, Cout), jnp.float32)]
    else:
        kern = functools.partial(_conv3x3_kernel, R=R, W=W, Cin=Cin, relu=relu)
        scratch = []

    out = pl.pallas_call(
        kern,
        out_shape=jax.ShapeDtypeStruct((M_out, Cout), jnp.bfloat16),
        grid=(G,),
        in_specs=[
            pl.BlockSpec((1, R + 2, W + 2, Cin), lambda i: (i, 0, 0, 0)),
            pl.BlockSpec((3, 3 * Cin, Cout), lambda i: (0, 0, 0)),   # VMEM-resident
            pl.BlockSpec((1, Cout), lambda i: (0, 0)),               # VMEM-resident
        ],
        out_specs=pl.BlockSpec((out_rows_blk, Cout), lambda i: (i, 0)),
        scratch_shapes=scratch,
        compiler_params=pltpu.CompilerParams(
            dimension_semantics=("parallel",),
            vmem_limit_bytes=_VMEM_LIMIT),
        cost_estimate=pl.CostEstimate(flops=flops, transcendentals=0,
                                      bytes_accessed=bytes_accessed),
    )(xg.astype(jnp.bfloat16), wmat, bias2)

    if fuse_pool:
        return out.reshape(N, H // 2, W // 2, Cout)
    out = out.reshape(N, H, W, Cout)
    if pool:                                  # pool requested but not fusable here
        out = maxpool2x2(out)
    return out


# ----------------------------------------------------------------------------
# Kernel 3: standalone 2x2 / stride-2 max pool (single read+write pass; used only
# when the pool could not be fused into the preceding conv)
# ----------------------------------------------------------------------------
def _maxpool_kernel(x_ref, o_ref, *, C):
    x = x_ref[...]                              # (tb, 2, Wo, 2*C)
    m = jnp.maximum(x[:, 0], x[:, 1])           # max over the row pair
    o_ref[...] = jnp.maximum(m[:, :, :C], m[:, :, C:])   # max over the column pair


def maxpool2x2(x):
    """x: NHWC with even H, W."""
    N, H, W, C = x.shape
    # TODO(synk): ceil_mode=True would add an extra output row/col for odd H/W.
    assert H % 2 == 0 and W % 2 == 0
    Ho, Wo = H // 2, W // 2
    xr = x.reshape(N * Ho, 2, Wo, 2 * C)        # pure row-major split/merge: free
    tb = _pick_tile(N * Ho, 256, 8)
    out = pl.pallas_call(
        functools.partial(_maxpool_kernel, C=C),
        out_shape=jax.ShapeDtypeStruct((N * Ho, Wo, C), x.dtype),
        grid=(N * Ho // tb,),
        in_specs=[pl.BlockSpec((tb, 2, Wo, 2 * C), lambda i: (i, 0, 0, 0))],
        out_specs=pl.BlockSpec((tb, Wo, C), lambda i: (i, 0, 0)),
        compiler_params=pltpu.CompilerParams(
            dimension_semantics=("parallel",),
            vmem_limit_bytes=_VMEM_LIMIT),
    )(xr)
    return out.reshape(N, Ho, Wo, C)


# ----------------------------------------------------------------------------
# Host-side exact fold of the 1x1 conv into the following 3x3 conv
# ----------------------------------------------------------------------------
def _fold_1x1_into_conv3x3(w0, b0, w1, b1):
    """conv1x1 is a per-pixel affine map, which commutes with ReflectionPad2d, so
    it folds exactly into the following 3x3 conv's weights/bias."""
    w0m = w0.reshape(w0.shape[0], w0.shape[1])           # (C, C)
    w1f = jnp.einsum("ochw,ci->oihw", w1, w0m)
    b1f = b1 + jnp.einsum("ochw,c->o", w1, b0)
    return w1f, b1f


# ----------------------------------------------------------------------------
# Parameter init (deterministic, synthetic) — shapes follow the PyTorch module
# ----------------------------------------------------------------------------
_CONV_DEFS = [
    (3, 3, 1),      # conv 0: 1x1, no ReLU
    (3, 64, 3),     # conv1_1
    (64, 64, 3),    # conv1_2
    (64, 128, 3),   # conv2_1
    (128, 128, 3),  # conv2_2
    (128, 256, 3),  # conv3_1
    (256, 256, 3),  # conv3_2
    (256, 256, 3),  # conv3_3
    (256, 256, 3),  # conv3_4
    (256, 512, 3),  # conv4_1 (last conv inside enc_0 = layers[:31])
]


def init_params(key):
    params = []
    for cin, cout, k in _CONV_DEFS:
        key, wk, bk = jax.random.split(key, 3)
        fan_in = cin * k * k
        w = jax.random.normal(wk, (cout, cin, k, k), jnp.float32) * jnp.sqrt(2.0 / fan_in)
        b = jax.random.normal(bk, (cout,), jnp.float32) * 0.01
        params.append((w, b))
    return params


# ----------------------------------------------------------------------------
# Encoder.forward  ==  enc_0 = vgg layers [0:31]  (input NCHW -> relu4_1 NCHW)
# ----------------------------------------------------------------------------
def encoder_forward(x_nchw, params):
    # NCHW -> NHWC, bf16 activations (f32 accumulation inside every matmul).
    x = jnp.transpose(x_nchw, (0, 2, 3, 1)).astype(jnp.bfloat16)

    # Fold Conv2d(3,3,1x1) into conv1_1 (exact): removes one full-res HBM pass.
    w11, b11 = _fold_1x1_into_conv3x3(params[0][0], params[0][1],
                                      params[1][0], params[1][1])

    x = conv3x3_reflect_relu(x, w11, b11)                    # conv1_1 (conv0 folded)
    x = conv3x3_reflect_relu(x, *params[2], pool=True)       # conv1_2 + MaxPool (fused)
    x = conv3x3_reflect_relu(x, *params[3])                  # conv2_1
    x = conv3x3_reflect_relu(x, *params[4], pool=True)       # conv2_2 + MaxPool (fused)
    x = conv3x3_reflect_relu(x, *params[5])                  # conv3_1
    x = conv3x3_reflect_relu(x, *params[6])                  # conv3_2
    x = conv3x3_reflect_relu(x, *params[7])                  # conv3_3
    x = conv3x3_reflect_relu(x, *params[8], pool=True)       # conv3_4 + MaxPool
    x = conv3x3_reflect_relu(x, *params[9])                  # conv4_1 (relu4_1)

    return jnp.transpose(x, (0, 3, 1, 2)).astype(jnp.float32)   # NHWC -> NCHW


if __name__ == "__main__":
    key = jax.random.PRNGKey(0)
    pkey, xkey = jax.random.split(key)
    params = init_params(pkey)

    # Small input consistent with the module: NCHW, 3 input channels.
    x = jax.random.normal(xkey, (2, 3, 16, 16), jnp.float32)

    fwd = jax.jit(encoder_forward)
    out = jax.block_until_ready(fwd(x, params))

    assert out.shape == (2, 512, 2, 2), out.shape  # 3 max-pools: 16 -> 2
    assert out.dtype == jnp.float32
    print("KERNEL_OK")
</pallas_src>

<mosaic_0001>
module attributes {stable_mosaic.version = 11 : i64} {
  func.func @_conv3x3_kernel(%arg0: i32, %arg1: memref<1x18x18x3xbf16, #tpu.memory_space<vmem>>, %arg2: memref<3x9x64xbf16, #tpu.memory_space<vmem>>, %arg3: memref<1x64xf32, #tpu.memory_space<vmem>>, %arg4: memref<256x64xbf16, #tpu.memory_space<vmem>>) attributes {dimension_semantics = [#tpu.dimension_semantics<parallel>], iteration_bounds = array<i64: 2>, scalar_prefetch = 0 : i64, scratch_operands = 0 : i64, tpu.core_type = #tpu.core_type<tc>, window_params = [{transform_indices = @transform_0, window_bounds = array<i64: 1, 18, 18, 3>}, {pipeline_mode = #tpu.pipeline_mode<synchronous>, transform_indices = @transform_1, window_bounds = array<i64: 3, 9, 64>}, {pipeline_mode = #tpu.pipeline_mode<synchronous>, transform_indices = @transform_2, window_bounds = array<i64: 1, 64>}, {transform_indices = @transform_3, window_bounds = array<i64: 256, 64>}]} {
    %c0 = arith.constant 0 : index
    %c0_0 = arith.constant 0 : index
    %c0_1 = arith.constant 0 : index
    %c0_2 = arith.constant 0 : index
    %0 = vector.load %arg1[%c0, %c0_0, %c0_1, %c0_2] : memref<1x18x18x3xbf16, #tpu.memory_space<vmem>>, vector<1x18x18x3xbf16>
    %1 = vector.shape_cast %0 : vector<1x18x18x3xbf16> to vector<18x18x3xbf16>
    %2 = vector.extract_strided_slice %1 {offsets = [0, 0, 0], sizes = [18, 16, 3], strides = [1, 1, 1]} : vector<18x18x3xbf16> to vector<18x16x3xbf16>
    %3 = vector.extract_strided_slice %1 {offsets = [0, 1, 0], sizes = [18, 16, 3], strides = [1, 1, 1]} : vector<18x18x3xbf16> to vector<18x16x3xbf16>
    %4 = vector.extract_strided_slice %1 {offsets = [0, 2, 0], sizes = [18, 16, 3], strides = [1, 1, 1]} : vector<18x18x3xbf16> to vector<18x16x3xbf16>
    %5 = tpu.concatenate %2, %3, %4 in 2 : vector<18x16x3xbf16>, vector<18x16x3xbf16>, vector<18x16x3xbf16> -> vector<18x16x9xbf16>
    %6 = vector.extract_strided_slice %5 {offsets = [0, 0, 0], sizes = [16, 16, 9], strides = [1, 1, 1]} : vector<18x16x9xbf16> to vector<16x16x9xbf16>
    %7 = vector.shape_cast %6 : vector<16x16x9xbf16> to vector<256x9xbf16>
    %c0_3 = arith.constant 0 : index
    %c0_4 = arith.constant 0 : index
    %c0_5 = arith.constant 0 : index
    %8 = vector.load %arg2[%c0_3, %c0_4, %c0_5] : memref<3x9x64xbf16, #tpu.memory_space<vmem>>, vector<1x9x64xbf16>
    %9 = vector.shape_cast %8 : vector<1x9x64xbf16> to vector<9x64xbf16>
    %cst = arith.constant dense<0.000000e+00> : vector<256x64xf32>
    %10 = tpu.matmul %7, %9, %cst {dimension_numbers = #tpu.dot_dimension_numbers<[1], [0], [0], [1], [0, 0, 1, 1], [], []>} : vector<256x9xbf16>, vector<9x64xbf16>, vector<256x64xf32> -> vector<256x64xf32>
    %11 = vector.extract_strided_slice %5 {offsets = [1, 0, 0], sizes = [16, 16, 9], strides = [1, 1, 1]} : vector<18x16x9xbf16> to vector<16x16x9xbf16>
    %12 = vector.shape_cast %11 : vector<16x16x9xbf16> to vector<256x9xbf16>
    %c1 = arith.constant 1 : index
    %c0_6 = arith.constant 0 : index
    %c0_7 = arith.constant 0 : index
    %13 = vector.load %arg2[%c1, %c0_6, %c0_7] : memref<3x9x64xbf16, #tpu.memory_space<vmem>>, vector<1x9x64xbf16>
    %14 = vector.shape_cast %13 : vector<1x9x64xbf16> to vector<9x64xbf16>
    %cst_8 = arith.constant dense<0.000000e+00> : vector<256x64xf32>
    %15 = tpu.matmul %12, %14, %cst_8 {dimension_numbers = #tpu.dot_dimension_numbers<[1], [0], [0], [1], [0, 0, 1, 1], [], []>} : vector<256x9xbf16>, vector<9x64xbf16>, vector<256x64xf32> -> vector<256x64xf32>
    %16 = arith.addf %10, %15 : vector<256x64xf32>
    %17 = vector.extract_strided_slice %5 {offsets = [2, 0, 0], sizes = [16, 16, 9], strides = [1, 1, 1]} : vector<18x16x9xbf16> to vector<16x16x9xbf16>
    %18 = vector.shape_cast %17 : vector<16x16x9xbf16> to vector<256x9xbf16>
    %c2 = arith.constant 2 : index
    %c0_9 = arith.constant 0 : index
    %c0_10 = arith.constant 0 : index
    %19 = vector.load %arg2[%c2, %c0_9, %c0_10] : memref<3x9x64xbf16, #tpu.memory_space<vmem>>, vector<1x9x64xbf16>
    %20 = vector.shape_cast %19 : vector<1x9x64xbf16> to vector<9x64xbf16>
    %cst_11 = arith.constant dense<0.000000e+00> : vector<256x64xf32>
    %21 = tpu.matmul %18, %20, %cst_11 {dimension_numbers = #tpu.dot_dimension_numbers<[1], [0], [0], [1], [0, 0, 1, 1], [], []>} : vector<256x9xbf16>, vector<9x64xbf16>, vector<256x64xf32> -> vector<256x64xf32>
    %22 = arith.addf %16, %21 : vector<256x64xf32>
    %c0_12 = arith.constant 0 : index
    %c0_13 = arith.constant 0 : index
    %23 = vector.load %arg3[%c0_12, %c0_13] : memref<1x64xf32, #tpu.memory_space<vmem>>, vector<1x64xf32>
    %24 = vector.broadcast %23 : vector<1x64xf32> to vector<256x64xf32>
    %25 = arith.addf %22, %24 : vector<256x64xf32>
    %cst_14 = arith.constant 0.000000e+00 : f32
    %26 = vector.broadcast %cst_14 : f32 to vector<256x64xf32>
    %27 = arith.maximumf %25, %26 : vector<256x64xf32>
    %28 = arith.truncf %27 : vector<256x64xf32> to vector<256x64xbf16>
    %c0_15 = arith.constant 0 : index
    %c0_16 = arith.constant 0 : index
    %29 = vector.load %arg4[%c0_15, %c0_16] : memref<256x64xbf16, #tpu.memory_space<vmem>>, vector<256x64xbf16>
    tpu.vector_store %arg4[%c0_15, %c0_16], %28 {strides = array<i32>} : memref<256x64xbf16, #tpu.memory_space<vmem>>, vector<256x64xbf16>,
    return
  }
  func.func @transform_0(%arg0: i32) -> (i32, i32, i32, i32) {
    %c0_i32 = arith.constant 0 : i32
    %c0_i32_0 = arith.constant 0 : i32
    %c0_i32_1 = arith.constant 0 : i32
    %c0_i32_2 = arith.constant 0 : i32
    return %arg0, %c0_i32, %c0_i32_0, %c0_i32_1 : i32, i32, i32, i32
  }
  func.func @transform_1(%arg0: i32) -> (i32, i32, i32) {
    %c0_i32 = arith.constant 0 : i32
    %c0_i32_0 = arith.constant 0 : i32
    %c0_i32_1 = arith.constant 0 : i32
    %c0_i32_2 = arith.constant 0 : i32
    return %c0_i32, %c0_i32_0, %c0_i32_1 : i32, i32, i32
  }
  func.func @transform_2(%arg0: i32) -> (i32, i32) {
    %c0_i32 = arith.constant 0 : i32
    %c0_i32_0 = arith.constant 0 : i32
    %c0_i32_1 = arith.constant 0 : i32
    return %c0_i32, %c0_i32_0 : i32, i32
  }
  func.func @transform_3(%arg0: i32) -> (i32, i32) {
    %c0_i32 = arith.constant 0 : i32
    %c0_i32_0 = arith.constant 0 : i32
    return %arg0, %c0_i32 : i32, i32
  }
}

module attributes {stable_mosaic.version = 11 : i64} {
  func.func @_conv3x3_pool_kernel(%arg0: i32, %arg1: memref<1x18x18x64xbf16, #tpu.memory_space<vmem>>, %arg2: memref<3x192x64xbf16, #tpu.memory_space<vmem>>, %arg3: memref<1x64xf32, #tpu.memory_space<vmem>>, %arg4: memref<64x64xbf16, #tpu.memory_space<vmem>>, %arg5: memref<128x64xf32, #tpu.memory_space<vmem>>) attributes {dimension_semantics = [#tpu.dimension_semantics<parallel>], iteration_bounds = array<i64: 2>, scalar_prefetch = 0 : i64, scratch_operands = 1 : i64, tpu.core_type = #tpu.core_type<tc>, window_params = [{transform_indices = @transform_0, window_bounds = array<i64: 1, 18, 18, 64>}, {pipeline_mode = #tpu.pipeline_mode<synchronous>, transform_indices = @transform_1, window_bounds = array<i64: 3, 192, 64>}, {pipeline_mode = #tpu.pipeline_mode<synchronous>, transform_indices = @transform_2, window_bounds = array<i64: 1, 64>}, {transform_indices = @transform_3, window_bounds = array<i64: 64, 64>}]} {
    %c0 = arith.constant 0 : index
    %c0_0 = arith.constant 0 : index
    %c0_1 = arith.constant 0 : index
    %c0_2 = arith.constant 0 : index
    %0 = vector.load %arg1[%c0, %c0_0, %c0_1, %c0_2] : memref<1x18x18x64xbf16, #tpu.memory_space<vmem>>, vector<1x18x18x64xbf16>
    %1 = vector.shape_cast %0 : vector<1x18x18x64xbf16> to vector<18x18x64xbf16>
    %2 = vector.extract_strided_slice %1 {offsets = [0, 0, 0], sizes = [18, 16, 64], strides = [1, 1, 1]} : vector<18x18x64xbf16> to vector<18x16x64xbf16>
    %3 = vector.extract_strided_slice %1 {offsets = [0, 1, 0], sizes = [18, 16, 64], strides = [1, 1, 1]} : vector<18x18x64xbf16> to vector<18x16x64xbf16>
    %4 = vector.extract_strided_slice %1 {offsets = [0, 2, 0], sizes = [18, 16, 64], strides = [1, 1, 1]} : vector<18x18x64xbf16> to vector<18x16x64xbf16>
    %5 = tpu.concatenate %2, %3, %4 in 2 : vector<18x16x64xbf16>, vector<18x16x64xbf16>, vector<18x16x64xbf16> -> vector<18x16x192xbf16>
    %6 = vector.extract_strided_slice %5 {offsets = [0, 0, 0], sizes = [16, 16, 192], strides = [1, 1, 1]} : vector<18x16x192xbf16> to vector<16x16x192xbf16>
    %7 = vector.shape_cast %6 : vector<16x16x192xbf16> to vector<256x192xbf16>
    %c0_3 = arith.constant 0 : index
    %c0_4 = arith.constant 0 : index
    %c0_5 = arith.constant 0 : index
    %8 = vector.load %arg2[%c0_3, %c0_4, %c0_5] : memref<3x192x64xbf16, #tpu.memory_space<vmem>>, vector<1x192x64xbf16>
    %9 = vector.shape_cast %8 : vector<1x192x64xbf16> to vector<192x64xbf16>
    %cst = arith.constant dense<0.000000e+00> : vector<256x64xf32>
    %10 = tpu.matmul %7, %9, %cst {dimension_numbers = #tpu.dot_dimension_numbers<[1], [0], [0], [1], [0, 0, 1, 1], [], []>} : vector<256x192xbf16>, vector<192x64xbf16>, vector<256x64xf32> -> vector<256x64xf32>
    %11 = vector.extract_strided_slice %5 {offsets = [1, 0, 0], sizes = [16, 16, 192], strides = [1, 1, 1]} : vector<18x16x192xbf16> to vector<16x16x192xbf16>
    %12 = vector.shape_cast %11 : vector<16x16x192xbf16> to vector<256x192xbf16>
    %c1 = arith.constant 1 : index
    %c0_6 = arith.constant 0 : index
    %c0_7 = arith.constant 0 : index
    %13 = vector.load %arg2[%c1, %c0_6, %c0_7] : memref<3x192x64xbf16, #tpu.memory_space<vmem>>, vector<1x192x64xbf16>
    %14 = vector.shape_cast %13 : vector<1x192x64xbf16> to vector<192x64xbf16>
    %cst_8 = arith.constant dense<0.000000e+00> : vector<256x64xf32>
    %15 = tpu.matmul %12, %14, %cst_8 {dimension_numbers = #tpu.dot_dimension_numbers<[1], [0], [0], [1], [0, 0, 1, 1], [], []>} : vector<256x192xbf16>, vector<192x64xbf16>, vector<256x64xf32> -> vector<256x64xf32>
    %16 = arith.addf %10, %15 : vector<256x64xf32>
    %17 = vector.extract_strided_slice %5 {offsets = [2, 0, 0], sizes = [16, 16, 192], strides = [1, 1, 1]} : vector<18x16x192xbf16> to vector<16x16x192xbf16>
    %18 = vector.shape_cast %17 : vector<16x16x192xbf16> to vector<256x192xbf16>
    %c2 = arith.constant 2 : index
    %c0_9 = arith.constant 0 : index
    %c0_10 = arith.constant 0 : index
    %19 = vector.load %arg2[%c2, %c0_9, %c0_10] : memref<3x192x64xbf16, #tpu.memory_space<vmem>>, vector<1x192x64xbf16>
    %20 = vector.shape_cast %19 : vector<1x192x64xbf16> to vector<192x64xbf16>
    %cst_11 = arith.constant dense<0.000000e+00> : vector<256x64xf32>
    %21 = tpu.matmul %18, %20, %cst_11 {dimension_numbers = #tpu.dot_dimension_numbers<[1], [0], [0], [1], [0, 0, 1, 1], [], []>} : vector<256x192xbf16>, vector<192x64xbf16>, vector<256x64xf32> -> vector<256x64xf32>
    %22 = arith.addf %16, %21 : vector<256x64xf32>
    %c0_12 = arith.constant 0 : index
    %c0_13 = arith.constant 0 : index
    %23 = vector.load %arg3[%c0_12, %c0_13] : memref<1x64xf32, #tpu.memory_space<vmem>>, vector<1x64xf32>
    %24 = vector.broadcast %23 : vector<1x64xf32> to vector<256x64xf32>
    %25 = arith.addf %22, %24 : vector<256x64xf32>
    %cst_14 = arith.constant 0.000000e+00 : f32
    %26 = vector.broadcast %cst_14 : f32 to vector<256x64xf32>
    %27 = arith.maximumf %25, %26 : vector<256x64xf32>
    %28 = vector.shape_cast %27 : vector<256x64xf32> to vector<8x32x64xf32>
    %29 = vector.extract_strided_slice %28 {offsets = [0, 0, 0], sizes = [8, 16, 64], strides = [1, 1, 1]} : vector<8x32x64xf32> to vector<8x16x64xf32>
    %30 = vector.extract_strided_slice %28 {offsets = [0, 16, 0], sizes = [8, 16, 64], strides = [1, 1, 1]} : vector<8x32x64xf32> to vector<8x16x64xf32>
    %31 = arith.maximumf %29, %30 : vector<8x16x64xf32>
    %32 = vector.shape_cast %31 : vector<8x16x64xf32> to vector<128x64xf32>
    %c0_15 = arith.constant 0 : index
    %c0_16 = arith.constant 0 : index
    %33 = vector.load %arg5[%c0_15, %c0_16] : memref<128x64xf32, #tpu.memory_space<vmem>>, vector<128x64xf32>
    tpu.vector_store %arg5[%c0_15, %c0_16], %32 {strides = array<i32>} : memref<128x64xf32, #tpu.memory_space<vmem>>, vector<128x64xf32>,
    %c0_17 = arith.constant 0 : index
    %c0_18 = arith.constant 0 : index
    %34 = tpu.strided_load %arg5[%c0_17, %c0_18] {strides = array<i32: 2, 1>} : memref<128x64xf32, #tpu.memory_space<vmem>>, vector<64x64xf32>
    %c1_19 = arith.constant 1 : index
    %c0_20 = arith.constant 0 : index
    %35 = tpu.strided_load %arg5[%c1_19, %c0_20] {strides = array<i32: 2, 1>} : memref<128x64xf32, #tpu.memory_space<vmem>>, vector<64x64xf32>
    %36 = arith.maximumf %34, %35 : vector<64x64xf32>
    %37 = arith.truncf %36 : vector<64x64xf32> to vector<64x64xbf16>
    %c0_21 = arith.constant 0 : index
    %c0_22 = arith.constant 0 : index
    %38 = vector.load %arg4[%c0_21, %c0_22] : memref<64x64xbf16, #tpu.memory_space<vmem>>, vector<64x64xbf16>
    tpu.vector_store %arg4[%c0_21, %c0_22], %37 {strides = array<i32>} : memref<64x64xbf16, #tpu.memory_space<vmem>>, vector<64x64xbf16>,
    return
  }
  func.func @transform_0(%arg0: i32) -> (i32, i32, i32, i32) {
    %c0_i32 = arith.constant 0 : i32
    %c0_i32_0 = arith.constant 0 : i32
    %c0_i32_1 = arith.constant 0 : i32
    %c0_i32_2 = arith.constant 0 : i32
    return %arg0, %c0_i32, %c0_i32_0, %c0_i32_1 : i32, i32, i32, i32
  }
  func.func @transform_1(%arg0: i32) -> (i32, i32, i32) {
    %c0_i32 = arith.constant 0 : i32
    %c0_i32_0 = arith.constant 0 : i32
    %c0_i32_1 = arith.constant 0 : i32
    %c0_i32_2 = arith.constant 0 : i32
    return %c0_i32, %c0_i32_0, %c0_i32_1 : i32, i32, i32
  }
  func.func @transform_2(%arg0: i32) -> (i32, i32) {
    %c0_i32 = arith.constant 0 : i32
    %c0_i32_0 = arith.constant 0 : i32
    %c0_i32_1 = arith.constant 0 : i32
    return %c0_i32, %c0_i32_0 : i32, i32
  }
  func.func @transform_3(%arg0: i32) -> (i32, i32) {
    %c0_i32 = arith.constant 0 : i32
    %c0_i32_0 = arith.constant 0 : i32
    return %arg0, %c0_i32 : i32, i32
  }
}

module attributes {stable_mosaic.version = 11 : i64} {
  func.func @_conv3x3_kernel(%arg0: i32, %arg1: memref<1x10x10x64xbf16, #tpu.memory_space<vmem>>, %arg2: memref<3x192x128xbf16, #tpu.memory_space<vmem>>, %arg3: memref<1x128xf32, #tpu.memory_space<vmem>>, %arg4: memref<64x128xbf16, #tpu.memory_space<vmem>>) attributes {dimension_semantics = [#tpu.dimension_semantics<parallel>], iteration_bounds = array<i64: 2>, scalar_prefetch = 0 : i64, scratch_operands = 0 : i64, tpu.core_type = #tpu.core_type<tc>, window_params = [{transform_indices = @transform_0, window_bounds = array<i64: 1, 10, 10, 64>}, {pipeline_mode = #tpu.pipeline_mode<synchronous>, transform_indices = @transform_1, window_bounds = array<i64: 3, 192, 128>}, {pipeline_mode = #tpu.pipeline_mode<synchronous>, transform_indices = @transform_2, window_bounds = array<i64: 1, 128>}, {transform_indices = @transform_3, window_bounds = array<i64: 64, 128>}]} {
    %c0 = arith.constant 0 : index
    %c0_0 = arith.constant 0 : index
    %c0_1 = arith.constant 0 : index
    %c0_2 = arith.constant 0 : index
    %0 = vector.load %arg1[%c0, %c0_0, %c0_1, %c0_2] : memref<1x10x10x64xbf16, #tpu.memory_space<vmem>>, vector<1x10x10x64xbf16>
    %1 = vector.shape_cast %0 : vector<1x10x10x64xbf16> to vector<10x10x64xbf16>
    %2 = vector.extract_strided_slice %1 {offsets = [0, 0, 0], sizes = [10, 8, 64], strides = [1, 1, 1]} : vector<10x10x64xbf16> to vector<10x8x64xbf16>
    %3 = vector.extract_strided_slice %1 {offsets = [0, 1, 0], sizes = [10, 8, 64], strides = [1, 1, 1]} : vector<10x10x64xbf16> to vector<10x8x64xbf16>
    %4 = vector.extract_strided_slice %1 {offsets = [0, 2, 0], sizes = [10, 8, 64], strides = [1, 1, 1]} : vector<10x10x64xbf16> to vector<10x8x64xbf16>
    %5 = tpu.concatenate %2, %3, %4 in 2 : vector<10x8x64xbf16>, vector<10x8x64xbf16>, vector<10x8x64xbf16> -> vector<10x8x192xbf16>
    %6 = vector.extract_strided_slice %5 {offsets = [0, 0, 0], sizes = [8, 8, 192], strides = [1, 1, 1]} : vector<10x8x192xbf16> to vector<8x8x192xbf16>
    %7 = vector.shape_cast %6 : vector<8x8x192xbf16> to vector<64x192xbf16>
    %c0_3 = arith.constant 0 : index
    %c0_4 = arith.constant 0 : index
    %c0_5 = arith.constant 0 : index
    %8 = vector.load %arg2[%c0_3, %c0_4, %c0_5] : memref<3x192x128xbf16, #tpu.memory_space<vmem>>, vector<1x192x128xbf16>
    %9 = vector.shape_cast %8 : vector<1x192x128xbf16> to vector<192x128xbf16>
    %cst = arith.constant dense<0.000000e+00> : vector<64x128xf32>
    %10 = tpu.matmul %7, %9, %cst {dimension_numbers = #tpu.dot_dimension_numbers<[1], [0], [0], [1], [0, 0, 1, 1], [], []>} : vector<64x192xbf16>, vector<192x128xbf16>, vector<64x128xf32> -> vector<64x128xf32>
    %11 = vector.extract_strided_slice %5 {offsets = [1, 0, 0], sizes = [8, 8, 192], strides = [1, 1, 1]} : vector<10x8x192xbf16> to vector<8x8x192xbf16>
    %12 = vector.shape_cast %11 : vector<8x8x192xbf16> to vector<64x192xbf16>
    %c1 = arith.constant 1 : index
    %c0_6 = arith.constant 0 : index
    %c0_7 = arith.constant 0 : index
    %13 = vector.load %arg2[%c1, %c0_6, %c0_7] : memref<3x192x128xbf16, #tpu.memory_space<vmem>>, vector<1x192x128xbf16>
    %14 = vector.shape_cast %13 : vector<1x192x128xbf16> to vector<192x128xbf16>
    %cst_8 = arith.constant dense<0.000000e+00> : vector<64x128xf32>
    %15 = tpu.matmul %12, %14, %cst_8 {dimension_numbers = #tpu.dot_dimension_numbers<[1], [0], [0], [1], [0, 0, 1, 1], [], []>} : vector<64x192xbf16>, vector<192x128xbf16>, vector<64x128xf32> -> vector<64x128xf32>
    %16 = arith.addf %10, %15 : vector<64x128xf32>
    %17 = vector.extract_strided_slice %5 {offsets = [2, 0, 0], sizes = [8, 8, 192], strides = [1, 1, 1]} : vector<10x8x192xbf16> to vector<8x8x192xbf16>
    %18 = vector.shape_cast %17 : vector<8x8x192xbf16> to vector<64x192xbf16>
    %c2 = arith.constant 2 : index
    %c0_9 = arith.constant 0 : index
    %c0_10 = arith.constant 0 : index
    %19 = vector.load %arg2[%c2, %c0_9, %c0_10] : memref<3x192x128xbf16, #tpu.memory_space<vmem>>, vector<1x192x128xbf16>
    %20 = vector.shape_cast %19 : vector<1x192x128xbf16> to vector<192x128xbf16>
    %cst_11 = arith.constant dense<0.000000e+00> : vector<64x128xf32>
    %21 = tpu.matmul %18, %20, %cst_11 {dimension_numbers = #tpu.dot_dimension_numbers<[1], [0], [0], [1], [0, 0, 1, 1], [], []>} : vector<64x192xbf16>, vector<192x128xbf16>, vector<64x128xf32> -> vector<64x128xf32>
    %22 = arith.addf %16, %21 : vector<64x128xf32>
    %c0_12 = arith.constant 0 : index
    %c0_13 = arith.constant 0 : index
    %23 = vector.load %arg3[%c0_12, %c0_13] : memref<1x128xf32, #tpu.memory_space<vmem>>, vector<1x128xf32>
    %24 = vector.broadcast %23 : vector<1x128xf32> to vector<64x128xf32>
    %25 = arith.addf %22, %24 : vector<64x128xf32>
    %cst_14 = arith.constant 0.000000e+00 : f32
    %26 = vector.broadcast %cst_14 : f32 to vector<64x128xf32>
    %27 = arith.maximumf %25, %26 : vector<64x128xf32>
    %28 = arith.truncf %27 : vector<64x128xf32> to vector<64x128xbf16>
    %c0_15 = arith.constant 0 : index
    %c0_16 = arith.constant 0 : index
    %29 = vector.load %arg4[%c0_15, %c0_16] : memref<64x128xbf16, #tpu.memory_space<vmem>>, vector<64x128xbf16>
    tpu.vector_store %arg4[%c0_15, %c0_16], %28 {strides = array<i32>} : memref<64x128xbf16, #tpu.memory_space<vmem>>, vector<64x128xbf16>,
    return
  }
  func.func @transform_0(%arg0: i32) -> (i32, i32, i32, i32) {
    %c0_i32 = arith.constant 0 : i32
    %c0_i32_0 = arith.constant 0 : i32
    %c0_i32_1 = arith.constant 0 : i32
    %c0_i32_2 = arith.constant 0 : i32
    return %arg0, %c0_i32, %c0_i32_0, %c0_i32_1 : i32, i32, i32, i32
  }
  func.func @transform_1(%arg0: i32) -> (i32, i32, i32) {
    %c0_i32 = arith.constant 0 : i32
    %c0_i32_0 = arith.constant 0 : i32
    %c0_i32_1 = arith.constant 0 : i32
    %c0_i32_2 = arith.constant 0 : i32
    return %c0_i32, %c0_i32_0, %c0_i32_1 : i32, i32, i32
  }
  func.func @transform_2(%arg0: i32) -> (i32, i32) {
    %c0_i32 = arith.constant 0 : i32
    %c0_i32_0 = arith.constant 0 : i32
    %c0_i32_1 = arith.constant 0 : i32
    return %c0_i32, %c0_i32_0 : i32, i32
  }
  func.func @transform_3(%arg0: i32) -> (i32, i32) {
    %c0_i32 = arith.constant 0 : i32
    %c0_i32_0 = arith.constant 0 : i32
    return %arg0, %c0_i32 : i32, i32
  }
}

module attributes {stable_mosaic.version = 11 : i64} {
  func.func @_conv3x3_pool_kernel(%arg0: i32, %arg1: memref<1x10x10x128xbf16, #tpu.memory_space<vmem>>, %arg2: memref<3x384x128xbf16, #tpu.memory_space<vmem>>, %arg3: memref<1x128xf32, #tpu.memory_space<vmem>>, %arg4: memref<16x128xbf16, #tpu.memory_space<vmem>>, %arg5: memref<32x128xf32, #tpu.memory_space<vmem>>) attributes {dimension_semantics = [#tpu.dimension_semantics<parallel>], iteration_bounds = array<i64: 2>, scalar_prefetch = 0 : i64, scratch_operands = 1 : i64, tpu.core_type = #tpu.core_type<tc>, window_params = [{transform_indices = @transform_0, window_bounds = array<i64: 1, 10, 10, 128>}, {pipeline_mode = #tpu.pipeline_mode<synchronous>, transform_indices = @transform_1, window_bounds = array<i64: 3, 384, 128>}, {pipeline_mode = #tpu.pipeline_mode<synchronous>, transform_indices = @transform_2, window_bounds = array<i64: 1, 128>}, {transform_indices = @transform_3, window_bounds = array<i64: 16, 128>}]} {
    %c0 = arith.constant 0 : index
    %c0_0 = arith.constant 0 : index
    %c0_1 = arith.constant 0 : index
    %c0_2 = arith.constant 0 : index
    %0 = vector.load %arg1[%c0, %c0_0, %c0_1, %c0_2] : memref<1x10x10x128xbf16, #tpu.memory_space<vmem>>, vector<1x10x10x128xbf16>
    %1 = vector.shape_cast %0 : vector<1x10x10x128xbf16> to vector<10x10x128xbf16>
    %2 = vector.extract_strided_slice %1 {offsets = [0, 0, 0], sizes = [10, 8, 128], strides = [1, 1, 1]} : vector<10x10x128xbf16> to vector<10x8x128xbf16>
    %3 = vector.extract_strided_slice %1 {offsets = [0, 1, 0], sizes = [10, 8, 128], strides = [1, 1, 1]} : vector<10x10x128xbf16> to vector<10x8x128xbf16>
    %4 = vector.extract_strided_slice %1 {offsets = [0, 2, 0], sizes = [10, 8, 128], strides = [1, 1, 1]} : vector<10x10x128xbf16> to vector<10x8x128xbf16>
    %5 = tpu.concatenate %2, %3, %4 in 2 : vector<10x8x128xbf16>, vector<10x8x128xbf16>, vector<10x8x128xbf16> -> vector<10x8x384xbf16>
    %6 = vector.extract_strided_slice %5 {offsets = [0, 0, 0], sizes = [8, 8, 384], strides = [1, 1, 1]} : vector<10x8x384xbf16> to vector<8x8x384xbf16>
    %7 = vector.shape_cast %6 : vector<8x8x384xbf16> to vector<64x384xbf16>
    %c0_3 = arith.constant 0 : index
    %c0_4 = arith.constant 0 : index
    %c0_5 = arith.constant 0 : index
    %8 = vector.load %arg2[%c0_3, %c0_4, %c0_5] : memref<3x384x128xbf16, #tpu.memory_space<vmem>>, vector<1x384x128xbf16>
    %9 = vector.shape_cast %8 : vector<1x384x128xbf16> to vector<384x128xbf16>
    %cst = arith.constant dense<0.000000e+00> : vector<64x128xf32>
    %10 = tpu.matmul %7, %9, %cst {dimension_numbers = #tpu.dot_dimension_numbers<[1], [0], [0], [1], [0, 0, 1, 1], [], []>} : vector<64x384xbf16>, vector<384x128xbf16>, vector<64x128xf32> -> vector<64x128xf32>
    %11 = vector.extract_strided_slice %5 {offsets = [1, 0, 0], sizes = [8, 8, 384], strides = [1, 1, 1]} : vector<10x8x384xbf16> to vector<8x8x384xbf16>
    %12 = vector.shape_cast %11 : vector<8x8x384xbf16> to vector<64x384xbf16>
    %c1 = arith.constant 1 : index
    %c0_6 = arith.constant 0 : index
    %c0_7 = arith.constant 0 : index
    %13 = vector.load %arg2[%c1, %c0_6, %c0_7] : memref<3x384x128xbf16, #tpu.memory_space<vmem>>, vector<1x384x128xbf16>
    %14 = vector.shape_cast %13 : vector<1x384x128xbf16> to vector<384x128xbf16>
    %cst_8 = arith.constant dense<0.000000e+00> : vector<64x128xf32>
    %15 = tpu.matmul %12, %14, %cst_8 {dimension_numbers = #tpu.dot_dimension_numbers<[1], [0], [0], [1], [0, 0, 1, 1], [], []>} : vector<64x384xbf16>, vector<384x128xbf16>, vector<64x128xf32> -> vector<64x128xf32>
    %16 = arith.addf %10, %15 : vector<64x128xf32>
    %17 = vector.extract_strided_slice %5 {offsets = [2, 0, 0], sizes = [8, 8, 384], strides = [1, 1, 1]} : vector<10x8x384xbf16> to vector<8x8x384xbf16>
    %18 = vector.shape_cast %17 : vector<8x8x384xbf16> to vector<64x384xbf16>
    %c2 = arith.constant 2 : index
    %c0_9 = arith.constant 0 : index
    %c0_10 = arith.constant 0 : index
    %19 = vector.load %arg2[%c2, %c0_9, %c0_10] : memref<3x384x128xbf16, #tpu.memory_space<vmem>>, vector<1x384x128xbf16>
    %20 = vector.shape_cast %19 : vector<1x384x128xbf16> to vector<384x128xbf16>
    %cst_11 = arith.constant dense<0.000000e+00> : vector<64x128xf32>
    %21 = tpu.matmul %18, %20, %cst_11 {dimension_numbers = #tpu.dot_dimension_numbers<[1], [0], [0], [1], [0, 0, 1, 1], [], []>} : vector<64x384xbf16>, vector<384x128xbf16>, vector<64x128xf32> -> vector<64x128xf32>
    %22 = arith.addf %16, %21 : vector<64x128xf32>
    %c0_12 = arith.constant 0 : index
    %c0_13 = arith.constant 0 : index
    %23 = vector.load %arg3[%c0_12, %c0_13] : memref<1x128xf32, #tpu.memory_space<vmem>>, vector<1x128xf32>
    %24 = vector.broadcast %23 : vector<1x128xf32> to vector<64x128xf32>
    %25 = arith.addf %22, %24 : vector<64x128xf32>
    %cst_14 = arith.constant 0.000000e+00 : f32
    %26 = vector.broadcast %cst_14 : f32 to vector<64x128xf32>
    %27 = arith.maximumf %25, %26 : vector<64x128xf32>
    %28 = vector.shape_cast %27 : vector<64x128xf32> to vector<4x16x128xf32>
    %29 = vector.extract_strided_slice %28 {offsets = [0, 0, 0], sizes = [4, 8, 128], strides = [1, 1, 1]} : vector<4x16x128xf32> to vector<4x8x128xf32>
    %30 = vector.extract_strided_slice %28 {offsets = [0, 8, 0], sizes = [4, 8, 128], strides = [1, 1, 1]} : vector<4x16x128xf32> to vector<4x8x128xf32>
    %31 = arith.maximumf %29, %30 : vector<4x8x128xf32>
    %32 = vector.shape_cast %31 : vector<4x8x128xf32> to vector<32x128xf32>
    %c0_15 = arith.constant 0 : index
    %c0_16 = arith.constant 0 : index
    %33 = vector.load %arg5[%c0_15, %c0_16] : memref<32x128xf32, #tpu.memory_space<vmem>>, vector<32x128xf32>
    tpu.vector_store %arg5[%c0_15, %c0_16], %32 {strides = array<i32>} : memref<32x128xf32, #tpu.memory_space<vmem>>, vector<32x128xf32>,
    %c0_17 = arith.constant 0 : index
    %c0_18 = arith.constant 0 : index
    %34 = tpu.strided_load %arg5[%c0_17, %c0_18] {strides = array<i32: 2, 1>} : memref<32x128xf32, #tpu.memory_space<vmem>>, vector<16x128xf32>
    %c1_19 = arith.constant 1 : index
    %c0_20 = arith.constant 0 : index
    %35 = tpu.strided_load %arg5[%c1_19, %c0_20] {strides = array<i32: 2, 1>} : memref<32x128xf32, #tpu.memory_space<vmem>>, vector<16x128xf32>
    %36 = arith.maximumf %34, %35 : vector<16x128xf32>
    %37 = arith.truncf %36 : vector<16x128xf32> to vector<16x128xbf16>
    %c0_21 = arith.constant 0 : index
    %c0_22 = arith.constant 0 : index
    %38 = vector.load %arg4[%c0_21, %c0_22] : memref<16x128xbf16, #tpu.memory_space<vmem>>, vector<16x128xbf16>
    tpu.vector_store %arg4[%c0_21, %c0_22], %37 {strides = array<i32>} : memref<16x128xbf16, #tpu.memory_space<vmem>>, vector<16x128xbf16>,
    return
  }
  func.func @transform_0(%arg0: i32) -> (i32, i32, i32, i32) {
    %c0_i32 = arith.constant 0 : i32
    %c0_i32_0 = arith.constant 0 : i32
    %c0_i32_1 = arith.constant 0 : i32
    %c0_i32_2 = arith.constant 0 : i32
    return %arg0, %c0_i32, %c0_i32_0, %c0_i32_1 : i32, i32, i32, i32
  }
  func.func @transform_1(%arg0: i32) -> (i32, i32, i32) {
    %c0_i32 = arith.constant 0 : i32
    %c0_i32_0 = arith.constant 0 : i32
    %c0_i32_1 = arith.constant 0 : i32
    %c0_i32_2 = arith.constant 0 : i32
    return %c0_i32, %c0_i32_0, %c0_i32_1 : i32, i32, i32
  }
  func.func @transform_2(%arg0: i32) -> (i32, i32) {
    %c0_i32 = arith.constant 0 : i32
    %c0_i32_0 = arith.constant 0 : i32
    %c0_i32_1 = arith.constant 0 : i32
    return %c0_i32, %c0_i32_0 : i32, i32
  }
  func.func @transform_3(%arg0: i32) -> (i32, i32) {
    %c0_i32 = arith.constant 0 : i32
    %c0_i32_0 = arith.constant 0 : i32
    return %arg0, %c0_i32 : i32, i32
  }
}

module attributes {stable_mosaic.version = 11 : i64} {
  func.func @_matmul_bias_act_kernel(%arg0: i32, %arg1: i32, %arg2: i32, %arg3: memref<32x384xbf16, #tpu.memory_space<vmem>>, %arg4: memref<384x256xbf16, #tpu.memory_space<vmem>>, %arg5: memref<1x256xf32, #tpu.memory_space<vmem>>, %arg6: memref<32x256xbf16, #tpu.memory_space<vmem>>, %arg7: memref<32x256xf32, #tpu.memory_space<vmem>>) attributes {dimension_semantics = [#tpu.dimension_semantics<parallel>, #tpu.dimension_semantics<parallel>, #tpu.dimension_semantics<arbitrary>], iteration_bounds = array<i64: 1, 1, 3>, scalar_prefetch = 0 : i64, scratch_operands = 1 : i64, tpu.core_type = #tpu.core_type<tc>, window_params = [{transform_indices = @transform_0, window_bounds = array<i64: 32, 384>}, {transform_indices = @transform_1, window_bounds = array<i64: 384, 256>}, {transform_indices = @transform_2, window_bounds = array<i64: 1, 256>}, {transform_indices = @transform_3, window_bounds = array<i64: 32, 256>}]} {
    %c0_i32 = arith.constant 0 : i32
    %0 = arith.cmpi eq, %arg2, %c0_i32 : i32
    %1 = arith.extui %0 : i1 to i32
    %c0_i32_0 = arith.constant 0 : i32
    %2 = arith.cmpi ne, %1, %c0_i32_0 : i32
    scf.if %2 {
      %cst_9 = arith.constant 0.000000e+00 : f32
      %12 = vector.broadcast %cst_9 : f32 to vector<32x256xf32>
      %c0_10 = arith.constant 0 : index
      %c0_11 = arith.constant 0 : index
      %13 = vector.load %arg7[%c0_10, %c0_11] : memref<32x256xf32, #tpu.memory_space<vmem>>, vector<32x256xf32>
      tpu.vector_store %arg7[%c0_10, %c0_11], %12 {strides = array<i32>} : memref<32x256xf32, #tpu.memory_space<vmem>>, vector<32x256xf32>,
    } else {
    }
    %c0 = arith.constant 0 : index
    %c0_1 = arith.constant 0 : index
    %3 = vector.load %arg7[%c0, %c0_1] : memref<32x256xf32, #tpu.memory_space<vmem>>, vector<32x256xf32>
    %c0_2 = arith.constant 0 : index
    %c0_3 = arith.constant 0 : index
    %4 = vector.load %arg3[%c0_2, %c0_3] : memref<32x384xbf16, #tpu.memory_space<vmem>>, vector<32x384xbf16>
    %c0_4 = arith.constant 0 : index
    %c0_5 = arith.constant 0 : index
    %5 = vector.load %arg4[%c0_4, %c0_5] : memref<384x256xbf16, #tpu.memory_space<vmem>>, vector<384x256xbf16>
    %cst = arith.constant dense<0.000000e+00> : vector<32x256xf32>
    %6 = tpu.matmul %4, %5, %cst {dimension_numbers = #tpu.dot_dimension_numbers<[1], [0], [0], [1], [0, 0, 1, 1], [], []>} : vector<32x384xbf16>, vector<384x256xbf16>, vector<32x256xf32> -> vector<32x256xf32>
    %7 = arith.addf %3, %6 : vector<32x256xf32>
    %c0_6 = arith.constant 0 : index
    %c0_7 = arith.constant 0 : index
    %8 = vector.load %arg7[%c0_6, %c0_7] : memref<32x256xf32, #tpu.memory_space<vmem>>, vector<32x256xf32>
    tpu.vector_store %arg7[%c0_6, %c0_7], %7 {strides = array<i32>} : memref<32x256xf32, #tpu.memory_space<vmem>>, vector<32x256xf32>,
    %c2_i32 = arith.constant 2 : i32
    %9 = arith.cmpi eq, %arg2, %c2_i32 : i32
    %10 = arith.extui %9 : i1 to i32
    %c0_i32_8 = arith.constant 0 : i32
    %11 = arith.cmpi ne, %10, %c0_i32_8 : i32
    scf.if %11 {
      %c0_9 = arith.constant 0 : index
      %c0_10 = arith.constant 0 : index
      %12 = vector.load %arg7[%c0_9, %c0_10] : memref<32x256xf32, #tpu.memory_space<vmem>>, vector<32x256xf32>
      %c0_11 = arith.constant 0 : index
      %c0_12 = arith.constant 0 : index
      %13 = vector.load %arg5[%c0_11, %c0_12] : memref<1x256xf32, #tpu.memory_space<vmem>>, vector<1x256xf32>
      %14 = vector.broadcast %13 : vector<1x256xf32> to vector<32x256xf32>
      %15 = arith.addf %12, %14 : vector<32x256xf32>
      %cst_13 = arith.constant 0.000000e+00 : f32
      %16 = vector.broadcast %cst_13 : f32 to vector<32x256xf32>
      %17 = arith.maximumf %15, %16 : vector<32x256xf32>
      %18 = arith.truncf %17 : vector<32x256xf32> to vector<32x256xbf16>
      %c0_14 = arith.constant 0 : index
      %c0_15 = arith.constant 0 : index
      %19 = vector.load %arg6[%c0_14, %c0_15] : memref<32x256xbf16, #tpu.memory_space<vmem>>, vector<32x256xbf16>
      tpu.vector_store %arg6[%c0_14, %c0_15], %18 {strides = array<i32>} : memref<32x256xbf16, #tpu.memory_space<vmem>>, vector<32x256xbf16>,
    } else {
    }
    return
  }
  func.func @transform_0(%arg0: i32, %arg1: i32, %arg2: i32) -> (i32, i32) {
    %c0_i32 = arith.constant 0 : i32
    return %arg0, %arg2 : i32, i32
  }
  func.func @transform_1(%arg0: i32, %arg1: i32, %arg2: i32) -> (i32, i32) {
    %c0_i32 = arith.constant 0 : i32
    return %arg2, %arg1 : i32, i32
  }
  func.func @transform_2(%arg0: i32, %arg1: i32, %arg2: i32) -> (i32, i32) {
    %c0_i32 = arith.constant 0 : i32
    %c0_i32_0 = arith.constant 0 : i32
    return %c0_i32, %arg1 : i32, i32
  }
  func.func @transform_3(%arg0: i32, %arg1: i32, %arg2: i32) -> (i32, i32) {
    %c0_i32 = arith.constant 0 : i32
    return %arg0, %arg1 : i32, i32
  }
}

module attributes {stable_mosaic.version = 11 : i64} {
  func.func @_matmul_bias_act_kernel(%arg0: i32, %arg1: i32, %arg2: i32, %arg3: memref<32x384xbf16, #tpu.memory_space<vmem>>, %arg4: memref<384x256xbf16, #tpu.memory_space<vmem>>, %arg5: memref<1x256xf32, #tpu.memory_space<vmem>>, %arg6: memref<32x256xbf16, #tpu.memory_space<vmem>>, %arg7: memref<32x256xf32, #tpu.memory_space<vmem>>) attributes {dimension_semantics = [#tpu.dimension_semantics<parallel>, #tpu.dimension_semantics<parallel>, #tpu.dimension_semantics<arbitrary>], iteration_bounds = array<i64: 1, 1, 6>, scalar_prefetch = 0 : i64, scratch_operands = 1 : i64, tpu.core_type = #tpu.core_type<tc>, window_params = [{transform_indices = @transform_0, window_bounds = array<i64: 32, 384>}, {transform_indices = @transform_1, window_bounds = array<i64: 384, 256>}, {transform_indices = @transform_2, window_bounds = array<i64: 1, 256>}, {transform_indices = @transform_3, window_bounds = array<i64: 32, 256>}]} {
    %c0_i32 = arith.constant 0 : i32
    %0 = arith.cmpi eq, %arg2, %c0_i32 : i32
    %1 = arith.extui %0 : i1 to i32
    %c0_i32_0 = arith.constant 0 : i32
    %2 = arith.cmpi ne, %1, %c0_i32_0 : i32
    scf.if %2 {
      %cst_9 = arith.constant 0.000000e+00 : f32
      %12 = vector.broadcast %cst_9 : f32 to vector<32x256xf32>
      %c0_10 = arith.constant 0 : index
      %c0_11 = arith.constant 0 : index
      %13 = vector.load %arg7[%c0_10, %c0_11] : memref<32x256xf32, #tpu.memory_space<vmem>>, vector<32x256xf32>
      tpu.vector_store %arg7[%c0_10, %c0_11], %12 {strides = array<i32>} : memref<32x256xf32, #tpu.memory_space<vmem>>, vector<32x256xf32>,
    } else {
    }
    %c0 = arith.constant 0 : index
    %c0_1 = arith.constant 0 : index
    %3 = vector.load %arg7[%c0, %c0_1] : memref<32x256xf32, #tpu.memory_space<vmem>>, vector<32x256xf32>
    %c0_2 = arith.constant 0 : index
    %c0_3 = arith.constant 0 : index
    %4 = vector.load %arg3[%c0_2, %c0_3] : memref<32x384xbf16, #tpu.memory_space<vmem>>, vector<32x384xbf16>
    %c0_4 = arith.constant 0 : index
    %c0_5 = arith.constant 0 : index
    %5 = vector.load %arg4[%c0_4, %c0_5] : memref<384x256xbf16, #tpu.memory_space<vmem>>, vector<384x256xbf16>
    %cst = arith.constant dense<0.000000e+00> : vector<32x256xf32>
    %6 = tpu.matmul %4, %5, %cst {dimension_numbers = #tpu.dot_dimension_numbers<[1], [0], [0], [1], [0, 0, 1, 1], [], []>} : vector<32x384xbf16>, vector<384x256xbf16>, vector<32x256xf32> -> vector<32x256xf32>
    %7 = arith.addf %3, %6 : vector<32x256xf32>
    %c0_6 = arith.constant 0 : index
    %c0_7 = arith.constant 0 : index
    %8 = vector.load %arg7[%c0_6, %c0_7] : memref<32x256xf32, #tpu.memory_space<vmem>>, vector<32x256xf32>
    tpu.vector_store %arg7[%c0_6, %c0_7], %7 {strides = array<i32>} : memref<32x256xf32, #tpu.memory_space<vmem>>, vector<32x256xf32>,
    %c5_i32 = arith.constant 5 : i32
    %9 = arith.cmpi eq, %arg2, %c5_i32 : i32
    %10 = arith.extui %9 : i1 to i32
    %c0_i32_8 = arith.constant 0 : i32
    %11 = arith.cmpi ne, %10, %c0_i32_8 : i32
    scf.if %11 {
      %c0_9 = arith.constant 0 : index
      %c0_10 = arith.constant 0 : index
      %12 = vector.load %arg7[%c0_9, %c0_10] : memref<32x256xf32, #tpu.memory_space<vmem>>, vector<32x256xf32>
      %c0_11 = arith.constant 0 : index
      %c0_12 = arith.constant 0 : index
      %13 = vector.load %arg5[%c0_11, %c0_12] : memref<1x256xf32, #tpu.memory_space<vmem>>, vector<1x256xf32>
      %14 = vector.broadcast %13 : vector<1x256xf32> to vector<32x256xf32>
      %15 = arith.addf %12, %14 : vector<32x256xf32>
      %cst_13 = arith.constant 0.000000e+00 : f32
      %16 = vector.broadcast %cst_13 : f32 to vector<32x256xf32>
      %17 = arith.maximumf %15, %16 : vector<32x256xf32>
      %18 = arith.truncf %17 : vector<32x256xf32> to vector<32x256xbf16>
      %c0_14 = arith.constant 0 : index
      %c0_15 = arith.constant 0 : index
      %19 = vector.load %arg6[%c0_14, %c0_15] : memref<32x256xbf16, #tpu.memory_space<vmem>>, vector<32x256xbf16>
      tpu.vector_store %arg6[%c0_14, %c0_15], %18 {strides = array<i32>} : memref<32x256xbf16, #tpu.memory_space<vmem>>, vector<32x256xbf16>,
    } else {
    }
    return
  }
  func.func @transform_0(%arg0: i32, %arg1: i32, %arg2: i32) -> (i32, i32) {
    %c0_i32 = arith.constant 0 : i32
    return %arg0, %arg2 : i32, i32
  }
  func.func @transform_1(%arg0: i32, %arg1: i32, %arg2: i32) -> (i32, i32) {
    %c0_i32 = arith.constant 0 : i32
    return %arg2, %arg1 : i32, i32
  }
  func.func @transform_2(%arg0: i32, %arg1: i32, %arg2: i32) -> (i32, i32) {
    %c0_i32 = arith.constant 0 : i32
    %c0_i32_0 = arith.constant 0 : i32
    return %c0_i32, %arg1 : i32, i32
  }
  func.func @transform_3(%arg0: i32, %arg1: i32, %arg2: i32) -> (i32, i32) {
    %c0_i32 = arith.constant 0 : i32
    return %arg0, %arg1 : i32, i32
  }
}

module attributes {stable_mosaic.version = 11 : i64} {
  func.func @_maxpool_kernel(%arg0: i32, %arg1: memref<4x2x2x512xbf16, #tpu.memory_space<vmem>>, %arg2: memref<4x2x256xbf16, #tpu.memory_space<vmem>>) attributes {dimension_semantics = [#tpu.dimension_semantics<parallel>], iteration_bounds = array<i64: 1>, scalar_prefetch = 0 : i64, scratch_operands = 0 : i64, tpu.core_type = #tpu.core_type<tc>, window_params = [{transform_indices = @transform_0, window_bounds = array<i64: 4, 2, 2, 512>}, {transform_indices = @transform_1, window_bounds = array<i64: 4, 2, 256>}]} {
    %c0 = arith.constant 0 : index
    %c0_0 = arith.constant 0 : index
    %c0_1 = arith.constant 0 : index
    %c0_2 = arith.constant 0 : index
    %0 = vector.load %arg1[%c0, %c0_0, %c0_1, %c0_2] : memref<4x2x2x512xbf16, #tpu.memory_space<vmem>>, vector<4x2x2x512xbf16>
    %1 = vector.extract_strided_slice %0 {offsets = [0, 0, 0, 0], sizes = [4, 1, 2, 512], strides = [1, 1, 1, 1]} : vector<4x2x2x512xbf16> to vector<4x1x2x512xbf16>
    %2 = vector.shape_cast %1 : vector<4x1x2x512xbf16> to vector<4x2x512xbf16>
    %3 = vector.extract_strided_slice %0 {offsets = [0, 1, 0, 0], sizes = [4, 1, 2, 512], strides = [1, 1, 1, 1]} : vector<4x2x2x512xbf16> to vector<4x1x2x512xbf16>
    %4 = vector.shape_cast %3 : vector<4x1x2x512xbf16> to vector<4x2x512xbf16>
    %5 = arith.maximumf %2, %4 : vector<4x2x512xbf16>
    %6 = vector.extract_strided_slice %5 {offsets = [0, 0, 0], sizes = [4, 2, 256], strides = [1, 1, 1]} : vector<4x2x512xbf16> to vector<4x2x256xbf16>
    %7 = vector.extract_strided_slice %5 {offsets = [0, 0, 256], sizes = [4, 2, 256], strides = [1, 1, 1]} : vector<4x2x512xbf16> to vector<4x2x256xbf16>
    %8 = arith.maximumf %6, %7 : vector<4x2x256xbf16>
    %c0_3 = arith.constant 0 : index
    %c0_4 = arith.constant 0 : index
    %c0_5 = arith.constant 0 : index
    %9 = vector.load %arg2[%c0_3, %c0_4, %c0_5] : memref<4x2x256xbf16, #tpu.memory_space<vmem>>, vector<4x2x256xbf16>
    tpu.vector_store %arg2[%c0_3, %c0_4, %c0_5], %8 {strides = array<i32>} : memref<4x2x256xbf16, #tpu.memory_space<vmem>>, vector<4x2x256xbf16>,
    return
  }
  func.func @transform_0(%arg0: i32) -> (i32, i32, i32, i32) {
    %c0_i32 = arith.constant 0 : i32
    %c0_i32_0 = arith.constant 0 : i32
    %c0_i32_1 = arith.constant 0 : i32
    %c0_i32_2 = arith.constant 0 : i32
    return %arg0, %c0_i32, %c0_i32_0, %c0_i32_1 : i32, i32, i32, i32
  }
  func.func @transform_1(%arg0: i32) -> (i32, i32, i32) {
    %c0_i32 = arith.constant 0 : i32
    %c0_i32_0 = arith.constant 0 : i32
    %c0_i32_1 = arith.constant 0 : i32
    return %arg0, %c0_i32, %c0_i32_0 : i32, i32, i32
  }
}

module attributes {stable_mosaic.version = 11 : i64} {
  func.func @_matmul_bias_act_kernel(%arg0: i32, %arg1: i32, %arg2: i32, %arg3: memref<8x384xbf16, #tpu.memory_space<vmem>>, %arg4: memref<384x256xbf16, #tpu.memory_space<vmem>>, %arg5: memref<1x256xf32, #tpu.memory_space<vmem>>, %arg6: memref<8x256xbf16, #tpu.memory_space<vmem>>, %arg7: memref<8x256xf32, #tpu.memory_space<vmem>>) attributes {dimension_semantics = [#tpu.dimension_semantics<parallel>, #tpu.dimension_semantics<parallel>, #tpu.dimension_semantics<arbitrary>], iteration_bounds = array<i64: 1, 2, 6>, scalar_prefetch = 0 : i64, scratch_operands = 1 : i64, tpu.core_type = #tpu.core_type<tc>, window_params = [{transform_indices = @transform_0, window_bounds = array<i64: 8, 384>}, {transform_indices = @transform_1, window_bounds = array<i64: 384, 256>}, {transform_indices = @transform_2, window_bounds = array<i64: 1, 256>}, {transform_indices = @transform_3, window_bounds = array<i64: 8, 256>}]} {
    %c0_i32 = arith.constant 0 : i32
    %0 = arith.cmpi eq, %arg2, %c0_i32 : i32
    %1 = arith.extui %0 : i1 to i32
    %c0_i32_0 = arith.constant 0 : i32
    %2 = arith.cmpi ne, %1, %c0_i32_0 : i32
    scf.if %2 {
      %cst_9 = arith.constant 0.000000e+00 : f32
      %12 = vector.broadcast %cst_9 : f32 to vector<8x256xf32>
      %c0_10 = arith.constant 0 : index
      %c0_11 = arith.constant 0 : index
      %13 = vector.load %arg7[%c0_10, %c0_11] : memref<8x256xf32, #tpu.memory_space<vmem>>, vector<8x256xf32>
      tpu.vector_store %arg7[%c0_10, %c0_11], %12 {strides = array<i32>} : memref<8x256xf32, #tpu.memory_space<vmem>>, vector<8x256xf32>,
    } else {
    }
    %c0 = arith.constant 0 : index
    %c0_1 = arith.constant 0 : index
    %3 = vector.load %arg7[%c0, %c0_1] : memref<8x256xf32, #tpu.memory_space<vmem>>, vector<8x256xf32>
    %c0_2 = arith.constant 0 : index
    %c0_3 = arith.constant 0 : index
    %4 = vector.load %arg3[%c0_2, %c0_3] : memref<8x384xbf16, #tpu.memory_space<vmem>>, vector<8x384xbf16>
    %c0_4 = arith.constant 0 : index
    %c0_5 = arith.constant 0 : index
    %5 = vector.load %arg4[%c0_4, %c0_5] : memref<384x256xbf16, #tpu.memory_space<vmem>>, vector<384x256xbf16>
    %cst = arith.constant dense<0.000000e+00> : vector<8x256xf32>
    %6 = tpu.matmul %4, %5, %cst {dimension_numbers = #tpu.dot_dimension_numbers<[1], [0], [0], [1], [0, 0, 1, 1], [], []>} : vector<8x384xbf16>, vector<384x256xbf16>, vector<8x256xf32> -> vector<8x256xf32>
    %7 = arith.addf %3, %6 : vector<8x256xf32>
    %c0_6 = arith.constant 0 : index
    %c0_7 = arith.constant 0 : index
    %8 = vector.load %arg7[%c0_6, %c0_7] : memref<8x256xf32, #tpu.memory_space<vmem>>, vector<8x256xf32>
    tpu.vector_store %arg7[%c0_6, %c0_7], %7 {strides = array<i32>} : memref<8x256xf32, #tpu.memory_space<vmem>>, vector<8x256xf32>,
    %c5_i32 = arith.constant 5 : i32
    %9 = arith.cmpi eq, %arg2, %c5_i32 : i32
    %10 = arith.extui %9 : i1 to i32
    %c0_i32_8 = arith.constant 0 : i32
    %11 = arith.cmpi ne, %10, %c0_i32_8 : i32
    scf.if %11 {
      %c0_9 = arith.constant 0 : index
      %c0_10 = arith.constant 0 : index
      %12 = vector.load %arg7[%c0_9, %c0_10] : memref<8x256xf32, #tpu.memory_space<vmem>>, vector<8x256xf32>
      %c0_11 = arith.constant 0 : index
      %c0_12 = arith.constant 0 : index
      %13 = vector.load %arg5[%c0_11, %c0_12] : memref<1x256xf32, #tpu.memory_space<vmem>>, vector<1x256xf32>
      %14 = vector.broadcast %13 : vector<1x256xf32> to vector<8x256xf32>
      %15 = arith.addf %12, %14 : vector<8x256xf32>
      %cst_13 = arith.constant 0.000000e+00 : f32
      %16 = vector.broadcast %cst_13 : f32 to vector<8x256xf32>
      %17 = arith.maximumf %15, %16 : vector<8x256xf32>
      %18 = arith.truncf %17 : vector<8x256xf32> to vector<8x256xbf16>
      %c0_14 = arith.constant 0 : index
      %c0_15 = arith.constant 0 : index
      %19 = vector.load %arg6[%c0_14, %c0_15] : memref<8x256xbf16, #tpu.memory_space<vmem>>, vector<8x256xbf16>
      tpu.vector_store %arg6[%c0_14, %c0_15], %18 {strides = array<i32>} : memref<8x256xbf16, #tpu.memory_space<vmem>>, vector<8x256xbf16>,
    } else {
    }
    return
  }
  func.func @transform_0(%arg0: i32, %arg1: i32, %arg2: i32) -> (i32, i32) {
    %c0_i32 = arith.constant 0 : i32
    return %arg0, %arg2 : i32, i32
  }
  func.func @transform_1(%arg0: i32, %arg1: i32, %arg2: i32) -> (i32, i32) {
    %c0_i32 = arith.constant 0 : i32
    return %arg2, %arg1 : i32, i32
  }
  func.func @transform_2(%arg0: i32, %arg1: i32, %arg2: i32) -> (i32, i32) {
    %c0_i32 = arith.constant 0 : i32
    %c0_i32_0 = arith.constant 0 : i32
    return %c0_i32, %arg1 : i32, i32
  }
  func.func @transform_3(%arg0: i32, %arg1: i32, %arg2: i32) -> (i32, i32) {
    %c0_i32 = arith.constant 0 : i32
    return %arg0, %arg1 : i32, i32
  }
}

</mosaic_0001>

<bundles_post_ra>
// kernel: encoder_forward.10
= control target key start
LH: loop header
LB: loop body
LE: loop exit
PB: predicated region body
PF: predicated region fallthrough
CT: control target
= control target key end

     0   :  { %s2068_s12 = smov 0   ;;  %s2672_s0 = inlined_call_operand.vmem [shape: bf16[2,18,18,3], index: 0, kind: input, shape index: {}]   ;;  %s2673_s1 = inlined_call_operand.vmem [shape: bf16[3,9,64], index: 1, kind: input, shape index: {}]   ;;  %s2674_s2 = inlined_call_operand.vmem [shape: f32[1,64], index: 2, kind: input, shape index: {}]   ;;  %s2675_s3 = inlined_call_operand.vmem [shape: bf16[512,64], index: 3, kind: output, shape index: {}]  }
   0x1 LB: > { %s2074_s13 = sadd.s32 4294967295, %s2043_s12   ;;  %p1669_p0 = scmp.ge.s32.totalorder %s2043_s12, 1  ;;  %s2043_s12 = sphi %s2068_s12, %s13_s12  }
   0x2   : > { %p137_p1 = scmp.lt.s32.totalorder %s2043_s12, 3 }
   0x4   : > { %p138_p2 = pnand %p1669_p0, %p137_p1 }
   0x5   : > { %p161_p3 = scmp.lt.s32.totalorder (!%p138_p2), %s2074_s13, 1  ;;  %s2045_s19 = smov (!%p138_p2), 6  }
   0x6   : > { %141 = sbr.rel (%p138_p2) target bundleno = 469 (0x1d5), region = 32  ;;  %s2046_s20 = smov (!%p138_p2), 3  }
   0x7   : > { %s1671_s27 = sshll.u32 (!%p138_p2), %s2074_s13, 5 }
   0x8   : > { %p167_p4 = scmp.lt.s32.totalorder (!%p138_p2), %s1671_s27, 63 }
   0xb   : > { %s162_s14 = scalar_select %p161_p3, %s2074_s13, 1  ;;  %vm624_vm0 = vcmask 1046528   ;;  %vm371_vm1 = vsmask.f32 7424  ;;  %vm832_vm2 = vcmask 1043456   ;;  %vm833_vm3 = vcmask 1044480  }
   0xc   : > { %vm715_vm4 = vcmask 23552   ;;  %vm752_vm5 = vcmask 48128   ;;  %vm799_vm6 = vcmask 72704   ;;  %s2677_s27 = smov (!%p167_p4, %s1671_s27), 63  ;;  %vm1576_vm7 = vcmask 519168  }
   0xd   : > { %s1986_s15 = smul.u32 216, %s162_s14  ;;  %s1672_s30 = sshll.u32 %s2677_s27, 2 }
   0xe   : > { %s2548_s6 = scalar_lea.vmem %s2675_s3, %s1672_s30 }
   0xf   : > { %s2083_s18 = scalar_lea.vmem %s2672_s0, %s1986_s15 }
  0x10   : > { %v2086_v0 = vld [vmem:[%s2083_s18 + $0x78] sm:$0xff]   ;;  %v1999_v1 = vld [vmem:[%s2083_s18 + $0x80] ss:$0 sps:$4 sm:$0x11]   ;;  %v2090_v2 = vld [vmem:[%s2083_s18 + $0x6c] sm:$0xff]  }
  0x11   : > { %v655_v3 = vrot.slane %v2086_v0, 1  ;;  %v656_v4 = vrot.slane %v1999_v1, 1  ;;  %v2001_v5 = vld [vmem:[%s2083_s18 + $0x74] ss:$0 sps:$4 sm:$0x11]   ;;  %v2095_v6 = vld [vmem:[%s2083_s18 + $0x18] sm:$0xff]  }
  0x12   : > { %v652_v7 = vrot.slane %v2090_v2, 1  ;;  %v2099_v8 = vld [vmem:[%s2083_s18 + $0xc] sm:$0xff]   ;;  %v653_v10 = vrot.slane %v2001_v5, 1  ;;  %v2003_v11 = vld [vmem:[%s2083_s18 + $0x20] ss:$0 sps:$4 sm:$0x11]  }
  0x13   : > { %v657_v9 = vsel %vm624_vm0, %v655_v3, %v656_v4  ;;  %v631_v12 = vrot.slane %v2095_v6, 1  ;;  %v628_v13 = vrot.slane %v2099_v8, 1  ;;  %v632_v15 = vrot.slane %v2003_v11, 1  ;;  %v2005_v16 = vld [vmem:[%s2083_s18 + $0x14] ss:$0 sps:$4 sm:$0x11]  }
  0x14   : > { %699 = vrot.lane.b32.xlu0 %v657_v9, %s2045_s19  ;;  %v654_v14 = vsel %vm624_vm0, %v652_v7, %v653_v10  ;;  %v481_v17 = vshrl.u32 %v2090_v2, 16  ;;  %v483_v18 = vshll.u32 %v2090_v2, 16  ;;  %v488_v19 = vshll.u32 %v2001_v5, 16  ;;  %v2115_v25 = vld [vmem:[%s2083_s18 + $0x84] sm:$0xff]   ;;  %v2128_v39 = vld [vmem:[%s2083_s18 + $0x90] sm:$0xff]   ;;  %v2155_v9 = vld [vmem:[%s2083_s18 + $0x9c] sm:$0xff]  }
  0x15   : > { %697 = vrot.lane.b32.xlu1 %v654_v14, %s2045_s19  ;;  %v385_v20 = vshrl.u32 %v2099_v8, 16  ;;  %v633_v21 = vsel %vm624_vm0, %v631_v12, %v632_v15  ;;  %v629_v22 = vrot.slane %v2005_v16, 1  ;;  %v387_v23 = vshll.u32 %v2099_v8, 16  ;;  %v2121_v34 = vld [vmem:[%s2083_s18 + $0x8c] ss:$0 sps:$4 sm:$0x11]  }
  0x16   : > { %v392_v24 = vshll.u32 %v2005_v16, 16  ;;  %v485_v26 = vrot.slane %v483_v18, 1  ;;  %v490_v27 = vrot.slane %v488_v19, 1  ;;  %v493_v28 = vshrl.u32 %v2086_v0, 16  ;;  %v2132_v44 = vld [vmem:[%s2083_s18 + $0x24] sm:$0xff]   ;;  %v2150_v3 = vld [vmem:[%s2083_s18 + $0x30] sm:$0xff]  }
  0x17   : > { %v495_v29 = vshll.u32 %v2086_v0, 16  ;;  %v630_v30 = vsel %vm624_vm0, %v628_v13, %v629_v22  ;;  %v389_v31 = vrot.slane %v387_v23, 1  ;;  %v500_v33 = vshll.u32 %v1999_v1, 16  ;;  %v2009_v52 = vld [vmem:[%s2083_s18 + $0x98] ss:$0 sps:$4 sm:$0x11]  }
  0x18   : > { %v394_v32 = vrot.slane %v392_v24, 1  ;;  %681 = vrot.lane.b32.xlu0 %v630_v30, %s2045_s19  ;;  %v486_v35 = vor.u32 %v485_v26, %v481_v17  ;;  %v397_v37 = vshrl.u32 %v2095_v6, 16  ;;  %v399_v38 = vshll.u32 %v2095_v6, 16  ;;  %v2147_v1 = vld [vmem:[%s2083_s18 + $0x2c] ss:$0 sps:$4 sm:$0x11]  }
  0x19   : > { %683 = vrot.lane.b32.xlu1 %v633_v21, %s2045_s19  ;;  %v497_v36 = vrot.slane %v495_v29, 1  ;;  %v390_v40 = vor.u32 %v389_v31, %v385_v20  ;;  %v502_v41 = vrot.slane %v500_v33, 1  ;;  %v404_v42 = vshll.u32 %v2003_v11, 16  ;;  %v2013_v15 = vld [vmem:[%s2083_s18 + $0x38] ss:$0 sps:$4 sm:$0x11]  }
  0x1a   : > { %v505_v43 = vshrl.u32 %v2115_v25, 16  ;;  %v491_v45 = vsel %vm371_vm1, %v486_v35, %v490_v27  ;;  %v401_v47 = vrot.slane %v399_v38, 1  ;;  %v507_v48 = vshll.u32 %v2115_v25, 16  ;;  %v2167_v23 = vld [vmem:[%s2083_s18 + $0xa4] ss:$0 sps:$4 sm:$0x11]  }
  0x1b   : > { %v498_v46 = vor.u32 %v497_v36, %v493_v28  ;;  %v395_v49 = vsel %vm371_vm1, %v390_v40, %v394_v32  ;;  %v406_v50 = vrot.slane %v404_v42, 1  ;;  %v512_v51 = vshll.u32 %v2121_v34, 16  ;;  %v2177_v33 = vld [vmem:[%s2083_s18 + $0xa8] sm:$0xff]   ;;  %v2188_v42 = vld [vmem:[%s2083_s18 + $0x3c] sm:$0xff]  }
  0x1c   : > { %v517_v53 = vshrl.u32 %v2128_v39, 16  ;;  %606 = vrot.lane.b32.xlu0 %v491_v45, %s2046_s20  ;;  %v402_v54 = vor.u32 %v401_v47, %v397_v37  ;;  %v509_v55 = vrot.slane %v507_v48, 1  ;;  %v519_v56 = vshll.u32 %v2128_v39, 16  ;;  %v2183_v37 = vld [vmem:[%s2083_s18 + $0xb0] ss:$0 sps:$4 sm:$0x11]  }
  0x1d   : > { %590 = vrot.lane.b32.xlu1 %v395_v49, %s2046_s20  ;;  %v503_v57 = vsel %vm371_vm1, %v498_v46, %v502_v41  ;;  %v514_v58 = vrot.slane %v512_v51, 1  ;;  %v524_v59 = vshll.u32 %v2009_v52, 16  ;;  %v658_v63 = vrot.slane %v2115_v25, 1 }
  0x1e   : > { %v407_v60 = vsel %vm371_vm1, %v402_v54, %v406_v50  ;;  %v510_v61 = vor.u32 %v509_v55, %v505_v43  ;;  %v521_v62 = vrot.slane %v519_v56, 1  ;;  %v409_v5 = vshrl.u32 %v2132_v44, 16  ;;  %v2197_v50 = vld [vmem:[%s2083_s18 + $0x44] ss:$0 sps:$4 sm:$0x11]  }
  0x1f   : > { %v526_v4 = vrot.slane %v524_v59, 1  ;;  %v411_v7 = vshll.u32 %v2132_v44, 16  ;;  %v659_v11 = vrot.slane %v2121_v34, 1  ;;  %v416_v12 = vshll.u32 %v2147_v1, 16 }
  0x20   : > { %608 = vrot.lane.b32.xlu0 %v503_v57, %s2046_s20  ;;  %v522_v10 = vor.u32 %v521_v62, %v517_v53  ;;  %v515_v13 = vsel %vm371_vm1, %v510_v61, %v514_v58  ;;  %v421_v16 = vshrl.u32 %v2150_v3, 16  ;;  %v423_v17 = vshll.u32 %v2150_v3, 16  ;;  %v2207_v59 = vld [vmem:[%s2083_s18 + $0x50] ss:$0 sps:$4 sm:$0x11]  }
  0x21   : > { %592 = vrot.lane.b32.xlu1 %v407_v60, %s2046_s20  ;;  %v413_v14 = vrot.slane %v411_v7, 1  ;;  %v418_v19 = vrot.slane %v416_v12, 1  ;;  %v428_v22 = vshll.u32 %v2013_v15, 16  ;;  %v661_v24 = vrot.slane %v2128_v39, 1 }
  0x22   : > { %v527_v18 = vsel %vm371_vm1, %v522_v10, %v526_v4  ;;  %v425_v21 = vrot.slane %v423_v17, 1  ;;  %v662_v26 = vrot.slane %v2009_v52, 1  ;;  %v634_v27 = vrot.slane %v2132_v44, 1  ;;  %v2201_v52 = vld [vmem:[%s2083_s18 + $0x48] sm:$0xff]   ;;  %v2215_v4 = vld [vmem:[%s2083_s18 + $0xb4] sm:$0xff]  }
  0x23   : > { %v414_v20 = vor.u32 %v413_v14, %v409_v5  ;;  %v531_v28 = vshll.u32 %v2155_v9, 16  ;;  %v660_v29 = vsel %vm624_vm0, %v658_v63, %v659_v11  ;;  %v430_v32 = vrot.slane %v428_v22, 1  ;;  %v2228_v17 = vld [vmem:[%s2083_s18 + $0xbc] ss:$0 sps:$4 sm:$0x11]  }
  0x24   : > { %610 = vrot.lane.b32.xlu0 %v515_v13, %s2046_s20  ;;  %v426_v31 = vor.u32 %v425_v21, %v421_v16  ;;  %v635_v34 = vrot.slane %v2147_v1, 1  ;;  %v637_v35 = vrot.slane %v2150_v3, 1  ;;  %v529_v36 = vshrl.u32 %v2155_v9, 16  ;;  %v2225_v16 = vld [vmem:[%s2083_s18 + $0xc0] sm:$0xff]  }
  0x25   : > { %612 = vrot.lane.b32.xlu1 %v527_v18, %s2046_s20  ;;  %v419_v30 = vsel %vm371_vm1, %v414_v20, %v418_v19  ;;  %v533_v38 = vrot.slane %v531_v28, 1  ;;  %v536_v40 = vshll.u32 %v2167_v23, 16  ;;  %v543_v41 = vshll.u32 %v2177_v33, 16  ;;  %v2233_v20 = vld [vmem:[%s2083_s18 + $0xc8] ss:$0 sps:$4 sm:$0x11]  }
  0x26   : > { %v663_v43 = vsel %vm624_vm0, %v661_v24, %v662_v26  ;;  %v541_v45 = vshrl.u32 %v2177_v33, 16  ;;  %v548_v46 = vshll.u32 %v2183_v37, 16  ;;  %v431_v47 = vsel %vm371_vm1, %v426_v31, %v430_v32  ;;  %v2242_v26 = vld [vmem:[%s2083_s18 + $0x54] sm:$0xff]  }
  0x27   : > { %v638_v48 = vrot.slane %v2013_v15, 1  ;;  %v545_v49 = vrot.slane %v543_v41, 1  ;;  %v435_v51 = vshll.u32 %v2188_v42, 16  ;;  %v534_v53 = vor.u32 %v533_v38, %v529_v36 }
  0x28   : > { %701 = vrot.lane.b32.xlu0 %v660_v29, %s2045_s19  ;;  %v538_v54 = vrot.slane %v536_v40, 1  ;;  %v550_v56 = vrot.slane %v548_v46, 1  ;;  %v433_v57 = vshrl.u32 %v2188_v42, 16  ;;  %v636_v60 = vsel %vm624_vm0, %v634_v27, %v635_v34 }
  0x29   : > { %594 = vrot.lane.b32.xlu1 %v419_v30, %s2046_s20  ;;  %v546_v55 = vor.u32 %v545_v49, %v541_v45  ;;  %v437_v58 = vrot.slane %v435_v51, 1  ;;  %v639_v61 = vsel %vm624_vm0, %v637_v35, %v638_v48  ;;  %v440_v62 = vshll.u32 %v2197_v50, 16  ;;  %v2266_v51 = vld [vmem:[%s2083_s18] sm:$0xff]  }
  0x2a   : > { %v447_v63 = vshll.u32 %v2201_v52, 16  ;;  %v664_v1 = vrot.slane %v2155_v9, 1  ;;  %v539_v5 = vsel %vm371_vm1, %v534_v53, %v538_v54  ;;  %v665_v10 = vrot.slane %v2167_v23, 1 }
  0x2b   : > { %v551_v7 = vsel %vm371_vm1, %v546_v55, %v550_v56  ;;  %v445_v11 = vshrl.u32 %v2201_v52, 16  ;;  %v438_v12 = vor.u32 %v437_v58, %v433_v57  ;;  %v442_v13 = vrot.slane %v440_v62, 1  ;;  %v2271_v57 = vld [vmem:[%s2083_s18 + $0x8] ss:$0 sps:$4 sm:$0x11]  }
  0x2c   : > { %703 = vrot.lane.b32.xlu0 %v663_v43, %s2045_s19  ;;  %v449_v14 = vrot.slane %v447_v63, 1  ;;  %v452_v15 = vshll.u32 %v2207_v59, 16  ;;  %v555_v18 = vshll.u32 %v2215_v4, 16  ;;  %v667_v19 = vrot.slane %v2177_v33, 1 }
  0x2d   : > { %596 = vrot.lane.b32.xlu1 %v431_v47, %s2046_s20  ;;  %v666_v21 = vsel %vm624_vm0, %v664_v1, %v665_v10  ;;  %v668_v22 = vrot.slane %v2183_v37, 1  ;;  %v640_v23 = vrot.slane %v2188_v42, 1  ;;  %v567_v24 = vshll.u32 %v2225_v16, 16  ;;  %v2251_v37 = vld [vmem:[%s2083_s18 + $0x5c] ss:$0 sps:$4 sm:$0x11]  }
  0x2e   : > { %v443_v27 = vsel %vm371_vm1, %v438_v12, %v442_v13  ;;  %v450_v28 = vor.u32 %v449_v14, %v445_v11  ;;  %v454_v29 = vrot.slane %v452_v15, 1  ;;  %v641_v30 = vrot.slane %v2197_v50, 1  ;;  %v2261_v47 = vld [vmem:[%s2083_s18 + $0x60] sm:$0xff]   ;;  %v2029_v63 = vld [vmem:[%s2083_s18 + $0x68] ss:$0 sps:$4 sm:$0x11]  }
  0x2f   : > { %v643_v31 = vrot.slane %v2201_v52, 1  ;;  %v553_v32 = vshrl.u32 %v2215_v4, 16  ;;  %v557_v34 = vrot.slane %v555_v18, 1  ;;  %v560_v35 = vshll.u32 %v2228_v17, 16  ;;  %v2034_v11 = vld [vmem:[%s2673_s1 + $0x8] sm:$0x1f]  }
  0x30   : > { %685 = vrot.lane.b32.xlu0 %v636_v60, %s2045_s19  ;;  %v572_v36 = vshll.u32 %v2233_v20, 16  ;;  %v644_v38 = vrot.slane %v2207_v59, 1  ;;  %v565_v40 = vshrl.u32 %v2225_v16, 16  ;;  %v569_v41 = vrot.slane %v567_v24, 1  ;;  %v2036_v18 = vld [vmem:[%s2673_s1 + $0x10] sm:$0x1f]  }
  0x31   : > { %687 = vrot.lane.b32.xlu1 %v639_v61, %s2045_s19  ;;  %v459_v43 = vshll.u32 %v2242_v26, 16  ;;  %v669_v45 = vsel %vm624_vm0, %v667_v19, %v668_v22  ;;  %v455_v46 = vsel %vm371_vm1, %v450_v28, %v454_v29  ;;  %v562_v48 = vrot.slane %v560_v35, 1  ;;  %v2285_v10 = vld [vmem:[%s2083_s18 + $0xd4] ss:$0 sps:$4 sm:$0x11]  }
  0x32   : > { %v670_v49 = vrot.slane %v2215_v4, 1  ;;  %v671_v50 = vrot.slane %v2228_v17, 1  ;;  %v558_v53 = vor.u32 %v557_v34, %v553_v32  ;;  %v574_v54 = vrot.slane %v572_v36, 1  ;;  %v2035_v17 = vld [vmem:[%s2673_s1] sm:$0x1f]  }
  0x33   : > { %v457_v55 = vshrl.u32 %v2242_v26, 16  ;;  %v464_v56 = vshll.u32 %v2251_v37, 16  ;;  %v570_v58 = vor.u32 %v569_v41, %v565_v40  ;;  %v461_v59 = vrot.slane %v459_v43, 1 }
  0x34   : > { %614 = vrot.lane.b32.xlu0 %v539_v5, %s2046_s20  ;;  %v625_v60 = vrot.slane %v2266_v51, 1  ;;  %v642_v61 = vsel %vm624_vm0, %v640_v23, %v641_v30  ;;  %v645_v62 = vsel %vm624_vm0, %v643_v31, %v644_v38  ;;  %v471_v1 = vshll.u32 %v2261_v47, 16 }
  0x35   : > { %616 = vrot.lane.b32.xlu1 %v551_v7, %s2046_s20  ;;  %v626_v5 = vrot.slane %v2271_v57, 1  ;;  %v2282_v7 = vld [vmem:[%s2083_s18 + $0xcc] sm:$0xff]   ;;  %v563_v12 = vsel %vm371_vm1, %v558_v53, %v562_v48  ;;  %v466_v13 = vrot.slane %v464_v56, 1  ;;  %v469_v14 = vshrl.u32 %v2261_v47, 16 }
  0x36   : > { %v575_v19 = vsel %vm371_vm1, %v570_v58, %v574_v54  ;;  %v2047_v22 = vmov 65535   ;;  %v676_v24 = vrot.slane %v2282_v7, 1  ;;  %v476_v28 = vshll.u32 %v2029_v63, 16 }
  0x37   : > { %v627_v15 = vsel %vm624_vm0, %v625_v60, %v626_v5  ;;  %v834_v23 = vsel %vm832_vm2, 4294967295, %v2047_v22  ;;  %v677_v30 = vrot.slane %v2285_v10, 1  ;;  %v672_v36 = vsel %vm624_vm0, %v670_v49, %v671_v50 }
  0x38   : > { %705 = vrot.lane.b32.xlu0 %v666_v21, %s2045_s19  ;;  %v462_v21 = vor.u32 %v461_v59, %v457_v55  ;;  %v835_v29 = vsel %vm833_vm3, %v834_v23, 0  ;;  %v673_v38 = vrot.slane %v2225_v16, 1  ;;  %v375_v40 = vshll.u32 %v2266_v51, 16 }
  0x39   : > { %598 = vrot.lane.b32.xlu1 %v443_v27, %s2046_s20  ;;  %v473_v27 = vrot.slane %v471_v1, 1  ;;  %v837_v31 = vand.u32 %v2034_v11, %v835_v29  ;;  %v678_v32 = vsel %vm624_vm0, %v676_v24, %v677_v30  ;;  %v2307_v34 = vand.u32 %v2035_v17, %v835_v29 }
  0x3a   : > { %v2309_v35 = vand.u32 %v2036_v18, %v835_v29  ;;  %v467_v41 = vsel %vm371_vm1, %v462_v21, %v466_v13  ;;  %v674_v43 = vrot.slane %v2233_v20, 1  ;;  %v646_v48 = vrot.slane %v2242_v26, 1 }
  0x3b   : > { %1882 = vmatprep.subr.bf16.mxu0 %v837_v31  ;;  %1984 = vmatprep.subr.bf16.mxu1 %v837_v31  ;;  %v647_v53 = vrot.slane %v2251_v37, 1  ;;  %v649_v20 = vrot.slane %v2261_v47, 1  ;;  %v650_v49 = vrot.slane %v2029_v63, 1  ;;  %v373_v50 = vshrl.u32 %v2266_v51, 16 }
  0x3c   : > { %707 = vrot.lane.b32.xlu0 %v669_v45, %s2045_s19  ;;  %v474_v45 = vor.u32 %v473_v27, %v469_v14  ;;  %1883 = vmatpush3.bf16.msra.mxu0 %v837_v31  ;;  %v377_v54 = vrot.slane %v375_v40, 1  ;;  %v675_v55 = vsel %vm624_vm0, %v673_v38, %v674_v43  ;;  %v380_v37 = vshll.u32 %v2271_v57, 16 }
  0x3d   : > { %600 = vrot.lane.b32.xlu1 %v455_v46, %s2046_s20  ;;  %v478_v46 = vrot.slane %v476_v28, 1  ;;  %1985 = vmatpush3.bf16.msra.mxu1 %v837_v31  ;;  %v579_v58 = vshll.u32 %v2282_v7, 16  ;;  %v648_v59 = vsel %vm624_vm0, %v646_v48, %v647_v53  ;;  %v651_v60 = vsel %vm624_vm0, %v649_v20, %v650_v49 }
  0x3e   : > { %1916 = vmatprep.subr.bf16.mxu1 %v2307_v34  ;;  %1950 = vmatprep.subr.bf16.mxu0 %v2309_v35  ;;  %v577_v63 = vshrl.u32 %v2282_v7, 16  ;;  %v584_v5 = vshll.u32 %v2285_v10, 16 }
  0x3f   : > { %v479_v56 = vsel %vm371_vm1, %v474_v45, %v478_v46  ;;  %v581_v1 = vrot.slane %v579_v58, 1 }
  0x40   : > { %689 = vrot.lane.b32.xlu0 %v642_v61, %s2045_s19  ;;  %v378_v61 = vor.u32 %v377_v54, %v373_v50 }
  0x41   : > { %691 = vrot.lane.b32.xlu1 %v645_v62, %s2045_s19  ;;  %v382_v62 = vrot.slane %v380_v37, 1  ;;  %v582_v11 = vor.u32 %v581_v1, %v577_v63 }
  0x43   : > { %v383_v57 = vsel %vm371_vm1, %v378_v61, %v382_v62 }
  0x44   : > { %618 = vrot.lane.b32.xlu0 %v563_v12, %s2046_s20  ;;  %v586_v12 = vrot.slane %v584_v5, 1 }
  0x45   : > { %620 = vrot.lane.b32.xlu1 %v575_v19, %s2046_s20 }
  0x46   : > { %v587_v13 = vsel %vm371_vm1, %v582_v11, %v586_v12 }
  0x48   : > { %709 = vrot.lane.b32.xlu0 %v672_v36, %s2045_s19 }
  0x49   : > { %602 = vrot.lane.b32.xlu1 %v467_v41, %s2046_s20 }
  0x4c   : > { %711 = vrot.lane.b32.xlu0 %v675_v55, %s2045_s19 }
  0x4d   : > { %604 = vrot.lane.b32.xlu1 %v479_v56, %s2046_s20 }
  0x50   : > { %693 = vrot.lane.b32.xlu0 %v648_v59, %s2045_s19 }
  0x51   : > { %695 = vrot.lane.b32.xlu1 %v651_v60, %s2045_s19 }
  0x54   : > { %588 = vrot.lane.b32.xlu0 %v383_v57, %s2046_s20 }
  0x55   : > { %679 = vrot.lane.b32.xlu1 %v627_v15, %s2045_s19 }
  0x58   : > { %622 = vrot.lane.b32.xlu0 %v587_v13, %s2046_s20 }
  0x59   : > { %713 = vrot.lane.b32.xlu1 %v678_v32, %s2045_s19 }
  0x86   : > { %v700_v14 = vpop.permute.xlu0 %699 }
  0x87   : > { %v698_v10 = vpop.permute.xlu1 %697 }
  0x8a   : > { %v682_v18 = vpop.permute.xlu0 %681 }
  0x8b   : > { %v684_v17 = vpop.permute.xlu1 %683 }
  0x8e   : > { %v607_v19 = vpop.permute.xlu0 %606 }
  0x8f   : > { %v591_v21 = vpop.permute.xlu1 %590  ;;  %v735_v22 = vsel %vm715_vm4, %v2090_v2, %v607_v19 }
  0x90   : > { %v719_v15 = vsel %vm715_vm4, %v2099_v8, %v591_v21  ;;  %v2352_v24 = vsel %vm752_vm5, %v735_v22, %v698_v10 }
  0x91   : > { %v2349_v23 = vsel %vm752_vm5, %v719_v15, %v682_v18  ;;  %1900 = vmatprep.mubr.msk.bf16.mxu1 %vm799_vm6, %v2352_v24 }
  0x92   : > { %1884 = vmatprep.mubr.msk.bf16.mxu0 %vm799_vm6, %v2349_v23  ;;  %v609_v27 = vpop.permute.xlu0 %608 }
  0x93   : > { %v593_v28 = vpop.permute.xlu1 %592  ;;  %v737_v2 = vsel %vm715_vm4, %v2086_v0, %v609_v27 }
  0x94   : > { %v721_v8 = vsel %vm715_vm4, %v2095_v6, %v593_v28  ;;  %v2366_v30 = vsel %vm752_vm5, %v737_v2, %v700_v14 }
  0x95   : > { %v2363_v29 = vsel %vm752_vm5, %v721_v8, %v684_v17  ;;  %1901 = vmatmul.mubr.msk.bf16.vlgmr.msra.gmra.mxu1 %vm799_vm6, %v2366_v30 }
  0x96   : > { %1885 = vmatmul.mubr.msk.bf16.vlgmr.msra.gmra.mxu0 %vm799_vm6, %v2363_v29  ;;  %v611_v31 = vpop.permute.xlu0 %610  ;;  %1917 = vmatpush3.bf16.msra.mxu1 %v2307_v34 }
  0x97   : > { %v613_v32 = vpop.permute.xlu1 %612  ;;  %1951 = vmatpush3.bf16.msra.mxu0 %v2309_v35  ;;  %v739_v0 = vsel %vm715_vm4, %v2115_v25, %v611_v31 }
  0x98   : > { %v741_v40 = vsel %vm715_vm4, %v2128_v39, %v613_v32 }
  0x9a   : > { %v702_v6 = vpop.permute.xlu0 %701 }
  0x9b   : > { %v595_v36 = vpop.permute.xlu1 %594  ;;  %v2377_v38 = vsel %vm752_vm5, %v739_v0, %v702_v6 }
  0x9c   : > { %1904 = vmatprep.mubr.msk.bf16.mxu1 %vm799_vm6, %v2377_v38  ;;  %v723_v25 = vsel %vm715_vm4, %v2132_v44, %v595_v36 }
  0x9e   : > { %v704_v41 = vpop.permute.xlu0 %703 }
  0x9f   : > { %v597_v43 = vpop.permute.xlu1 %596  ;;  %v2384_v34 = vsel %vm752_vm5, %v741_v40, %v704_v41 }
  0xa0   : > { %1905 = vmatmul.mubr.msk.bf16.gmra.mxu1 %vm799_vm6, %v2384_v34  ;;  %v725_v35 = vsel %vm715_vm4, %v2150_v3, %v597_v43 }
  0xa2   : > { %v686_v45 = vpop.permute.xlu0 %685 }
  0xa3   : > { %v688_v46 = vpop.permute.xlu1 %687  ;;  %v760_v48 = vsel %vm752_vm5, %v723_v25, %v686_v45 }
  0xa4   : > { %v762_v39 = vsel %vm752_vm5, %v725_v35, %v688_v46  ;;  %1888 = vmatprep.mubr.msk.bf16.mxu0 %vm799_vm6, %v760_v48 }
  0xa5   : > { %1889 = vmatmul.mubr.msk.bf16.gmra.mxu0 %vm799_vm6, %v762_v39 }
  0xa6   : > { %v615_v53 = vpop.permute.xlu0 %614 }
  0xa7   : > { %v617_v20 = vpop.permute.xlu1 %616  ;;  %v743_v49 = vsel %vm715_vm4, %v2155_v9, %v615_v53 }
  0xa8   : > { %v745_v3 = vsel %vm715_vm4, %v2177_v33, %v617_v20 }
  0xaa   : > { %v706_v50 = vpop.permute.xlu0 %705 }
  0xab   : > { %v599_v44 = vpop.permute.xlu1 %598  ;;  %v2399_v54 = vsel %vm752_vm5, %v743_v49, %v706_v50 }
  0xac   : > { %1908 = vmatprep.mubr.msk.bf16.mxu1 %vm799_vm6, %v2399_v54  ;;  %v727_v9 = vsel %vm715_vm4, %v2188_v42, %v599_v44 }
  0xae   : > { %v708_v55 = vpop.permute.xlu0 %707 }
  0xaf   : > { %v601_v56 = vpop.permute.xlu1 %600  ;;  %v2406_v37 = vsel %vm752_vm5, %v745_v3, %v708_v55 }
  0xb0   : > { %1909 = vmatmul.mubr.msk.bf16.gmra.mxu1 %vm799_vm6, %v2406_v37  ;;  %v729_v58 = vsel %vm715_vm4, %v2201_v52, %v601_v56 }
  0xb2   : > { %v690_v59 = vpop.permute.xlu0 %689 }
  0xb3   : > { %v692_v60 = vpop.permute.xlu1 %691  ;;  %v764_v61 = vsel %vm752_vm5, %v727_v9, %v690_v59 }
  0xb4   : > { %v766_v33 = vsel %vm752_vm5, %v729_v58, %v692_v60  ;;  %1892 = vmatprep.mubr.msk.bf16.mxu0 %vm799_vm6, %v764_v61  ;;  %v2541_v60 = vld [vmem:[%s2674_s2] ss:$0 sm:$0xff] }
  0xb5   : > { %1893 = vmatmul.mubr.msk.bf16.gmra.mxu0 %vm799_vm6, %v766_v33 }
  0xb6   : > { %v619_v62 = vpop.permute.xlu0 %618 }
  0xb7   : > { %v621_v63 = vpop.permute.xlu1 %620  ;;  %v747_v1 = vsel %vm715_vm4, %v2215_v4, %v619_v62 }
  0xb8   : > { %v749_v52 = vsel %vm715_vm4, %v2225_v16, %v621_v63 }
  0xba   : > { %v710_v5 = vpop.permute.xlu0 %709 }
  0xbb   : > { %v603_v42 = vpop.permute.xlu1 %602  ;;  %v784_v57 = vsel %vm752_vm5, %v747_v1, %v710_v5 }
  0xbc   : > { %1912 = vmatprep.mubr.msk.bf16.mxu1 %vm799_vm6, %v784_v57  ;;  %v731_v14 = vsel %vm715_vm4, %v2242_v26, %v603_v42 }
  0xbe   : > { %v712_v11 = vpop.permute.xlu0 %711 }
  0xbf   : > { %v605_v12 = vpop.permute.xlu1 %604  ;;  %v786_v13 = vsel %vm752_vm5, %v749_v52, %v712_v11 }
  0xc0   : > { %1913 = vmatmul.mubr.msk.bf16.gmra.mxu1 %vm799_vm6, %v786_v13  ;;  %v733_v4 = vsel %vm715_vm4, %v2261_v47, %v605_v12 }
  0xc2   : > { %v694_v10 = vpop.permute.xlu0 %693 }
  0xc3   : > { %v696_v17 = vpop.permute.xlu1 %695  ;;  %v768_v18 = vsel %vm752_vm5, %v731_v14, %v694_v10 }
  0xc4   : > { %v770_v19 = vsel %vm752_vm5, %v733_v4, %v696_v17  ;;  %1896 = vmatprep.mubr.msk.bf16.mxu0 %vm799_vm6, %v768_v18 }
  0xc5   : > { %1897 = vmatmul.mubr.msk.bf16.gmra.mxu0 %vm799_vm6, %v770_v19 }
  0xc6   : > { %1952 = vmatprep.mubr.msk.bf16.mxu0 %vm799_vm6, %v2363_v29  ;;  %v589_v16 = vpop.permute.xlu0 %588 }
  0xc7   : > { %v680_v21 = vpop.permute.xlu1 %679  ;;  %v717_v26 = vsel %vm715_vm4, %v2266_v51, %v589_v16 }
  0xc8   : > { %v754_v47 = vsel %vm752_vm5, %v717_v26, %v680_v21 }
  0xc9   : > { %1918 = vmatprep.mubr.msk.bf16.mxu1 %vm799_vm6, %v754_v47 }
  0xca   : > { %1919 = vmatmul.mubr.msk.bf16.vlgmr.msra.gmra.mxu1 %vm799_vm6, %v2349_v23  ;;  %v623_v22 = vpop.permute.xlu0 %622 }
  0xcb   : > { %v714_v15 = vpop.permute.xlu1 %713  ;;  %1922 = vmatprep.mubr.msk.bf16.mxu1 %vm799_vm6, %v2363_v29  ;;  %v751_v27 = vsel %vm715_vm4, %v2282_v7, %v623_v22 }
  0xcc   : > { %v788_v28 = vsel %vm752_vm5, %v751_v27, %v714_v15 }
  0xcd   : > { %1953 = vmatmul.mubr.msk.bf16.vlgmr.msra.gmra.mxu0 %vm799_vm6, %v760_v48 }
  0xce   : > { %1956 = vmatprep.mubr.msk.bf16.mxu0 %vm799_vm6, %v762_v39 }
  0xd2   : > { %1923 = vmatmul.mubr.msk.bf16.gmra.mxu1 %vm799_vm6, %v760_v48 }
  0xd3   : > { %1926 = vmatprep.mubr.msk.bf16.mxu1 %vm799_vm6, %v762_v39 }
  0xd5   : > { %1957 = vmatmul.mubr.msk.bf16.gmra.mxu0 %vm799_vm6, %v764_v61 }
  0xd6   : > { %1960 = vmatprep.mubr.msk.bf16.mxu0 %vm799_vm6, %v766_v33 }
  0xda   : > { %1927 = vmatmul.mubr.msk.bf16.gmra.mxu1 %vm799_vm6, %v764_v61 }
  0xdb   : > { %1930 = vmatprep.mubr.msk.bf16.mxu1 %vm799_vm6, %v766_v33 }
  0xdd   : > { %1961 = vmatmul.mubr.msk.bf16.gmra.mxu0 %vm799_vm6, %v768_v18 }
  0xde   : > { %1964 = vmatprep.mubr.msk.bf16.mxu0 %vm799_vm6, %v770_v19 }
  0xe2   : > { %1931 = vmatmul.mubr.msk.bf16.gmra.mxu1 %vm799_vm6, %v768_v18 }
  0xe3   : > { %1934 = vmatprep.mubr.msk.bf16.mxu1 %vm799_vm6, %v770_v19 }
  0xe5   : > { %1965 = vmatmul.mubr.msk.bf16.gmra.mxu0 %vm799_vm6, %v2352_v24 }
  0xe6   : > { %1968 = vmatprep.mubr.msk.bf16.mxu0 %vm799_vm6, %v2366_v30 }
  0xea   : > { %1935 = vmatmul.mubr.msk.bf16.gmra.mxu1 %vm799_vm6, %v2352_v24 }
  0xeb   : > { %1938 = vmatprep.mubr.msk.bf16.mxu1 %vm799_vm6, %v2366_v30 }
  0xed   : > { %1969 = vmatmul.mubr.msk.bf16.gmra.mxu0 %vm799_vm6, %v2377_v38 }
  0xee   : > { %1972 = vmatprep.mubr.msk.bf16.mxu0 %vm799_vm6, %v2384_v34 }
  0xf2   : > { %1939 = vmatmul.mubr.msk.bf16.gmra.mxu1 %vm799_vm6, %v2377_v38 }
  0xf3   : > { %1942 = vmatprep.mubr.msk.bf16.mxu1 %vm799_vm6, %v2384_v34 }
  0xf5   : > { %1973 = vmatmul.mubr.msk.bf16.gmra.mxu0 %vm799_vm6, %v2399_v54 }
  0xf6   : > { %1976 = vmatprep.mubr.msk.bf16.mxu0 %vm799_vm6, %v2406_v37 }
  0xfa   : > { %1943 = vmatmul.mubr.msk.bf16.gmra.mxu1 %vm799_vm6, %v2399_v54 }
  0xfb   : > { %1946 = vmatprep.mubr.msk.bf16.mxu1 %vm799_vm6, %v2406_v37 }
  0xfd   : > { %1977 = vmatmul.mubr.msk.bf16.gmra.mxu0 %vm799_vm6, %v784_v57 }
  0xfe   : > { %1980 = vmatprep.mubr.msk.bf16.mxu0 %vm799_vm6, %v786_v13 }
 0x102   : > { %1947 = vmatmul.mubr.msk.bf16.gmra.mxu1 %vm799_vm6, %v784_v57 }
 0x105   : > { %1981 = vmatmul.mubr.msk.bf16.gmra.mxu0 %vm799_vm6, %v788_v28 }
 0x155   : > { %v2487_v51 = vpop.f32.mrf.mxu1 }
 0x156   : > { %v1886_v23 = vpop.f32.mrf.mxu0 }
 0x157   : > { %v2489_v7 = vpop.f32.mrf.mxu1 }
 0x158   : > { %v873_v2 = vpop.f32.mrf.mxu0 }
 0x159   : > { %v2491_v24 = vpop.f32.mrf.mxu1 }
 0x15a   : > { %v1887_v29 = vpop.f32.mrf.mxu0 }
 0x15b   : > { %v2493_v8 = vpop.f32.mrf.mxu1 }
 0x15c   : > { %v876_v31 = vpop.f32.mrf.mxu0 }
 0x160   : > { %v2495_v30 = vpop.f32.mrf.mxu1 }
 0x162   : > { %v2497_v32 = vpop.f32.mrf.mxu1 }
 0x164   : > { %v2499_v6 = vpop.f32.mrf.mxu1 }
 0x165   : > { %v1890_v0 = vpop.f32.mrf.mxu0 }
 0x166   : > { %v2501_v38 = vpop.f32.mrf.mxu1 }
 0x167   : > { %v889_v36 = vpop.f32.mrf.mxu0 }
 0x169   : > { %v1891_v40 = vpop.f32.mrf.mxu0 }
 0x16b   : > { %v2505_v43 = vpop.f32.mrf.mxu0 }
 0x170   : > { %v2503_v41 = vpop.f32.mrf.mxu1 }
 0x172   : > { %v2507_v34 = vpop.f32.mrf.mxu1 }
 0x174   : > { %v2511_v35 = vpop.f32.mrf.mxu1 }
 0x175   : > { %v2509_v25 = vpop.f32.mrf.mxu0 }
 0x176   : > { %v2515_v46 = vpop.f32.mrf.mxu1 }
 0x177   : > { %v2513_v45 = vpop.f32.mrf.mxu0 }
 0x179   : > { %v2517_v48 = vpop.f32.mrf.mxu0 }
 0x17b   : > { %v2523_v20 = vpop.f32.mrf.mxu0 }
 0x180   : > { %v2519_v39 = vpop.f32.mrf.mxu1 }
 0x182   : > { %v2521_v53 = vpop.f32.mrf.mxu1 }
 0x184   : > { %v2525_v49 = vpop.f32.mrf.mxu1 }
 0x185   : > { %v2527_v50 = vpop.f32.mrf.mxu0 }
 0x186   : > { %v2532_v54 = vpop.f32.mrf.mxu1 }
 0x187   : > { %v2530_v44 = vpop.f32.mrf.mxu0 }
 0x189   : > { %v2534_v3 = vpop.f32.mrf.mxu0 }
 0x18a   : > { %v1920_v55 = vpop.f32.mrf.mxu1 }
 0x18b   : > { %v1053_v56 = vadd.f32 %v1920_v55, %v1886_v23  ;;  %v2536_v37 = vpop.f32.mrf.mxu0 }
 0x18c   : > { %v1044_v9 = vpop.f32.mrf.mxu1 }
 0x18d   : > { %v1045_v58 = vadd.f32 %v1044_v9, %v873_v2  ;;  %v1954_v59 = vpop.f32.mrf.mxu0 }
 0x18e   : > { %v1347_v61 = vadd.f32 %v1954_v59, %v1053_v56  ;;  %v1921_v33 = vpop.f32.mrf.mxu1 }
 0x18f   : > { %v1056_v62 = vadd.f32 %v1921_v33, %v1887_v29  ;;  %v1218_v63 = vpop.f32.mrf.mxu0 }
 0x190   : > { %v1386_v1 = vadd.f32 %v2541_v60, %v1347_v61  ;;  %v1345_v5 = vadd.f32 %v1218_v63, %v1045_v58  ;;  %v1047_v42 = vpop.f32.mrf.mxu1 }
 0x191   : > { %v1048_v57 = vadd.f32 %v1047_v42, %v876_v31  ;;  %v1955_v52 = vpop.f32.mrf.mxu0 }
 0x192   : > { %v1418_v11 = vmax.f32 %v1386_v1, 0.0  ;;  %v1384_v12 = vadd.f32 %v2541_v60, %v1345_v5  ;;  %v1348_v13 = vadd.f32 %v1955_v52, %v1056_v62  ;;  %v1924_v14 = vpop.f32.mrf.mxu1 }
 0x193   : > { %v1069_v4 = vadd.f32 %v1924_v14, %v1890_v0  ;;  %v1221_v10 = vpop.f32.mrf.mxu0 }
 0x194   : > { %v1801_v17 = vpack.c.bf16 %v1418_v11, %v1418_v11  ;;  %v1416_v18 = vmax.f32 %v1384_v12, 0.0  ;;  %v1387_v19 = vadd.f32 %v2541_v60, %v1348_v13  ;;  %v1346_v16 = vadd.f32 %v1221_v10, %v1048_v57  ;;  %v1060_v21 = vpop.f32.mrf.mxu1 }
 0x195   : > { %v1061_v26 = vadd.f32 %v1060_v21, %v889_v36  ;;  %v1958_v47 = vpop.f32.mrf.mxu0 }
 0x196   : > { %1579 = vst.msk [vmem:[%s2548_s6 + $0x8] sm:$0xf] %vm1576_vm7, %v1801_v17  ;;  %v1799_v22 = vpack.c.bf16 %v1416_v18, %v1416_v18  ;;  %v1419_v15 = vmax.f32 %v1387_v19, 0.0  ;;  %v1385_v27 = vadd.f32 %v2541_v60, %v1346_v16  ;;  %v1351_v28 = vadd.f32 %v1958_v47, %v1069_v4  ;;  %v1925_v23 = vpop.f32.mrf.mxu1 }
 0x197   : > { %v1072_v2 = vadd.f32 %v1925_v23, %v1891_v40  ;;  %v1234_v29 = vpop.f32.mrf.mxu0 }
 0x198   : > { %1577 = vst.msk [vmem:[%s2548_s6] sm:$0xf] %vm1576_vm7, %v1799_v22  ;;  %v1802_v31 = vpack.c.bf16 %v1419_v15, %v1419_v15  ;;  %v1417_v0 = vmax.f32 %v1385_v27, 0.0  ;;  %v1390_v55 = vadd.f32 %v2541_v60, %v1351_v28  ;;  %v1349_v36 = vadd.f32 %v1234_v29, %v1061_v26  ;;  %v1063_v56 = vpop.f32.mrf.mxu1 }
 0x199   : > { %v1064_v9 = vadd.f32 %v1063_v56, %v2505_v43  ;;  %v1959_v58 = vpop.f32.mrf.mxu0 }
 0x19a   : > { %1580 = vst.msk [vmem:[%s2548_s6 + $0xc] sm:$0xf] %vm1576_vm7, %v1802_v31  ;;  %v1800_v59 = vpack.c.bf16 %v1417_v0, %v1417_v0  ;;  %v1422_v61 = vmax.f32 %v1390_v55, 0.0  ;;  %v1388_v40 = vadd.f32 %v2541_v60, %v1349_v36  ;;  %v1352_v33 = vadd.f32 %v1959_v58, %v1072_v2  ;;  %v1928_v62 = vpop.f32.mrf.mxu1 }
 0x19b   : > { %v1085_v63 = vadd.f32 %v1928_v62, %v2509_v25  ;;  %v1237_v1 = vpop.f32.mrf.mxu0 }
 0x19c   : > { %1578 = vst.msk [vmem:[%s2548_s6 + $0x4] sm:$0xf] %vm1576_vm7, %v1800_v59  ;;  %v1805_v5 = vpack.c.bf16 %v1422_v61, %v1422_v61  ;;  %v1420_v42 = vmax.f32 %v1388_v40, 0.0  ;;  %v1391_v43 = vadd.f32 %v2541_v60, %v1352_v33  ;;  %v1350_v57 = vadd.f32 %v1237_v1, %v1064_v9  ;;  %v1076_v52 = vpop.f32.mrf.mxu1 }
 0x19d   : > { %v1077_v11 = vadd.f32 %v1076_v52, %v2513_v45  ;;  %v1962_v12 = vpop.f32.mrf.mxu0 }
 0x19e   : > { %1583 = vst.msk [vmem:[%s2548_s6 + $0x18] sm:$0xf] %vm1576_vm7, %v1805_v5  ;;  %v1803_v13 = vpack.c.bf16 %v1420_v42, %v1420_v42  ;;  %v1423_v14 = vmax.f32 %v1391_v43, 0.0  ;;  %v1389_v25 = vadd.f32 %v2541_v60, %v1350_v57  ;;  %v1355_v4 = vadd.f32 %v1962_v12, %v1085_v63  ;;  %v1929_v10 = vpop.f32.mrf.mxu1 }
 0x19f   : > { %v1088_v17 = vadd.f32 %v1929_v10, %v2517_v48  ;;  %v1250_v18 = vpop.f32.mrf.mxu0 }
 0x1a0   : > { %1581 = vst.msk [vmem:[%s2548_s6 + $0x10] sm:$0xf] %vm1576_vm7, %v1803_v13  ;;  %v1806_v19 = vpack.c.bf16 %v1423_v14, %v1423_v14  ;;  %v1421_v16 = vmax.f32 %v1389_v25, 0.0  ;;  %v1394_v45 = vadd.f32 %v2541_v60, %v1355_v4  ;;  %v1353_v21 = vadd.f32 %v1250_v18, %v1077_v11  ;;  %v1079_v26 = vpop.f32.mrf.mxu1 }
 0x1a1   : > { %v1080_v47 = vadd.f32 %v1079_v26, %v2523_v20  ;;  %v1963_v22 = vpop.f32.mrf.mxu0 }
 0x1a2   : > { %1584 = vst.msk [vmem:[%s2548_s6 + $0x1c] sm:$0xf] %vm1576_vm7, %v1806_v19  ;;  %v1804_v15 = vpack.c.bf16 %v1421_v16, %v1421_v16  ;;  %v1426_v27 = vmax.f32 %v1394_v45, 0.0  ;;  %v1392_v48 = vadd.f32 %v2541_v60, %v1353_v21  ;;  %v1356_v28 = vadd.f32 %v1963_v22, %v1088_v17  ;;  %v1932_v23 = vpop.f32.mrf.mxu1 }
 0x1a3   : > { %v1101_v2 = vadd.f32 %v1932_v23, %v2527_v50  ;;  %v1253_v29 = vpop.f32.mrf.mxu0 }
 0x1a4   : > { %1582 = vst.msk [vmem:[%s2548_s6 + $0x14] sm:$0xf] %vm1576_vm7, %v1804_v15  ;;  %v1809_v31 = vpack.c.bf16 %v1426_v27, %v1426_v27  ;;  %v1424_v0 = vmax.f32 %v1392_v48, 0.0  ;;  %v1395_v20 = vadd.f32 %v2541_v60, %v1356_v28  ;;  %v1354_v55 = vadd.f32 %v1253_v29, %v1080_v47  ;;  %v1092_v36 = vpop.f32.mrf.mxu1 }
 0x1a5   : > { %v1093_v56 = vadd.f32 %v1092_v36, %v2530_v44  ;;  %v1966_v9 = vpop.f32.mrf.mxu0 }
 0x1a6   : > { %1587 = vst.msk [vmem:[%s2548_s6 + $0x28] sm:$0xf] %vm1576_vm7, %v1809_v31  ;;  %v1807_v58 = vpack.c.bf16 %v1424_v0, %v1424_v0  ;;  %v1427_v59 = vmax.f32 %v1395_v20, 0.0  ;;  %v1393_v50 = vadd.f32 %v2541_v60, %v1354_v55  ;;  %v1359_v61 = vadd.f32 %v1966_v9, %v1101_v2  ;;  %v1933_v40 = vpop.f32.mrf.mxu1 }
 0x1a7   : > { %v1104_v33 = vadd.f32 %v1933_v40, %v2534_v3  ;;  %v1266_v62 = vpop.f32.mrf.mxu0 }
 0x1a8   : > { %1585 = vst.msk [vmem:[%s2548_s6 + $0x20] sm:$0xf] %vm1576_vm7, %v1807_v58  ;;  %v1810_v63 = vpack.c.bf16 %v1427_v59, %v1427_v59  ;;  %v1425_v1 = vmax.f32 %v1393_v50, 0.0  ;;  %v1398_v44 = vadd.f32 %v2541_v60, %v1359_v61  ;;  %v1357_v5 = vadd.f32 %v1266_v62, %v1093_v56  ;;  %v1095_v42 = vpop.f32.mrf.mxu1 }
 0x1a9   : > { %v1096_v43 = vadd.f32 %v1095_v42, %v2536_v37  ;;  %v1967_v57 = vpop.f32.mrf.mxu0 }
 0x1aa   : > { %1588 = vst.msk [vmem:[%s2548_s6 + $0x2c] sm:$0xf] %vm1576_vm7, %v1810_v63  ;;  %v1808_v52 = vpack.c.bf16 %v1425_v1, %v1425_v1  ;;  %v1430_v11 = vmax.f32 %v1398_v44, 0.0  ;;  %v1396_v3 = vadd.f32 %v2541_v60, %v1357_v5  ;;  %v1360_v12 = vadd.f32 %v1967_v57, %v1104_v33  ;;  %v1936_v13 = vpop.f32.mrf.mxu1 }
 0x1ab   : > { %v1117_v14 = vadd.f32 %v1936_v13, %v2487_v51  ;;  %v1269_v25 = vpop.f32.mrf.mxu0 }
 0x1ac   : > { %1586 = vst.msk [vmem:[%s2548_s6 + $0x24] sm:$0xf] %vm1576_vm7, %v1808_v52  ;;  %v1813_v4 = vpack.c.bf16 %v1430_v11, %v1430_v11  ;;  %v1428_v10 = vmax.f32 %v1396_v3, 0.0  ;;  %v1399_v37 = vadd.f32 %v2541_v60, %v1360_v12  ;;  %v1358_v17 = vadd.f32 %v1269_v25, %v1096_v43  ;;  %v1108_v18 = vpop.f32.mrf.mxu1 }
 0x1ad   : > { %v1109_v19 = vadd.f32 %v1108_v18, %v2489_v7  ;;  %v1970_v16 = vpop.f32.mrf.mxu0 }
 0x1ae   : > { %1591 = vst.msk [vmem:[%s2548_s6 + $0x38] sm:$0xf] %vm1576_vm7, %v1813_v4  ;;  %v1811_v45 = vpack.c.bf16 %v1428_v10, %v1428_v10  ;;  %v1431_v21 = vmax.f32 %v1399_v37, 0.0  ;;  %v1397_v51 = vadd.f32 %v2541_v60, %v1358_v17  ;;  %v1363_v26 = vadd.f32 %v1970_v16, %v1117_v14  ;;  %v1937_v47 = vpop.f32.mrf.mxu1 }
 0x1af   : > { %v1120_v22 = vadd.f32 %v1937_v47, %v2491_v24  ;;  %v1282_v15 = vpop.f32.mrf.mxu0 }
 0x1b0   : > { %1589 = vst.msk [vmem:[%s2548_s6 + $0x30] sm:$0xf] %vm1576_vm7, %v1811_v45  ;;  %v1814_v27 = vpack.c.bf16 %v1431_v21, %v1431_v21  ;;  %v1429_v48 = vmax.f32 %v1397_v51, 0.0  ;;  %v1402_v7 = vadd.f32 %v2541_v60, %v1363_v26  ;;  %v1361_v28 = vadd.f32 %v1282_v15, %v1109_v19  ;;  %v1111_v23 = vpop.f32.mrf.mxu1 }
 0x1b1   : > { %v1112_v2 = vadd.f32 %v1111_v23, %v2493_v8  ;;  %v1971_v29 = vpop.f32.mrf.mxu0 }
 0x1b2   : > { %1592 = vst.msk [vmem:[%s2548_s6 + $0x3c] sm:$0xf] %vm1576_vm7, %v1814_v27  ;;  %v1812_v31 = vpack.c.bf16 %v1429_v48, %v1429_v48  ;;  %v1434_v0 = vmax.f32 %v1402_v7, 0.0  ;;  %v1400_v24 = vadd.f32 %v2541_v60, %v1361_v28  ;;  %v1364_v20 = vadd.f32 %v1971_v29, %v1120_v22  ;;  %v1940_v55 = vpop.f32.mrf.mxu1 }
 0x1b3   : > { %v1133_v36 = vadd.f32 %v1940_v55, %v2495_v30  ;;  %v1285_v56 = vpop.f32.mrf.mxu0 }
 0x1b4   : > { %1590 = vst.msk [vmem:[%s2548_s6 + $0x34] sm:$0xf] %vm1576_vm7, %v1812_v31  ;;  %v1817_v9 = vpack.c.bf16 %v1434_v0, %v1434_v0  ;;  %v1432_v58 = vmax.f32 %v1400_v24, 0.0  ;;  %v1403_v8 = vadd.f32 %v2541_v60, %v1364_v20  ;;  %v1362_v59 = vadd.f32 %v1285_v56, %v1112_v2  ;;  %v1124_v50 = vpop.f32.mrf.mxu1 }
 0x1b5   : > { %v1125_v61 = vadd.f32 %v1124_v50, %v2497_v32  ;;  %v1974_v40 = vpop.f32.mrf.mxu0 }
 0x1b6   : > { %1595 = vst.msk [vmem:[%s2548_s6 + $0x48] sm:$0xf] %vm1576_vm7, %v1817_v9  ;;  %v1815_v33 = vpack.c.bf16 %v1432_v58, %v1432_v58  ;;  %v1435_v62 = vmax.f32 %v1403_v8, 0.0  ;;  %v1401_v30 = vadd.f32 %v2541_v60, %v1362_v59  ;;  %v1367_v63 = vadd.f32 %v1974_v40, %v1133_v36  ;;  %v1941_v1 = vpop.f32.mrf.mxu1 }
 0x1b7   : > { %v1136_v44 = vadd.f32 %v1941_v1, %v2499_v6  ;;  %v1298_v5 = vpop.f32.mrf.mxu0 }
 0x1b8   : > { %1593 = vst.msk [vmem:[%s2548_s6 + $0x40] sm:$0xf] %vm1576_vm7, %v1815_v33  ;;  %v1818_v42 = vpack.c.bf16 %v1435_v62, %v1435_v62  ;;  %v1433_v43 = vmax.f32 %v1401_v30, 0.0  ;;  %v1406_v32 = vadd.f32 %v2541_v60, %v1367_v63  ;;  %v1365_v57 = vadd.f32 %v1298_v5, %v1125_v61  ;;  %v1127_v52 = vpop.f32.mrf.mxu1 }
 0x1b9   : > { %v1128_v11 = vadd.f32 %v1127_v52, %v2501_v38  ;;  %v1975_v3 = vpop.f32.mrf.mxu0 }
 0x1ba   : > { %1596 = vst.msk [vmem:[%s2548_s6 + $0x4c] sm:$0xf] %vm1576_vm7, %v1818_v42  ;;  %v1816_v12 = vpack.c.bf16 %v1433_v43, %v1433_v43  ;;  %v1438_v13 = vmax.f32 %v1406_v32, 0.0  ;;  %v1404_v6 = vadd.f32 %v2541_v60, %v1365_v57  ;;  %v1368_v14 = vadd.f32 %v1975_v3, %v1136_v44  ;;  %v1944_v25 = vpop.f32.mrf.mxu1 }
 0x1bb   : > { %v1149_v4 = vadd.f32 %v1944_v25, %v2503_v41  ;;  %v1301_v10 = vpop.f32.mrf.mxu0 }
 0x1bc   : > { %1594 = vst.msk [vmem:[%s2548_s6 + $0x44] sm:$0xf] %vm1576_vm7, %v1816_v12  ;;  %v1821_v37 = vpack.c.bf16 %v1438_v13, %v1438_v13  ;;  %v1436_v17 = vmax.f32 %v1404_v6, 0.0  ;;  %v1407_v38 = vadd.f32 %v2541_v60, %v1368_v14  ;;  %v1366_v18 = vadd.f32 %v1301_v10, %v1128_v11  ;;  %v1140_v19 = vpop.f32.mrf.mxu1 }
 0x1bd   : > { %v1141_v16 = vadd.f32 %v1140_v19, %v2507_v34  ;;  %v1978_v45 = vpop.f32.mrf.mxu0 }
 0x1be   : > { %1599 = vst.msk [vmem:[%s2548_s6 + $0x58] sm:$0xf] %vm1576_vm7, %v1821_v37  ;;  %v1819_v21 = vpack.c.bf16 %v1436_v17, %v1436_v17  ;;  %v1439_v51 = vmax.f32 %v1407_v38, 0.0  ;;  %v1405_v41 = vadd.f32 %v2541_v60, %v1366_v18  ;;  %v1371_v26 = vadd.f32 %v1978_v45, %v1149_v4  ;;  %v1945_v47 = vpop.f32.mrf.mxu1 }
 0x1bf   : > { %v1152_v22 = vadd.f32 %v1945_v47, %v2511_v35  ;;  %v1314_v15 = vpop.f32.mrf.mxu0 }
 0x1c0   : > { %1597 = vst.msk [vmem:[%s2548_s6 + $0x50] sm:$0xf] %vm1576_vm7, %v1819_v21  ;;  %v1822_v27 = vpack.c.bf16 %v1439_v51, %v1439_v51  ;;  %v1437_v48 = vmax.f32 %v1405_v41, 0.0  ;;  %v1410_v34 = vadd.f32 %v2541_v60, %v1371_v26  ;;  %v1369_v7 = vadd.f32 %v1314_v15, %v1141_v16  ;;  %v1143_v28 = vpop.f32.mrf.mxu1 }
 0x1c1   : > { %v1144_v23 = vadd.f32 %v1143_v28, %v2515_v46  ;;  %v1979_v2 = vpop.f32.mrf.mxu0 }
 0x1c2   : > { %1600 = vst.msk [vmem:[%s2548_s6 + $0x5c] sm:$0xf] %vm1576_vm7, %v1822_v27  ;;  %v1820_v29 = vpack.c.bf16 %v1437_v48, %v1437_v48  ;;  %v1442_v31 = vmax.f32 %v1410_v34, 0.0  ;;  %v1408_v35 = vadd.f32 %v2541_v60, %v1369_v7  ;;  %v1372_v0 = vadd.f32 %v1979_v2, %v1152_v22  ;;  %v1948_v24 = vpop.f32.mrf.mxu1 }
 0x1c3   : > { %v1165_v20 = vadd.f32 %v1948_v24, %v2519_v39  ;;  %v1317_v55 = vpop.f32.mrf.mxu0 }
 0x1c4   : > { %1598 = vst.msk [vmem:[%s2548_s6 + $0x54] sm:$0xf] %vm1576_vm7, %v1820_v29  ;;  %v1825_v36 = vpack.c.bf16 %v1442_v31, %v1442_v31  ;;  %v1440_v56 = vmax.f32 %v1408_v35, 0.0  ;;  %v1411_v46 = vadd.f32 %v2541_v60, %v1372_v0  ;;  %v1370_v9 = vadd.f32 %v1317_v55, %v1144_v23  ;;  %v1156_v58 = vpop.f32.mrf.mxu1 }
 0x1c5   : > { %v1157_v8 = vadd.f32 %v1156_v58, %v2521_v53  ;;  %v1982_v59 = vpop.f32.mrf.mxu0 }
 0x1c6   : > { %1603 = vst.msk [vmem:[%s2548_s6 + $0x68] sm:$0xf] %vm1576_vm7, %v1825_v36  ;;  %v1823_v50 = vpack.c.bf16 %v1440_v56, %v1440_v56  ;;  %v1443_v61 = vmax.f32 %v1411_v46, 0.0  ;;  %v1409_v39 = vadd.f32 %v2541_v60, %v1370_v9  ;;  %v1375_v40 = vadd.f32 %v1982_v59, %v1165_v20  ;;  %v1949_v33 = vpop.f32.mrf.mxu1 }
 0x1c7   : > { %v1168_v62 = vadd.f32 %v1949_v33, %v2525_v49  ;;  %v1330_v30 = vpop.f32.mrf.mxu0 }
 0x1c8   : > { %1601 = vst.msk [vmem:[%s2548_s6 + $0x60] sm:$0xf] %vm1576_vm7, %v1823_v50  ;;  %v1826_v63 = vpack.c.bf16 %v1443_v61, %v1443_v61  ;;  %v1441_v1 = vmax.f32 %v1409_v39, 0.0  ;;  %v1414_v53 = vadd.f32 %v2541_v60, %v1375_v40  ;;  %v1373_v44 = vadd.f32 %v1330_v30, %v1157_v8  ;;  %v1159_v5 = vpop.f32.mrf.mxu1 }
 0x1c9   : > { %v1160_v42 = vadd.f32 %v1159_v5, %v2532_v54  ;;  %v1983_v43 = vpop.f32.mrf.mxu0 }
 0x1ca   : > { %1604 = vst.msk [vmem:[%s2548_s6 + $0x6c] sm:$0xf] %vm1576_vm7, %v1826_v63  ;;  %v1824_v32 = vpack.c.bf16 %v1441_v1, %v1441_v1  ;;  %v1446_v57 = vmax.f32 %v1414_v53, 0.0  ;;  %v1412_v49 = vadd.f32 %v2541_v60, %v1373_v44  ;;  %v1376_v52 = vadd.f32 %v1983_v43, %v1168_v62 }
 0x1cb   : > { %v1333_v11 = vpop.f32.mrf.mxu0 }
 0x1cc   : > { %1602 = vst.msk [vmem:[%s2548_s6 + $0x64] sm:$0xf] %vm1576_vm7, %v1824_v32  ;;  %v1829_v3 = vpack.c.bf16 %v1446_v57, %v1446_v57  ;;  %v1444_v12 = vmax.f32 %v1412_v49, 0.0  ;;  %v1415_v13 = vadd.f32 %v2541_v60, %v1376_v52  ;;  %v1374_v6 = vadd.f32 %v1333_v11, %v1160_v42 }
 0x1ce   : > { %1607 = vst.msk [vmem:[%s2548_s6 + $0x78] sm:$0xf] %vm1576_vm7, %v1829_v3  ;;  %v1827_v54 = vpack.c.bf16 %v1444_v12, %v1444_v12  ;;  %v1447_v14 = vmax.f32 %v1415_v13, 0.0  ;;  %v1413_v25 = vadd.f32 %v2541_v60, %v1374_v6 }
 0x1d0   : > { %1605 = vst.msk [vmem:[%s2548_s6 + $0x70] sm:$0xf] %vm1576_vm7, %v1827_v54  ;;  %v1830_v4 = vpack.c.bf16 %v1447_v14, %v1447_v14  ;;  %v1445_v10 = vmax.f32 %v1413_v25, 0.0 }
 0x1d2   : > { %1608 = vst.msk [vmem:[%s2548_s6 + $0x7c] sm:$0xf] %vm1576_vm7, %v1830_v4  ;;  %v1828_v37 = vpack.c.bf16 %v1445_v10, %v1445_v10 }
 0x1d4   : > { %1606 = vst.msk [vmem:[%s2548_s6 + $0x74] sm:$0xf] %vm1576_vm7, %v1828_v37 }
 0x1d5 PF: > { %s13_s12 = sadd.s32 1, %s2043_s12  }
 0x1d6   : > { %p10_p5 = scmp.ge.s32.totalorder %s13_s12, 4  }
 0x1d8   :  { %12 = sbr.rel (!%p10_p5) target bundleno = 1 (0x1), region = 64 }

// kernel: encoder_forward.11
= control target key start
LH: loop header
LB: loop body
LE: loop exit
PB: predicated region body
PF: predicated region fallthrough
CT: control target
= control target key end

     0   :  { %s2164_s12 = smov 0   ;;  %s2988_s0 = inlined_call_operand.vmem [shape: bf16[2,18,18,64], index: 0, kind: input, shape index: {}]   ;;  %s2989_s1 = inlined_call_operand.vmem [shape: bf16[3,192,64], index: 1, kind: input, shape index: {}]   ;;  %s2990_s2 = inlined_call_operand.vmem [shape: f32[1,64], index: 2, kind: input, shape index: {}]   ;;  %s2991_s3 = inlined_call_operand.vmem [shape: bf16[128,64], index: 3, kind: output, shape index: {}]  }
   0x1 LB: > { %s2170_s13 = sadd.s32 4294967295, %s2140_s12   ;;  %p1836_p0 = scmp.ge.s32.totalorder %s2140_s12, 1  ;;  %s2140_s12 = sphi %s2164_s12, %s13_s12  }
   0x2   : > { %p137_p1 = scmp.lt.s32.totalorder %s2140_s12, 3 }
   0x4   : > { %p138_p2 = pnand %p1836_p0, %p137_p1 }
   0x5   : > { %p161_p3 = scmp.lt.s32.totalorder (!%p138_p2), %s2170_s13, 1  ;;  %s2143_s4 = smov (!%p138_p2), 64  }
   0x6   : > { %141 = sbr.rel (%p138_p2) target bundleno = 546 (0x222), region = 32 }
   0xb   : > { %v2096_v0 = vld [vmem:[%s2989_s1 + $0x98] sm:$0xff]   ;;  %v2142_v1 = vmov 0   ;;  %s162_s16 = scalar_select %p161_p3, %s2170_s13, 1  ;;  %v2097_v2 = vld [vmem:[%s2989_s1 + $0x90] sm:$0xff]   ;;  %vm371_vm0 = vsmask.f32 7424 }
   0xc   : > { %2027 = vmatprep.subr.bf16.mxu1 %v2142_v1  ;;  %903 = vmatprep.subr.bf16.mxu0 %v2142_v1  ;;  %v2098_v3 = vld [vmem:[%s2989_s1 + $0x88] sm:$0xff]   ;;  %v2099_v6 = vld [vmem:[%s2989_s1 + $0x80] sm:$0xff]   ;;  %v2100_v18 = vld [vmem:[%s2989_s1 + $0x78] sm:$0xff]   ;;  %vm624_vm1 = vcmask 1046528   ;;  %vm679_vm2 = vcmask 523264   ;;  %vm1767_vm3 = vcmask 519168  }
   0xd   : > { %2039 = vmatpush1.bf16.msra.mxu1 %v2096_v0  ;;  %904 = vmatpush1.bf16.msra.mxu0 %v2096_v0  ;;  %s2051_s19 = smul.u32 216, %s162_s16  ;;  %v2101_v34 = vld [vmem:[%s2989_s1 + $0x70] sm:$0xff]  }
   0xe   : > { %2028 = vmatprep.subr.bf16.mxu1 %v2142_v1  ;;  %905 = vmatprep.subr.bf16.mxu0 %v2142_v1 }
   0xf   : > { %s2189_s22 = scalar_lea.vmem %s2988_s0, %s2051_s19  ;;  %s1838_s19 = sshll.u32 %s2170_s13, 3 }
  0x10   : > { %v2197_v4 = vld [vmem:[%s2189_s22 + $0x6c] sm:$0xff]   ;;  %v2200_v5 = vld [vmem:[%s2189_s22 + $0x74] ss:$0 sps:$4 sm:$0x11]   ;;  %v2220_v17 = vld [vmem:[%s2189_s22 + $0x78] sm:$0xff]   ;;  %p167_p4 = scmp.lt.s32.totalorder %s1838_s19, 15 }
  0x11   : > { %2040 = vmatpush1.bf16.msra.mxu1 %v2097_v2  ;;  %906 = vmatpush1.bf16.msra.mxu0 %v2097_v2  ;;  %v2206_v7 = vld [vmem:[%s2189_s22 + $0xc] sm:$0xff]   ;;  %v481_v8 = vshrl.u32 %v2197_v4, 16  ;;  %v483_v9 = vshll.u32 %v2197_v4, 16  ;;  %v488_v10 = vshll.u32 %v2200_v5, 16  ;;  %v493_v23 = vshrl.u32 %v2220_v17, 16  ;;  %v2231_v25 = vld [vmem:[%s2189_s22 + $0x18] sm:$0xff]  }
  0x12   : > { %2029 = vmatprep.subr.bf16.mxu1 %v2142_v1  ;;  %907 = vmatprep.subr.bf16.mxu0 %v2142_v1  ;;  %v2212_v11 = vld [vmem:[%s2189_s22 + $0x14] ss:$0 sps:$4 sm:$0x11]   ;;  %v385_v12 = vshrl.u32 %v2206_v7, 16  ;;  %v387_v13 = vshll.u32 %v2206_v7, 16  ;;  %v495_v24 = vshll.u32 %v2220_v17, 16 }
  0x13   : > { %v485_v14 = vrot.slane %v483_v9, 1  ;;  %v490_v15 = vrot.slane %v488_v10, 1  ;;  %v392_v16 = vshll.u32 %v2212_v11, 16  ;;  %v2226_v20 = vld [vmem:[%s2189_s22 + $0x80] ss:$0 sps:$4 sm:$0x11]  }
  0x14   : > { %v389_v19 = vrot.slane %v387_v13, 1  ;;  %v500_v27 = vshll.u32 %v2226_v20, 16  ;;  %v2235_v28 = vld [vmem:[%s2189_s22 + $0x20] ss:$0 sps:$4 sm:$0x11]   ;;  %v497_v30 = vrot.slane %v495_v24, 1 }
  0x15   : > { %2041 = vmatpush1.bf16.msra.mxu1 %v2098_v3  ;;  %908 = vmatpush1.bf16.msra.mxu0 %v2098_v3  ;;  %v486_v21 = vor.u32 %v485_v14, %v481_v8  ;;  %v394_v22 = vrot.slane %v392_v16, 1  ;;  %v397_v31 = vshrl.u32 %v2231_v25, 16  ;;  %v399_v32 = vshll.u32 %v2231_v25, 16  ;;  %v2243_v33 = vld [vmem:[%s2189_s22 + $0x84] sm:$0xff]   ;;  %v2271_v52 = vld [vmem:[%s2189_s22 + $0x90] sm:$0xff]   ;;  %v2292_v8 = vld [vmem:[%s2189_s22 + $0x9c] sm:$0xff]  }
  0x16   : > { %2030 = vmatprep.subr.bf16.mxu1 %v2142_v1  ;;  %909 = vmatprep.subr.bf16.mxu0 %v2142_v1  ;;  %v390_v26 = vor.u32 %v389_v19, %v385_v12  ;;  %v502_v36 = vrot.slane %v500_v27, 1  ;;  %v404_v37 = vshll.u32 %v2235_v28, 16  ;;  %v498_v38 = vor.u32 %v497_v30, %v493_v23  ;;  %v2252_v40 = vld [vmem:[%s2189_s22 + $0x8c] ss:$0 sps:$4 sm:$0x11]   ;;  %v2257_v44 = vld [vmem:[%s2189_s22 + $0x24] sm:$0xff]  }
  0x17   : > { %v491_v29 = vsel %vm371_vm0, %v486_v21, %v490_v15  ;;  %v401_v39 = vrot.slane %v399_v32, 1  ;;  %v505_v41 = vshrl.u32 %v2243_v33, 16  ;;  %v507_v42 = vshll.u32 %v2243_v33, 16  ;;  %v2266_v49 = vld [vmem:[%s2189_s22 + $0x2c] ss:$0 sps:$4 sm:$0x11]  }
  0x18   : > { %606 = vrot.lane.b32.xlu0 %v491_v29, %s2143_s4  ;;  %v395_v35 = vsel %vm371_vm0, %v390_v26, %v394_v22  ;;  %v406_v43 = vrot.slane %v404_v37, 1  ;;  %v503_v45 = vsel %vm371_vm0, %v498_v38, %v502_v36  ;;  %v512_v48 = vshll.u32 %v2252_v40, 16  ;;  %v2275_v56 = vld [vmem:[%s2189_s22 + $0x30] sm:$0xff]   ;;  %v2279_v59 = vld [vmem:[%s2189_s22 + $0x98] ss:$0 sps:$4 sm:$0x11]  }
  0x19   : > { %2042 = vmatpush1.bf16.msra.mxu1 %v2099_v6  ;;  %910 = vmatpush1.bf16.msra.mxu0 %v2099_v6  ;;  %v402_v46 = vor.u32 %v401_v39, %v397_v31  ;;  %v509_v47 = vrot.slane %v507_v42, 1  ;;  %v409_v50 = vshrl.u32 %v2257_v44, 16  ;;  %v411_v51 = vshll.u32 %v2257_v44, 16  ;;  %v2295_v10 = vld [vmem:[%s2189_s22 + $0x38] ss:$0 sps:$4 sm:$0x11]  }
  0x1a   : > { %2031 = vmatprep.subr.bf16.mxu1 %v2142_v1  ;;  %911 = vmatprep.subr.bf16.mxu0 %v2142_v1  ;;  %v514_v55 = vrot.slane %v512_v48, 1  ;;  %v416_v58 = vshll.u32 %v2266_v49, 16  ;;  %v517_v60 = vshrl.u32 %v2271_v52, 16  ;;  %v519_v62 = vshll.u32 %v2271_v52, 16  ;;  %v2308_v29 = vld [vmem:[%s2189_s22 + $0x3c] sm:$0xff]   ;;  %v2315_v31 = vld [vmem:[%s2189_s22 + $0xa8] sm:$0xff]  }
  0x1b   : > { %608 = vrot.lane.b32.xlu1 %v503_v45, %s2143_s4  ;;  %v407_v53 = vsel %vm371_vm0, %v402_v46, %v406_v43  ;;  %v510_v54 = vor.u32 %v509_v47, %v505_v41  ;;  %v413_v57 = vrot.slane %v411_v51, 1  ;;  %v421_v63 = vshrl.u32 %v2275_v56, 16  ;;  %v2312_v30 = vld [vmem:[%s2189_s22 + $0x44] ss:$0 sps:$4 sm:$0x11]   ;;  %v2329_v45 = vld [vmem:[%s2189_s22 + $0x48] sm:$0xff]  }
  0x1c   : > { %590 = vrot.lane.b32.xlu0 %v395_v35, %s2143_s4  ;;  %v418_v2 = vrot.slane %v416_v58, 1  ;;  %v524_v3 = vshll.u32 %v2279_v59, 16  ;;  %v423_v6 = vshll.u32 %v2275_v56, 16  ;;  %v521_v9 = vrot.slane %v519_v62, 1  ;;  %s2993_s19 = smov (!%p167_p4, %s1838_s19), 15 }
  0x1d   : > { %2043 = vmatpush1.bf16.msra.mxu1 %v2100_v18  ;;  %912 = vmatpush1.bf16.msra.mxu0 %v2100_v18  ;;  %v515_v61 = vsel %vm371_vm0, %v510_v54, %v514_v55  ;;  %v414_v0 = vor.u32 %v413_v57, %v409_v50  ;;  %v428_v16 = vshll.u32 %v2295_v10, 16  ;;  %v2300_v18 = vld [vmem:[%s2189_s22 + $0xa4] ss:$0 sps:$4 sm:$0x11]   ;;  %v529_v19 = vshrl.u32 %v2292_v8, 16  ;;  %v2339_v55 = vld [vmem:[%s2189_s22 + $0xb4] sm:$0xff]  }
  0x1e   : > { %2032 = vmatprep.subr.bf16.mxu1 %v2142_v1  ;;  %913 = vmatprep.subr.bf16.mxu0 %v2142_v1  ;;  %v526_v13 = vrot.slane %v524_v3, 1  ;;  %v425_v14 = vrot.slane %v423_v6, 1  ;;  %v522_v15 = vor.u32 %v521_v9, %v517_v60  ;;  %v531_v21 = vshll.u32 %v2292_v8, 16  ;;  %v2323_v39 = vld [vmem:[%s2189_s22 + $0xb0] ss:$0 sps:$4 sm:$0x11]  }
  0x1f   : > { %592 = vrot.lane.b32.xlu1 %v407_v53, %s2143_s4  ;;  %v419_v12 = vsel %vm371_vm0, %v414_v0, %v418_v2  ;;  %v430_v24 = vrot.slane %v428_v16, 1  ;;  %v536_v27 = vshll.u32 %v2300_v18, 16  ;;  %v433_v36 = vshrl.u32 %v2308_v29, 16  ;;  %v2334_v50 = vld [vmem:[%s2189_s22 + $0x50] ss:$0 sps:$4 sm:$0x11]  }
  0x20   : > { %610 = vrot.lane.b32.xlu0 %v515_v61, %s2143_s4  ;;  %v426_v22 = vor.u32 %v425_v14, %v421_v63  ;;  %v527_v23 = vsel %vm371_vm0, %v522_v15, %v526_v13  ;;  %v533_v26 = vrot.slane %v531_v21, 1  ;;  %v435_v37 = vshll.u32 %v2308_v29, 16  ;;  %v2343_v63 = vld [vmem:[%s2189_s22 + $0xbc] ss:$0 sps:$4 sm:$0x11]   ;;  %v2349_v9 = vld [vmem:[%s2189_s22 + $0x54] sm:$0xff]  }
  0x21   : > { %2044 = vmatpush1.bf16.msra.mxu1 %v2101_v34  ;;  %914 = vmatpush1.bf16.msra.mxu0 %v2101_v34  ;;  %v538_v35 = vrot.slane %v536_v27, 1  ;;  %v440_v38 = vshll.u32 %v2312_v30, 16  ;;  %v541_v41 = vshrl.u32 %v2315_v31, 16  ;;  %v543_v43 = vshll.u32 %v2315_v31, 16  ;;  %v2365_v27 = vld [vmem:[%s2189_s22 + $0x60] sm:$0xff]   ;;  %s1839_s13 = sshll.u32 %s2993_s19, 2 }
  0x22   : > { %2033 = vmatprep.subr.bf16.mxu1 %v2142_v1  ;;  %915 = vmatprep.subr.bf16.mxu0 %v2142_v1  ;;  %v431_v32 = vsel %vm371_vm0, %v426_v22, %v430_v24  ;;  %v534_v34 = vor.u32 %v533_v26, %v529_v19  ;;  %v437_v46 = vrot.slane %v435_v37, 1  ;;  %v548_v48 = vshll.u32 %v2323_v39, 16  ;;  %v2356_v16 = vld [vmem:[%s2189_s22 + $0x5c] ss:$0 sps:$4 sm:$0x11]   ;;  %v2361_v22 = vld [vmem:[%s2189_s22 + $0xc0] sm:$0xff]  }
  0x23   : > { %594 = vrot.lane.b32.xlu1 %v419_v12, %s2143_s4  ;;  %v442_v47 = vrot.slane %v440_v38, 1  ;;  %v545_v51 = vrot.slane %v543_v43, 1  ;;  %v445_v53 = vshrl.u32 %v2329_v45, 16  ;;  %v447_v54 = vshll.u32 %v2329_v45, 16 }
  0x24   : > { %612 = vrot.lane.b32.xlu0 %v527_v23, %s2143_s4  ;;  %v539_v42 = vsel %vm371_vm0, %v534_v34, %v538_v35  ;;  %v438_v57 = vor.u32 %v437_v46, %v433_v36  ;;  %v550_v58 = vrot.slane %v548_v48, 1  ;;  %v452_v60 = vshll.u32 %v2334_v50, 16  ;;  %v2369_v35 = vld [vmem:[%s2189_s22 + $0xc8] ss:$0 sps:$4 sm:$0x11]   ;;  %v2380_v48 = vld [vmem:[%s2189_s22] sm:$0xff]  }
  0x25   : > { %v546_v61 = vor.u32 %v545_v51, %v541_v41  ;;  %v449_v62 = vrot.slane %v447_v54, 1  ;;  %v553_v0 = vshrl.u32 %v2339_v55, 16  ;;  %v555_v2 = vshll.u32 %v2339_v55, 16 }
  0x26   : > { %v443_v3 = vsel %vm371_vm0, %v438_v57, %v442_v47  ;;  %v454_v6 = vrot.slane %v452_v60, 1  ;;  %v560_v15 = vshll.u32 %v2343_v63, 16  ;;  %v457_v19 = vshrl.u32 %v2349_v9, 16 }
  0x27   : > { %596 = vrot.lane.b32.xlu1 %v431_v32, %s2143_s4  ;;  %v551_v12 = vsel %vm371_vm0, %v546_v61, %v550_v58  ;;  %v450_v13 = vor.u32 %v449_v62, %v445_v53  ;;  %v557_v14 = vrot.slane %v555_v2, 1  ;;  %v459_v21 = vshll.u32 %v2349_v9, 16  ;;  %v2383_v53 = vld [vmem:[%s2189_s22 + $0x68] ss:$0 sps:$4 sm:$0x11]  }
  0x28   : > { %614 = vrot.lane.b32.xlu0 %v539_v42, %s2143_s4  ;;  %v562_v26 = vrot.slane %v560_v15, 1  ;;  %v464_v34 = vshll.u32 %v2356_v16, 16  ;;  %v565_v36 = vshrl.u32 %v2361_v22, 16  ;;  %v567_v38 = vshll.u32 %v2361_v22, 16 }
  0x29   : > { %v455_v23 = vsel %vm371_vm0, %v450_v13, %v454_v6  ;;  %v558_v24 = vor.u32 %v557_v14, %v553_v0  ;;  %v461_v32 = vrot.slane %v459_v21, 1  ;;  %v469_v41 = vshrl.u32 %v2365_v27, 16  ;;  %v2389_v62 = vld [vmem:[%s2189_s22 + $0x8] ss:$0 sps:$4 sm:$0x11]   ;;  %v2103_v21 = vld [vmem:[%s2989_s1 + $0x60] sm:$0xff]  }
  0x2a   : > { %v466_v43 = vrot.slane %v464_v34, 1  ;;  %v572_v46 = vshll.u32 %v2369_v35, 16  ;;  %v471_v47 = vshll.u32 %v2365_v27, 16  ;;  %v569_v51 = vrot.slane %v567_v38, 1  ;;  %v2102_v6 = vld [vmem:[%s2989_s1 + $0x68] sm:$0xff]   ;;  %v2104_v38 = vld [vmem:[%s2989_s1 + $0xb8] sm:$0xff]  }
  0x2b   : > { %598 = vrot.lane.b32.xlu1 %v443_v3, %s2143_s4  ;;  %v563_v37 = vsel %vm371_vm0, %v558_v24, %v562_v26  ;;  %v462_v42 = vor.u32 %v461_v32, %v457_v19  ;;  %v476_v61 = vshll.u32 %v2383_v53, 16  ;;  %v373_v0 = vshrl.u32 %v2380_v48, 16  ;;  %2045 = vmatpush1.bf16.msra.mxu1 %v2102_v6 }
  0x2c   : > { %616 = vrot.lane.b32.xlu0 %v551_v12, %s2143_s4  ;;  %v574_v57 = vrot.slane %v572_v46, 1  ;;  %v473_v58 = vrot.slane %v471_v47, 1  ;;  %v570_v60 = vor.u32 %v569_v51, %v565_v36  ;;  %v375_v2 = vshll.u32 %v2380_v48, 16  ;;  %916 = vmatpush1.bf16.msra.mxu0 %v2102_v6  ;;  %v2445_v46 = vld [vmem:[%s2189_s22 + $0xcc] sm:$0xff]   ;;  %v2108_v6 = vld [vmem:[%s2989_s1 + $0x38] sm:$0xff]  }
  0x2d   : > { %v467_v54 = vsel %vm371_vm0, %v462_v42, %v466_v43  ;;  %v652_v12 = vrot.slane %v2197_v4, 1  ;;  %v478_v14 = vrot.slane %v476_v61, 1  ;;  %v380_v19 = vshll.u32 %v2389_v62, 16  ;;  %2034 = vmatprep.subr.bf16.mxu1 %v2142_v1  ;;  %917 = vmatprep.subr.bf16.mxu0 %v2142_v1  ;;  %v2106_v42 = vld [vmem:[%s2989_s1 + $0xa8] sm:$0xff]   ;;  %v2107_v43 = vld [vmem:[%s2989_s1 + $0xa0] sm:$0xff]  }
  0x2e   : > { %v474_v3 = vor.u32 %v473_v58, %v469_v41  ;;  %v575_v13 = vsel %vm371_vm0, %v570_v60, %v574_v57  ;;  %v377_v15 = vrot.slane %v375_v2, 1  ;;  %v628_v36 = vrot.slane %v2206_v7, 1  ;;  %v2448_v47 = vld [vmem:[%s2189_s22 + $0xd4] ss:$0 sps:$4 sm:$0x11]   ;;  %s2904_s22 = scalar_lea.vmem %s2991_s3, %s1839_s13 }
  0x2f   : > { %600 = vrot.lane.b32.xlu1 %v455_v23, %s2143_s4  ;;  %v653_v23 = vrot.slane %v2200_v5, 1  ;;  %v382_v32 = vrot.slane %v380_v19, 1  ;;  %v629_v5 = vrot.slane %v2212_v11, 1  ;;  %2046 = vmatpush1.bf16.msra.mxu1 %v2103_v21  ;;  %v2105_v11 = vld [vmem:[%s2989_s1 + $0xb0] sm:$0xff]   ;;  %v577_v51 = vshrl.u32 %v2445_v46, 16 }
  0x30   : > { %618 = vrot.lane.b32.xlu0 %v563_v37, %s2143_s4  ;;  %v479_v24 = vsel %vm371_vm0, %v474_v3, %v478_v14  ;;  %v378_v26 = vor.u32 %v377_v15, %v373_v0  ;;  %918 = vmatpush1.bf16.msra.mxu0 %v2103_v21  ;;  %v584_v57 = vshll.u32 %v2448_v47, 16  ;;  %v655_v2 = vrot.slane %v2220_v17, 1  ;;  %v2110_v21 = vld [vmem:[%s2989_s1 + $0x30] sm:$0xff]  }
  0x31   : > { %v2409_v34 = vsel %vm624_vm1, %v652_v12, %v653_v23  ;;  %2035 = vmatprep.subr.bf16.mxu1 %v2142_v1  ;;  %v2422_v41 = vsel %vm624_vm1, %v628_v36, %v629_v5  ;;  %927 = vmatprep.subr.bf16.mxu0 %v2142_v1  ;;  %v656_v3 = vrot.slane %v2226_v20, 1  ;;  %v631_v15 = vrot.slane %v2231_v25, 1  ;;  %v2109_v20 = vld [vmem:[%s2989_s1 + $0xf8] sm:$0xff]  }
  0x32   : > { %v383_v37 = vsel %vm371_vm0, %v378_v26, %v382_v32  ;;  %1920 = vmatprep.mubr.msk.bf16.mxu1 %vm679_vm2, %v2409_v34  ;;  %1912 = vmatprep.mubr.msk.bf16.mxu0 %vm679_vm2, %v2422_v41  ;;  %v586_v60 = vrot.slane %v584_v57, 1  ;;  %v632_v19 = vrot.slane %v2235_v28, 1  ;;  %v658_v26 = vrot.slane %v2243_v33, 1 }
  0x33   : > { %602 = vrot.lane.b32.xlu1 %v467_v54, %s2143_s4  ;;  %2047 = vmatpush2.bf16.msra.mxu1 %v2104_v38  ;;  %v579_v54 = vshll.u32 %v2445_v46, 16  ;;  %v659_v32 = vrot.slane %v2252_v40, 1  ;;  %v634_v40 = vrot.slane %v2257_v44, 1 }
  0x34   : > { %620 = vrot.lane.b32.xlu0 %v575_v13, %s2143_s4  ;;  %928 = vmatpush2.bf16.msra.mxu0 %v2104_v38  ;;  %v2461_v13 = vsel %vm624_vm1, %v655_v2, %v656_v3  ;;  %v635_v38 = vrot.slane %v2266_v49, 1  ;;  %v661_v49 = vrot.slane %v2271_v52, 1  ;;  %v2117_v3 = vld [vmem:[%s2989_s1 + $0xd8] sm:$0xff]  }
  0x35   : > { %2036 = vmatprep.subr.bf16.mxu1 %v2142_v1  ;;  %929 = vmatprep.subr.bf16.mxu0 %v2142_v1  ;;  %v581_v58 = vrot.slane %v579_v54, 1 }
  0x36   : > { %v2526_v54 = vsel %vm624_vm1, %v634_v40, %v635_v38 }
  0x37   : > { %604 = vrot.lane.b32.xlu1 %v479_v24, %s2143_s4  ;;  %2048 = vmatpush2.bf16.msra.mxu1 %v2105_v11  ;;  %v582_v61 = vor.u32 %v581_v58, %v577_v51  ;;  %v2484_v24 = vsel %vm624_vm1, %v631_v15, %v632_v19  ;;  %v2115_v58 = vld [vmem:[%s2989_s1 + $0xe0] sm:$0xff]   ;;  %v665_v15 = vrot.slane %v2300_v18, 1 }
  0x38   : > { %588 = vrot.lane.b32.xlu0 %v383_v37, %s2143_s4  ;;  %930 = vmatpush2.bf16.msra.mxu0 %v2105_v11  ;;  %v2112_v37 = vld [vmem:[%s2989_s1 + $0x28] sm:$0xff]  }
  0x39   : > { %2037 = vmatprep.subr.bf16.mxu1 %v2142_v1  ;;  %931 = vmatprep.subr.bf16.mxu0 %v2142_v1  ;;  %v587_v0 = vsel %vm371_vm0, %v582_v61, %v586_v60  ;;  %v2116_v61 = vld [vmem:[%s2989_s1 + $0x18] sm:$0xff]  }
  0x3b   : > { %2049 = vmatpush2.bf16.msra.mxu1 %v2106_v42  ;;  %622 = vrot.lane.b32.xlu1 %v587_v0, %s2143_s4  ;;  %v638_v0 = vrot.slane %v2295_v10, 1 }
  0x3c   : > { %932 = vmatpush2.bf16.msra.mxu0 %v2106_v42  ;;  %2038 = vmatprep.subr.bf16.mxu1 %v2142_v1  ;;  %v2113_v42 = vld [vmem:[%s2989_s1 + $0xe8] sm:$0xff]  }
  0x3d   : > { %933 = vmatprep.subr.bf16.mxu0 %v2142_v1 }
  0x3f   : > { %2050 = vmatpush2.bf16.msra.mxu1 %v2107_v43 }
  0x40   : > { %934 = vmatpush2.bf16.msra.mxu0 %v2107_v43  ;;  %1139 = vmatprep.subr.bf16.mxu1 %v2142_v1  ;;  %v2114_v43 = vld [vmem:[%s2989_s1 + $0x20] sm:$0xff]  }
  0x41   : > { %1400 = vmatprep.subr.bf16.mxu0 %v2142_v1 }
  0x8a   : > { %v607_v12 = vpop.permute.xlu0 %606 }
  0x8b   : > { %v2465_v14 = vsel %vm679_vm2, %v2197_v4, %v607_v12  ;;  %v664_v12 = vrot.slane %v2292_v8, 1 }
  0x8c   : > { %1000 = vmatmul.mubr.bf16.vlgmr.msra.gmra.mxu1 %v2465_v14 }
  0x8d   : > { %1140 = vmatpush1.bf16.msra.mxu1 %v2108_v6  ;;  %1921 = vmatprep.mubr.msk.bf16.mxu1 %vm679_vm2, %v2461_v13  ;;  %v609_v23 = vpop.permute.xlu1 %608  ;;  %v2580_v18 = vsel %vm624_vm1, %v664_v12, %v665_v15 }
  0x8e   : > { %v591_v4 = vpop.permute.xlu0 %590  ;;  %1141 = vmatprep.subr.bf16.mxu1 %v2142_v1  ;;  %v2491_v36 = vsel %vm679_vm2, %v2220_v17, %v609_v23  ;;  %v2504_v17 = vsel %vm624_vm1, %v658_v26, %v659_v32  ;;  %v641_v23 = vrot.slane %v2312_v30, 1  ;;  %v2121_v32 = vld [vmem:[%s2989_s1 + $0xc8] sm:$0xff]  }
  0x8f   : > { %v2481_v28 = vsel %vm679_vm2, %v2206_v7, %v591_v4  ;;  %v2111_v7 = vld [vmem:[%s2989_s1 + $0xf0] sm:$0xff]   ;;  %v640_v4 = vrot.slane %v2308_v29, 1 }
  0x90   : > { %936 = vmatmul.mubr.bf16.vlgmr.msra.gmra.mxu0 %v2481_v28 }
  0x91   : > { %1401 = vmatpush1.bf16.msra.mxu0 %v2109_v20  ;;  %1142 = vmatpush1.bf16.msra.mxu1 %v2110_v21  ;;  %v593_v5 = vpop.permute.xlu1 %592  ;;  %v2119_v20 = vld [vmem:[%s2989_s1 + $0xd0] sm:$0xff]   ;;  %v2599_v30 = vsel %vm624_vm1, %v640_v4, %v641_v23 }
  0x92   : > { %1402 = vmatprep.subr.bf16.mxu0 %v2142_v1  ;;  %1913 = vmatprep.mubr.msk.bf16.mxu0 %vm679_vm2, %v2484_v24  ;;  %v2511_v11 = vsel %vm679_vm2, %v2231_v25, %v593_v5  ;;  %v611_v51 = vpop.permute.xlu0 %610  ;;  %v662_v25 = vrot.slane %v2279_v59, 1  ;;  %v2122_v5 = vld [vmem:[%s2989_s1] sm:$0xff]  }
  0x93   : > { %1143 = vmatprep.subr.bf16.mxu1 %v2142_v1  ;;  %v2531_v57 = vsel %vm679_vm2, %v2243_v33, %v611_v51  ;;  %v637_v33 = vrot.slane %v2275_v56, 1  ;;  %v2124_v51 = vld [vmem:[%s2989_s1 + $0x58] sm:$0xff]  }
  0x94   : > { %1008 = vmatmul.mubr.bf16.gmra.mxu1 %v2491_v36  ;;  %v2540_v59 = vsel %vm624_vm1, %v661_v49, %v662_v25 }
  0x95   : > { %1403 = vmatpush1.bf16.msra.mxu0 %v2111_v7  ;;  %1144 = vmatpush1.bf16.msra.mxu1 %v2112_v37  ;;  %v595_v60 = vpop.permute.xlu1 %594  ;;  %v2560_v10 = vsel %vm624_vm1, %v637_v33, %v638_v0  ;;  %v667_v37 = vrot.slane %v2315_v31, 1 }
  0x96   : > { %1404 = vmatprep.subr.bf16.mxu0 %v2142_v1  ;;  %1922 = vmatprep.mubr.msk.bf16.mxu1 %vm679_vm2, %v2504_v17  ;;  %v2551_v2 = vsel %vm679_vm2, %v2257_v44, %v595_v60  ;;  %v613_v6 = vpop.permute.xlu0 %612  ;;  %v2118_v44 = vld [vmem:[%s2989_s1 + $0x10] sm:$0xff]   ;;  %v670_v60 = vrot.slane %v2339_v55, 1 }
  0x97   : > { %1145 = vmatprep.subr.bf16.mxu1 %v2142_v1  ;;  %v2571_v19 = vsel %vm679_vm2, %v2271_v52, %v613_v6  ;;  %v2120_v52 = vld [vmem:[%s2989_s1 + $0x8] sm:$0xff]   ;;  %v646_v6 = vrot.slane %v2349_v9, 1 }
  0x98   : > { %944 = vmatmul.mubr.bf16.gmra.mxu0 %v2511_v11 }
  0x99   : > { %1405 = vmatpush1.bf16.msra.mxu0 %v2113_v42  ;;  %1146 = vmatpush1.bf16.msra.mxu1 %v2114_v43  ;;  %v597_v21 = vpop.permute.xlu1 %596  ;;  %v643_v43 = vrot.slane %v2329_v45, 1 }
  0x9a   : > { %1914 = vmatprep.mubr.msk.bf16.mxu0 %vm679_vm2, %v2526_v54  ;;  %1406 = vmatprep.subr.bf16.mxu0 %v2142_v1  ;;  %v2591_v26 = vsel %vm679_vm2, %v2275_v56, %v597_v21  ;;  %v615_v7 = vpop.permute.xlu0 %614  ;;  %v668_v56 = vrot.slane %v2323_v39, 1  ;;  %v2123_v39 = vld [vmem:[%s2989_s1 + $0xc0] sm:$0xff]   ;;  %v673_v21 = vrot.slane %v2361_v22, 1 }
  0x9b   : > { %1147 = vmatprep.subr.bf16.mxu1 %v2142_v1  ;;  %v2611_v40 = vsel %vm679_vm2, %v2292_v8, %v615_v7  ;;  %v644_v8 = vrot.slane %v2334_v50, 1  ;;  %v2125_v50 = vld [vmem:[%s2989_s1 + $0x118] sm:$0xff]   ;;  %v649_v7 = vrot.slane %v2365_v27, 1 }
  0x9c   : > { %1016 = vmatmul.mubr.bf16.gmra.mxu1 %v2531_v57  ;;  %v2619_v42 = vsel %vm624_vm1, %v667_v37, %v668_v56  ;;  %v650_v37 = vrot.slane %v2383_v53, 1 }
  0x9d   : > { %1407 = vmatpush1.bf16.msra.mxu0 %v2115_v58  ;;  %1923 = vmatprep.mubr.msk.bf16.mxu1 %vm679_vm2, %v2540_v59  ;;  %v599_v38 = vpop.permute.xlu1 %598  ;;  %v2639_v58 = vsel %vm624_vm1, %v643_v43, %v644_v8 }
  0x9e   : > { %1148 = vmatpush1.bf16.msra.mxu1 %v2116_v61  ;;  %1408 = vmatprep.subr.bf16.mxu0 %v2142_v1  ;;  %v2631_v49 = vsel %vm679_vm2, %v2308_v29, %v599_v38  ;;  %v617_v25 = vpop.permute.xlu0 %616  ;;  %v671_v29 = vrot.slane %v2343_v63, 1  ;;  %v2126_v61 = vld [vmem:[%s2989_s1 + $0x50] sm:$0xff]   ;;  %v626_v38 = vrot.slane %v2389_v62, 1 }
  0x9f   : > { %1149 = vmatprep.subr.bf16.mxu1 %v2142_v1  ;;  %v2651_v33 = vsel %vm679_vm2, %v2315_v31, %v617_v25  ;;  %v2127_v63 = vld [vmem:[%s2989_s1 + $0x110] sm:$0xff]   ;;  %v2128_v31 = vld [vmem:[%s2989_s1 + $0x48] sm:$0xff]  }
  0xa0   : > { %952 = vmatmul.mubr.bf16.gmra.mxu0 %v2551_v2 }
  0xa1   : > { %1409 = vmatpush1.bf16.msra.mxu0 %v2117_v3  ;;  %1915 = vmatprep.mubr.msk.bf16.mxu0 %vm679_vm2, %v2560_v10  ;;  %v601_v0 = vpop.permute.xlu1 %600  ;;  %v2659_v3 = vsel %vm624_vm1, %v670_v60, %v671_v29 }
  0xa2   : > { %1150 = vmatpush1.bf16.msra.mxu1 %v2118_v44  ;;  %1410 = vmatprep.subr.bf16.mxu0 %v2142_v1  ;;  %v647_v44 = vrot.slane %v2356_v16, 1  ;;  %v2671_v12 = vsel %vm679_vm2, %v2329_v45, %v601_v0  ;;  %v2129_v16 = vld [vmem:[%s2989_s1 + $0x108] sm:$0xff]   ;;  %v619_v15 = vpop.permute.xlu0 %618  ;;  %v2130_v45 = vld [vmem:[%s2989_s1 + $0x40] sm:$0xff]  }
  0xa3   : > { %1151 = vmatprep.subr.bf16.mxu1 %v2142_v1  ;;  %v2691_v4 = vsel %vm679_vm2, %v2339_v55, %v619_v15 }
  0xa4   : > { %1024 = vmatmul.mubr.bf16.gmra.mxu1 %v2571_v19 }
  0xa5   : > { %1924 = vmatprep.mubr.msk.bf16.mxu1 %vm679_vm2, %v2580_v18  ;;  %1411 = vmatpush1.bf16.msra.mxu0 %v2119_v20  ;;  %v2679_v20 = vsel %vm624_vm1, %v646_v6, %v647_v44  ;;  %v603_v23 = vpop.permute.xlu1 %602 }
  0xa6   : > { %1152 = vmatpush1.bf16.msra.mxu1 %v2120_v52  ;;  %1412 = vmatprep.subr.bf16.mxu0 %v2142_v1  ;;  %v674_v52 = vrot.slane %v2369_v35, 1  ;;  %v2131_v35 = vld [vmem:[%s2989_s1 + $0x100] sm:$0xff]   ;;  %v702_v55 = vsel %vm679_vm2, %v2349_v9, %v603_v23  ;;  %v621_v56 = vpop.permute.xlu0 %620 }
  0xa7   : > { %1153 = vmatprep.subr.bf16.mxu1 %v2142_v1 }
  0xa8   : > { %960 = vmatmul.mubr.bf16.gmra.mxu0 %v2591_v26 }
  0xa9   : > { %1916 = vmatprep.mubr.msk.bf16.mxu0 %vm679_vm2, %v2599_v30  ;;  %1413 = vmatpush1.bf16.msra.mxu0 %v2121_v32  ;;  %v2699_v32 = vsel %vm624_vm1, %v673_v21, %v674_v52  ;;  %v605_v53 = vpop.permute.xlu1 %604 }
  0xaa   : > { %1154 = vmatpush1.bf16.msra.mxu1 %v2122_v5  ;;  %1414 = vmatprep.subr.bf16.mxu0 %v2142_v1  ;;  %v651_v5 = vsel %vm624_vm1, %v649_v7, %v650_v37  ;;  %v705_v43 = vsel %vm679_vm2, %v2365_v27, %v605_v53  ;;  %v589_v8 = vpop.permute.xlu0 %588  ;;  %v677_v27 = vrot.slane %v2448_v47, 1 }
  0xab   : > { %1163 = vmatprep.subr.bf16.mxu1 %v2142_v1  ;;  %v681_v62 = vsel %vm679_vm2, %v2380_v48, %v589_v8 }
  0xac   : > { %1032 = vmatmul.mubr.bf16.gmra.mxu1 %v2611_v40 }
  0xad   : > { %1925 = vmatprep.mubr.msk.bf16.mxu1 %vm679_vm2, %v2619_v42  ;;  %1415 = vmatpush1.bf16.msra.mxu0 %v2123_v39  ;;  %v625_v39 = vrot.slane %v2380_v48, 1 }
  0xae   : > { %1164 = vmatpush2.bf16.msra.mxu1 %v2124_v51  ;;  %1424 = vmatprep.subr.bf16.mxu0 %v2142_v1 }
  0xaf   : > { %1165 = vmatprep.subr.bf16.mxu1 %v2142_v1  ;;  %v627_v9 = vsel %vm624_vm1, %v625_v39, %v626_v38 }
  0xb0   : > { %968 = vmatmul.mubr.bf16.gmra.mxu0 %v2631_v49 }
  0xb1   : > { %1917 = vmatprep.mubr.msk.bf16.mxu0 %vm679_vm2, %v2639_v58  ;;  %1425 = vmatpush2.bf16.msra.mxu0 %v2125_v50 }
  0xb2   : > { %1166 = vmatpush2.bf16.msra.mxu1 %v2126_v61  ;;  %1426 = vmatprep.subr.bf16.mxu0 %v2142_v1 }
  0xb3   : > { %1167 = vmatprep.subr.bf16.mxu1 %v2142_v1 }
  0xb4   : > { %1040 = vmatmul.mubr.bf16.gmra.mxu1 %v2651_v33 }
  0xb5   : > { %1926 = vmatprep.mubr.msk.bf16.mxu1 %vm679_vm2, %v2659_v3  ;;  %1427 = vmatpush2.bf16.msra.mxu0 %v2127_v63 }
  0xb6   : > { %1168 = vmatpush2.bf16.msra.mxu1 %v2128_v31  ;;  %1428 = vmatprep.subr.bf16.mxu0 %v2142_v1 }
  0xb7   : > { %1169 = vmatprep.subr.bf16.mxu1 %v2142_v1 }
  0xb8   : > { %976 = vmatmul.mubr.bf16.gmra.mxu0 %v2671_v12 }
  0xb9   : > { %1918 = vmatprep.mubr.msk.bf16.mxu0 %vm679_vm2, %v2679_v20  ;;  %1429 = vmatpush2.bf16.msra.mxu0 %v2129_v16 }
  0xba   : > { %1170 = vmatpush2.bf16.msra.mxu1 %v2130_v45  ;;  %1430 = vmatprep.subr.bf16.mxu0 %v2142_v1  ;;  %v2714_v1 = vsel %vm679_vm2, %v2361_v22, %v621_v56  ;;  %v676_v22 = vrot.slane %v2445_v46, 1 }
  0xbc   : > { %1048 = vmatmul.mubr.bf16.gmra.mxu1 %v2691_v4  ;;  %v678_v48 = vsel %vm624_vm1, %v676_v22, %v677_v27 }
  0xbd   : > { %1927 = vmatprep.mubr.msk.bf16.mxu1 %vm679_vm2, %v2699_v32  ;;  %1431 = vmatpush2.bf16.msra.mxu0 %v2131_v35 }
  0xc0   : > { %984 = vmatmul.mubr.bf16.gmra.mxu0 %v702_v55 }
  0xc1   : > { %1919 = vmatprep.mubr.msk.bf16.mxu0 %vm679_vm2, %v651_v5 }
  0xc4   : > { %1056 = vmatmul.mubr.bf16.gmra.mxu1 %v2714_v1 }
  0xc5   : > { %1940 = vmatprep.mubr.msk.bf16.mxu1 %vm679_vm2, %v627_v9 }
  0xc8   : > { %992 = vmatmul.mubr.bf16.gmra.mxu0 %v705_v43 }
  0xc9   : > { %1992 = vmatprep.mubr.msk.bf16.mxu0 %vm679_vm2, %v2484_v24 }
  0xcc   : > { %1172 = vmatmul.mubr.bf16.vlgmr.msra.gmra.mxu1 %v681_v62 }
  0xcd   : > { %1941 = vmatprep.mubr.msk.bf16.mxu1 %vm679_vm2, %v2422_v41 }
  0xd0   : > { %1433 = vmatmul.mubr.bf16.vlgmr.msra.gmra.mxu0 %v2511_v11 }
  0xd1   : > { %1993 = vmatprep.mubr.msk.bf16.mxu0 %vm679_vm2, %v2526_v54 }
  0xd4   : > { %1180 = vmatmul.mubr.bf16.gmra.mxu1 %v2481_v28 }
  0xd5   : > { %1942 = vmatprep.mubr.msk.bf16.mxu1 %vm679_vm2, %v2484_v24 }
  0xd8   : > { %1441 = vmatmul.mubr.bf16.gmra.mxu0 %v2551_v2 }
  0xd9   : > { %1994 = vmatprep.mubr.msk.bf16.mxu0 %vm679_vm2, %v2560_v10 }
  0xdc   : > { %1188 = vmatmul.mubr.bf16.gmra.mxu1 %v2511_v11 }
  0xdd   : > { %1943 = vmatprep.mubr.msk.bf16.mxu1 %vm679_vm2, %v2526_v54 }
  0xe0   : > { %1449 = vmatmul.mubr.bf16.gmra.mxu0 %v2591_v26 }
  0xe1   : > { %1995 = vmatprep.mubr.msk.bf16.mxu0 %vm679_vm2, %v2599_v30 }
  0xe4   : > { %1196 = vmatmul.mubr.bf16.gmra.mxu1 %v2551_v2 }
  0xe5   : > { %1944 = vmatprep.mubr.msk.bf16.mxu1 %vm679_vm2, %v2560_v10 }
  0xe8   : > { %1457 = vmatmul.mubr.bf16.gmra.mxu0 %v2631_v49 }
  0xe9   : > { %1996 = vmatprep.mubr.msk.bf16.mxu0 %vm679_vm2, %v2639_v58 }
  0xec   : > { %1204 = vmatmul.mubr.bf16.gmra.mxu1 %v2591_v26 }
  0xed   : > { %1945 = vmatprep.mubr.msk.bf16.mxu1 %vm679_vm2, %v2599_v30 }
  0xf0   : > { %1465 = vmatmul.mubr.bf16.gmra.mxu0 %v2671_v12 }
  0xf1   : > { %1997 = vmatprep.mubr.msk.bf16.mxu0 %vm679_vm2, %v2679_v20 }
  0xf4   : > { %1212 = vmatmul.mubr.bf16.gmra.mxu1 %v2631_v49 }
  0xf5   : > { %1946 = vmatprep.mubr.msk.bf16.mxu1 %vm679_vm2, %v2639_v58 }
  0xf8   : > { %1473 = vmatmul.mubr.bf16.gmra.mxu0 %v702_v55 }
  0xf9   : > { %1998 = vmatprep.mubr.msk.bf16.mxu0 %vm679_vm2, %v651_v5 }
  0xfc   : > { %1220 = vmatmul.mubr.bf16.gmra.mxu1 %v2671_v12 }
  0xfd   : > { %1947 = vmatprep.mubr.msk.bf16.mxu1 %vm679_vm2, %v2679_v20 }
 0x100   : > { %1481 = vmatmul.mubr.bf16.gmra.mxu0 %v705_v43 }
 0x101   : > { %1999 = vmatprep.mubr.msk.bf16.mxu0 %vm679_vm2, %v2409_v34 }
 0x104   : > { %1228 = vmatmul.mubr.bf16.gmra.mxu1 %v702_v55 }
 0x105   : > { %1948 = vmatprep.mubr.msk.bf16.mxu1 %vm679_vm2, %v651_v5 }
 0x108   : > { %1489 = vmatmul.mubr.bf16.gmra.mxu0 %v2465_v14 }
 0x109   : > { %2000 = vmatprep.mubr.msk.bf16.mxu0 %vm679_vm2, %v2461_v13 }
 0x10c   : > { %1236 = vmatmul.mubr.bf16.gmra.mxu1 %v705_v43 }
 0x10d   : > { %1949 = vmatprep.mubr.msk.bf16.mxu1 %vm679_vm2, %v2409_v34  ;;  %v623_v34 = vpop.permute.xlu1 %622 }
 0x10e   : > { %v732_v41 = vsel %vm679_vm2, %v2445_v46, %v623_v34 }
 0x110   : > { %1497 = vmatmul.mubr.bf16.gmra.mxu0 %v2491_v36 }
 0x111   : > { %2001 = vmatprep.mubr.msk.bf16.mxu0 %vm679_vm2, %v2504_v17 }
 0x114   : > { %1244 = vmatmul.mubr.bf16.gmra.mxu1 %v2465_v14 }
 0x115   : > { %1950 = vmatprep.mubr.msk.bf16.mxu1 %vm679_vm2, %v2461_v13 }
 0x118   : > { %1505 = vmatmul.mubr.bf16.gmra.mxu0 %v2531_v57 }
 0x119   : > { %2002 = vmatprep.mubr.msk.bf16.mxu0 %vm679_vm2, %v2540_v59 }
 0x11c   : > { %1252 = vmatmul.mubr.bf16.gmra.mxu1 %v2491_v36 }
 0x11d   : > { %1951 = vmatprep.mubr.msk.bf16.mxu1 %vm679_vm2, %v2504_v17 }
 0x120   : > { %1513 = vmatmul.mubr.bf16.gmra.mxu0 %v2571_v19 }
 0x121   : > { %2003 = vmatprep.mubr.msk.bf16.mxu0 %vm679_vm2, %v2580_v18 }
 0x124   : > { %1260 = vmatmul.mubr.bf16.gmra.mxu1 %v2531_v57 }
 0x125   : > { %1952 = vmatprep.mubr.msk.bf16.mxu1 %vm679_vm2, %v2540_v59 }
 0x128   : > { %1521 = vmatmul.mubr.bf16.gmra.mxu0 %v2611_v40 }
 0x129   : > { %2004 = vmatprep.mubr.msk.bf16.mxu0 %vm679_vm2, %v2619_v42 }
 0x12c   : > { %1268 = vmatmul.mubr.bf16.gmra.mxu1 %v2571_v19 }
 0x12d   : > { %1953 = vmatprep.mubr.msk.bf16.mxu1 %vm679_vm2, %v2580_v18 }
 0x130   : > { %1529 = vmatmul.mubr.bf16.gmra.mxu0 %v2651_v33 }
 0x131   : > { %2005 = vmatprep.mubr.msk.bf16.mxu0 %vm679_vm2, %v2659_v3 }
 0x134   : > { %1276 = vmatmul.mubr.bf16.gmra.mxu1 %v2611_v40 }
 0x135   : > { %1954 = vmatprep.mubr.msk.bf16.mxu1 %vm679_vm2, %v2619_v42 }
 0x138   : > { %1537 = vmatmul.mubr.bf16.gmra.mxu0 %v2691_v4 }
 0x139   : > { %2006 = vmatprep.mubr.msk.bf16.mxu0 %vm679_vm2, %v2699_v32 }
 0x13c   : > { %1284 = vmatmul.mubr.bf16.gmra.mxu1 %v2651_v33 }
 0x13d   : > { %1955 = vmatprep.mubr.msk.bf16.mxu1 %vm679_vm2, %v2659_v3 }
 0x140   : > { %1545 = vmatmul.mubr.bf16.gmra.mxu0 %v2714_v1 }
 0x141   : > { %2007 = vmatprep.mubr.msk.bf16.mxu0 %vm679_vm2, %v678_v48 }
 0x144   : > { %1292 = vmatmul.mubr.bf16.gmra.mxu1 %v2691_v4 }
 0x148   : > { %1553 = vmatmul.mubr.bf16.gmra.mxu0 %v732_v41 }
 0x14c   : > { %v2814_v13 = vpop.f32.mrf.mxu1 }
 0x14e   : > { %v1003_v47 = vpop.f32.mrf.mxu1 }
 0x150   : > { %v2816_v14 = vpop.f32.mrf.mxu0  ;;  %v2818_v28 = vpop.f32.mrf.mxu1 }
 0x152   : > { %v939_v24 = vpop.f32.mrf.mxu0  ;;  %v1006_v36 = vpop.f32.mrf.mxu1 }
 0x154   : > { %v2820_v17 = vpop.f32.mrf.mxu0  ;;  %v2822_v11 = vpop.f32.mrf.mxu1 }
 0x156   : > { %v942_v54 = vpop.f32.mrf.mxu0  ;;  %v1011_v57 = vpop.f32.mrf.mxu1 }
 0x158   : > { %v2824_v59 = vpop.f32.mrf.mxu0  ;;  %v2826_v2 = vpop.f32.mrf.mxu1 }
 0x15a   : > { %v947_v46 = vpop.f32.mrf.mxu0  ;;  %v1014_v10 = vpop.f32.mrf.mxu1 }
 0x15c   : > { %v2828_v19 = vpop.f32.mrf.mxu0  ;;  %v2830_v18 = vpop.f32.mrf.mxu1 }
 0x15e   : > { %v950_v26 = vpop.f32.mrf.mxu0  ;;  %v1019_v30 = vpop.f32.mrf.mxu1 }
 0x160   : > { %v2832_v40 = vpop.f32.mrf.mxu0  ;;  %v2834_v42 = vpop.f32.mrf.mxu1 }
 0x162   : > { %v955_v51 = vpop.f32.mrf.mxu0  ;;  %v1022_v49 = vpop.f32.mrf.mxu1 }
 0x163   : > { %v2882_v49 = vld [vmem:[%s2990_s2] ss:$0 sm:$0xff] }
 0x164   : > { %v2836_v50 = vpop.f32.mrf.mxu0  ;;  %v2838_v25 = vpop.f32.mrf.mxu1 }
 0x166   : > { %v958_v58 = vpop.f32.mrf.mxu0  ;;  %v1027_v60 = vpop.f32.mrf.mxu1 }
 0x168   : > { %v2840_v29 = vpop.f32.mrf.mxu0  ;;  %v2842_v61 = vpop.f32.mrf.mxu1 }
 0x16a   : > { %v963_v33 = vpop.f32.mrf.mxu0  ;;  %v1030_v63 = vpop.f32.mrf.mxu1 }
 0x16c   : > { %v2844_v0 = vpop.f32.mrf.mxu0  ;;  %v2846_v3 = vpop.f32.mrf.mxu1 }
 0x16e   : > { %v966_v6 = vpop.f32.mrf.mxu0  ;;  %v1035_v44 = vpop.f32.mrf.mxu1 }
 0x170   : > { %v2848_v31 = vpop.f32.mrf.mxu0  ;;  %v2850_v12 = vpop.f32.mrf.mxu1 }
 0x172   : > { %v971_v16 = vpop.f32.mrf.mxu0  ;;  %v1038_v15 = vpop.f32.mrf.mxu1 }
 0x174   : > { %v2852_v20 = vpop.f32.mrf.mxu0  ;;  %v2854_v21 = vpop.f32.mrf.mxu1 }
 0x176   : > { %v974_v52 = vpop.f32.mrf.mxu0  ;;  %v1043_v45 = vpop.f32.mrf.mxu1 }
 0x178   : > { %v2856_v4 = vpop.f32.mrf.mxu0  ;;  %v2858_v35 = vpop.f32.mrf.mxu1 }
 0x17a   : > { %v979_v23 = vpop.f32.mrf.mxu0  ;;  %v1046_v32 = vpop.f32.mrf.mxu1 }
 0x17c   : > { %v2860_v7 = vpop.f32.mrf.mxu0  ;;  %v2862_v37 = vpop.f32.mrf.mxu1 }
 0x17e   : > { %v982_v55 = vpop.f32.mrf.mxu0  ;;  %v1051_v56 = vpop.f32.mrf.mxu1 }
 0x180   : > { %v2864_v5 = vpop.f32.mrf.mxu0  ;;  %v2866_v39 = vpop.f32.mrf.mxu1 }
 0x182   : > { %v987_v38 = vpop.f32.mrf.mxu0  ;;  %v1054_v1 = vpop.f32.mrf.mxu1 }
 0x184   : > { %v2868_v53 = vpop.f32.mrf.mxu0  ;;  %v2870_v9 = vpop.f32.mrf.mxu1 }
 0x186   : > { %v990_v43 = vpop.f32.mrf.mxu0  ;;  %v1059_v8 = vpop.f32.mrf.mxu1 }
 0x188   : > { %v2872_v62 = vpop.f32.mrf.mxu0  ;;  %v2874_v22 = vpop.f32.mrf.mxu1 }
 0x18a   : > { %v995_v27 = vpop.f32.mrf.mxu0  ;;  %v1062_v48 = vpop.f32.mrf.mxu1 }
 0x18c   : > { %v2876_v34 = vpop.f32.mrf.mxu0  ;;  %v1173_v41 = vpop.f32.mrf.mxu1 }
 0x18d   : > { %v1174_v10 = vadd.f32 %v1173_v41, %v2816_v14 }
 0x18e   : > { %v998_v47 = vpop.f32.mrf.mxu0  ;;  %v1175_v24 = vpop.f32.mrf.mxu1 }
 0x190   : > { %v1176_v36 = vpop.f32.mrf.mxu1  ;;  %v1434_v54 = vpop.f32.mrf.mxu0 }
 0x191   : > { %v1561_v51 = vadd.f32 %v1434_v54, %v1174_v10  ;;  %v1177_v33 = vadd.f32 %v1176_v36, %v2820_v17 }
 0x192   : > { %v1178_v57 = vpop.f32.mrf.mxu1  ;;  %v1436_v46 = vpop.f32.mrf.mxu0 }
 0x193   : > { %v1600_v16 = vadd.f32 %v2882_v49, %v1561_v51 }
 0x194   : > { %v1181_v26 = vpop.f32.mrf.mxu1  ;;  %v1437_v30 = vpop.f32.mrf.mxu0 }
 0x195   : > { %v1182_v63 = vadd.f32 %v1181_v26, %v2824_v59  ;;  %v1562_v15 = vadd.f32 %v1437_v30, %v1177_v33  ;;  %v1632_v38 = vmax.f32 %v1600_v16, 0.0 }
 0x196   : > { %v1183_v58 = vpop.f32.mrf.mxu1  ;;  %v1439_v60 = vpop.f32.mrf.mxu0 }
 0x197   : > { %v1601_v17 = vadd.f32 %v2882_v49, %v1562_v15 }
 0x198   : > { %v1184_v6 = vpop.f32.mrf.mxu1  ;;  %v1442_v44 = vpop.f32.mrf.mxu0 }
 0x199   : > { %v1563_v14 = vadd.f32 %v1442_v44, %v1182_v63  ;;  %v1185_v23 = vadd.f32 %v1184_v6, %v2828_v19  ;;  %v1633_v24 = vmax.f32 %v1601_v17, 0.0 }
 0x19a   : > { %v1186_v52 = vpop.f32.mrf.mxu1  ;;  %v1444_v45 = vpop.f32.mrf.mxu0 }
 0x19b   : > { %v1602_v32 = vadd.f32 %v2882_v49, %v1563_v14 }
 0x19c   : > { %v1189_v55 = vpop.f32.mrf.mxu1  ;;  %v1445_v56 = vpop.f32.mrf.mxu0 }
 0x19d   : > { %v1634_v1 = vmax.f32 %v1602_v32, 0.0  ;;  %v1564_v59 = vadd.f32 %v1445_v56, %v1185_v23  ;;  %v1190_v36 = vadd.f32 %v1189_v55, %v2832_v40 }
 0x19e   : > { %v1191_v43 = vpop.f32.mrf.mxu1  ;;  %v1447_v8 = vpop.f32.mrf.mxu0 }
 0x19f   : > { %v1664_v27 = vmax.f32 %v1632_v38, %v1634_v1  ;;  %v1603_v48 = vadd.f32 %v2882_v49, %v1564_v59 }
 0x1a0   : > { %v1192_v41 = vpop.f32.mrf.mxu1  ;;  %v1450_v47 = vpop.f32.mrf.mxu0 }
 0x1a1   : > { %1680 = vst.msk [vmem:[#allocation2] sm:$0xff] %vm679_vm2, %v1664_v27  ;;  %v1635_v19 = vmax.f32 %v1603_v48, 0.0  ;;  %v1565_v10 = vadd.f32 %v1450_v47, %v1190_v36  ;;  %v1193_v60 = vadd.f32 %v1192_v41, %v2836_v50 }
 0x1a2   : > { %v1194_v54 = vpop.f32.mrf.mxu1  ;;  %v1452_v57 = vpop.f32.mrf.mxu0 }
 0x1a3   : > { %v1665_v46 = vmax.f32 %v1633_v24, %v1635_v19  ;;  %v1604_v63 = vadd.f32 %v2882_v49, %v1565_v10 }
 0x1a4   : > { %v1197_v26 = vpop.f32.mrf.mxu1  ;;  %v1453_v30 = vpop.f32.mrf.mxu0 }
 0x1a5   : > { %1681 = vst.msk [vmem:[#allocation2 + $0x8] sm:$0xff] %vm679_vm2, %v1665_v46  ;;  %v1198_v33 = vadd.f32 %v1197_v26, %v2840_v29  ;;  %v1566_v44 = vadd.f32 %v1453_v30, %v1193_v60  ;;  %v1636_v55 = vmax.f32 %v1604_v63, 0.0 }
 0x1a6   : > { %v1199_v51 = vpop.f32.mrf.mxu1  ;;  %v1455_v58 = vpop.f32.mrf.mxu0 }
 0x1a7   : > { %v1605_v29 = vadd.f32 %v2882_v49, %v1566_v44 }
 0x1a8   : > { %v1200_v6 = vpop.f32.mrf.mxu1  ;;  %v1458_v40 = vpop.f32.mrf.mxu0 }
 0x1a9   : > { %v1567_v16 = vadd.f32 %v1458_v40, %v1198_v33  ;;  %v1201_v52 = vadd.f32 %v1200_v6, %v2844_v0  ;;  %v1637_v47 = vmax.f32 %v1605_v29, 0.0 }
 0x1aa   : > { %v1202_v15 = vpop.f32.mrf.mxu1  ;;  %v1460_v14 = vpop.f32.mrf.mxu0 }
 0x1ab   : > { %v1606_v45 = vadd.f32 %v2882_v49, %v1567_v16 }
 0x1ac   : > { %v1696_v23 = vld [vmem:[#allocation2] ss:$2 sm:$0xff]  ;;  %v1712_v32 = vld [vmem:[#allocation2 + $0x1] ss:$2 sm:$0xff]  ;;  %v1205_v56 = vpop.f32.mrf.mxu1  ;;  %v1461_v50 = vpop.f32.mrf.mxu0 }
 0x1ad   : > { %v1727_v38 = vmax.f32 %v1696_v23, %v1712_v32  ;;  %v1638_v17 = vmax.f32 %v1606_v45, 0.0  ;;  %v1568_v1 = vadd.f32 %v1461_v50, %v1201_v52  ;;  %v1206_v19 = vadd.f32 %v1205_v56, %v2848_v31 }
 0x1ae   : > { %v1207_v0 = vpop.f32.mrf.mxu1  ;;  %v1463_v59 = vpop.f32.mrf.mxu0 }
 0x1af   : > { %v2019_v43 = vpack.c.bf16 %v1727_v38, %v1727_v38  ;;  %v1666_v8 = vmax.f32 %v1636_v55, %v1638_v17  ;;  %v1607_v27 = vadd.f32 %v2882_v49, %v1568_v1 }
 0x1b0   : > { %v1208_v48 = vpop.f32.mrf.mxu1  ;;  %v1466_v41 = vpop.f32.mrf.mxu0 }
 0x1b1   : > { %1768 = vst.msk [vmem:[%s2904_s22] sm:$0xf] %vm1767_vm3, %v2019_v43  ;;  %v1639_v24 = vmax.f32 %v1607_v27, 0.0  ;;  %v1569_v46 = vadd.f32 %v1466_v41, %v1206_v19  ;;  %v1209_v58 = vadd.f32 %v1208_v48, %v2852_v20 }
 0x1b2   : > { %1682 = vst.msk [vmem:[#allocation2 + $0x10] sm:$0xff] %vm679_vm2, %v1666_v8  ;;  %v1210_v36 = vpop.f32.mrf.mxu1  ;;  %v1468_v54 = vpop.f32.mrf.mxu0 }
 0x1b3   : > { %v1667_v57 = vmax.f32 %v1637_v47, %v1639_v24  ;;  %v1608_v33 = vadd.f32 %v2882_v49, %v1569_v46 }
 0x1b4   : > { %v1213_v10 = vpop.f32.mrf.mxu1  ;;  %v1469_v26 = vpop.f32.mrf.mxu0 }
 0x1b5   : > { %1683 = vst.msk [vmem:[#allocation2 + $0x18] sm:$0xff] %vm679_vm2, %v1667_v57  ;;  %v1214_v60 = vadd.f32 %v1213_v10, %v2856_v4  ;;  %v1570_v40 = vadd.f32 %v1469_v26, %v1209_v58  ;;  %v1640_v23 = vmax.f32 %v1608_v33, 0.0 }
 0x1b6   : > { %v1215_v30 = vpop.f32.mrf.mxu1  ;;  %v1471_v51 = vpop.f32.mrf.mxu0 }
 0x1b7   : > { %v1609_v4 = vadd.f32 %v2882_v49, %v1570_v40 }
 0x1b8   : > { %v1216_v63 = vpop.f32.mrf.mxu1  ;;  %v1474_v6 = vpop.f32.mrf.mxu0 }
 0x1b9   : > { %v1571_v31 = vadd.f32 %v1474_v6, %v1214_v60  ;;  %v1217_v15 = vadd.f32 %v1216_v63, %v2860_v7  ;;  %v1641_v43 = vmax.f32 %v1609_v4, 0.0 }
 0x1ba   : > { %v1218_v44 = vpop.f32.mrf.mxu1  ;;  %v1476_v16 = vpop.f32.mrf.mxu0 }
 0x1bb   : > { %v1610_v14 = vadd.f32 %v2882_v49, %v1571_v31 }
 0x1bc   : > { %v1698_v52 = vld [vmem:[#allocation2 + $0x10] ss:$2 sm:$0xff]  ;;  %v1714_v45 = vld [vmem:[#allocation2 + $0x11] ss:$2 sm:$0xff]  ;;  %v1221_v32 = vpop.f32.mrf.mxu1  ;;  %v1477_v20 = vpop.f32.mrf.mxu0 }
 0x1bd   : > { %v1728_v55 = vmax.f32 %v1698_v52, %v1714_v45  ;;  %v1642_v56 = vmax.f32 %v1610_v14, 0.0  ;;  %v1572_v50 = vadd.f32 %v1477_v20, %v1217_v15  ;;  %v1222_v27 = vadd.f32 %v1221_v32, %v2864_v5 }
 0x1be   : > { %v1223_v38 = vpop.f32.mrf.mxu1  ;;  %v1479_v29 = vpop.f32.mrf.mxu0 }
 0x1bf   : > { %v2020_v17 = vpack.c.bf16 %v1728_v55, %v1728_v55  ;;  %v1668_v1 = vmax.f32 %v1640_v23, %v1642_v56  ;;  %v1611_v0 = vadd.f32 %v2882_v49, %v1572_v50 }
 0x1c0   : > { %v1224_v7 = vpop.f32.mrf.mxu1  ;;  %v1482_v59 = vpop.f32.mrf.mxu0 }
 0x1c1   : > { %1769 = vst.msk [vmem:[%s2904_s22 + $0x4] sm:$0xf] %vm1767_vm3, %v2020_v17  ;;  %v1643_v8 = vmax.f32 %v1611_v0, 0.0  ;;  %v1573_v24 = vadd.f32 %v1482_v59, %v1222_v27  ;;  %v1225_v46 = vadd.f32 %v1224_v7, %v2868_v53 }
 0x1c2   : > { %1684 = vst.msk [vmem:[#allocation2 + $0x20] sm:$0xff] %vm679_vm2, %v1668_v1  ;;  %v1226_v48 = vpop.f32.mrf.mxu1  ;;  %v1484_v41 = vpop.f32.mrf.mxu0 }
 0x1c3   : > { %v1669_v47 = vmax.f32 %v1641_v43, %v1643_v8  ;;  %v1612_v26 = vadd.f32 %v2882_v49, %v1573_v24 }
 0x1c4   : > { %v1229_v19 = vpop.f32.mrf.mxu1  ;;  %v1485_v36 = vpop.f32.mrf.mxu0 }
 0x1c5   : > { %1685 = vst.msk [vmem:[#allocation2 + $0x28] sm:$0xff] %vm679_vm2, %v1669_v47  ;;  %v1230_v10 = vadd.f32 %v1229_v19, %v2872_v62  ;;  %v1574_v58 = vadd.f32 %v1485_v36, %v1225_v46  ;;  %v1644_v44 = vmax.f32 %v1612_v26, 0.0 }
 0x1c6   : > { %v1231_v54 = vpop.f32.mrf.mxu1  ;;  %v1487_v57 = vpop.f32.mrf.mxu0 }
 0x1c7   : > { %v1613_v62 = vadd.f32 %v2882_v49, %v1574_v58 }
 0x1c8   : > { %v1232_v30 = vpop.f32.mrf.mxu1  ;;  %v1490_v51 = vpop.f32.mrf.mxu0 }
 0x1c9   : > { %v1575_v5 = vadd.f32 %v1490_v51, %v1230_v10  ;;  %v1233_v63 = vadd.f32 %v1232_v30, %v2876_v34  ;;  %v1645_v56 = vmax.f32 %v1613_v62, 0.0 }
 0x1ca   : > { %v1234_v60 = vpop.f32.mrf.mxu1  ;;  %v1492_v33 = vpop.f32.mrf.mxu0 }
 0x1cb   : > { %v1614_v6 = vadd.f32 %v2882_v49, %v1575_v5 }
 0x1cc   : > { %v1700_v40 = vld [vmem:[#allocation2 + $0x20] ss:$2 sm:$0xff]  ;;  %v1716_v31 = vld [vmem:[#allocation2 + $0x21] ss:$2 sm:$0xff]  ;;  %v1237_v16 = vpop.f32.mrf.mxu1  ;;  %v1493_v53 = vpop.f32.mrf.mxu0 }
 0x1cd   : > { %v1729_v15 = vmax.f32 %v1700_v40, %v1716_v31  ;;  %v1646_v14 = vmax.f32 %v1614_v6, 0.0  ;;  %v1576_v52 = vadd.f32 %v1493_v53, %v1233_v63  ;;  %v1238_v38 = vadd.f32 %v1237_v16, %v2814_v13 }
 0x1ce   : > { %v1239_v45 = vpop.f32.mrf.mxu1  ;;  %v1495_v23 = vpop.f32.mrf.mxu0 }
 0x1cf   : > { %v2021_v32 = vpack.c.bf16 %v1729_v15, %v1729_v15  ;;  %v1670_v20 = vmax.f32 %v1644_v44, %v1646_v14  ;;  %v1615_v55 = vadd.f32 %v2882_v49, %v1576_v52 }
 0x1d0   : > { %v1240_v34 = vpop.f32.mrf.mxu1  ;;  %v1498_v4 = vpop.f32.mrf.mxu0 }
 0x1d1   : > { %1770 = vst.msk [vmem:[%s2904_s22 + $0x8] sm:$0xf] %vm1767_vm3, %v2021_v32  ;;  %v1647_v50 = vmax.f32 %v1615_v55, 0.0  ;;  %v1577_v0 = vadd.f32 %v1498_v4, %v1238_v38  ;;  %v1241_v27 = vadd.f32 %v1240_v34, %v2818_v28 }
 0x1d2   : > { %1686 = vst.msk [vmem:[#allocation2 + $0x30] sm:$0xff] %vm679_vm2, %v1670_v20  ;;  %v1242_v29 = vpop.f32.mrf.mxu1  ;;  %v1500_v17 = vpop.f32.mrf.mxu0 }
 0x1d3   : > { %v1671_v1 = vmax.f32 %v1645_v56, %v1647_v50  ;;  %v1616_v41 = vadd.f32 %v2882_v49, %v1577_v0 }
 0x1d4   : > { %v1245_v7 = vpop.f32.mrf.mxu1  ;;  %v1501_v59 = vpop.f32.mrf.mxu0 }
 0x1d5   : > { %1687 = vst.msk [vmem:[#allocation2 + $0x38] sm:$0xff] %vm679_vm2, %v1671_v1  ;;  %v1246_v48 = vadd.f32 %v1245_v7, %v2822_v11  ;;  %v1578_v19 = vadd.f32 %v1501_v59, %v1241_v27  ;;  %v1648_v30 = vmax.f32 %v1616_v41, 0.0 }
 0x1d6   : > { %v1247_v43 = vpop.f32.mrf.mxu1  ;;  %v1503_v8 = vpop.f32.mrf.mxu0 }
 0x1d7   : > { %v1617_v11 = vadd.f32 %v2882_v49, %v1578_v19 }
 0x1d8   : > { %v1248_v47 = vpop.f32.mrf.mxu1  ;;  %v1506_v24 = vpop.f32.mrf.mxu0 }
 0x1d9   : > { %v1579_v13 = vadd.f32 %v1506_v24, %v1246_v48  ;;  %v1249_v57 = vadd.f32 %v1248_v47, %v2826_v2  ;;  %v1649_v16 = vmax.f32 %v1617_v11, 0.0 }
 0x1da   : > { %v1250_v36 = vpop.f32.mrf.mxu1  ;;  %v1508_v54 = vpop.f32.mrf.mxu0 }
 0x1db   : > { %v1618_v46 = vadd.f32 %v2882_v49, %v1579_v13 }
 0x1dc   : > { %v1702_v10 = vld [vmem:[#allocation2 + $0x30] ss:$2 sm:$0xff]  ;;  %v1718_v26 = vld [vmem:[#allocation2 + $0x31] ss:$2 sm:$0xff]  ;;  %v1253_v51 = vpop.f32.mrf.mxu1  ;;  %v1509_v28 = vpop.f32.mrf.mxu0 }
 0x1dd   : > { %v1730_v58 = vmax.f32 %v1702_v10, %v1718_v26  ;;  %v1650_v5 = vmax.f32 %v1618_v46, 0.0  ;;  %v1580_v60 = vadd.f32 %v1509_v28, %v1249_v57  ;;  %v1254_v15 = vadd.f32 %v1253_v51, %v2830_v18 }
 0x1de   : > { %v1255_v33 = vpop.f32.mrf.mxu1  ;;  %v1511_v63 = vpop.f32.mrf.mxu0 }
 0x1df   : > { %v2022_v6 = vpack.c.bf16 %v1730_v58, %v1730_v58  ;;  %v1672_v40 = vmax.f32 %v1648_v30, %v1650_v5  ;;  %v1619_v31 = vadd.f32 %v2882_v49, %v1580_v60 }
 0x1e0   : > { %v1256_v2 = vpop.f32.mrf.mxu1  ;;  %v1514_v44 = vpop.f32.mrf.mxu0 }
 0x1e1   : > { %1771 = vst.msk [vmem:[%s2904_s22 + $0xc] sm:$0xf] %vm1767_vm3, %v2022_v6  ;;  %v1651_v53 = vmax.f32 %v1619_v31, 0.0  ;;  %v1581_v45 = vadd.f32 %v1514_v44, %v1254_v15  ;;  %v1257_v34 = vadd.f32 %v1256_v2, %v2834_v42 }
 0x1e2   : > { %1688 = vst.msk [vmem:[#allocation2 + $0x40] sm:$0xff] %vm679_vm2, %v1672_v40  ;;  %v1258_v62 = vpop.f32.mrf.mxu1  ;;  %v1516_v14 = vpop.f32.mrf.mxu0 }
 0x1e3   : > { %v1673_v52 = vmax.f32 %v1649_v16, %v1651_v53  ;;  %v1620_v56 = vadd.f32 %v2882_v49, %v1581_v45 }
 0x1e4   : > { %v1261_v23 = vpop.f32.mrf.mxu1  ;;  %v1517_v32 = vpop.f32.mrf.mxu0 }
 0x1e5   : > { %1689 = vst.msk [vmem:[#allocation2 + $0x48] sm:$0xff] %vm679_vm2, %v1673_v52  ;;  %v1262_v4 = vadd.f32 %v1261_v23, %v2838_v25  ;;  %v1582_v29 = vadd.f32 %v1517_v32, %v1257_v34  ;;  %v1652_v8 = vmax.f32 %v1620_v56, 0.0 }
 0x1e6   : > { %v1263_v20 = vpop.f32.mrf.mxu1  ;;  %v1519_v55 = vpop.f32.mrf.mxu0 }
 0x1e7   : > { %v1621_v25 = vadd.f32 %v2882_v49, %v1582_v29 }
 0x1e8   : > { %v1264_v50 = vpop.f32.mrf.mxu1  ;;  %v1522_v38 = vpop.f32.mrf.mxu0 }
 0x1e9   : > { %v1583_v18 = vadd.f32 %v1522_v38, %v1262_v4  ;;  %v1265_v0 = vadd.f32 %v1264_v50, %v2842_v61  ;;  %v1653_v46 = vmax.f32 %v1621_v25, 0.0 }
 0x1ea   : > { %v1266_v17 = vpop.f32.mrf.mxu1  ;;  %v1524_v1 = vpop.f32.mrf.mxu0 }
 0x1eb   : > { %v1622_v7 = vadd.f32 %v2882_v49, %v1583_v18 }
 0x1ec   : > { %v1704_v59 = vld [vmem:[#allocation2 + $0x40] ss:$2 sm:$0xff]  ;;  %v1720_v43 = vld [vmem:[#allocation2 + $0x41] ss:$2 sm:$0xff]  ;;  %v1269_v27 = vpop.f32.mrf.mxu1  ;;  %v1525_v42 = vpop.f32.mrf.mxu0 }
 0x1ed   : > { %v1731_v48 = vmax.f32 %v1704_v59, %v1720_v43  ;;  %v1654_v41 = vmax.f32 %v1622_v7, 0.0  ;;  %v1584_v47 = vadd.f32 %v1525_v42, %v1265_v0  ;;  %v1270_v26 = vadd.f32 %v1269_v27, %v2846_v3 }
 0x1ee   : > { %v1271_v24 = vpop.f32.mrf.mxu1  ;;  %v1527_v19 = vpop.f32.mrf.mxu0 }
 0x1ef   : > { %v2023_v13 = vpack.c.bf16 %v1731_v48, %v1731_v48  ;;  %v1674_v36 = vmax.f32 %v1652_v8, %v1654_v41  ;;  %v1623_v54 = vadd.f32 %v2882_v49, %v1584_v47 }
 0x1f0   : > { %v1272_v61 = vpop.f32.mrf.mxu1  ;;  %v1530_v57 = vpop.f32.mrf.mxu0 }
 0x1f1   : > { %1772 = vst.msk [vmem:[%s2904_s22 + $0x10] sm:$0xf] %vm1767_vm3, %v2023_v13  ;;  %v1655_v10 = vmax.f32 %v1623_v54, 0.0  ;;  %v1585_v58 = vadd.f32 %v1530_v57, %v1270_v26  ;;  %v1273_v63 = vadd.f32 %v1272_v61, %v2850_v12 }
 0x1f2   : > { %1690 = vst.msk [vmem:[#allocation2 + $0x50] sm:$0xff] %vm679_vm2, %v1674_v36  ;;  %v1274_v30 = vpop.f32.mrf.mxu1  ;;  %v1532_v51 = vpop.f32.mrf.mxu0 }
 0x1f3   : > { %v1675_v28 = vmax.f32 %v1653_v46, %v1655_v10  ;;  %v1624_v40 = vadd.f32 %v2882_v49, %v1585_v58 }
 0x1f4   : > { %v1277_v11 = vpop.f32.mrf.mxu1  ;;  %v1533_v5 = vpop.f32.mrf.mxu0 }
 0x1f5   : > { %1691 = vst.msk [vmem:[#allocation2 + $0x58] sm:$0xff] %vm679_vm2, %v1675_v28  ;;  %v1278_v6 = vadd.f32 %v1277_v11, %v2854_v21  ;;  %v1586_v44 = vadd.f32 %v1533_v5, %v1273_v63  ;;  %v1656_v45 = vmax.f32 %v1624_v40, 0.0 }
 0x1f6   : > { %v1279_v60 = vpop.f32.mrf.mxu1  ;;  %v1535_v33 = vpop.f32.mrf.mxu0 }
 0x1f7   : > { %v1625_v21 = vadd.f32 %v2882_v49, %v1586_v44 }
 0x1f8   : > { %v1280_v31 = vpop.f32.mrf.mxu1  ;;  %v1538_v2 = vpop.f32.mrf.mxu0 }
 0x1f9   : > { %v1587_v3 = vadd.f32 %v1538_v2, %v1278_v6  ;;  %v1281_v15 = vadd.f32 %v1280_v31, %v2858_v35  ;;  %v1657_v18 = vmax.f32 %v1625_v21, 0.0 }
 0x1fa   : > { %v1282_v16 = vpop.f32.mrf.mxu1  ;;  %v1540_v53 = vpop.f32.mrf.mxu0 }
 0x1fb   : > { %v1626_v62 = vadd.f32 %v2882_v49, %v1587_v3 }
 0x1fc   : > { %v1706_v14 = vld [vmem:[#allocation2 + $0x50] ss:$2 sm:$0xff]  ;;  %v1722_v52 = vld [vmem:[#allocation2 + $0x51] ss:$2 sm:$0xff]  ;;  %v1285_v23 = vpop.f32.mrf.mxu1  ;;  %v1541_v12 = vpop.f32.mrf.mxu0 }
 0x1fd   : > { %v1732_v32 = vmax.f32 %v1706_v14, %v1722_v52  ;;  %v1658_v20 = vmax.f32 %v1626_v62, 0.0  ;;  %v1588_v55 = vadd.f32 %v1541_v12, %v1281_v15  ;;  %v1286_v1 = vadd.f32 %v1285_v23, %v2862_v37 }
 0x1fe   : > { %v1287_v34 = vpop.f32.mrf.mxu1  ;;  %v1543_v4 = vpop.f32.mrf.mxu0 }
 0x1ff   : > { %v2024_v56 = vpack.c.bf16 %v1732_v32, %v1732_v32  ;;  %v1676_v50 = vmax.f32 %v1656_v45, %v1658_v20  ;;  %v1627_v38 = vadd.f32 %v2882_v49, %v1588_v55 }
 0x200   : > { %v1288_v35 = vpop.f32.mrf.mxu1  ;;  %v1546_v29 = vpop.f32.mrf.mxu0 }
 0x201   : > { %1773 = vst.msk [vmem:[%s2904_s22 + $0x14] sm:$0xf] %vm1767_vm3, %v2024_v56  ;;  %v1659_v17 = vmax.f32 %v1627_v38, 0.0  ;;  %v1589_v43 = vadd.f32 %v1546_v29, %v1286_v1  ;;  %v1289_v25 = vadd.f32 %v1288_v35, %v2866_v39 }
 0x202   : > { %1692 = vst.msk [vmem:[#allocation2 + $0x60] sm:$0xff] %vm679_vm2, %v1676_v50  ;;  %v1290_v0 = vpop.f32.mrf.mxu1  ;;  %v1548_v7 = vpop.f32.mrf.mxu0 }
 0x203   : > { %v1677_v59 = vmax.f32 %v1657_v18, %v1659_v17  ;;  %v1628_v47 = vadd.f32 %v2882_v49, %v1589_v43 }
 0x204   : > { %v1293_v8 = vpop.f32.mrf.mxu1  ;;  %v1549_v27 = vpop.f32.mrf.mxu0 }
 0x205   : > { %1693 = vst.msk [vmem:[#allocation2 + $0x68] sm:$0xff] %vm679_vm2, %v1677_v59  ;;  %v1294_v41 = vadd.f32 %v1293_v8, %v2870_v9  ;;  %v1590_v13 = vadd.f32 %v1549_v27, %v1289_v25  ;;  %v1660_v26 = vmax.f32 %v1628_v47, 0.0 }
 0x206   : > { %v1295_v42 = vpop.f32.mrf.mxu1  ;;  %v1551_v48 = vpop.f32.mrf.mxu0 }
 0x207   : > { %v1629_v9 = vadd.f32 %v2882_v49, %v1590_v13 }
 0x208   : > { %v1296_v24 = vpop.f32.mrf.mxu1  ;;  %v1554_v19 = vpop.f32.mrf.mxu0 }
 0x209   : > { %v1591_v37 = vadd.f32 %v1554_v19, %v1294_v41  ;;  %v1297_v61 = vadd.f32 %v1296_v24, %v2874_v22  ;;  %v1661_v22 = vmax.f32 %v1629_v9, 0.0 }
 0x20a   : > { %v1298_v36 = vpop.f32.mrf.mxu1  ;;  %v1556_v54 = vpop.f32.mrf.mxu0 }
 0x20b   : > { %v1630_v57 = vadd.f32 %v2882_v49, %v1591_v37 }
 0x20c   : > { %v1708_v46 = vld [vmem:[#allocation2 + $0x60] ss:$2 sm:$0xff]  ;;  %v1724_v10 = vld [vmem:[#allocation2 + $0x61] ss:$2 sm:$0xff]  ;;  %v1557_v30 = vpop.f32.mrf.mxu0 }
 0x20d   : > { %v1733_v39 = vmax.f32 %v1708_v46, %v1724_v10  ;;  %v1662_v51 = vmax.f32 %v1630_v57, 0.0  ;;  %v1592_v28 = vadd.f32 %v1557_v30, %v1297_v61 }
 0x20e   : > { %v1559_v58 = vpop.f32.mrf.mxu0 }
 0x20f   : > { %v2025_v11 = vpack.c.bf16 %v1733_v39, %v1733_v39  ;;  %v1678_v5 = vmax.f32 %v1660_v26, %v1662_v51  ;;  %v1631_v60 = vadd.f32 %v2882_v49, %v1592_v28 }
 0x211   : > { %1774 = vst.msk [vmem:[%s2904_s22 + $0x18] sm:$0xf] %vm1767_vm3, %v2025_v11  ;;  %v1663_v33 = vmax.f32 %v1631_v60, 0.0 }
 0x212   : > { %1694 = vst.msk [vmem:[#allocation2 + $0x70] sm:$0xff] %vm679_vm2, %v1678_v5 }
 0x213   : > { %v1679_v63 = vmax.f32 %v1661_v22, %v1663_v33 }
 0x215   : > { %1695 = vst.msk [vmem:[#allocation2 + $0x78] sm:$0xff] %vm679_vm2, %v1679_v63 }
 0x21c   : > { %v1710_v6 = vld [vmem:[#allocation2 + $0x70] ss:$2 sm:$0xff]  ;;  %v1726_v40 = vld [vmem:[#allocation2 + $0x71] ss:$2 sm:$0xff] }
 0x21d   : > { %v1734_v31 = vmax.f32 %v1710_v6, %v1726_v40 }
 0x21f   : > { %v2026_v2 = vpack.c.bf16 %v1734_v31, %v1734_v31 }
 0x221   : > { %1775 = vst.msk [vmem:[%s2904_s22 + $0x1c] sm:$0xf] %vm1767_vm3, %v2026_v2 }
 0x222 PF: > { %s13_s12 = sadd.s32 1, %s2140_s12  }
 0x223   : > { %p10_p5 = scmp.ge.s32.totalorder %s13_s12, 4  }
 0x225   :  { %12 = sbr.rel (!%p10_p5) target bundleno = 1 (0x1), region = 79 }

// kernel: encoder_forward.12
= control target key start
LH: loop header
LB: loop body
LE: loop exit
PB: predicated region body
PF: predicated region fallthrough
CT: control target
= control target key end

     0   :  { %s1355_s12 = smov 0   ;;  %s1709_s0 = inlined_call_operand.vmem [shape: bf16[2,10,10,64], index: 0, kind: input, shape index: {}]   ;;  %s1710_s1 = inlined_call_operand.vmem [shape: bf16[3,192,128], index: 1, kind: input, shape index: {}]   ;;  %s1711_s2 = inlined_call_operand.vmem [shape: f32[1,128], index: 2, kind: input, shape index: {}]   ;;  %s1712_s3 = inlined_call_operand.vmem [shape: bf16[128,128], index: 3, kind: output, shape index: {}]  }
   0x1 LB: > { %s1361_s13 = sadd.s32 4294967295, %s1331_s12   ;;  %p1074_p0 = scmp.ge.s32.totalorder %s1331_s12, 1  ;;  %s1331_s12 = sphi %s1355_s12, %s13_s12  }
   0x2   : > { %p137_p1 = scmp.lt.s32.totalorder %s1331_s12, 3 }
   0x4   : > { %p138_p2 = pnand %p1074_p0, %p137_p1 }
   0x5   : > { %p161_p3 = scmp.lt.s32.totalorder (!%p138_p2), %s1361_s13, 1  ;;  %s1334_s8 = smov (!%p138_p2), 64  }
   0x6   : > { %141 = sbr.rel (%p138_p2) target bundleno = 411 (0x19b), region = 32  ;;  %s1076_s17 = sshll.u32 (!%p138_p2), %s1361_s13, 3 }
   0x7   : > { %p167_p4 = scmp.lt.s32.totalorder (!%p138_p2), %s1076_s17, 15 }
   0xb   : > { %v1289_v0 = vld [vmem:[%s1710_s1 + $0x98] sm:$0xff]   ;;  %v1333_v1 = vmov 0   ;;  %s162_s16 = scalar_select %p161_p3, %s1361_s13, 1  ;;  %v1291_v3 = vld [vmem:[%s1710_s1 + $0x90] sm:$0xff]   ;;  %v1293_v5 = vld [vmem:[%s1710_s1 + $0x88] sm:$0xff]   ;;  %vm343_vm0 = vcmask 523264  }
   0xc   : > { %546 = vmatprep.subr.bf16.mxu0 %v1333_v1  ;;  %707 = vmatprep.subr.bf16.mxu1 %v1333_v1  ;;  %v1290_v2 = vld [vmem:[%s1710_s1 + $0x38] sm:$0xff]   ;;  %v1292_v4 = vld [vmem:[%s1710_s1 + $0x30] sm:$0xff]   ;;  %v1294_v6 = vld [vmem:[%s1710_s1 + $0x28] sm:$0xff]   ;;  %s1714_s17 = smov (!%p167_p4, %s1076_s17), 15 }
   0xd   : > { %547 = vmatpush1.bf16.msra.mxu0 %v1289_v0  ;;  %s1268_s21 = smul.u32 80, %s162_s16  ;;  %708 = vmatpush1.bf16.msra.mxu1 %v1290_v2  ;;  %v1295_v34 = vld [vmem:[%s1710_s1 + $0x80] sm:$0xff]   ;;  %v1297_v57 = vld [vmem:[%s1710_s1 + $0x78] sm:$0xff]   ;;  %v1299_v2 = vld [vmem:[%s1710_s1 + $0x70] sm:$0xff]   ;;  %s1077_s13 = sshll.u32 %s1714_s17, 2 }
   0xe   : > { %548 = vmatprep.subr.bf16.mxu0 %v1333_v1  ;;  %709 = vmatprep.subr.bf16.mxu1 %v1333_v1  ;;  %v1296_v45 = vld [vmem:[%s1710_s1 + $0x20] sm:$0xff]   ;;  %v1298_v62 = vld [vmem:[%s1710_s1 + $0x18] sm:$0xff]   ;;  %s170_s22 = scalar_lea.vmem %s1712_s3, %s1077_s13 }
   0xf   : > { %s1389_s28 = scalar_lea.vmem %s1709_s0, %s1268_s21 }
  0x10   : > { %v1395_v7 = vld [vmem:[%s1389_s28 + $0x10] sm:$0xf]  ;;  %v178_v8 = vld [vmem:[%s1389_s28 + $0x14] sm:$0x1]  ;;  %v1399_v9 = vld [vmem:[%s1389_s28] sm:$0xf] }
  0x11   : > { %549 = vmatpush1.bf16.msra.mxu0 %v1291_v3  ;;  %v1403_v10 = vcombine.low %v1395_v7, %v178_v8  ;;  %v174_v11 = vld [vmem:[%s1389_s28 + $0x4] sm:$0x1]  ;;  %v1407_v12 = vld [vmem:[%s1389_s28 + $0x18] sm:$0xf]  ;;  %v180_v13 = vld [vmem:[%s1389_s28 + $0x1c] sm:$0x1]  ;;  %710 = vmatpush1.bf16.msra.mxu1 %v1292_v4 }
  0x12   : > { %550 = vmatprep.subr.bf16.mxu0 %v1333_v1  ;;  %v1411_v14 = vcombine.low %v1399_v9, %v174_v11  ;;  %v1414_v15 = vcombine.low %v1407_v12, %v180_v13  ;;  %v1417_v16 = vld [vmem:[%s1389_s28 + $0x8] sm:$0xf]  ;;  %v176_v17 = vld [vmem:[%s1389_s28 + $0xc] sm:$0x1]  ;;  %v1421_v18 = vld [vmem:[%s1389_s28 + $0x20] sm:$0xf]  ;;  %711 = vmatprep.subr.bf16.mxu1 %v1333_v1 }
  0x13   : > { %v258_v19 = vshrl.u32 %v1403_v10, 16  ;;  %v260_v20 = vshll.u32 %v1403_v10, 16  ;;  %v1427_v21 = vcombine.low %v1417_v16, %v176_v17  ;;  %v182_v22 = vld [vmem:[%s1389_s28 + $0x24] sm:$0x1]  ;;  %v1431_v23 = vld [vmem:[%s1389_s28 + $0x28] sm:$0xf] }
  0x14   : > { %v244_v24 = vshrl.u32 %v1411_v14, 16  ;;  %v246_v25 = vshll.u32 %v1411_v14, 16  ;;  %v265_v26 = vshrl.u32 %v1414_v15, 16  ;;  %v267_v27 = vshll.u32 %v1414_v15, 16  ;;  %v184_v28 = vld [vmem:[%s1389_s28 + $0x2c] sm:$0x1] }
  0x15   : > { %551 = vmatpush1.bf16.msra.mxu0 %v1293_v5  ;;  %v262_v29 = vrot.slane %v260_v20, 1  ;;  %v251_v30 = vshrl.u32 %v1427_v21, 16  ;;  %v253_v31 = vshll.u32 %v1427_v21, 16  ;;  %v1442_v32 = vcombine.low %v1421_v18, %v182_v22  ;;  %v1445_v33 = vld [vmem:[%s1389_s28 + $0x30] sm:$0xf]  ;;  %712 = vmatpush1.bf16.msra.mxu1 %v1294_v6 }
  0x16   : > { %552 = vmatprep.subr.bf16.mxu0 %v1333_v1  ;;  %v248_v35 = vrot.slane %v246_v25, 1  ;;  %v269_v36 = vrot.slane %v267_v27, 1  ;;  %v1451_v37 = vcombine.low %v1431_v23, %v184_v28  ;;  %v186_v38 = vld [vmem:[%s1389_s28 + $0x34] sm:$0x1]  ;;  %v1455_v39 = vld [vmem:[%s1389_s28 + $0x38] sm:$0xf]  ;;  %713 = vmatprep.subr.bf16.mxu1 %v1333_v1 }
  0x17   : > { %v263_v40 = vor.u32 %v262_v29, %v258_v19  ;;  %v255_v41 = vrot.slane %v253_v31, 1  ;;  %v272_v42 = vshrl.u32 %v1442_v32, 16  ;;  %v274_v43 = vshll.u32 %v1442_v32, 16  ;;  %v188_v44 = vld [vmem:[%s1389_s28 + $0x3c] sm:$0x1]  ;;  %v1300_v19 = vld [vmem:[%s1710_s1 + $0x10] sm:$0xff]  }
  0x18   : > { %v249_v46 = vor.u32 %v248_v35, %v244_v24  ;;  %v279_v47 = vshrl.u32 %v1451_v37, 16  ;;  %v281_v48 = vshll.u32 %v1451_v37, 16  ;;  %v1467_v49 = vld [vmem:[%s1389_s28 + $0x40] sm:$0xf]  ;;  %v190_v50 = vld [vmem:[%s1389_s28 + $0x44] sm:$0x1]  ;;  %v270_v51 = vor.u32 %v269_v36, %v265_v26 }
  0x19   : > { %553 = vmatpush1.bf16.msra.mxu0 %v1295_v34  ;;  %317 = vrot.lane.b32.xlu1 %v263_v40, %s1334_s8  ;;  %v276_v52 = vrot.slane %v274_v43, 1  ;;  %v1473_v53 = vcombine.low %v1445_v33, %v186_v38  ;;  %v1476_v54 = vcombine.low %v1455_v39, %v188_v44  ;;  %v1479_v55 = vld [vmem:[%s1389_s28 + $0x48] sm:$0xf]  ;;  %v192_v56 = vld [vmem:[%s1389_s28 + $0x4c] sm:$0x1]  ;;  %v256_v58 = vor.u32 %v255_v41, %v251_v30  ;;  %v1303_v31 = vld [vmem:[%s1710_s1 + $0x60] sm:$0xff]  }
  0x1a   : > { %554 = vmatprep.subr.bf16.mxu0 %v1333_v1  ;;  %714 = vmatpush1.bf16.msra.mxu1 %v1296_v45  ;;  %v283_v59 = vrot.slane %v281_v48, 1  ;;  %v1487_v60 = vcombine.low %v1467_v49, %v190_v50  ;;  %v1490_v61 = vcombine.low %v1479_v55, %v192_v56  ;;  %v1301_v24 = vld [vmem:[%s1710_s1 + $0x68] sm:$0xff]   ;;  %v334_v30 = vrot.slane %v1427_v21, 1  ;;  %v1304_v38 = vld [vmem:[%s1710_s1] sm:$0xff]   ;;  %v1307_v48 = vld [vmem:[%s1710_s1 + $0xb0] sm:$0xff]  }
  0x1b   : > { %313 = vrot.lane.b32.xlu0 %v249_v46, %s1334_s8  ;;  %715 = vmatprep.subr.bf16.mxu1 %v1333_v1  ;;  %v286_v63 = vshrl.u32 %v1473_v53, 16  ;;  %v288_v0 = vshll.u32 %v1473_v53, 16  ;;  %v293_v3 = vshrl.u32 %v1476_v54, 16  ;;  %v295_v4 = vshll.u32 %v1476_v54, 16  ;;  %v1302_v26 = vld [vmem:[%s1710_s1 + $0x8] sm:$0xff]  }
  0x1c   : > { %v300_v5 = vshrl.u32 %v1487_v60, 16  ;;  %v302_v6 = vshll.u32 %v1487_v60, 16  ;;  %v284_v8 = vor.u32 %v283_v59, %v279_v47  ;;  %v307_v13 = vshrl.u32 %v1490_v61, 16  ;;  %v1310_v56 = vld [vmem:[%s1710_s1 + $0x48] sm:$0xff]  }
  0x1d   : > { %555 = vmatpush1.bf16.msra.mxu0 %v1297_v57  ;;  %319 = vrot.lane.b32.xlu1 %v270_v51, %s1334_s8  ;;  %v290_v11 = vrot.slane %v288_v0, 1  ;;  %v309_v17 = vshll.u32 %v1490_v61, 16  ;;  %v277_v20 = vor.u32 %v276_v52, %v272_v42  ;;  %v297_v22 = vrot.slane %v295_v4, 1  ;;  %v1305_v42 = vld [vmem:[%s1710_s1 + $0xb8] sm:$0xff]   ;;  %v1308_v52 = vld [vmem:[%s1710_s1 + $0x50] sm:$0xff]   ;;  %v1311_v57 = vld [vmem:[%s1710_s1 + $0xa0] sm:$0xff]  }
  0x1e   : > { %556 = vmatprep.subr.bf16.mxu0 %v1333_v1  ;;  %716 = vmatpush1.bf16.msra.mxu1 %v1298_v62  ;;  %v304_v29 = vrot.slane %v302_v6, 1  ;;  %v335_v34 = vrot.slane %v1403_v10, 1  ;;  %v336_v35 = vrot.slane %v1414_v15, 1  ;;  %v333_v40 = vrot.slane %v1411_v14, 1 }
  0x1f   : > { %315 = vrot.lane.b32.xlu0 %v256_v58, %s1334_s8  ;;  %717 = vmatprep.subr.bf16.mxu1 %v1333_v1  ;;  %v311_v25 = vrot.slane %v309_v17, 1  ;;  %v298_v27 = vor.u32 %v297_v22, %v293_v3  ;;  %v291_v28 = vor.u32 %v290_v11, %v286_v63  ;;  %v337_v15 = vrot.slane %v1442_v32, 1  ;;  %v1306_v32 = vld [vmem:[%s1710_s1 + $0x58] sm:$0xff]   ;;  %v1312_v58 = vld [vmem:[%s1710_s1 + $0x40] sm:$0xff]   ;;  %v1315_v17 = vld [vmem:[%s1710_s1 + $0xe8] sm:$0xff]  }
  0x20   : > { %v1113_v21 = vcombine.low %v334_v30, %v335_v34  ;;  %v305_v41 = vor.u32 %v304_v29, %v300_v5  ;;  %v1538_v10 = vcombine.low %v335_v34, %v336_v35  ;;  %v1137_v43 = vcombine.low %v333_v40, %v334_v30  ;;  %v1313_v5 = vld [vmem:[%s1710_s1 + $0xf8] sm:$0xff]  }
  0x21   : > { %557 = vmatpush1.bf16.msra.mxu0 %v1299_v2  ;;  %323 = vrot.lane.b32.xlu1 %v284_v8, %s1334_s8  ;;  %v312_v36 = vor.u32 %v311_v25, %v307_v13  ;;  %v338_v14 = vrot.slane %v1451_v37, 1  ;;  %v1115_v44 = vcombine.low %v336_v35, %v337_v15  ;;  %v339_v45 = vrot.slane %v1473_v53, 1  ;;  %v1321_v35 = vld [vmem:[%s1710_s1 + $0x118] sm:$0xff]  }
  0x22   : > { %558 = vmatprep.subr.bf16.mxu0 %v1333_v1  ;;  %718 = vmatpush1.bf16.msra.mxu1 %v1300_v19  ;;  %v340_v47 = vrot.slane %v1476_v54, 1  ;;  %v341_v51 = vrot.slane %v1487_v60, 1  ;;  %v1309_v54 = vld [vmem:[%s1710_s1 + $0xa8] sm:$0xff]   ;;  %v342_v59 = vrot.slane %v1490_v61, 1 }
  0x23   : > { %321 = vrot.lane.b32.xlu0 %v277_v20, %s1334_s8  ;;  %719 = vmatprep.subr.bf16.mxu1 %v1333_v1  ;;  %v1552_v46 = vcombine.low %v337_v15, %v338_v14  ;;  %v1557_v37 = vcombine.low %v338_v14, %v339_v45  ;;  %v1316_v20 = vld [vmem:[%s1710_s1 + $0xe0] sm:$0xff]  }
  0x24   : > { %1132 = vmatprep.mubr.msk.bf16.mxu0 %vm343_vm0, %v1113_v21  ;;  %1156 = vmatprep.mubr.msk.bf16.mxu1 %vm343_vm0, %v1137_v43  ;;  %v1563_v50 = vcombine.low %v339_v45, %v340_v47  ;;  %v1570_v53 = vcombine.low %v340_v47, %v341_v51  ;;  %v1592_v60 = vcombine.low %v341_v51, %v342_v59  ;;  %v1324_v21 = vld [vmem:[%s1710_s1 + $0x100] sm:$0xff]  }
  0x25   : > { %559 = vmatpush1.bf16.msra.mxu0 %v1301_v24  ;;  %327 = vrot.lane.b32.xlu1 %v298_v27, %s1334_s8 }
  0x26   : > { %560 = vmatprep.subr.bf16.mxu0 %v1333_v1  ;;  %720 = vmatpush1.bf16.msra.mxu1 %v1302_v26 }
  0x27   : > { %325 = vrot.lane.b32.xlu0 %v291_v28, %s1334_s8  ;;  %721 = vmatprep.subr.bf16.mxu1 %v1333_v1  ;;  %v1318_v28 = vld [vmem:[%s1710_s1 + $0xd0] sm:$0xff]  }
  0x29   : > { %561 = vmatpush1.bf16.msra.mxu0 %v1303_v31  ;;  %331 = vrot.lane.b32.xlu1 %v312_v36, %s1334_s8  ;;  %v1322_v36 = vld [vmem:[%s1710_s1 + $0x110] sm:$0xff]  }
  0x2a   : > { %570 = vmatprep.subr.bf16.mxu0 %v1333_v1  ;;  %722 = vmatpush1.bf16.msra.mxu1 %v1304_v38  ;;  %v1323_v38 = vld [vmem:[%s1710_s1 + $0x108] sm:$0xff]  }
  0x2b   : > { %329 = vrot.lane.b32.xlu0 %v305_v41, %s1334_s8  ;;  %731 = vmatprep.subr.bf16.mxu1 %v1333_v1 }
  0x2d   : > { %571 = vmatpush2.bf16.msra.mxu0 %v1305_v42 }
  0x2e   : > { %572 = vmatprep.subr.bf16.mxu0 %v1333_v1  ;;  %732 = vmatpush2.bf16.msra.mxu1 %v1306_v32 }
  0x2f   : > { %733 = vmatprep.subr.bf16.mxu1 %v1333_v1 }
  0x31   : > { %573 = vmatpush2.bf16.msra.mxu0 %v1307_v48 }
  0x32   : > { %574 = vmatprep.subr.bf16.mxu0 %v1333_v1  ;;  %734 = vmatpush2.bf16.msra.mxu1 %v1308_v52 }
  0x33   : > { %735 = vmatprep.subr.bf16.mxu1 %v1333_v1 }
  0x35   : > { %575 = vmatpush2.bf16.msra.mxu0 %v1309_v54 }
  0x36   : > { %576 = vmatprep.subr.bf16.mxu0 %v1333_v1  ;;  %736 = vmatpush2.bf16.msra.mxu1 %v1310_v56 }
  0x37   : > { %737 = vmatprep.subr.bf16.mxu1 %v1333_v1 }
  0x39   : > { %577 = vmatpush2.bf16.msra.mxu0 %v1311_v57 }
  0x3a   : > { %878 = vmatprep.subr.bf16.mxu0 %v1333_v1  ;;  %738 = vmatpush2.bf16.msra.mxu1 %v1312_v58 }
  0x3b   : > { %1244 = vmatprep.subr.bf16.mxu1 %v1333_v1 }
  0x8b   : > { %v318_v63 = vpop.permute.xlu1 %317 }
  0x8c   : > { %v352_v0 = vsel %vm343_vm0, %v1395_v7, %v318_v63  ;;  %v1314_v7 = vld [vmem:[%s1710_s1 + $0xf0] sm:$0xff]  }
  0x8d   : > { %v314_v62 = vpop.permute.xlu0 %313 }
  0x8e   : > { %v346_v3 = vsel %vm343_vm0, %v1399_v9, %v314_v62 }
  0x8f   : > { %v320_v8 = vpop.permute.xlu1 %319 }
  0x91   : > { %v316_v2 = vpop.permute.xlu0 %315 }
  0x92   : > { %v349_v4 = vsel %vm343_vm0, %v1417_v16, %v316_v2  ;;  %v355_v16 = vsel %vm343_vm0, %v1407_v12, %v320_v8 }
  0x93   : > { %v1112_v6 = vcombine.low %v349_v4, %v352_v0  ;;  %v1136_v61 = vcombine.low %v346_v3, %v349_v4  ;;  %v324_v19 = vpop.permute.xlu1 %323 }
  0x94   : > { %v361_v22 = vsel %vm343_vm0, %v1431_v23, %v324_v19  ;;  %v1317_v23 = vld [vmem:[%s1710_s1 + $0xd8] sm:$0xff]  }
  0x95   : > { %579 = vmatmul.mubr.bf16.vlgmr.msra.gmra.mxu0 %v1112_v6  ;;  %740 = vmatmul.mubr.bf16.vlgmr.msra.gmra.mxu1 %v1136_v61  ;;  %v322_v11 = vpop.permute.xlu0 %321 }
  0x96   : > { %879 = vmatpush1.bf16.msra.mxu0 %v1313_v5  ;;  %1256 = vmatpush1.bf16.msra.mxu1 %v1313_v5  ;;  %v358_v9 = vsel %vm343_vm0, %v1421_v18, %v322_v11  ;;  %v1618_v18 = vcombine.low %v352_v0, %v355_v16 }
  0x97   : > { %880 = vmatprep.subr.bf16.mxu0 %v1333_v1  ;;  %1245 = vmatprep.subr.bf16.mxu1 %v1333_v1  ;;  %v1114_v13 = vcombine.low %v355_v16, %v358_v9  ;;  %v1636_v25 = vcombine.low %v358_v9, %v361_v22 }
  0x98   : > { %1133 = vmatprep.mubr.msk.bf16.mxu0 %vm343_vm0, %v1115_v44  ;;  %1157 = vmatprep.mubr.msk.bf16.mxu1 %vm343_vm0, %v1538_v10 }
  0x99   : > { %v326_v12 = vpop.permute.xlu0 %325 }
  0x9a   : > { %881 = vmatpush1.bf16.msra.mxu0 %v1314_v7  ;;  %1257 = vmatpush1.bf16.msra.mxu1 %v1314_v7  ;;  %v364_v24 = vsel %vm343_vm0, %v1445_v33, %v326_v12  ;;  %v328_v33 = vpop.permute.xlu1 %327 }
  0x9b   : > { %882 = vmatprep.subr.bf16.mxu0 %v1333_v1  ;;  %1246 = vmatprep.subr.bf16.mxu1 %v1333_v1  ;;  %v1116_v26 = vcombine.low %v361_v22, %v364_v24  ;;  %v367_v29 = vsel %vm343_vm0, %v1455_v39, %v328_v33  ;;  %v1319_v39 = vld [vmem:[%s1710_s1 + $0xc8] sm:$0xff]  }
  0x9c   : > { %v1142_v31 = vcombine.low %v364_v24, %v367_v29 }
  0x9d   : > { %587 = vmatmul.mubr.bf16.gmra.mxu0 %v1114_v13  ;;  %748 = vmatmul.mubr.bf16.gmra.mxu1 %v1618_v18  ;;  %v330_v27 = vpop.permute.xlu0 %329  ;;  %v1202_v13 = vld [vmem:[%s1711_s2] ss:$0 sm:$0xff] }
  0x9e   : > { %883 = vmatpush1.bf16.msra.mxu0 %v1315_v17  ;;  %1258 = vmatpush1.bf16.msra.mxu1 %v1315_v17  ;;  %v370_v30 = vsel %vm343_vm0, %v1467_v49, %v330_v27  ;;  %v1320_v49 = vld [vmem:[%s1710_s1 + $0xc0] sm:$0xff]   ;;  %v332_v40 = vpop.permute.xlu1 %331 }
  0x9f   : > { %884 = vmatprep.subr.bf16.mxu0 %v1333_v1  ;;  %1247 = vmatprep.subr.bf16.mxu1 %v1333_v1  ;;  %v1118_v34 = vcombine.low %v367_v29, %v370_v30  ;;  %v373_v41 = vsel %vm343_vm0, %v1479_v55, %v332_v40 }
  0xa0   : > { %1158 = vmatprep.mubr.msk.bf16.mxu1 %vm343_vm0, %v1552_v46  ;;  %1134 = vmatprep.mubr.msk.bf16.mxu0 %vm343_vm0, %v1557_v37 }
  0xa2   : > { %885 = vmatpush1.bf16.msra.mxu0 %v1316_v20  ;;  %1259 = vmatpush1.bf16.msra.mxu1 %v1316_v20 }
  0xa3   : > { %886 = vmatprep.subr.bf16.mxu0 %v1333_v1  ;;  %1248 = vmatprep.subr.bf16.mxu1 %v1333_v1 }
  0xa5   : > { %756 = vmatmul.mubr.bf16.gmra.mxu1 %v1636_v25  ;;  %595 = vmatmul.mubr.bf16.gmra.mxu0 %v1116_v26 }
  0xa6   : > { %887 = vmatpush1.bf16.msra.mxu0 %v1317_v23  ;;  %1260 = vmatpush1.bf16.msra.mxu1 %v1317_v23 }
  0xa7   : > { %888 = vmatprep.subr.bf16.mxu0 %v1333_v1  ;;  %1249 = vmatprep.subr.bf16.mxu1 %v1333_v1 }
  0xa8   : > { %1159 = vmatprep.mubr.msk.bf16.mxu1 %vm343_vm0, %v1563_v50  ;;  %1135 = vmatprep.mubr.msk.bf16.mxu0 %vm343_vm0, %v1570_v53 }
  0xaa   : > { %889 = vmatpush1.bf16.msra.mxu0 %v1318_v28  ;;  %1261 = vmatpush1.bf16.msra.mxu1 %v1318_v28 }
  0xab   : > { %890 = vmatprep.subr.bf16.mxu0 %v1333_v1  ;;  %1250 = vmatprep.subr.bf16.mxu1 %v1333_v1 }
  0xad   : > { %764 = vmatmul.mubr.bf16.gmra.mxu1 %v1142_v31  ;;  %603 = vmatmul.mubr.bf16.gmra.mxu0 %v1118_v34 }
  0xae   : > { %891 = vmatpush1.bf16.msra.mxu0 %v1319_v39  ;;  %1262 = vmatpush1.bf16.msra.mxu1 %v1319_v39 }
  0xaf   : > { %892 = vmatprep.subr.bf16.mxu0 %v1333_v1  ;;  %1251 = vmatprep.subr.bf16.mxu1 %v1333_v1 }
  0xb0   : > { %1198 = vmatprep.mubr.msk.bf16.mxu0 %vm343_vm0, %v1538_v10  ;;  %1200 = vmatprep.mubr.msk.bf16.mxu1 %vm343_vm0, %v1563_v50  ;;  %v1184_v10 = vcombine.low %v370_v30, %v373_v41 }
  0xb2   : > { %893 = vmatpush1.bf16.msra.mxu0 %v1320_v49  ;;  %1263 = vmatpush1.bf16.msra.mxu1 %v1320_v49 }
  0xb3   : > { %902 = vmatprep.subr.bf16.mxu0 %v1333_v1  ;;  %1252 = vmatprep.subr.bf16.mxu1 %v1333_v1 }
  0xb6   : > { %903 = vmatpush2.bf16.msra.mxu0 %v1321_v35  ;;  %1264 = vmatpush2.bf16.msra.mxu1 %v1321_v35 }
  0xb7   : > { %904 = vmatprep.subr.bf16.mxu0 %v1333_v1  ;;  %1253 = vmatprep.subr.bf16.mxu1 %v1333_v1 }
  0xba   : > { %905 = vmatpush2.bf16.msra.mxu0 %v1322_v36  ;;  %1265 = vmatpush2.bf16.msra.mxu1 %v1322_v36 }
  0xbb   : > { %906 = vmatprep.subr.bf16.mxu0 %v1333_v1  ;;  %1254 = vmatprep.subr.bf16.mxu1 %v1333_v1 }
  0xbe   : > { %907 = vmatpush2.bf16.msra.mxu0 %v1323_v38  ;;  %1266 = vmatpush2.bf16.msra.mxu1 %v1323_v38 }
  0xbf   : > { %908 = vmatprep.subr.bf16.mxu0 %v1333_v1  ;;  %1255 = vmatprep.subr.bf16.mxu1 %v1333_v1 }
  0xc2   : > { %909 = vmatpush2.bf16.msra.mxu0 %v1324_v21  ;;  %1267 = vmatpush2.bf16.msra.mxu1 %v1324_v21 }
  0xc5   : > { %911 = vmatmul.mubr.bf16.vlgmr.msra.gmra.mxu0 %v1618_v18  ;;  %927 = vmatmul.mubr.bf16.vlgmr.msra.gmra.mxu1 %v1142_v31 }
  0xc6   : > { %1199 = vmatprep.mubr.msk.bf16.mxu0 %vm343_vm0, %v1552_v46  ;;  %1201 = vmatprep.mubr.msk.bf16.mxu1 %vm343_vm0, %v1592_v60 }
  0xcd   : > { %919 = vmatmul.mubr.bf16.gmra.mxu0 %v1636_v25  ;;  %935 = vmatmul.mubr.bf16.gmra.mxu1 %v1184_v10 }
 0x155   : > { %v580_v1 = vpop.f32.mrf.mxu0  ;;  %v741_v15 = vpop.f32.mrf.mxu1 }
 0x156   : > { %v742_v8 = vadd.f32 %v741_v15, %v580_v1 }
 0x157   : > { %v582_v42 = vpop.f32.mrf.mxu0  ;;  %v743_v43 = vpop.f32.mrf.mxu1 }
 0x159   : > { %v583_v14 = vpop.f32.mrf.mxu0  ;;  %v744_v44 = vpop.f32.mrf.mxu1 }
 0x15a   : > { %v745_v12 = vadd.f32 %v744_v44, %v583_v14 }
 0x15b   : > { %v585_v45 = vpop.f32.mrf.mxu0  ;;  %v746_v32 = vpop.f32.mrf.mxu1 }
 0x15d   : > { %v588_v47 = vpop.f32.mrf.mxu0  ;;  %v749_v46 = vpop.f32.mrf.mxu1 }
 0x15e   : > { %v750_v29 = vadd.f32 %v749_v46, %v588_v47 }
 0x15f   : > { %v590_v37 = vpop.f32.mrf.mxu0  ;;  %v751_v48 = vpop.f32.mrf.mxu1 }
 0x161   : > { %v591_v50 = vpop.f32.mrf.mxu0  ;;  %v752_v51 = vpop.f32.mrf.mxu1 }
 0x162   : > { %v753_v15 = vadd.f32 %v752_v51, %v591_v50 }
 0x163   : > { %v754_v52 = vpop.f32.mrf.mxu1  ;;  %v593_v55 = vpop.f32.mrf.mxu0 }
 0x165   : > { %v757_v53 = vpop.f32.mrf.mxu1  ;;  %v596_v54 = vpop.f32.mrf.mxu0 }
 0x166   : > { %v758_v11 = vadd.f32 %v757_v53, %v596_v54 }
 0x167   : > { %v759_v56 = vpop.f32.mrf.mxu1  ;;  %v598_v57 = vpop.f32.mrf.mxu0 }
 0x169   : > { %v760_v58 = vpop.f32.mrf.mxu1  ;;  %v599_v59 = vpop.f32.mrf.mxu0 }
 0x16a   : > { %v761_v20 = vadd.f32 %v760_v58, %v599_v59 }
 0x16b   : > { %v762_v60 = vpop.f32.mrf.mxu1  ;;  %v601_v62 = vpop.f32.mrf.mxu0 }
 0x16d   : > { %v765_v63 = vpop.f32.mrf.mxu1  ;;  %v604_v0 = vpop.f32.mrf.mxu0 }
 0x16e   : > { %v766_v30 = vadd.f32 %v765_v63, %v604_v0 }
 0x16f   : > { %v767_v2 = vpop.f32.mrf.mxu1  ;;  %v606_v3 = vpop.f32.mrf.mxu0 }
 0x171   : > { %v768_v4 = vpop.f32.mrf.mxu1  ;;  %v607_v5 = vpop.f32.mrf.mxu0 }
 0x172   : > { %v769_v42 = vadd.f32 %v768_v4, %v607_v5 }
 0x173   : > { %v770_v6 = vpop.f32.mrf.mxu1  ;;  %v609_v61 = vpop.f32.mrf.mxu0 }
 0x185   : > { %v912_v7 = vpop.f32.mrf.mxu0  ;;  %v928_v9 = vpop.f32.mrf.mxu1 }
 0x186   : > { %v943_v16 = vadd.f32 %v912_v7, %v742_v8  ;;  %v947_v17 = vadd.f32 %v928_v9, %v758_v11 }
 0x187   : > { %v914_v18 = vpop.f32.mrf.mxu0  ;;  %v930_v19 = vpop.f32.mrf.mxu1 }
 0x188   : > { %v958_v22 = vadd.f32 %v1202_v13, %v943_v16  ;;  %v962_v24 = vadd.f32 %v1202_v13, %v947_v17 }
 0x189   : > { %v915_v25 = vpop.f32.mrf.mxu0  ;;  %v931_v26 = vpop.f32.mrf.mxu1 }
 0x18a   : > { %v944_v23 = vadd.f32 %v915_v25, %v745_v12  ;;  %v948_v33 = vadd.f32 %v931_v26, %v761_v20  ;;  %v966_v39 = vmax.f32 %v958_v22, 0.0  ;;  %v970_v49 = vmax.f32 %v962_v24, 0.0 }
 0x18b   : > { %v917_v27 = vpop.f32.mrf.mxu0  ;;  %v933_v28 = vpop.f32.mrf.mxu1 }
 0x18c   : > { %v959_v31 = vadd.f32 %v1202_v13, %v944_v23  ;;  %v963_v34 = vadd.f32 %v1202_v13, %v948_v33 }
 0x18d   : > { %v920_v35 = vpop.f32.mrf.mxu0  ;;  %v936_v36 = vpop.f32.mrf.mxu1 }
 0x18e   : > { %v967_v38 = vmax.f32 %v959_v31, 0.0  ;;  %v971_v21 = vmax.f32 %v963_v34, 0.0  ;;  %v945_v40 = vadd.f32 %v920_v35, %v750_v29  ;;  %v949_v41 = vadd.f32 %v936_v36, %v766_v30 }
 0x18f   : > { %v922_v10 = vpop.f32.mrf.mxu0  ;;  %v938_v1 = vpop.f32.mrf.mxu1 }
 0x190   : > { %v1224_v43 = vpack.c.bf16 %v967_v38, %v966_v39  ;;  %v1234_v14 = vpack.c.bf16 %v971_v21, %v970_v49  ;;  %v960_v32 = vadd.f32 %v1202_v13, %v945_v40  ;;  %v964_v47 = vadd.f32 %v1202_v13, %v949_v41 }
 0x191   : > { %v923_v44 = vpop.f32.mrf.mxu0  ;;  %v939_v45 = vpop.f32.mrf.mxu1 }
 0x192   : > { %1225 = vst [vmem:[%s170_s22] sm:$0xff] %v1224_v43   ;;  %1242 = vst [vmem:[%s170_s22 + $0x10] sm:$0xff] %v1234_v14   ;;  %v946_v46 = vadd.f32 %v923_v44, %v753_v15  ;;  %v950_v37 = vadd.f32 %v939_v45, %v769_v42  ;;  %v968_v54 = vmax.f32 %v960_v32, 0.0  ;;  %v972_v56 = vmax.f32 %v964_v47, 0.0 }
 0x193   : > { %v925_v48 = vpop.f32.mrf.mxu0  ;;  %v941_v52 = vpop.f32.mrf.mxu1 }
 0x194   : > { %v961_v55 = vadd.f32 %v1202_v13, %v946_v46  ;;  %v965_v53 = vadd.f32 %v1202_v13, %v950_v37 }
 0x196   : > { %v969_v57 = vmax.f32 %v961_v55, 0.0  ;;  %v973_v58 = vmax.f32 %v965_v53, 0.0 }
 0x198   : > { %v1229_v50 = vpack.c.bf16 %v969_v57, %v968_v54  ;;  %v1239_v51 = vpack.c.bf16 %v973_v58, %v972_v56 }
 0x19a   : > { %1241 = vst [vmem:[%s170_s22 + $0x8] sm:$0xff] %v1229_v50   ;;  %1243 = vst [vmem:[%s170_s22 + $0x18] sm:$0xff] %v1239_v51  }
 0x19b PF: > { %s13_s12 = sadd.s32 1, %s1331_s12  }
 0x19c   : > { %p10_p5 = scmp.ge.s32.totalorder %s13_s12, 4  }
 0x19e   :  { %12 = sbr.rel (!%p10_p5) target bundleno = 1 (0x1), region = 64 }

// kernel: encoder_forward.13
= control target key start
LH: loop header
LB: loop body
LE: loop exit
PB: predicated region body
PF: predicated region fallthrough
CT: control target
= control target key end

     0   :  { %s2060_s12 = smov 0   ;;  %s2548_s0 = inlined_call_operand.vmem [shape: bf16[2,10,10,128], index: 0, kind: input, shape index: {}]   ;;  %s2549_s1 = inlined_call_operand.vmem [shape: bf16[3,384,128], index: 1, kind: input, shape index: {}]   ;;  %s2550_s2 = inlined_call_operand.vmem [shape: f32[1,128], index: 2, kind: input, shape index: {}]   ;;  %s2551_s3 = inlined_call_operand.vmem [shape: bf16[32,128], index: 3, kind: output, shape index: {}]  }
   0x1 LB: > { %s2066_s13 = sadd.s32 4294967295, %s2038_s12   ;;  %p1483_p0 = scmp.ge.s32.totalorder %s2038_s12, 1  ;;  %s2038_s12 = sphi %s2060_s12, %s13_s12  }
   0x2   : > { %p137_p1 = scmp.lt.s32.totalorder %s2038_s12, 3 }
   0x4   : > { %p138_p2 = pnand %p1483_p0, %p137_p1 }
   0x5   : > { %p161_p3 = scmp.lt.s32.totalorder (!%p138_p2), %s2066_s13, 1  ;;  %s1485_s18 = sshll.u32 (!%p138_p2), %s2066_s13, 1 }
   0x6   : > { %141 = sbr.rel (%p138_p2) target bundleno = 356 (0x164), region = 32  ;;  %p167_p4 = scmp.lt.s32.totalorder (!%p138_p2), %s1485_s18, 3 }
   0xb   : > { %v1941_v0 = vld [vmem:[%s2549_s1 + $0x138] sm:$0xff]   ;;  %v1944_v3 = vld [vmem:[%s2549_s1 + $0x130] sm:$0xff]   ;;  %v1947_v6 = vld [vmem:[%s2549_s1 + $0x128] sm:$0xff]   ;;  %s162_s15 = scalar_select %p161_p3, %s2066_s13, 1 }
   0xc   : > { %v1942_v1 = vld [vmem:[%s2549_s1 + $0xf8] sm:$0xff]   ;;  %1704 = vmatprep.subr.bf16.mxu0 %v1941_v0  ;;  %v1945_v4 = vld [vmem:[%s2549_s1 + $0xf0] sm:$0xff]   ;;  %v1948_v7 = vld [vmem:[%s2549_s1 + $0xe8] sm:$0xff]   ;;  %s2553_s18 = smov (!%p167_p4, %s1485_s18), 3 }
   0xd   : > { %v1943_v2 = vld [vmem:[%s2549_s1 + $0x178] sm:$0xff]   ;;  %1705 = vmatpush3.bf16.msra.mxu0 %v1942_v1  ;;  %v1946_v5 = vld [vmem:[%s2549_s1 + $0x170] sm:$0xff]   ;;  %v1949_v8 = vld [vmem:[%s2549_s1 + $0x168] sm:$0xff]   ;;  %s1932_s22 = smul.u32 80, %s162_s15  ;;  %s1486_s19 = sshll.u32 %s2553_s18, 2 }
   0xe   : > { %1860 = vmatprep.subr.bf16.mxu1 %v1943_v2  ;;  %1706 = vmatprep.subr.bf16.mxu0 %v1944_v3  ;;  %v1950_v9 = vld [vmem:[%s2549_s1 + $0x120] sm:$0xff]   ;;  %v1953_v12 = vld [vmem:[%s2549_s1 + $0x118] sm:$0xff]   ;;  %v1956_v15 = vld [vmem:[%s2549_s1 + $0x110] sm:$0xff]  }
   0xf   : > { %1861 = vmatpush3.bf16.msra.mxu1 %v1943_v2  ;;  %v1951_v10 = vld [vmem:[%s2549_s1 + $0xe0] sm:$0xff]   ;;  %v1955_v13 = vld [vmem:[%s2549_s1 + $0x158] sm:$0xff]   ;;  %v1958_v16 = vld [vmem:[%s2549_s1 + $0x150] sm:$0xff]   ;;  %s2135_s6 = scalar_lea.vmem %s2548_s0, %s1932_s22  ;;  %s170_s22 = scalar_lea.vmem %s2551_s3, %s1486_s19 }
  0x10   : > { %1862 = vmatprep.subr.bf16.mxu1 %v1946_v5  ;;  %v1952_v11 = vld [vmem:[%s2549_s1 + $0x160] sm:$0xff]   ;;  %v1954_v14 = vld [vmem:[%s2549_s1 + $0xd8] sm:$0xff]   ;;  %v1957_v17 = vld [vmem:[%s2549_s1 + $0xd0] sm:$0xff]  }
  0x11   : > { %1707 = vmatpush3.bf16.msra.mxu0 %v1945_v4  ;;  %v1959_v18 = vld [vmem:[%s2549_s1 + $0x108] sm:$0xff]   ;;  %v1962_v21 = vld [vmem:[%s2549_s1 + $0x100] sm:$0xff]   ;;  %v2148_v24 = vld [vmem:[%s2135_s6 + $0x10] sm:$0xf] }
  0x12   : > { %1708 = vmatprep.subr.bf16.mxu0 %v1947_v6  ;;  %v1960_v19 = vld [vmem:[%s2549_s1 + $0xc8] sm:$0xff]   ;;  %v178_v25 = vld [vmem:[%s2135_s6 + $0x14] sm:$0x1]  ;;  %v1964_v27 = vld [vmem:[%s2549_s1 + $0x140] sm:$0xff]  }
  0x13   : > { %1863 = vmatpush3.bf16.msra.mxu1 %v1946_v5  ;;  %v1961_v20 = vld [vmem:[%s2549_s1 + $0x148] sm:$0xff]   ;;  %v2158_v28 = vcombine.low %v2148_v24, %v178_v25  ;;  %v2161_v29 = vld [vmem:[%s2135_s6 + $0x18] sm:$0xf]  ;;  %v180_v30 = vld [vmem:[%s2135_s6 + $0x1c] sm:$0x1] }
  0x14   : > { %1864 = vmatprep.subr.bf16.mxu1 %v1949_v8  ;;  %v2144_v22 = vld [vmem:[%s2135_s6 + $0x8] sm:$0xf]  ;;  %v176_v23 = vld [vmem:[%s2135_s6 + $0xc] sm:$0x1]  ;;  %v1963_v31 = vld [vmem:[%s2549_s1 + $0xc0] sm:$0xff]   ;;  %v2170_v34 = vcombine.low %v2161_v29, %v180_v30 }
  0x15   : > { %1709 = vmatpush3.bf16.msra.mxu0 %v1948_v7  ;;  %v2152_v26 = vcombine.low %v2144_v22, %v176_v23  ;;  %v258_v36 = vshrl.u32 %v2158_v28, 16  ;;  %v260_v37 = vshll.u32 %v2158_v28, 16  ;;  %v1968_v38 = vld [vmem:[%s2549_s1 + $0x78] sm:$0xff]   ;;  %v315_v39 = vrot.slane %v2158_v28, 1  ;;  %v2180_v41 = vld [vmem:[%s2135_s6 + $0x20] sm:$0xf] }
  0x16   : > { %1710 = vmatprep.subr.bf16.mxu0 %v1950_v9  ;;  %v182_v42 = vld [vmem:[%s2135_s6 + $0x24] sm:$0x1]  ;;  %v1972_v43 = vld [vmem:[%s2549_s1 + $0xb8] sm:$0xff]   ;;  %v316_v45 = vrot.slane %v2170_v34, 1  ;;  %v1545_v51 = vcombine.low %v2144_v22, %v2148_v24  ;;  %v1975_v53 = vld [vmem:[%s2549_s1 + $0xb0] sm:$0xff]   ;;  %v265_v54 = vshrl.u32 %v2170_v34, 16  ;;  %v1548_v9 = vcombine.low %v2161_v29, %v2180_v41 }
  0x17   : > { %1865 = vmatpush3.bf16.msra.mxu1 %v1949_v8  ;;  %v251_v32 = vshrl.u32 %v2152_v26, 16  ;;  %v253_v33 = vshll.u32 %v2152_v26, 16  ;;  %v314_v35 = vrot.slane %v2152_v26, 1  ;;  %v262_v44 = vrot.slane %v260_v37, 1  ;;  %v1970_v52 = vld [vmem:[%s2549_s1 + $0x38] sm:$0xff]   ;;  %v1973_v60 = vld [vmem:[%s2549_s1 + $0x70] sm:$0xff]  }
  0x18   : > { %1866 = vmatprep.subr.bf16.mxu1 %v1952_v11  ;;  %v2192_v47 = vcombine.low %v2180_v41, %v182_v42  ;;  %v267_v55 = vshll.u32 %v2170_v34, 16  ;;  %v1974_v63 = vld [vmem:[%s2549_s1 + $0x30] sm:$0xff]   ;;  %v1977_v2 = vld [vmem:[%s2549_s1 + $0x68] sm:$0xff]   ;;  %v188_v23 = vld [vmem:[%s2135_s6 + $0x3c] sm:$0x1] }
  0x19   : > { %1711 = vmatpush3.bf16.msra.mxu0 %v1951_v10  ;;  %v255_v40 = vrot.slane %v253_v33, 1  ;;  %v1547_v46 = vcombine.low %v314_v35, %v315_v39  ;;  %v2196_v49 = vor.u32 %v262_v44, %v258_v36  ;;  %v1979_v3 = vld [vmem:[%s2549_s1 + $0xa8] sm:$0xff]   ;;  %v2243_v8 = vld [vmem:[%s2135_s6 + $0x30] sm:$0xf]  ;;  %v186_v10 = vld [vmem:[%s2135_s6 + $0x34] sm:$0x1] }
  0x1a   : > { %1712 = vmatprep.subr.bf16.mxu0 %v1953_v12  ;;  %v317_v50 = vrot.slane %v2192_v47, 1  ;;  %v272_v58 = vshrl.u32 %v2192_v47, 16  ;;  %v274_v59 = vshll.u32 %v2192_v47, 16  ;;  %v269_v61 = vrot.slane %v267_v55, 1  ;;  %v1978_v5 = vld [vmem:[%s2549_s1 + $0x28] sm:$0xff]   ;;  %v1982_v12 = vld [vmem:[%s2549_s1 + $0xa0] sm:$0xff]  }
  0x1b   : > { %1867 = vmatpush3.bf16.msra.mxu1 %v1952_v11  ;;  %v2194_v48 = vor.u32 %v255_v40, %v251_v32  ;;  %1876 = vmatprep.mubr.bf16.mxu1 %v1547_v46  ;;  %v2239_v6 = vld [vmem:[%s2135_s6 + $0x28] sm:$0xf]  ;;  %v184_v7 = vld [vmem:[%s2135_s6 + $0x2c] sm:$0x1]  ;;  %v1981_v25 = vld [vmem:[%s2549_s1 + $0x20] sm:$0xff]  }
  0x1c   : > { %1868 = vmatprep.subr.bf16.mxu1 %v1955_v13  ;;  %v1550_v57 = vcombine.low %v316_v45, %v317_v50  ;;  %v276_v62 = vrot.slane %v274_v59, 1  ;;  %v2223_v0 = vor.u32 %v269_v61, %v265_v54  ;;  %v2249_v11 = vcombine.low %v2239_v6, %v184_v7  ;;  %v2274_v30 = vld [vmem:[%s2135_s6 + $0x40] sm:$0xf]  ;;  %v1986_v42 = vld [vmem:[%s2549_s1 + $0x58] sm:$0xff]   ;;  %v2006_v28 = vld [vmem:[%s2549_s1 + $0x1f0] sm:$0xff]  }
  0x1d   : > { %1713 = vmatpush3.bf16.msra.mxu0 %v1954_v14  ;;  %v1546_v56 = vcombine.low %v2194_v48, %v2196_v49  ;;  %v1980_v14 = vld [vmem:[%s2549_s1 + $0x60] sm:$0xff]   ;;  %v1987_v46 = vld [vmem:[%s2549_s1 + $0x18] sm:$0xff]   ;;  %v2010_v47 = vld [vmem:[%s2549_s1 + $0x1e8] sm:$0xff]  }
  0x1e   : > { %1714 = vmatprep.subr.bf16.mxu0 %v1956_v15  ;;  %v2225_v1 = vor.u32 %v276_v62, %v272_v58  ;;  %v279_v15 = vshrl.u32 %v2249_v11, 16  ;;  %v2376_v34 = vcombine.low %v2196_v49, %v2223_v0  ;;  %v1584_v49 = vcombine.low %v2148_v24, %v2161_v29  ;;  %v2014_v24 = vld [vmem:[%s2549_s1 + $0x1a0] sm:$0xff]   ;;  %v2019_v29 = vld [vmem:[%s2549_s1 + $0x218] sm:$0xff]  }
  0x1f   : > { %1869 = vmatpush3.bf16.msra.mxu1 %v1955_v13  ;;  %638 = vmatprep.mubr.bf16.mxu0 %v1546_v56  ;;  %v2255_v13 = vcombine.low %v2243_v8, %v186_v10  ;;  %v174_v10 = vld [vmem:[%s2135_s6 + $0x4] sm:$0x1] }
  0x20   : > { %1870 = vmatprep.subr.bf16.mxu1 %v1958_v16  ;;  %v1549_v4 = vcombine.low %v2223_v0, %v2225_v1  ;;  %v2015_v0 = vld [vmem:[%s2549_s1 + $0x220] sm:$0xff]  }
  0x21   : > { %1715 = vmatpush3.bf16.msra.mxu0 %v1957_v17  ;;  %v318_v17 = vrot.slane %v2249_v11, 1 }
  0x22   : > { %1716 = vmatprep.subr.bf16.mxu0 %v1959_v18  ;;  %v2264_v18 = vld [vmem:[%s2135_s6 + $0x38] sm:$0xf] }
  0x23   : > { %1871 = vmatpush3.bf16.msra.mxu1 %v1958_v16  ;;  %v281_v16 = vshll.u32 %v2249_v11, 16  ;;  %v2278_v32 = vcombine.low %v2264_v18, %v188_v23  ;;  %v2013_v11 = vld [vmem:[%s2549_s1 + $0x1e0] sm:$0xff]  }
  0x24   : > { %1872 = vmatprep.subr.bf16.mxu1 %v1961_v20 }
  0x25   : > { %1717 = vmatpush3.bf16.msra.mxu0 %v1960_v19  ;;  %v286_v19 = vshrl.u32 %v2255_v13, 16  ;;  %v293_v54 = vshrl.u32 %v2278_v32, 16  ;;  %v295_v55 = vshll.u32 %v2278_v32, 16 }
  0x26   : > { %1718 = vmatprep.subr.bf16.mxu0 %v1962_v21  ;;  %v319_v21 = vrot.slane %v2255_v13, 1 }
  0x27   : > { %1873 = vmatpush3.bf16.msra.mxu1 %v1961_v20  ;;  %v288_v20 = vshll.u32 %v2255_v13, 16  ;;  %v297_v61 = vrot.slane %v295_v55, 1  ;;  %v2024_v55 = vld [vmem:[%s2549_s1 + $0x1c8] sm:$0xff]  }
  0x28   : > { %1874 = vmatprep.subr.bf16.mxu1 %v1964_v27  ;;  %v1553_v36 = vcombine.low %v318_v17, %v319_v21 }
  0x29   : > { %1719 = vmatpush3.bf16.msra.mxu0 %v1963_v31  ;;  %v190_v31 = vld [vmem:[%s2135_s6 + $0x44] sm:$0x1]  ;;  %v290_v33 = vrot.slane %v288_v20, 1 }
  0x2a   : > { %1756 = vmatprep.subr.bf16.mxu0 %v1968_v38  ;;  %v2285_v37 = vcombine.low %v2274_v30, %v190_v31  ;;  %v1990_v38 = vld [vmem:[%s2549_s1 + $0x98] sm:$0xff]  }
  0x2b   : > { %1875 = vmatpush3.bf16.msra.mxu1 %v1964_v27  ;;  %v283_v27 = vrot.slane %v281_v16, 1  ;;  %v2296_v44 = vor.u32 %v290_v33, %v286_v19  ;;  %v2000_v16 = vld [vmem:[%s2549_s1 + $0x80] sm:$0xff]  }
  0x2c   : > { %1884 = vmatprep.subr.bf16.mxu1 %v1972_v43  ;;  %639 = vmatmul.mubr.bf16.vlgmr.msra.gmra.mxu0 %v1545_v51  ;;  %v321_v51 = vrot.slane %v2285_v37, 1  ;;  %v300_v58 = vshrl.u32 %v2285_v37, 16  ;;  %v302_v59 = vshll.u32 %v2285_v37, 16  ;;  %v1998_v19 = vld [vmem:[%s2549_s1 + $0x40] sm:$0xff]  }
  0x2d   : > { %1757 = vmatpush3.bf16.msra.mxu0 %v1970_v52  ;;  %646 = vmatprep.mubr.bf16.mxu0 %v1549_v4  ;;  %v2290_v40 = vor.u32 %v283_v27, %v279_v15  ;;  %v1993_v52 = vld [vmem:[%s2549_s1 + $0x90] sm:$0xff]   ;;  %v1995_v4 = vld [vmem:[%s2549_s1 + $0x48] sm:$0xff]   ;;  %v1999_v27 = vld [vmem:[%s2549_s1] sm:$0xff]  }
  0x2e   : > { %1877 = vmatmul.mubr.bf16.vlgmr.msra.gmra.mxu1 %v1550_v57  ;;  %1758 = vmatprep.subr.bf16.mxu0 %v1973_v60  ;;  %v1991_v60 = vld [vmem:[%s2549_s1 + $0x50] sm:$0xff]   ;;  %v304_v62 = vrot.slane %v302_v59, 1  ;;  %v192_v59 = vld [vmem:[%s2135_s6 + $0x4c] sm:$0x1] }
  0x2f   : > { %1885 = vmatpush3.bf16.msra.mxu1 %v1972_v43  ;;  %v320_v43 = vrot.slane %v2278_v32, 1  ;;  %1880 = vmatprep.mubr.bf16.mxu1 %v1553_v36  ;;  %v1552_v56 = vcombine.low %v2290_v40, %v2296_v44  ;;  %v2005_v36 = vld [vmem:[%s2549_s1 + $0x238] sm:$0xff]   ;;  %v1588_v13 = vcombine.low %v2225_v1, %v2290_v40  ;;  %v1587_v1 = vcombine.low %v2180_v41, %v2239_v6  ;;  %v2022_v40 = vld [vmem:[%s2549_s1 + $0x210] sm:$0xff]  }
  0x30   : > { %1886 = vmatprep.subr.bf16.mxu1 %v1975_v53  ;;  %v2018_v32 = vld [vmem:[%s2549_s1 + $0x198] sm:$0xff]  }
  0x31   : > { %1759 = vmatpush3.bf16.msra.mxu0 %v1974_v63  ;;  %v1556_v57 = vcombine.low %v320_v43, %v321_v51  ;;  %v1992_v63 = vld [vmem:[%s2549_s1 + $0x10] sm:$0xff]  }
  0x32   : > { %1760 = vmatprep.subr.bf16.mxu0 %v1977_v2  ;;  %v2323_v2 = vor.u32 %v297_v61, %v293_v54  ;;  %v2020_v54 = vld [vmem:[%s2549_s1 + $0x1d0] sm:$0xff]  }
  0x33   : > { %1887 = vmatpush3.bf16.msra.mxu1 %v1975_v53  ;;  %v1551_v53 = vcombine.low %v2239_v6, %v2243_v8  ;;  %v2021_v6 = vld [vmem:[%s2549_s1 + $0x190] sm:$0xff]  }
  0x34   : > { %1888 = vmatprep.subr.bf16.mxu1 %v1979_v3  ;;  %647 = vmatmul.mubr.bf16.gmra.mxu0 %v1548_v9  ;;  %v173_v9 = vld [vmem:[%s2135_s6] sm:$0xf]  ;;  %v1591_v41 = vcombine.low %v2296_v44, %v2323_v2  ;;  %v1590_v44 = vcombine.low %v2243_v8, %v2264_v18 }
  0x35   : > { %1761 = vmatpush3.bf16.msra.mxu0 %v1978_v5  ;;  %654 = vmatprep.mubr.bf16.mxu0 %v1552_v56  ;;  %v1997_v5 = vld [vmem:[%s2549_s1 + $0x88] sm:$0xff]   ;;  %v1487_v15 = vcombine.low %v173_v9, %v174_v10  ;;  %v2028_v8 = vld [vmem:[%s2549_s1 + $0x180] sm:$0xff]  }
  0x36   : > { %1762 = vmatprep.subr.bf16.mxu0 %v1980_v14  ;;  %1881 = vmatmul.mubr.bf16.gmra.mxu1 %v1556_v57  ;;  %v1996_v14 = vld [vmem:[%s2549_s1 + $0x8] sm:$0xff]   ;;  %v2029_v57 = vld [vmem:[%s2549_s1 + $0x200] sm:$0xff]  }
  0x37   : > { %1889 = vmatpush3.bf16.msra.mxu1 %v1979_v3  ;;  %v2325_v3 = vor.u32 %v304_v62, %v300_v58  ;;  %v244_v20 = vshrl.u32 %v1487_v15, 16  ;;  %v246_v23 = vshll.u32 %v1487_v15, 16  ;;  %v2025_v56 = vld [vmem:[%s2549_s1 + $0x188] sm:$0xff]   ;;  %v2027_v58 = vld [vmem:[%s2549_s1 + $0x1c0] sm:$0xff]  }
  0x38   : > { %1890 = vmatprep.subr.bf16.mxu1 %v1982_v12 }
  0x39   : > { %1763 = vmatpush3.bf16.msra.mxu0 %v1981_v25  ;;  %v1555_v7 = vcombine.low %v2323_v2, %v2325_v3  ;;  %v313_v25 = vrot.slane %v1487_v15, 1  ;;  %v248_v31 = vrot.slane %v246_v23, 1 }
  0x3a   : > { %1764 = vmatprep.subr.bf16.mxu0 %v1986_v42  ;;  %v2003_v42 = vld [vmem:[%s2549_s1 + $0x1f8] sm:$0xff]  }
  0x3b   : > { %1891 = vmatpush3.bf16.msra.mxu1 %v1982_v12  ;;  %v1554_v12 = vcombine.low %v2264_v18, %v2274_v30  ;;  %v1583_v33 = vcombine.low %v313_v25, %v314_v35  ;;  %v1581_v35 = vcombine.low %v173_v9, %v2144_v22  ;;  %v2382_v22 = vcombine.low %v317_v50, %v318_v17  ;;  %v2011_v50 = vld [vmem:[%s2549_s1 + $0x1a8] sm:$0xff]   ;;  %v2017_v17 = vld [vmem:[%s2549_s1 + $0x1d8] sm:$0xff]  }
  0x3c   : > { %1892 = vmatprep.subr.bf16.mxu1 %v1990_v38  ;;  %655 = vmatmul.mubr.bf16.gmra.mxu0 %v1551_v53  ;;  %v2008_v53 = vld [vmem:[%s2549_s1 + $0x230] sm:$0xff]  }
  0x3d   : > { %1765 = vmatpush3.bf16.msra.mxu0 %v1987_v46  ;;  %662 = vmatprep.mubr.bf16.mxu0 %v1555_v7  ;;  %v1586_v46 = vcombine.low %v315_v39, %v316_v45  ;;  %v2007_v39 = vld [vmem:[%s2549_s1 + $0x1b0] sm:$0xff]   ;;  %v2012_v45 = vld [vmem:[%s2549_s1 + $0x228] sm:$0xff]  }
  0x3e   : > { %1766 = vmatprep.subr.bf16.mxu0 %v1991_v60  ;;  %1900 = vmatprep.mubr.bf16.mxu1 %v1583_v33 }
  0x3f   : > { %1893 = vmatpush3.bf16.msra.mxu1 %v1990_v38  ;;  %v249_v38 = vor.u32 %v248_v31, %v244_v20 }
  0x40   : > { %1894 = vmatprep.subr.bf16.mxu1 %v1993_v52 }
  0x41   : > { %1767 = vmatpush3.bf16.msra.mxu0 %v1992_v63  ;;  %v1582_v26 = vcombine.low %v249_v38, %v2194_v48  ;;  %v1592_v48 = vcombine.low %v319_v21, %v320_v43  ;;  %v191_v21 = vld [vmem:[%s2135_s6 + $0x48] sm:$0xf] }
  0x42   : > { %1768 = vmatprep.subr.bf16.mxu0 %v1995_v4  ;;  %v1665_v43 = vcombine.low %v2274_v30, %v191_v21  ;;  %v2026_v30 = vld [vmem:[%s2549_s1 + $0x208] sm:$0xff]   ;;  %v1496_v18 = vcombine.low %v191_v21, %v192_v59 }
  0x43   : > { %1895 = vmatpush3.bf16.msra.mxu1 %v1993_v52  ;;  %v2004_v52 = vld [vmem:[%s2549_s1 + $0x1b8] sm:$0xff]  }
  0x44   : > { %1896 = vmatprep.subr.bf16.mxu1 %v1997_v5  ;;  %663 = vmatmul.mubr.bf16.gmra.mxu0 %v1554_v12  ;;  %v322_v60 = vrot.slane %v1496_v18, 1  ;;  %v309_v61 = vshll.u32 %v1496_v18, 16  ;;  %v307_v63 = vshrl.u32 %v1496_v18, 16 }
  0x45   : > { %1769 = vmatpush3.bf16.msra.mxu0 %v1996_v14  ;;  %936 = vmatprep.mubr.bf16.mxu0 %v1582_v26 }
  0x46   : > { %1770 = vmatprep.subr.bf16.mxu0 %v1998_v19  ;;  %v1667_v62 = vcombine.low %v321_v51, %v322_v60  ;;  %v311_v2 = vrot.slane %v309_v61, 1 }
  0x47   : > { %1897 = vmatpush3.bf16.msra.mxu1 %v1997_v5 }
  0x48   : > { %1898 = vmatprep.subr.bf16.mxu1 %v2000_v16  ;;  %v312_v4 = vor.u32 %v311_v2, %v307_v63 }
  0x49   : > { %1771 = vmatpush3.bf16.msra.mxu0 %v1999_v27 }
  0x4a   : > { %1808 = vmatprep.subr.bf16.mxu0 %v2003_v42  ;;  %v1666_v5 = vcombine.low %v2325_v3, %v312_v4 }
  0x4b   : > { %1899 = vmatpush3.bf16.msra.mxu1 %v2000_v16 }
  0x4c   : > { %1908 = vmatprep.subr.bf16.mxu1 %v2005_v36  ;;  %937 = vmatmul.mubr.bf16.vlgmr.msra.gmra.mxu0 %v1581_v35 }
  0x4d   : > { %1809 = vmatpush3.bf16.msra.mxu0 %v2004_v52  ;;  %944 = vmatprep.mubr.bf16.mxu0 %v2376_v34 }
  0x4e   : > { %1901 = vmatmul.mubr.bf16.vlgmr.msra.gmra.mxu1 %v1586_v46  ;;  %1810 = vmatprep.subr.bf16.mxu0 %v2006_v28 }
  0x4f   : > { %1909 = vmatpush3.bf16.msra.mxu1 %v2005_v36  ;;  %1904 = vmatprep.mubr.bf16.mxu1 %v2382_v22 }
  0x50   : > { %1910 = vmatprep.subr.bf16.mxu1 %v2008_v53 }
  0x51   : > { %1811 = vmatpush3.bf16.msra.mxu0 %v2007_v39 }
  0x52   : > { %1812 = vmatprep.subr.bf16.mxu0 %v2010_v47 }
  0x53   : > { %1911 = vmatpush3.bf16.msra.mxu1 %v2008_v53 }
  0x54   : > { %1912 = vmatprep.subr.bf16.mxu1 %v2012_v45  ;;  %945 = vmatmul.mubr.bf16.gmra.mxu0 %v1584_v49 }
  0x55   : > { %1813 = vmatpush3.bf16.msra.mxu0 %v2011_v50  ;;  %952 = vmatprep.mubr.bf16.mxu0 %v1588_v13 }
  0x56   : > { %1905 = vmatmul.mubr.bf16.gmra.mxu1 %v1592_v48  ;;  %1814 = vmatprep.subr.bf16.mxu0 %v2013_v11 }
  0x57   : > { %1913 = vmatpush3.bf16.msra.mxu1 %v2012_v45  ;;  %1924 = vmatprep.mubr.bf16.mxu1 %v1586_v46 }
  0x58   : > { %1914 = vmatprep.subr.bf16.mxu1 %v2015_v0 }
  0x59   : > { %1815 = vmatpush3.bf16.msra.mxu0 %v2014_v24 }
  0x5a   : > { %1816 = vmatprep.subr.bf16.mxu0 %v2017_v17 }
  0x5b   : > { %1915 = vmatpush3.bf16.msra.mxu1 %v2015_v0 }
  0x5c   : > { %1916 = vmatprep.subr.bf16.mxu1 %v2019_v29  ;;  %953 = vmatmul.mubr.bf16.gmra.mxu0 %v1587_v1 }
  0x5d   : > { %1817 = vmatpush3.bf16.msra.mxu0 %v2018_v32  ;;  %960 = vmatprep.mubr.bf16.mxu0 %v1591_v41 }
  0x5e   : > { %1818 = vmatprep.subr.bf16.mxu0 %v2020_v54 }
  0x5f   : > { %1917 = vmatpush3.bf16.msra.mxu1 %v2019_v29 }
  0x60   : > { %1918 = vmatprep.subr.bf16.mxu1 %v2022_v40 }
  0x61   : > { %1819 = vmatpush3.bf16.msra.mxu0 %v2021_v6 }
  0x62   : > { %1820 = vmatprep.subr.bf16.mxu0 %v2024_v55 }
  0x63   : > { %1919 = vmatpush3.bf16.msra.mxu1 %v2022_v40 }
  0x64   : > { %1920 = vmatprep.subr.bf16.mxu1 %v2026_v30  ;;  %961 = vmatmul.mubr.bf16.gmra.mxu0 %v1590_v44 }
  0x65   : > { %1821 = vmatpush3.bf16.msra.mxu0 %v2025_v56  ;;  %1267 = vmatprep.mubr.bf16.mxu0 %v2376_v34 }
  0x66   : > { %1822 = vmatprep.subr.bf16.mxu0 %v2027_v58 }
  0x67   : > { %1921 = vmatpush3.bf16.msra.mxu1 %v2026_v30 }
  0x68   : > { %1922 = vmatprep.subr.bf16.mxu1 %v2029_v57 }
  0x69   : > { %1823 = vmatpush3.bf16.msra.mxu0 %v2028_v8 }
  0x6b   : > { %1923 = vmatpush3.bf16.msra.mxu1 %v2029_v57 }
  0x6c   : > { %1268 = vmatmul.mubr.bf16.vlgmr.msra.gmra.mxu0 %v1584_v49 }
  0x6d   : > { %1275 = vmatprep.mubr.bf16.mxu0 %v1588_v13 }
  0x6e   : > { %1925 = vmatmul.mubr.bf16.vlgmr.msra.gmra.mxu1 %v2382_v22 }
  0x6f   : > { %1928 = vmatprep.mubr.bf16.mxu1 %v1592_v48 }
  0x74   : > { %1276 = vmatmul.mubr.bf16.gmra.mxu0 %v1587_v1 }
  0x75   : > { %1283 = vmatprep.mubr.bf16.mxu0 %v1591_v41 }
  0x76   : > { %1929 = vmatmul.mubr.bf16.gmra.mxu1 %v1667_v62 }
  0x7c   : > { %1284 = vmatmul.mubr.bf16.gmra.mxu0 %v1590_v44 }
  0x7d   : > { %1291 = vmatprep.mubr.bf16.mxu0 %v1666_v5 }
  0x84   : > { %1292 = vmatmul.mubr.bf16.gmra.mxu0 %v1665_v43 }
  0xec   : > { %v1720_v7 = vpop.f32.mrf.mxu0 }
  0xee   : > { %v1721_v9 = vpop.f32.mrf.mxu0  ;;  %v2465_v15 = vpop.f32.mrf.mxu1 }
  0xef   : > { %v1722_v10 = vadd.f32 %v1721_v9, %v1720_v7 }
  0xf0   : > { %v1723_v12 = vpop.f32.mrf.mxu0  ;;  %v705_v16 = vpop.f32.mrf.mxu1 }
  0xf1   : > { %v706_v58 = vadd.f32 %v1722_v10, %v705_v16 }
  0xf2   : > { %v1724_v14 = vpop.f32.mrf.mxu0  ;;  %v2467_v25 = vpop.f32.mrf.mxu1 }
  0xf3   : > { %v1725_v59 = vadd.f32 %v1724_v14, %v1723_v12 }
  0xf4   : > { %v1726_v37 = vpop.f32.mrf.mxu0  ;;  %v708_v31 = vpop.f32.mrf.mxu1 }
  0xf5   : > { %v709_v2 = vadd.f32 %v1725_v59, %v708_v31 }
  0xf6   : > { %v1727_v51 = vpop.f32.mrf.mxu0  ;;  %v2473_v38 = vpop.f32.mrf.mxu1 }
  0xf7   : > { %v1728_v19 = vadd.f32 %v1727_v51, %v1726_v37 }
  0xf8   : > { %v1729_v20 = vpop.f32.mrf.mxu0  ;;  %v2477_v26 = vpop.f32.mrf.mxu1 }
  0xfa   : > { %v1730_v23 = vpop.f32.mrf.mxu0  ;;  %v2483_v28 = vpop.f32.mrf.mxu1 }
  0xfb   : > { %v1731_v10 = vadd.f32 %v1730_v23, %v1729_v20 }
  0xfc   : > { %v1732_v27 = vpop.f32.mrf.mxu0  ;;  %v2487_v39 = vpop.f32.mrf.mxu1 }
  0xfe   : > { %v1733_v3 = vpop.f32.mrf.mxu0 }
  0xff   : > { %v2469_v33 = vadd.f32 %v1733_v3, %v1732_v27  ;;  %v714_v3 = vadd.f32 %v2465_v15, %v1728_v19 }
 0x100   : > { %v2471_v36 = vpop.f32.mrf.mxu0 }
 0x102   : > { %v2475_v42 = vpop.f32.mrf.mxu0 }
 0x104   : > { %v1738_v46 = vpop.f32.mrf.mxu0 }
 0x106   : > { %v1739_v35 = vpop.f32.mrf.mxu0 }
 0x107   : > { %v2479_v52 = vadd.f32 %v1739_v35, %v1738_v46 }
 0x108   : > { %v2481_v53 = vpop.f32.mrf.mxu0 }
 0x10a   : > { %v2485_v34 = vpop.f32.mrf.mxu0 }
 0x10c   : > { %v1772_v22 = vpop.f32.mrf.mxu0 }
 0x10e   : > { %v1773_v45 = vpop.f32.mrf.mxu0  ;;  %v1902_v47 = vpop.f32.mrf.mxu1 }
 0x10f   : > { %v1774_v44 = vadd.f32 %v1773_v45, %v1772_v22  ;;  %v2511_v22 = vld [vmem:[%s2550_s2] ss:$0 sm:$0xff] }
 0x110   : > { %v1775_v48 = vpop.f32.mrf.mxu0  ;;  %v1003_v50 = vpop.f32.mrf.mxu1 }
 0x111   : > { %v939_v61 = vadd.f32 %v1774_v44, %v706_v58 }
 0x112   : > { %v1776_v49 = vpop.f32.mrf.mxu0  ;;  %v2489_v13 = vpop.f32.mrf.mxu1 }
 0x113   : > { %v1777_v60 = vadd.f32 %v1776_v49, %v1775_v48  ;;  %v1004_v37 = vadd.f32 %v1003_v50, %v939_v61 }
 0x114   : > { %v1778_v0 = vpop.f32.mrf.mxu0  ;;  %v1006_v17 = vpop.f32.mrf.mxu1 }
 0x115   : > { %v942_v51 = vadd.f32 %v1777_v60, %v709_v2 }
 0x116   : > { %v1779_v11 = vpop.f32.mrf.mxu0  ;;  %v2491_v21 = vpop.f32.mrf.mxu1 }
 0x117   : > { %v1780_v7 = vadd.f32 %v1779_v11, %v1778_v0  ;;  %v1007_v45 = vadd.f32 %v1006_v17, %v942_v51  ;;  %v717_v11 = vadd.f32 %v2467_v25, %v1731_v10  ;;  %v722_v17 = vadd.f32 %v2469_v33, %v2477_v26 }
 0x118   : > { %v1781_v24 = vpop.f32.mrf.mxu0  ;;  %v2493_v43 = vpop.f32.mrf.mxu1 }
 0x119   : > { %v947_v16 = vadd.f32 %v1780_v7, %v714_v3 }
 0x11a   : > { %v1782_v29 = vpop.f32.mrf.mxu0  ;;  %v2497_v6 = vpop.f32.mrf.mxu1 }
 0x11b   : > { %v1783_v48 = vadd.f32 %v1782_v29, %v1781_v24  ;;  %v1012_v23 = vadd.f32 %v1902_v47, %v947_v16  ;;  %v1737_v24 = vadd.f32 %v2475_v42, %v2471_v36 }
 0x11c   : > { %v1784_v1 = vpop.f32.mrf.mxu0  ;;  %v2503_v56 = vpop.f32.mrf.mxu1 }
 0x11d   : > { %v950_v58 = vadd.f32 %v1783_v48, %v717_v11 }
 0x11e   : > { %v1785_v32 = vpop.f32.mrf.mxu0 }
 0x11f   : > { %v1786_v59 = vadd.f32 %v1785_v32, %v1784_v1  ;;  %v1015_v7 = vadd.f32 %v2489_v13, %v950_v58 }
 0x120   : > { %v1787_v40 = vpop.f32.mrf.mxu0 }
 0x121   : > { %v955_v1 = vadd.f32 %v1786_v59, %v722_v17 }
 0x122   : > { %v1788_v54 = vpop.f32.mrf.mxu0 }
 0x123   : > { %v1020_v3 = vadd.f32 %v2493_v43, %v955_v1 }
 0x124   : > { %v2495_v41 = vpop.f32.mrf.mxu0 }
 0x126   : > { %v2499_v30 = vpop.f32.mrf.mxu0 }
 0x128   : > { %v2501_v55 = vpop.f32.mrf.mxu0 }
 0x12a   : > { %v2505_v57 = vpop.f32.mrf.mxu0 }
 0x12c   : > { %v1824_v18 = vpop.f32.mrf.mxu0 }
 0x12e   : > { %v1926_v8 = vpop.f32.mrf.mxu1  ;;  %v1825_v63 = vpop.f32.mrf.mxu0 }
 0x12f   : > { %v1826_v4 = vadd.f32 %v1825_v63, %v1824_v18 }
 0x130   : > { %v1334_v62 = vpop.f32.mrf.mxu1  ;;  %v1827_v9 = vpop.f32.mrf.mxu0 }
 0x131   : > { %v1335_v27 = vadd.f32 %v1826_v4, %v1334_v62  ;;  %v1789_v4 = vadd.f32 %v1788_v54, %v1787_v40  ;;  %v1792_v40 = vadd.f32 %v2499_v30, %v2495_v41  ;;  %v1795_v41 = vadd.f32 %v2505_v57, %v2501_v55 }
 0x132   : > { %v1927_v5 = vpop.f32.mrf.mxu1  ;;  %v1828_v46 = vpop.f32.mrf.mxu0 }
 0x133   : > { %v1365_v12 = vadd.f32 %v1335_v27, %v1004_v37  ;;  %v1829_v14 = vadd.f32 %v1828_v46, %v1827_v9 }
 0x134   : > { %v1337_v35 = vpop.f32.mrf.mxu1  ;;  %v1830_v31 = vpop.f32.mrf.mxu0 }
 0x135   : > { %v1338_v49 = vadd.f32 %v1829_v14, %v1337_v35  ;;  %v1380_v15 = vadd.f32 %v2511_v22, %v1365_v12 }
 0x136   : > { %v1831_v50 = vpop.f32.mrf.mxu0  ;;  %v1930_v0 = vpop.f32.mrf.mxu1 }
 0x137   : > { %v1366_v19 = vadd.f32 %v1338_v49, %v1007_v45  ;;  %v1832_v20 = vadd.f32 %v1831_v50, %v1830_v31  ;;  %v1388_v25 = vmax.f32 %v1380_v15, 0.0 }
 0x138   : > { %v1833_v44 = vpop.f32.mrf.mxu0  ;;  %v1350_v61 = vpop.f32.mrf.mxu1 }
 0x139   : > { %v1381_v18 = vadd.f32 %v2511_v22, %v1366_v19  ;;  %v1343_v60 = vadd.f32 %v1926_v8, %v1832_v20  ;;  %v725_v8 = vadd.f32 %v1737_v24, %v2487_v39  ;;  %v730_v39 = vadd.f32 %v2473_v38, %v2479_v52 }
 0x13a   : > { %v1834_v29 = vpop.f32.mrf.mxu0  ;;  %v1931_v33 = vpop.f32.mrf.mxu1 }
 0x13b   : > { %v1389_v62 = vmax.f32 %v1381_v18, 0.0  ;;  %v1367_v63 = vadd.f32 %v1343_v60, %v1012_v23  ;;  %v1835_v2 = vadd.f32 %v1834_v29, %v1833_v44  ;;  %v958_v51 = vadd.f32 %v1789_v4, %v725_v8 }
 0x13c   : > { %v1836_v47 = vpop.f32.mrf.mxu0  ;;  %v1353_v35 = vpop.f32.mrf.mxu1  ;;  %v963_v45 = vadd.f32 %v1792_v40, %v730_v39 }
 0x13d   : > { %v1396_v32 = vmax.f32 %v1388_v25, %v1389_v62  ;;  %v1346_v9 = vadd.f32 %v1927_v5, %v1835_v2  ;;  %v1382_v36 = vadd.f32 %v2511_v22, %v1367_v63  ;;  %v1743_v5 = vadd.f32 %v2485_v34, %v2481_v53 }
 0x13e   : > { %v1837_v37 = vpop.f32.mrf.mxu0  ;;  %v1023_v43 = vadd.f32 %v2503_v56, %v958_v51  ;;  %v1028_v11 = vadd.f32 %v2491_v21, %v963_v45 }
 0x13f   : > { %1400 = vst [vmem:[#allocation2] sm:$0xff] %v1396_v32  ;;  %v1368_v42 = vadd.f32 %v1346_v9, %v1015_v7  ;;  %v1838_v26 = vadd.f32 %v1837_v37, %v1836_v47  ;;  %v1390_v10 = vmax.f32 %v1382_v36, 0.0  ;;  %v733_v38 = vadd.f32 %v2483_v28, %v1743_v5 }
 0x140   : > { %v1839_v27 = vpop.f32.mrf.mxu0 }
 0x141   : > { %v1383_v13 = vadd.f32 %v2511_v22, %v1368_v42  ;;  %v1351_v54 = vadd.f32 %v1838_v26, %v1350_v61  ;;  %v966_v56 = vadd.f32 %v1795_v41, %v733_v38 }
 0x142   : > { %v1840_v46 = vpop.f32.mrf.mxu0 }
 0x143   : > { %v1391_v12 = vmax.f32 %v1383_v13, 0.0  ;;  %v1369_v14 = vadd.f32 %v1351_v54, %v1020_v3  ;;  %v1841_v16 = vadd.f32 %v1840_v46, %v1839_v27  ;;  %v1031_v28 = vadd.f32 %v2497_v6, %v966_v56 }
 0x144   : > { %v1842_v31 = vpop.f32.mrf.mxu0 }
 0x145   : > { %v1397_v30 = vmax.f32 %v1390_v10, %v1391_v12  ;;  %v1354_v48 = vadd.f32 %v1841_v16, %v1353_v35  ;;  %v1384_v52 = vadd.f32 %v2511_v22, %v1369_v14 }
 0x146   : > { %v1843_v49 = vpop.f32.mrf.mxu0 }
 0x147   : > { %1401 = vst [vmem:[#allocation2 + $0x8] sm:$0xff] %v1397_v30  ;;  %v1370_v53 = vadd.f32 %v1354_v48, %v1023_v43  ;;  %v1844_v34 = vadd.f32 %v1843_v49, %v1842_v31  ;;  %v1392_v55 = vmax.f32 %v1384_v52, 0.0 }
 0x148   : > { %v1845_v50 = vpop.f32.mrf.mxu0 }
 0x149   : > { %v1385_v15 = vadd.f32 %v2511_v22, %v1370_v53  ;;  %v1359_v19 = vadd.f32 %v1930_v0, %v1844_v34 }
 0x14a   : > { %v1846_v20 = vpop.f32.mrf.mxu0 }
 0x14b   : > { %v1393_v57 = vmax.f32 %v1385_v15, 0.0  ;;  %v1371_v23 = vadd.f32 %v1359_v19, %v1028_v11  ;;  %v1847_v44 = vadd.f32 %v1846_v20, %v1845_v50 }
 0x14d   : > { %v1398_v58 = vmax.f32 %v1392_v55, %v1393_v57  ;;  %v1362_v59 = vadd.f32 %v1931_v33, %v1847_v44  ;;  %v1386_v18 = vadd.f32 %v2511_v22, %v1371_v23 }
 0x14e   : > { %v1404_v29 = vld [vmem:[#allocation2] ss:$2 sm:$0xff]  ;;  %v1408_v61 = vld [vmem:[#allocation2 + $0x1] ss:$2 sm:$0xff] }
 0x14f   : > { %1402 = vst [vmem:[#allocation2 + $0x10] sm:$0xff] %v1398_v58  ;;  %v1372_v60 = vadd.f32 %v1362_v59, %v1031_v28  ;;  %v1394_v17 = vmax.f32 %v1386_v18, 0.0  ;;  %v1411_v62 = vmax.f32 %v1404_v29, %v1408_v61 }
 0x151   : > { %v1387_v21 = vadd.f32 %v2511_v22, %v1372_v60 }
 0x153   : > { %v1395_v24 = vmax.f32 %v1387_v21, 0.0 }
 0x155   : > { %v1399_v0 = vmax.f32 %v1394_v17, %v1395_v24 }
 0x157   : > { %1403 = vst [vmem:[#allocation2 + $0x18] sm:$0xff] %v1399_v0 }
 0x15e   : > { %v1406_v25 = vld [vmem:[#allocation2 + $0x10] ss:$2 sm:$0xff]  ;;  %v1410_v6 = vld [vmem:[#allocation2 + $0x11] ss:$2 sm:$0xff] }
 0x15f   : > { %v1412_v63 = vmax.f32 %v1406_v25, %v1410_v6 }
 0x161   : > { %v1702_v2 = vpack.c.bf16 %v1412_v63, %v1411_v62 }
 0x163   : > { %1703 = vst [vmem:[%s170_s22] sm:$0xff] %v1702_v2  }
 0x164 PF: > { %s13_s12 = sadd.s32 1, %s2038_s12  }
 0x165   : > { %p10_p5 = scmp.ge.s32.totalorder %s13_s12, 4  }
 0x167   :  { %12 = sbr.rel (!%p10_p5) target bundleno = 1 (0x1), region = 67 }

// kernel: encoder_forward.14
= control target key start
LH: loop header
LB: loop body
LE: loop exit
PB: predicated region body
PF: predicated region fallthrough
CT: control target
= control target key end

     0   :  { %s1253_s12 = smov 0   ;;  %s1255_s13 = smov 0   ;;  %s1395_s0 = inlined_call_operand.vmem [shape: bf16[32,1152], index: 0, kind: input, shape index: {}]   ;;  %s1396_s1 = inlined_call_operand.vmem [shape: bf16[1152,256], index: 1, kind: input, shape index: {}]   ;;  %s1397_s2 = inlined_call_operand.vmem [shape: f32[1,256], index: 2, kind: input, shape index: {}]   ;;  %s1398_s3 = inlined_call_operand.vmem [shape: bf16[32,256], index: 3, kind: output, shape index: {}]  }
   0x1   :  { %s1257_s14 = smov 0   ;;  %s1259_s15 = smov 0  }
   0x2   :  { %s1261_s16 = smov 0  }
   0x3 LB: > { %s25_s17 = sadd.s32 1, %s1225_s15  ;;  %p48_p1 = scmp.ne.s32.totalorder %s1217_s13, %s1213_s12  ;;  %s1229_s16 = sphi %s1261_s16, %s13_s16   ;;  %s1225_s15 = sphi %s1259_s15, %s1402_s15   ;;  %s1221_s14 = sphi %s1257_s14, %s1401_s14   ;;  %s1217_s13 = sphi %s1255_s13, %s1400_s13   ;;  %s1213_s12 = sphi %s1253_s12, %s1399_s12  }
   0x4   : > { %p26_p0 = scmp.ge.s32.totalorder %s25_s17, 3  ;;  %p49_p2 = scmp.eq.s32.totalorder %s1229_s16, 0 }
   0x5   : > { %s41_s19 = sadd.s32 1, %s1217_s13  ;;  %p984_p5 = scmp.ge.s32.totalorder %s1229_s16, 3 }
   0x6   : > { %s1404_s17 = smov (%p26_p0, %s25_s17), 0  ;;  %p50_p3 = por %p49_p2, %p48_p1 }
   0x7   : > { %s37_s18 = ssub.s32 %s1225_s15, %s1404_s17  ;;  %164 = sbr.rel (%p984_p5) target bundleno = 21 (0x15), region = 20 }
   0x8   : > { %p39_p4 = scmp.eq.s32.totalorder %s37_s18, 0 }
   0xa   : > { %s1288_s20 = scalar_select %p39_p4, %s1217_s13, %s41_s19  }
   0xc   : > { %167 = sbr.rel (!%p50_p3) target bundleno = 21 (0x15), region = 24  ;;  %s169_s21 = sand.u32 (%p50_p3), 1, %s1217_s13  }
   0xd   : > { %s1061_s22 = smul.u32 (%p50_p3), 12, %s1225_s15 }
   0xe   : > { %s1067_s23 = smul.u32 (%p50_p3), 48, %s169_s21 }
   0xf   : > { %s177_s26 = scalar_lea.vmem (%p50_p3), %s1395_s0, %s1061_s22 }
  0x10   : > { %v192_v0 = vld [vmem:[%s177_s26] sm:$0xff] (%p50_p3)  ;;  %v196_v2 = vld [vmem:[%s177_s26 + $0x48] sm:$0xff] (%p50_p3)  ;;  %s171_s27 = scalar_lea.vmem (%p50_p3), [#allocation3], %s1067_s23  ;;  %v990_v6 = vld [vmem:[%s177_s26 + $0x50] sm:$0xf] (%p50_p3) }
  0x11   : > { %v194_v1 = vld [vmem:[%s177_s26 + $0x24] sm:$0xff]  ;;  %193 = vst [vmem:[%s171_s27] sm:$0xff] %v192_v0  ;;  %197 = vst [vmem:[%s171_s27 + $0x18] sm:$0xff] %v196_v2  ;;  %v198_v3 = vld [vmem:[%s177_s26 + $0x6c] sm:$0xff] }
  0x12   : > { %195 = vst [vmem:[%s171_s27 + $0xc] sm:$0xff] %v194_v1  ;;  %v986_v4 = vld [vmem:[%s177_s26 + $0x8] sm:$0xf]  ;;  %v988_v5 = vld [vmem:[%s177_s26 + $0x2c] sm:$0xf]  ;;  %199 = vst [vmem:[%s171_s27 + $0x24] sm:$0xff] %v198_v3 }
  0x13   : > { %987 = vst [vmem:[%s171_s27 + $0x8] sm:$0xf] %v986_v4  ;;  %989 = vst [vmem:[%s171_s27 + $0x14] sm:$0xf] %v988_v5  ;;  %v992_v7 = vld [vmem:[%s177_s26 + $0x74] sm:$0xf] }
  0x14   : > { %991 = vst [vmem:[%s171_s27 + $0x20] sm:$0xf] %v990_v6  ;;  %993 = vst [vmem:[%s171_s27 + $0x2c] sm:$0xf] %v992_v7 }
  0x15 PF: > { %p994_p6 = scmp.ge.s32.totalorder %s1229_s16, 1  ;;  %p235_p7 = scmp.lt.s32.totalorder %s1229_s16, 4 }
  0x17   : > { %p236_p8 = pnand %p994_p6, %p235_p7 }
  0x18   : > { %s242_s28 = sand.u32 (!%p236_p8), 1, %s1213_s12   ;;  %s286_s29 = smul.u32 (!%p236_p8), 48, %s1221_s14 }
  0x19   : > { %239 = sbr.rel (%p236_p8) target bundleno = 333 (0x14d), region = 54  ;;  %p997_p10 = scmp.ne.s32.totalorder (!%p236_p8), %s1221_s14, 0 }
  0x1a   : > { %s1068_s30 = smul.u32 (!%p236_p8), 48, %s242_s28  ;;  %p288_p9 = scmp.lt.s32.totalorder (!%p236_p8), %s286_s29, 143 }
  0x1c   : > { %s1305_s8 = scalar_lea.vmem (!%p236_p8), [#allocation3], %s1068_s30 }
  0x1e   : > { %s1406_s29 = smov (!%p288_p9, %s286_s29), 143  ;;  %319 = sbr.rel (%p997_p10) target bundleno = 40 (0x28), region = 62 }
  0x1f   : > { %s1062_s4 = sshll.u32 %s1406_s29, 3 }
  0x20   : > { %s1303_s7 = scalar_lea.vmem %s1396_s1, %s1062_s4 }
  0x23   : > { %v1231_v8 = vmov 0.0  }
  0x24   : > { %320 = vst [vmem:[#allocation2 + $0x30] sm:$0xff] %v1231_v8  ;;  %321 = vst [vmem:[#allocation2] sm:$0xff] %v1231_v8 }
  0x25   : > { %322 = vst [vmem:[#allocation2 + $0x18] sm:$0xff] %v1231_v8  ;;  %323 = vst [vmem:[#allocation2 + $0x10] sm:$0xff] %v1231_v8 }
  0x26   : > { %324 = vst [vmem:[#allocation2 + $0x8] sm:$0xff] %v1231_v8  ;;  %325 = vst [vmem:[#allocation2 + $0x20] sm:$0xff] %v1231_v8 }
  0x27   : > { %326 = vst [vmem:[#allocation2 + $0x28] sm:$0xff] %v1231_v8  ;;  %327 = vst [vmem:[#allocation2 + $0x38] sm:$0xff] %v1231_v8 }
  0x28 PF: > { %v1111_v9 = vld [vmem:[%s1303_s7 + $0x74] ss:$8 sps:$4 sm:$0xff]   ;;  %v1113_v10 = vld [vmem:[%s1303_s7 + $0x70] ss:$8 sps:$4 sm:$0xff]   ;;  %v1232_v11 = vmov 0   ;;  %p1052_p11 = scmp.ne.s32.totalorder %s1221_s14, 2 }
  0x29   : > { %749 = vmatprep.mubr.bf16.mxu1 %v1232_v11  ;;  %664 = vmatprep.subr.bf16.mxu0 %v1111_v9  ;;  %v1114_v12 = vld [vmem:[%s1303_s7 + $0x64] ss:$8 sps:$4 sm:$0xff]   ;;  %v1116_v13 = vld [vmem:[%s1303_s7 + $0x60] ss:$8 sps:$4 sm:$0xff]   ;;  %v1117_v14 = vld [vmem:[%s1303_s7 + $0x54] ss:$8 sps:$4 sm:$0xff]  }
  0x2a   : > { %665 = vmatpush1.bf16.msra.mxu0 %v1113_v10  ;;  %v1119_v15 = vld [vmem:[%s1303_s7 + $0x50] ss:$8 sps:$4 sm:$0xff]   ;;  %v1120_v16 = vld [vmem:[%s1303_s7 + $0x44] ss:$8 sps:$4 sm:$0xff]   ;;  %v1132_v17 = vld [vmem:[%s1303_s7 + $0x174] ss:$8 sps:$4 sm:$0xff]  }
  0x2b   : > { %666 = vmatprep.subr.bf16.mxu0 %v1114_v12  ;;  %v1134_v18 = vld [vmem:[%s1303_s7 + $0x170] ss:$8 sps:$4 sm:$0xff]   ;;  %v1122_v19 = vld [vmem:[%s1303_s7 + $0x40] ss:$8 sps:$4 sm:$0xff]   ;;  %v1123_v20 = vld [vmem:[%s1303_s7 + $0x34] ss:$8 sps:$4 sm:$0xff]   ;;  %717 = vmatprep.subr.bf16.mxu1 %v1132_v17 }
  0x2c   : > { %v1138_v21 = vld [vmem:[%s1303_s7 + $0x164] ss:$8 sps:$4 sm:$0xff]   ;;  %718 = vmatpush1.bf16.msra.mxu1 %v1134_v18  ;;  %v1140_v22 = vld [vmem:[%s1303_s7 + $0x160] ss:$8 sps:$4 sm:$0xff]   ;;  %v1125_v23 = vld [vmem:[%s1303_s7 + $0x30] ss:$8 sps:$4 sm:$0xff]  }
  0x2d   : > { %719 = vmatprep.subr.bf16.mxu1 %v1138_v21  ;;  %v1144_v24 = vld [vmem:[%s1303_s7 + $0x154] ss:$8 sps:$4 sm:$0xff]   ;;  %v1126_v25 = vld [vmem:[%s1303_s7 + $0x24] ss:$8 sps:$4 sm:$0xff]   ;;  %v1146_v26 = vld [vmem:[%s1303_s7 + $0x150] ss:$8 sps:$4 sm:$0xff]  }
  0x2e   : > { %667 = vmatpush1.bf16.msra.mxu0 %v1116_v13  ;;  %v1150_v27 = vld [vmem:[%s1303_s7 + $0x144] ss:$8 sps:$4 sm:$0xff]   ;;  %v1128_v28 = vld [vmem:[%s1303_s7 + $0x20] ss:$8 sps:$4 sm:$0xff]   ;;  %v1129_v29 = vld [vmem:[%s1303_s7 + $0x14] ss:$8 sps:$4 sm:$0xff]  }
  0x2f   : > { %668 = vmatprep.subr.bf16.mxu0 %v1117_v14  ;;  %v1152_v30 = vld [vmem:[%s1303_s7 + $0x140] ss:$8 sps:$4 sm:$0xff]   ;;  %v1156_v31 = vld [vmem:[%s1303_s7 + $0x134] ss:$8 sps:$4 sm:$0xff]   ;;  %v1131_v32 = vld [vmem:[%s1303_s7 + $0x10] ss:$8 sps:$4 sm:$0xff]  }
  0x30   : > { %720 = vmatpush1.bf16.msra.mxu1 %v1140_v22  ;;  %v1135_v33 = vld [vmem:[%s1303_s7 + $0x4] ss:$8 sps:$4 sm:$0xff]   ;;  %v1158_v34 = vld [vmem:[%s1303_s7 + $0x130] ss:$8 sps:$4 sm:$0xff]   ;;  %v1137_v36 = vld [vmem:[%s1303_s7] ss:$8 sps:$4 sm:$0xff]  }
  0x31   : > { %721 = vmatprep.subr.bf16.mxu1 %v1144_v24  ;;  %v1162_v35 = vld [vmem:[%s1303_s7 + $0x124] ss:$8 sps:$4 sm:$0xff]   ;;  %v1141_v37 = vld [vmem:[%s1303_s7 + $0xf4] ss:$8 sps:$4 sm:$0xff]   ;;  %v1164_v38 = vld [vmem:[%s1303_s7 + $0x120] ss:$8 sps:$4 sm:$0xff]  }
  0x32   : > { %669 = vmatpush1.bf16.msra.mxu0 %v1119_v15  ;;  %v1168_v39 = vld [vmem:[%s1303_s7 + $0x114] ss:$8 sps:$4 sm:$0xff]   ;;  %v1143_v40 = vld [vmem:[%s1303_s7 + $0xf0] ss:$8 sps:$4 sm:$0xff]   ;;  %v1147_v41 = vld [vmem:[%s1303_s7 + $0xe4] ss:$8 sps:$4 sm:$0xff]  }
  0x33   : > { %670 = vmatprep.subr.bf16.mxu0 %v1120_v16  ;;  %v1170_v42 = vld [vmem:[%s1303_s7 + $0x110] ss:$8 sps:$4 sm:$0xff]   ;;  %v1174_v43 = vld [vmem:[%s1303_s7 + $0x104] ss:$8 sps:$4 sm:$0xff]   ;;  %v1149_v45 = vld [vmem:[%s1303_s7 + $0xe0] ss:$8 sps:$4 sm:$0xff]  }
  0x34   : > { %722 = vmatpush1.bf16.msra.mxu1 %v1146_v26  ;;  %v1186_v44 = vld [vmem:[%s1305_s8 + $0x4] ss:$12 sps:$4 sm:$0xff]   ;;  %v1180_v50 = vld [vmem:[%s1305_s8 + $0x8] ss:$12 sps:$4 sm:$0xff]   ;;  %v1187_v55 = vld [vmem:[%s1305_s8 + $0x20] ss:$12 sps:$4 sm:$0xff]  }
  0x35   : > { %723 = vmatprep.subr.bf16.mxu1 %v1150_v27  ;;  %v1153_v46 = vld [vmem:[%s1303_s7 + $0xd4] ss:$8 sps:$4 sm:$0xff]   ;;  %696 = vmatprep.mubr.bf16.mxu0 %v1186_v44  ;;  %v1176_v47 = vld [vmem:[%s1303_s7 + $0x100] ss:$8 sps:$4 sm:$0xff]   ;;  %v1155_v48 = vld [vmem:[%s1303_s7 + $0xd0] ss:$8 sps:$4 sm:$0xff]  }
  0x36   : > { %671 = vmatpush1.bf16.msra.mxu0 %v1122_v19  ;;  %v1159_v49 = vld [vmem:[%s1303_s7 + $0xc4] ss:$8 sps:$4 sm:$0xff]   ;;  %v1161_v51 = vld [vmem:[%s1303_s7 + $0xc0] ss:$8 sps:$4 sm:$0xff]   ;;  %v1165_v52 = vld [vmem:[%s1303_s7 + $0xb4] ss:$8 sps:$4 sm:$0xff]  }
  0x37   : > { %672 = vmatprep.subr.bf16.mxu0 %v1123_v20  ;;  %v1167_v53 = vld [vmem:[%s1303_s7 + $0xb0] ss:$8 sps:$4 sm:$0xff]   ;;  %v1171_v54 = vld [vmem:[%s1303_s7 + $0xa4] ss:$8 sps:$4 sm:$0xff]   ;;  %v1173_v56 = vld [vmem:[%s1303_s7 + $0xa0] ss:$8 sps:$4 sm:$0xff]  }
  0x38   : > { %724 = vmatpush1.bf16.msra.mxu1 %v1152_v30  ;;  %v1177_v57 = vld [vmem:[%s1303_s7 + $0x94] ss:$8 sps:$4 sm:$0xff]   ;;  %v1179_v58 = vld [vmem:[%s1303_s7 + $0x90] ss:$8 sps:$4 sm:$0xff]   ;;  %v1181_v59 = vld [vmem:[%s1303_s7 + $0x84] ss:$8 sps:$4 sm:$0xff]  }
  0x39   : > { %725 = vmatprep.subr.bf16.mxu1 %v1156_v31  ;;  %v1183_v60 = vld [vmem:[%s1303_s7 + $0x80] ss:$8 sps:$4 sm:$0xff]   ;;  %v328_v4 = vld [vmem:[#allocation2 + $0x30] sm:$0xff]  ;;  %v330_v12 = vld [vmem:[#allocation2 + $0x18] sm:$0xff] }
  0x3a   : > { %673 = vmatpush1.bf16.msra.mxu0 %v1125_v23  ;;  %v1184_v61 = vld [vmem:[%s1305_s8] ss:$12 sps:$4 sm:$0xff]   ;;  %v1188_v62 = vld [vmem:[%s1305_s8 + $0x1c] ss:$12 sps:$4 sm:$0xff]   ;;  %v1190_v63 = vld [vmem:[%s1305_s8 + $0x18] ss:$12 sps:$4 sm:$0xff]  }
  0x3b   : > { %674 = vmatprep.subr.bf16.mxu0 %v1126_v25  ;;  %v329_v7 = vld [vmem:[#allocation2] sm:$0xff]  ;;  %v331_v17 = vld [vmem:[#allocation2 + $0x10] sm:$0xff]  ;;  %v332_v21 = vld [vmem:[#allocation2 + $0x8] sm:$0xff] }
  0x3c   : > { %726 = vmatpush1.bf16.msra.mxu1 %v1158_v34  ;;  %v333_v26 = vld [vmem:[#allocation2 + $0x20] sm:$0xff]  ;;  %v334_v30 = vld [vmem:[#allocation2 + $0x28] sm:$0xff] }
  0x3d   : > { %727 = vmatprep.subr.bf16.mxu1 %v1162_v35  ;;  %v335_v35 = vld [vmem:[#allocation2 + $0x38] sm:$0xff] }
  0x3e   : > { %675 = vmatpush1.bf16.msra.mxu0 %v1128_v28 }
  0x3f   : > { %676 = vmatprep.subr.bf16.mxu0 %v1129_v29 }
  0x40   : > { %728 = vmatpush1.bf16.msra.mxu1 %v1164_v38 }
  0x41   : > { %729 = vmatprep.subr.bf16.mxu1 %v1168_v39 }
  0x42   : > { %677 = vmatpush1.bf16.msra.mxu0 %v1131_v32 }
  0x43   : > { %678 = vmatprep.subr.bf16.mxu0 %v1135_v33 }
  0x44   : > { %730 = vmatpush1.bf16.msra.mxu1 %v1170_v42 }
  0x45   : > { %731 = vmatprep.subr.bf16.mxu1 %v1174_v43 }
  0x46   : > { %679 = vmatpush1.bf16.msra.mxu0 %v1137_v36 }
  0x47   : > { %680 = vmatprep.subr.bf16.mxu0 %v1141_v37 }
  0x48   : > { %732 = vmatpush1.bf16.msra.mxu1 %v1176_v47 }
  0x4a   : > { %681 = vmatpush2.bf16.msra.mxu0 %v1143_v40 }
  0x4b   : > { %682 = vmatprep.subr.bf16.mxu0 %v1147_v41  ;;  %750 = vmatmul.mubr.bf16.vlgmr.msra.gmra.mxu1 %v1180_v50 }
  0x4c   : > { %759 = vmatprep.mubr.bf16.mxu1 %v1232_v11 }
  0x4e   : > { %683 = vmatpush2.bf16.msra.mxu0 %v1149_v45 }
  0x4f   : > { %684 = vmatprep.subr.bf16.mxu0 %v1153_v46 }
  0x52   : > { %685 = vmatpush2.bf16.msra.mxu0 %v1155_v48 }
  0x53   : > { %686 = vmatprep.subr.bf16.mxu0 %v1159_v49  ;;  %760 = vmatmul.mubr.bf16.gmra.mxu1 %v1187_v55 }
  0x56   : > { %687 = vmatpush2.bf16.msra.mxu0 %v1161_v51 }
  0x57   : > { %688 = vmatprep.subr.bf16.mxu0 %v1165_v52 }
  0x5a   : > { %689 = vmatpush2.bf16.msra.mxu0 %v1167_v53 }
  0x5b   : > { %690 = vmatprep.subr.bf16.mxu0 %v1171_v54 }
  0x5e   : > { %691 = vmatpush2.bf16.msra.mxu0 %v1173_v56 }
  0x5f   : > { %692 = vmatprep.subr.bf16.mxu0 %v1177_v57 }
  0x62   : > { %693 = vmatpush2.bf16.msra.mxu0 %v1179_v58 }
  0x63   : > { %694 = vmatprep.subr.bf16.mxu0 %v1181_v59 }
  0x66   : > { %695 = vmatpush2.bf16.msra.mxu0 %v1183_v60 }
  0x69   : > { %697 = vmatmul.mubr.bf16.vlgmr.msra.gmra.mxu0 %v1184_v61 }
  0x6a   : > { %706 = vmatprep.mubr.bf16.mxu0 %v1188_v62 }
  0x71   : > { %707 = vmatmul.mubr.bf16.gmra.mxu0 %v1190_v63 }
 0x10b   : > { %v751_v0 = vpop.f32.mrf.mxu1 }
 0x10d   : > { %v753_v1 = vpop.f32.mrf.mxu1 }
 0x10f   : > { %v755_v2 = vpop.f32.mrf.mxu1 }
 0x111   : > { %v757_v3 = vpop.f32.mrf.mxu1 }
 0x113   : > { %v761_v9 = vpop.f32.mrf.mxu1 }
 0x115   : > { %v763_v16 = vpop.f32.mrf.mxu1 }
 0x117   : > { %v765_v25 = vpop.f32.mrf.mxu1 }
 0x119   : > { %v767_v34 = vpop.f32.mrf.mxu1 }
 0x129   : > { %v698_v5 = vpop.f32.mrf.mxu0 }
 0x12a   : > { %v752_v6 = vadd.f32 %v751_v0, %v698_v5 }
 0x12b   : > { %v700_v8 = vpop.f32.mrf.mxu0 }
 0x12c   : > { %v770_v10 = vadd.f32 %v752_v6, %v328_v4  ;;  %v754_v11 = vadd.f32 %v753_v1, %v700_v8 }
 0x12d   : > { %v702_v13 = vpop.f32.mrf.mxu0 }
 0x12e   : > { %778 = vst [vmem:[#allocation2 + $0x30] sm:$0xff] %v770_v10  ;;  %v771_v14 = vadd.f32 %v754_v11, %v329_v7  ;;  %v756_v15 = vadd.f32 %v755_v2, %v702_v13 }
 0x12f   : > { %v704_v18 = vpop.f32.mrf.mxu0 }
 0x130   : > { %779 = vst [vmem:[#allocation2] sm:$0xff] %v771_v14  ;;  %v772_v19 = vadd.f32 %v756_v15, %v330_v12  ;;  %v758_v20 = vadd.f32 %v757_v3, %v704_v18 }
 0x131   : > { %v708_v22 = vpop.f32.mrf.mxu0 }
 0x132   : > { %780 = vst [vmem:[#allocation2 + $0x18] sm:$0xff] %v772_v19  ;;  %v773_v23 = vadd.f32 %v758_v20, %v331_v17  ;;  %v762_v24 = vadd.f32 %v761_v9, %v708_v22 }
 0x133   : > { %v710_v27 = vpop.f32.mrf.mxu0 }
 0x134   : > { %781 = vst [vmem:[#allocation2 + $0x10] sm:$0xff] %v773_v23  ;;  %v774_v28 = vadd.f32 %v762_v24, %v332_v21  ;;  %v764_v29 = vadd.f32 %v763_v16, %v710_v27 }
 0x135   : > { %v712_v31 = vpop.f32.mrf.mxu0 }
 0x136   : > { %782 = vst [vmem:[#allocation2 + $0x8] sm:$0xff] %v774_v28  ;;  %v775_v32 = vadd.f32 %v764_v29, %v333_v26  ;;  %v766_v33 = vadd.f32 %v765_v25, %v712_v31 }
 0x137   : > { %v714_v36 = vpop.f32.mrf.mxu0 }
 0x138   : > { %783 = vst [vmem:[#allocation2 + $0x20] sm:$0xff] %v775_v32  ;;  %v776_v37 = vadd.f32 %v766_v33, %v334_v30  ;;  %v768_v38 = vadd.f32 %v767_v34, %v714_v36  ;;  %789 = sbr.rel (%p1052_p11) target bundleno = 333 (0x14d), region = 66 }
 0x13a   : > { %784 = vst [vmem:[#allocation2 + $0x28] sm:$0xff] %v776_v37  ;;  %v777_v39 = vadd.f32 %v768_v38, %v335_v35 }
 0x13c   : > { %785 = vst [vmem:[#allocation2 + $0x38] sm:$0xff] %v777_v39 }
 0x13d   : > { %v800_v40 = vlaneseq  ;;  %v798_v42 = vld [vmem:[%s1397_s2] sm:$0x3]  ;;  %v790_v43 = vld [vmem:[#allocation2 + $0x30] sm:$0xff]  ;;  %v792_v47 = vld [vmem:[#allocation2 + $0x18] sm:$0xff] }
 0x13e   : > { %v791_v44 = vld [vmem:[#allocation2] sm:$0xff]  ;;  %v793_v48 = vld [vmem:[#allocation2 + $0x10] sm:$0xff]  ;;  %v794_v49 = vld [vmem:[#allocation2 + $0x8] sm:$0xff] }
 0x13f   : > { %v801_v41 = vshrl.u32 %v800_v40, 7  ;;  %v795_v52 = vld [vmem:[#allocation2 + $0x20] sm:$0xff] }
 0x141   : > { %v802_v45 = vsub.s32 0, %v801_v41  ;;  %v806_v46 = vsub.s32 1, %v801_v41  ;;  %v796_v53 = vld [vmem:[#allocation2 + $0x28] sm:$0xff] }
 0x143   : > { %v803_v50 = vrot.slane %v798_v42, %v802_v45  ;;  %v807_v51 = vrot.slane %v798_v42, %v806_v46  ;;  %v797_v54 = vld [vmem:[#allocation2 + $0x38] sm:$0xff] }
 0x145   : > { %v810_v55 = vadd.f32 %v803_v50, %v790_v43  ;;  %v811_v56 = vadd.f32 %v807_v51, %v791_v44  ;;  %v812_v57 = vadd.f32 %v803_v50, %v792_v47  ;;  %v813_v58 = vadd.f32 %v807_v51, %v793_v48 }
 0x146   : > { %v814_v59 = vadd.f32 %v803_v50, %v794_v49  ;;  %v815_v60 = vadd.f32 %v807_v51, %v795_v52  ;;  %v816_v61 = vadd.f32 %v803_v50, %v796_v53  ;;  %v817_v62 = vadd.f32 %v807_v51, %v797_v54 }
 0x147   : > { %v818_v63 = vmax.f32 %v810_v55, 0.0  ;;  %v819_v0 = vmax.f32 %v811_v56, 0.0  ;;  %v820_v1 = vmax.f32 %v812_v57, 0.0  ;;  %v821_v2 = vmax.f32 %v813_v58, 0.0 }
 0x148   : > { %v822_v3 = vmax.f32 %v814_v59, 0.0  ;;  %v823_v4 = vmax.f32 %v815_v60, 0.0  ;;  %v824_v5 = vmax.f32 %v816_v61, 0.0  ;;  %v825_v6 = vmax.f32 %v817_v62, 0.0 }
 0x149   : > { %v1063_v7 = vpack.c.bf16 %v819_v0, %v818_v63  ;;  %v1064_v8 = vpack.c.bf16 %v821_v2, %v820_v1 }
 0x14a   : > { %v1065_v9 = vpack.c.bf16 %v823_v4, %v822_v3  ;;  %v1066_v10 = vpack.c.bf16 %v825_v6, %v824_v5 }
 0x14b   : > { %850 = vst [vmem:[%s1398_s3] sm:$0xff] %v1063_v7  ;;  %851 = vst [vmem:[%s1398_s3 + $0x8] sm:$0xff] %v1064_v8 }
 0x14c   : > { %852 = vst [vmem:[%s1398_s3 + $0x10] sm:$0xff] %v1065_v9  ;;  %853 = vst [vmem:[%s1398_s3 + $0x18] sm:$0xff] %v1066_v10 }
 0x14d PF: > { %s13_s16 = sadd.s32 1, %s1229_s16   ;;  %s1399_s12 = smov %s1217_s13 }
 0x14e   : > { %p10_p12 = scmp.ge.s32.totalorder %s13_s16, 5   ;;  %s1400_s13 = smov %s1288_s20 }
 0x14f   : > { %s1401_s14 = smov %s1225_s15  ;;  %s1402_s15 = smov %s1404_s17 }
 0x150   :  { %12 = sbr.rel (!%p10_p12) target bundleno = 3 (0x3), region = 113 }

// kernel: encoder_forward.15
= control target key start
LH: loop header
LB: loop body
LE: loop exit
PB: predicated region body
PF: predicated region fallthrough
CT: control target
= control target key end

     0   :  { %s1253_s12 = smov 0   ;;  %s1255_s13 = smov 0   ;;  %s1395_s0 = inlined_call_operand.vmem [shape: bf16[32,2304], index: 0, kind: input, shape index: {}]   ;;  %s1396_s1 = inlined_call_operand.vmem [shape: bf16[2304,256], index: 1, kind: input, shape index: {}]   ;;  %s1397_s2 = inlined_call_operand.vmem [shape: f32[1,256], index: 2, kind: input, shape index: {}]   ;;  %s1398_s3 = inlined_call_operand.vmem [shape: bf16[32,256], index: 3, kind: output, shape index: {}]  }
   0x1   :  { %s1257_s14 = smov 0   ;;  %s1259_s15 = smov 0  }
   0x2   :  { %s1261_s16 = smov 0  }
   0x3 LB: > { %s25_s17 = sadd.s32 1, %s1225_s15  ;;  %p48_p1 = scmp.ne.s32.totalorder %s1217_s13, %s1213_s12  ;;  %s1229_s16 = sphi %s1261_s16, %s13_s16   ;;  %s1225_s15 = sphi %s1259_s15, %s1402_s15   ;;  %s1221_s14 = sphi %s1257_s14, %s1401_s14   ;;  %s1217_s13 = sphi %s1255_s13, %s1400_s13   ;;  %s1213_s12 = sphi %s1253_s12, %s1399_s12  }
   0x4   : > { %p26_p0 = scmp.ge.s32.totalorder %s25_s17, 6  ;;  %p49_p2 = scmp.eq.s32.totalorder %s1229_s16, 0 }
   0x5   : > { %s41_s19 = sadd.s32 1, %s1217_s13  ;;  %p984_p5 = scmp.ge.s32.totalorder %s1229_s16, 6 }
   0x6   : > { %s1404_s17 = smov (%p26_p0, %s25_s17), 0  ;;  %p50_p3 = por %p49_p2, %p48_p1 }
   0x7   : > { %s37_s18 = ssub.s32 %s1225_s15, %s1404_s17  ;;  %164 = sbr.rel (%p984_p5) target bundleno = 21 (0x15), region = 20 }
   0x8   : > { %p39_p4 = scmp.eq.s32.totalorder %s37_s18, 0 }
   0xa   : > { %s1288_s20 = scalar_select %p39_p4, %s1217_s13, %s41_s19  }
   0xc   : > { %167 = sbr.rel (!%p50_p3) target bundleno = 21 (0x15), region = 24  ;;  %s169_s21 = sand.u32 (%p50_p3), 1, %s1217_s13  }
   0xd   : > { %s1061_s22 = smul.u32 (%p50_p3), 12, %s1225_s15 }
   0xe   : > { %s1067_s23 = smul.u32 (%p50_p3), 48, %s169_s21 }
   0xf   : > { %s177_s26 = scalar_lea.vmem (%p50_p3), %s1395_s0, %s1061_s22 }
  0x10   : > { %v192_v0 = vld [vmem:[%s177_s26] sm:$0xff] (%p50_p3)  ;;  %v194_v1 = vld [vmem:[%s177_s26 + $0x48] sm:$0xff] (%p50_p3)  ;;  %v196_v2 = vld [vmem:[%s177_s26 + $0x90] sm:$0xff] (%p50_p3)  ;;  %s171_s27 = scalar_lea.vmem (%p50_p3), [#allocation3], %s1067_s23 }
  0x11   : > { %193 = vst [vmem:[%s171_s27] sm:$0xff] %v192_v0  ;;  %195 = vst [vmem:[%s171_s27 + $0xc] sm:$0xff] %v194_v1  ;;  %v198_v3 = vld [vmem:[%s177_s26 + $0xd8] sm:$0xff]  ;;  %v986_v4 = vld [vmem:[%s177_s26 + $0x8] sm:$0xf] }
  0x12   : > { %197 = vst [vmem:[%s171_s27 + $0x18] sm:$0xff] %v196_v2  ;;  %v988_v5 = vld [vmem:[%s177_s26 + $0x50] sm:$0xf]  ;;  %199 = vst [vmem:[%s171_s27 + $0x24] sm:$0xff] %v198_v3  ;;  %v990_v6 = vld [vmem:[%s177_s26 + $0x98] sm:$0xf] }
  0x13   : > { %987 = vst [vmem:[%s171_s27 + $0x8] sm:$0xf] %v986_v4  ;;  %989 = vst [vmem:[%s171_s27 + $0x14] sm:$0xf] %v988_v5  ;;  %v992_v7 = vld [vmem:[%s177_s26 + $0xe0] sm:$0xf] }
  0x14   : > { %991 = vst [vmem:[%s171_s27 + $0x20] sm:$0xf] %v990_v6  ;;  %993 = vst [vmem:[%s171_s27 + $0x2c] sm:$0xf] %v992_v7 }
  0x15 PF: > { %p994_p6 = scmp.ge.s32.totalorder %s1229_s16, 1  ;;  %p235_p7 = scmp.lt.s32.totalorder %s1229_s16, 7 }
  0x17   : > { %p236_p8 = pnand %p994_p6, %p235_p7 }
  0x18   : > { %s242_s28 = sand.u32 (!%p236_p8), 1, %s1213_s12   ;;  %s286_s29 = smul.u32 (!%p236_p8), 48, %s1221_s14 }
  0x19   : > { %239 = sbr.rel (%p236_p8) target bundleno = 333 (0x14d), region = 54  ;;  %p997_p10 = scmp.ne.s32.totalorder (!%p236_p8), %s1221_s14, 0 }
  0x1a   : > { %s1068_s30 = smul.u32 (!%p236_p8), 48, %s242_s28  ;;  %p288_p9 = scmp.lt.s32.totalorder (!%p236_p8), %s286_s29, 287 }
  0x1c   : > { %s1305_s8 = scalar_lea.vmem (!%p236_p8), [#allocation3], %s1068_s30 }
  0x1e   : > { %s1406_s29 = smov (!%p288_p9, %s286_s29), 287  ;;  %319 = sbr.rel (%p997_p10) target bundleno = 40 (0x28), region = 62 }
  0x1f   : > { %s1062_s4 = sshll.u32 %s1406_s29, 3 }
  0x20   : > { %s1303_s7 = scalar_lea.vmem %s1396_s1, %s1062_s4 }
  0x23   : > { %v1231_v8 = vmov 0.0  }
  0x24   : > { %320 = vst [vmem:[#allocation2 + $0x30] sm:$0xff] %v1231_v8  ;;  %321 = vst [vmem:[#allocation2] sm:$0xff] %v1231_v8 }
  0x25   : > { %322 = vst [vmem:[#allocation2 + $0x18] sm:$0xff] %v1231_v8  ;;  %323 = vst [vmem:[#allocation2 + $0x10] sm:$0xff] %v1231_v8 }
  0x26   : > { %324 = vst [vmem:[#allocation2 + $0x8] sm:$0xff] %v1231_v8  ;;  %325 = vst [vmem:[#allocation2 + $0x20] sm:$0xff] %v1231_v8 }
  0x27   : > { %326 = vst [vmem:[#allocation2 + $0x28] sm:$0xff] %v1231_v8  ;;  %327 = vst [vmem:[#allocation2 + $0x38] sm:$0xff] %v1231_v8 }
  0x28 PF: > { %v1111_v9 = vld [vmem:[%s1303_s7 + $0x74] ss:$8 sps:$4 sm:$0xff]   ;;  %v1113_v10 = vld [vmem:[%s1303_s7 + $0x70] ss:$8 sps:$4 sm:$0xff]   ;;  %v1232_v11 = vmov 0   ;;  %p1052_p11 = scmp.ne.s32.totalorder %s1221_s14, 5 }
  0x29   : > { %749 = vmatprep.mubr.bf16.mxu1 %v1232_v11  ;;  %664 = vmatprep.subr.bf16.mxu0 %v1111_v9  ;;  %v1114_v12 = vld [vmem:[%s1303_s7 + $0x64] ss:$8 sps:$4 sm:$0xff]   ;;  %v1116_v13 = vld [vmem:[%s1303_s7 + $0x60] ss:$8 sps:$4 sm:$0xff]   ;;  %v1117_v14 = vld [vmem:[%s1303_s7 + $0x54] ss:$8 sps:$4 sm:$0xff]  }
  0x2a   : > { %665 = vmatpush1.bf16.msra.mxu0 %v1113_v10  ;;  %v1119_v15 = vld [vmem:[%s1303_s7 + $0x50] ss:$8 sps:$4 sm:$0xff]   ;;  %v1120_v16 = vld [vmem:[%s1303_s7 + $0x44] ss:$8 sps:$4 sm:$0xff]   ;;  %v1132_v17 = vld [vmem:[%s1303_s7 + $0x174] ss:$8 sps:$4 sm:$0xff]  }
  0x2b   : > { %666 = vmatprep.subr.bf16.mxu0 %v1114_v12  ;;  %v1134_v18 = vld [vmem:[%s1303_s7 + $0x170] ss:$8 sps:$4 sm:$0xff]   ;;  %v1122_v19 = vld [vmem:[%s1303_s7 + $0x40] ss:$8 sps:$4 sm:$0xff]   ;;  %v1123_v20 = vld [vmem:[%s1303_s7 + $0x34] ss:$8 sps:$4 sm:$0xff]   ;;  %717 = vmatprep.subr.bf16.mxu1 %v1132_v17 }
  0x2c   : > { %v1138_v21 = vld [vmem:[%s1303_s7 + $0x164] ss:$8 sps:$4 sm:$0xff]   ;;  %718 = vmatpush1.bf16.msra.mxu1 %v1134_v18  ;;  %v1140_v22 = vld [vmem:[%s1303_s7 + $0x160] ss:$8 sps:$4 sm:$0xff]   ;;  %v1125_v23 = vld [vmem:[%s1303_s7 + $0x30] ss:$8 sps:$4 sm:$0xff]  }
  0x2d   : > { %719 = vmatprep.subr.bf16.mxu1 %v1138_v21  ;;  %v1144_v24 = vld [vmem:[%s1303_s7 + $0x154] ss:$8 sps:$4 sm:$0xff]   ;;  %v1126_v25 = vld [vmem:[%s1303_s7 + $0x24] ss:$8 sps:$4 sm:$0xff]   ;;  %v1146_v26 = vld [vmem:[%s1303_s7 + $0x150] ss:$8 sps:$4 sm:$0xff]  }
  0x2e   : > { %667 = vmatpush1.bf16.msra.mxu0 %v1116_v13  ;;  %v1150_v27 = vld [vmem:[%s1303_s7 + $0x144] ss:$8 sps:$4 sm:$0xff]   ;;  %v1128_v28 = vld [vmem:[%s1303_s7 + $0x20] ss:$8 sps:$4 sm:$0xff]   ;;  %v1129_v29 = vld [vmem:[%s1303_s7 + $0x14] ss:$8 sps:$4 sm:$0xff]  }
  0x2f   : > { %668 = vmatprep.subr.bf16.mxu0 %v1117_v14  ;;  %v1152_v30 = vld [vmem:[%s1303_s7 + $0x140] ss:$8 sps:$4 sm:$0xff]   ;;  %v1156_v31 = vld [vmem:[%s1303_s7 + $0x134] ss:$8 sps:$4 sm:$0xff]   ;;  %v1131_v32 = vld [vmem:[%s1303_s7 + $0x10] ss:$8 sps:$4 sm:$0xff]  }
  0x30   : > { %720 = vmatpush1.bf16.msra.mxu1 %v1140_v22  ;;  %v1135_v33 = vld [vmem:[%s1303_s7 + $0x4] ss:$8 sps:$4 sm:$0xff]   ;;  %v1158_v34 = vld [vmem:[%s1303_s7 + $0x130] ss:$8 sps:$4 sm:$0xff]   ;;  %v1137_v36 = vld [vmem:[%s1303_s7] ss:$8 sps:$4 sm:$0xff]  }
  0x31   : > { %721 = vmatprep.subr.bf16.mxu1 %v1144_v24  ;;  %v1162_v35 = vld [vmem:[%s1303_s7 + $0x124] ss:$8 sps:$4 sm:$0xff]   ;;  %v1141_v37 = vld [vmem:[%s1303_s7 + $0xf4] ss:$8 sps:$4 sm:$0xff]   ;;  %v1164_v38 = vld [vmem:[%s1303_s7 + $0x120] ss:$8 sps:$4 sm:$0xff]  }
  0x32   : > { %669 = vmatpush1.bf16.msra.mxu0 %v1119_v15  ;;  %v1168_v39 = vld [vmem:[%s1303_s7 + $0x114] ss:$8 sps:$4 sm:$0xff]   ;;  %v1143_v40 = vld [vmem:[%s1303_s7 + $0xf0] ss:$8 sps:$4 sm:$0xff]   ;;  %v1147_v41 = vld [vmem:[%s1303_s7 + $0xe4] ss:$8 sps:$4 sm:$0xff]  }
  0x33   : > { %670 = vmatprep.subr.bf16.mxu0 %v1120_v16  ;;  %v1170_v42 = vld [vmem:[%s1303_s7 + $0x110] ss:$8 sps:$4 sm:$0xff]   ;;  %v1174_v43 = vld [vmem:[%s1303_s7 + $0x104] ss:$8 sps:$4 sm:$0xff]   ;;  %v1149_v45 = vld [vmem:[%s1303_s7 + $0xe0] ss:$8 sps:$4 sm:$0xff]  }
  0x34   : > { %722 = vmatpush1.bf16.msra.mxu1 %v1146_v26  ;;  %v1186_v44 = vld [vmem:[%s1305_s8 + $0x4] ss:$12 sps:$4 sm:$0xff]   ;;  %v1180_v50 = vld [vmem:[%s1305_s8 + $0x8] ss:$12 sps:$4 sm:$0xff]   ;;  %v1187_v55 = vld [vmem:[%s1305_s8 + $0x20] ss:$12 sps:$4 sm:$0xff]  }
  0x35   : > { %723 = vmatprep.subr.bf16.mxu1 %v1150_v27  ;;  %v1153_v46 = vld [vmem:[%s1303_s7 + $0xd4] ss:$8 sps:$4 sm:$0xff]   ;;  %696 = vmatprep.mubr.bf16.mxu0 %v1186_v44  ;;  %v1176_v47 = vld [vmem:[%s1303_s7 + $0x100] ss:$8 sps:$4 sm:$0xff]   ;;  %v1155_v48 = vld [vmem:[%s1303_s7 + $0xd0] ss:$8 sps:$4 sm:$0xff]  }
  0x36   : > { %671 = vmatpush1.bf16.msra.mxu0 %v1122_v19  ;;  %v1159_v49 = vld [vmem:[%s1303_s7 + $0xc4] ss:$8 sps:$4 sm:$0xff]   ;;  %v1161_v51 = vld [vmem:[%s1303_s7 + $0xc0] ss:$8 sps:$4 sm:$0xff]   ;;  %v1165_v52 = vld [vmem:[%s1303_s7 + $0xb4] ss:$8 sps:$4 sm:$0xff]  }
  0x37   : > { %672 = vmatprep.subr.bf16.mxu0 %v1123_v20  ;;  %v1167_v53 = vld [vmem:[%s1303_s7 + $0xb0] ss:$8 sps:$4 sm:$0xff]   ;;  %v1171_v54 = vld [vmem:[%s1303_s7 + $0xa4] ss:$8 sps:$4 sm:$0xff]   ;;  %v1173_v56 = vld [vmem:[%s1303_s7 + $0xa0] ss:$8 sps:$4 sm:$0xff]  }
  0x38   : > { %724 = vmatpush1.bf16.msra.mxu1 %v1152_v30  ;;  %v1177_v57 = vld [vmem:[%s1303_s7 + $0x94] ss:$8 sps:$4 sm:$0xff]   ;;  %v1179_v58 = vld [vmem:[%s1303_s7 + $0x90] ss:$8 sps:$4 sm:$0xff]   ;;  %v1181_v59 = vld [vmem:[%s1303_s7 + $0x84] ss:$8 sps:$4 sm:$0xff]  }
  0x39   : > { %725 = vmatprep.subr.bf16.mxu1 %v1156_v31  ;;  %v1183_v60 = vld [vmem:[%s1303_s7 + $0x80] ss:$8 sps:$4 sm:$0xff]   ;;  %v328_v4 = vld [vmem:[#allocation2 + $0x30] sm:$0xff]  ;;  %v330_v12 = vld [vmem:[#allocation2 + $0x18] sm:$0xff] }
  0x3a   : > { %673 = vmatpush1.bf16.msra.mxu0 %v1125_v23  ;;  %v1184_v61 = vld [vmem:[%s1305_s8] ss:$12 sps:$4 sm:$0xff]   ;;  %v1188_v62 = vld [vmem:[%s1305_s8 + $0x1c] ss:$12 sps:$4 sm:$0xff]   ;;  %v1190_v63 = vld [vmem:[%s1305_s8 + $0x18] ss:$12 sps:$4 sm:$0xff]  }
  0x3b   : > { %674 = vmatprep.subr.bf16.mxu0 %v1126_v25  ;;  %v329_v7 = vld [vmem:[#allocation2] sm:$0xff]  ;;  %v331_v17 = vld [vmem:[#allocation2 + $0x10] sm:$0xff]  ;;  %v332_v21 = vld [vmem:[#allocation2 + $0x8] sm:$0xff] }
  0x3c   : > { %726 = vmatpush1.bf16.msra.mxu1 %v1158_v34  ;;  %v333_v26 = vld [vmem:[#allocation2 + $0x20] sm:$0xff]  ;;  %v334_v30 = vld [vmem:[#allocation2 + $0x28] sm:$0xff] }
  0x3d   : > { %727 = vmatprep.subr.bf16.mxu1 %v1162_v35  ;;  %v335_v35 = vld [vmem:[#allocation2 + $0x38] sm:$0xff] }
  0x3e   : > { %675 = vmatpush1.bf16.msra.mxu0 %v1128_v28 }
  0x3f   : > { %676 = vmatprep.subr.bf16.mxu0 %v1129_v29 }
  0x40   : > { %728 = vmatpush1.bf16.msra.mxu1 %v1164_v38 }
  0x41   : > { %729 = vmatprep.subr.bf16.mxu1 %v1168_v39 }
  0x42   : > { %677 = vmatpush1.bf16.msra.mxu0 %v1131_v32 }
  0x43   : > { %678 = vmatprep.subr.bf16.mxu0 %v1135_v33 }
  0x44   : > { %730 = vmatpush1.bf16.msra.mxu1 %v1170_v42 }
  0x45   : > { %731 = vmatprep.subr.bf16.mxu1 %v1174_v43 }
  0x46   : > { %679 = vmatpush1.bf16.msra.mxu0 %v1137_v36 }
  0x47   : > { %680 = vmatprep.subr.bf16.mxu0 %v1141_v37 }
  0x48   : > { %732 = vmatpush1.bf16.msra.mxu1 %v1176_v47 }
  0x4a   : > { %681 = vmatpush2.bf16.msra.mxu0 %v1143_v40 }
  0x4b   : > { %682 = vmatprep.subr.bf16.mxu0 %v1147_v41  ;;  %750 = vmatmul.mubr.bf16.vlgmr.msra.gmra.mxu1 %v1180_v50 }
  0x4c   : > { %759 = vmatprep.mubr.bf16.mxu1 %v1232_v11 }
  0x4e   : > { %683 = vmatpush2.bf16.msra.mxu0 %v1149_v45 }
  0x4f   : > { %684 = vmatprep.subr.bf16.mxu0 %v1153_v46 }
  0x52   : > { %685 = vmatpush2.bf16.msra.mxu0 %v1155_v48 }
  0x53   : > { %686 = vmatprep.subr.bf16.mxu0 %v1159_v49  ;;  %760 = vmatmul.mubr.bf16.gmra.mxu1 %v1187_v55 }
  0x56   : > { %687 = vmatpush2.bf16.msra.mxu0 %v1161_v51 }
  0x57   : > { %688 = vmatprep.subr.bf16.mxu0 %v1165_v52 }
  0x5a   : > { %689 = vmatpush2.bf16.msra.mxu0 %v1167_v53 }
  0x5b   : > { %690 = vmatprep.subr.bf16.mxu0 %v1171_v54 }
  0x5e   : > { %691 = vmatpush2.bf16.msra.mxu0 %v1173_v56 }
  0x5f   : > { %692 = vmatprep.subr.bf16.mxu0 %v1177_v57 }
  0x62   : > { %693 = vmatpush2.bf16.msra.mxu0 %v1179_v58 }
  0x63   : > { %694 = vmatprep.subr.bf16.mxu0 %v1181_v59 }
  0x66   : > { %695 = vmatpush2.bf16.msra.mxu0 %v1183_v60 }
  0x69   : > { %697 = vmatmul.mubr.bf16.vlgmr.msra.gmra.mxu0 %v1184_v61 }
  0x6a   : > { %706 = vmatprep.mubr.bf16.mxu0 %v1188_v62 }
  0x71   : > { %707 = vmatmul.mubr.bf16.gmra.mxu0 %v1190_v63 }
 0x10b   : > { %v751_v0 = vpop.f32.mrf.mxu1 }
 0x10d   : > { %v753_v1 = vpop.f32.mrf.mxu1 }
 0x10f   : > { %v755_v2 = vpop.f32.mrf.mxu1 }
 0x111   : > { %v757_v3 = vpop.f32.mrf.mxu1 }
 0x113   : > { %v761_v9 = vpop.f32.mrf.mxu1 }
 0x115   : > { %v763_v16 = vpop.f32.mrf.mxu1 }
 0x117   : > { %v765_v25 = vpop.f32.mrf.mxu1 }
 0x119   : > { %v767_v34 = vpop.f32.mrf.mxu1 }
 0x129   : > { %v698_v5 = vpop.f32.mrf.mxu0 }
 0x12a   : > { %v752_v6 = vadd.f32 %v751_v0, %v698_v5 }
 0x12b   : > { %v700_v8 = vpop.f32.mrf.mxu0 }
 0x12c   : > { %v770_v10 = vadd.f32 %v752_v6, %v328_v4  ;;  %v754_v11 = vadd.f32 %v753_v1, %v700_v8 }
 0x12d   : > { %v702_v13 = vpop.f32.mrf.mxu0 }
 0x12e   : > { %778 = vst [vmem:[#allocation2 + $0x30] sm:$0xff] %v770_v10  ;;  %v771_v14 = vadd.f32 %v754_v11, %v329_v7  ;;  %v756_v15 = vadd.f32 %v755_v2, %v702_v13 }
 0x12f   : > { %v704_v18 = vpop.f32.mrf.mxu0 }
 0x130   : > { %779 = vst [vmem:[#allocation2] sm:$0xff] %v771_v14  ;;  %v772_v19 = vadd.f32 %v756_v15, %v330_v12  ;;  %v758_v20 = vadd.f32 %v757_v3, %v704_v18 }
 0x131   : > { %v708_v22 = vpop.f32.mrf.mxu0 }
 0x132   : > { %780 = vst [vmem:[#allocation2 + $0x18] sm:$0xff] %v772_v19  ;;  %v773_v23 = vadd.f32 %v758_v20, %v331_v17  ;;  %v762_v24 = vadd.f32 %v761_v9, %v708_v22 }
 0x133   : > { %v710_v27 = vpop.f32.mrf.mxu0 }
 0x134   : > { %781 = vst [vmem:[#allocation2 + $0x10] sm:$0xff] %v773_v23  ;;  %v774_v28 = vadd.f32 %v762_v24, %v332_v21  ;;  %v764_v29 = vadd.f32 %v763_v16, %v710_v27 }
 0x135   : > { %v712_v31 = vpop.f32.mrf.mxu0 }
 0x136   : > { %782 = vst [vmem:[#allocation2 + $0x8] sm:$0xff] %v774_v28  ;;  %v775_v32 = vadd.f32 %v764_v29, %v333_v26  ;;  %v766_v33 = vadd.f32 %v765_v25, %v712_v31 }
 0x137   : > { %v714_v36 = vpop.f32.mrf.mxu0 }
 0x138   : > { %783 = vst [vmem:[#allocation2 + $0x20] sm:$0xff] %v775_v32  ;;  %v776_v37 = vadd.f32 %v766_v33, %v334_v30  ;;  %v768_v38 = vadd.f32 %v767_v34, %v714_v36  ;;  %789 = sbr.rel (%p1052_p11) target bundleno = 333 (0x14d), region = 66 }
 0x13a   : > { %784 = vst [vmem:[#allocation2 + $0x28] sm:$0xff] %v776_v37  ;;  %v777_v39 = vadd.f32 %v768_v38, %v335_v35 }
 0x13c   : > { %785 = vst [vmem:[#allocation2 + $0x38] sm:$0xff] %v777_v39 }
 0x13d   : > { %v800_v40 = vlaneseq  ;;  %v798_v42 = vld [vmem:[%s1397_s2] sm:$0x3]  ;;  %v790_v43 = vld [vmem:[#allocation2 + $0x30] sm:$0xff]  ;;  %v792_v47 = vld [vmem:[#allocation2 + $0x18] sm:$0xff] }
 0x13e   : > { %v791_v44 = vld [vmem:[#allocation2] sm:$0xff]  ;;  %v793_v48 = vld [vmem:[#allocation2 + $0x10] sm:$0xff]  ;;  %v794_v49 = vld [vmem:[#allocation2 + $0x8] sm:$0xff] }
 0x13f   : > { %v801_v41 = vshrl.u32 %v800_v40, 7  ;;  %v795_v52 = vld [vmem:[#allocation2 + $0x20] sm:$0xff] }
 0x141   : > { %v802_v45 = vsub.s32 0, %v801_v41  ;;  %v806_v46 = vsub.s32 1, %v801_v41  ;;  %v796_v53 = vld [vmem:[#allocation2 + $0x28] sm:$0xff] }
 0x143   : > { %v803_v50 = vrot.slane %v798_v42, %v802_v45  ;;  %v807_v51 = vrot.slane %v798_v42, %v806_v46  ;;  %v797_v54 = vld [vmem:[#allocation2 + $0x38] sm:$0xff] }
 0x145   : > { %v810_v55 = vadd.f32 %v803_v50, %v790_v43  ;;  %v811_v56 = vadd.f32 %v807_v51, %v791_v44  ;;  %v812_v57 = vadd.f32 %v803_v50, %v792_v47  ;;  %v813_v58 = vadd.f32 %v807_v51, %v793_v48 }
 0x146   : > { %v814_v59 = vadd.f32 %v803_v50, %v794_v49  ;;  %v815_v60 = vadd.f32 %v807_v51, %v795_v52  ;;  %v816_v61 = vadd.f32 %v803_v50, %v796_v53  ;;  %v817_v62 = vadd.f32 %v807_v51, %v797_v54 }
 0x147   : > { %v818_v63 = vmax.f32 %v810_v55, 0.0  ;;  %v819_v0 = vmax.f32 %v811_v56, 0.0  ;;  %v820_v1 = vmax.f32 %v812_v57, 0.0  ;;  %v821_v2 = vmax.f32 %v813_v58, 0.0 }
 0x148   : > { %v822_v3 = vmax.f32 %v814_v59, 0.0  ;;  %v823_v4 = vmax.f32 %v815_v60, 0.0  ;;  %v824_v5 = vmax.f32 %v816_v61, 0.0  ;;  %v825_v6 = vmax.f32 %v817_v62, 0.0 }
 0x149   : > { %v1063_v7 = vpack.c.bf16 %v819_v0, %v818_v63  ;;  %v1064_v8 = vpack.c.bf16 %v821_v2, %v820_v1 }
 0x14a   : > { %v1065_v9 = vpack.c.bf16 %v823_v4, %v822_v3  ;;  %v1066_v10 = vpack.c.bf16 %v825_v6, %v824_v5 }
 0x14b   : > { %850 = vst [vmem:[%s1398_s3] sm:$0xff] %v1063_v7  ;;  %851 = vst [vmem:[%s1398_s3 + $0x8] sm:$0xff] %v1064_v8 }
 0x14c   : > { %852 = vst [vmem:[%s1398_s3 + $0x10] sm:$0xff] %v1065_v9  ;;  %853 = vst [vmem:[%s1398_s3 + $0x18] sm:$0xff] %v1066_v10 }
 0x14d PF: > { %s13_s16 = sadd.s32 1, %s1229_s16   ;;  %s1399_s12 = smov %s1217_s13 }
 0x14e   : > { %p10_p12 = scmp.ge.s32.totalorder %s13_s16, 8   ;;  %s1400_s13 = smov %s1288_s20 }
 0x14f   : > { %s1401_s14 = smov %s1225_s15  ;;  %s1402_s15 = smov %s1404_s17 }
 0x150   :  { %12 = sbr.rel (!%p10_p12) target bundleno = 3 (0x3), region = 113 }

// kernel: encoder_forward.18
= control target key start
LH: loop header
LB: loop body
LE: loop exit
PB: predicated region body
PF: predicated region fallthrough
CT: control target
= control target key end

     0   :  { %s90_s0 = inlined_call_operand.vmem [shape: bf16[4,2,2,512], index: 0, kind: input, shape index: {}]   ;;  %s91_s1 = inlined_call_operand.vmem [shape: bf16[4,2,256], index: 1, kind: output, shape index: {}]  }
   0x1   :  { %v8_v0 = vld [vmem:[%s90_s0] sm:$0xf]  ;;  %v9_v1 = vld [vmem:[%s90_s0 + $0x4] sm:$0xf]  ;;  %v10_v2 = vld [vmem:[%s90_s0 + $0x8] sm:$0xf] }
   0x2   :  { %v16_v3 = vmax.bf16 %v9_v1, %v8_v0  ;;  %v11_v4 = vld [vmem:[%s90_s0 + $0xc] sm:$0xf]  ;;  %v12_v5 = vld [vmem:[%s90_s0 + $0x10] sm:$0xf]  ;;  %v13_v6 = vld [vmem:[%s90_s0 + $0x14] sm:$0xf] }
   0x3   :  { %v17_v7 = vmax.bf16 %v11_v4, %v10_v2  ;;  %v18_v8 = vmax.bf16 %v13_v6, %v12_v5  ;;  %v14_v9 = vld [vmem:[%s90_s0 + $0x18] sm:$0xf]  ;;  %v15_v10 = vld [vmem:[%s90_s0 + $0x1c] sm:$0xf] }
   0x4   :  { %v24_v11 = vrot.slane %v16_v3, 2  ;;  %v19_v12 = vmax.bf16 %v15_v10, %v14_v9 }
   0x5   :  { %v25_v13 = vrot.slane %v17_v7, 2  ;;  %v26_v14 = vrot.slane %v18_v8, 2 }
   0x6   :  { %v32_v15 = vmax.bf16 %v24_v11, %v16_v3  ;;  %v27_v16 = vrot.slane %v19_v12, 2 }
   0x7   :  { %v33_v17 = vmax.bf16 %v25_v13, %v17_v7  ;;  %v34_v18 = vmax.bf16 %v26_v14, %v18_v8 }
   0x8   :  { %36 = vst [vmem:[%s91_s1] sm:$0x3] %v32_v15  ;;  %v35_v19 = vmax.bf16 %v27_v16, %v19_v12 }
   0x9   :  { %37 = vst [vmem:[%s91_s1 + $0x2] sm:$0x3] %v33_v17  ;;  %38 = vst [vmem:[%s91_s1 + $0x4] sm:$0x3] %v34_v18 }
   0xa   :  { %39 = vst [vmem:[%s91_s1 + $0x6] sm:$0x3] %v35_v19 }

// kernel: encoder_forward.19
= control target key start
LH: loop header
LB: loop body
LE: loop exit
PB: predicated region body
PF: predicated region fallthrough
CT: control target
= control target key end

     0   :  { %s1320_s12 = smov 0   ;;  %s1322_s13 = smov 0   ;;  %s1583_s0 = inlined_call_operand.vmem [shape: bf16[8,2304], index: 0, kind: input, shape index: {}]   ;;  %s1584_s1 = inlined_call_operand.vmem [shape: bf16[2304,512], index: 1, kind: input, shape index: {}]   ;;  %s1585_s2 = inlined_call_operand.vmem [shape: f32[1,512], index: 2, kind: input, shape index: {}]   ;;  %s1586_s3 = inlined_call_operand.vmem [shape: bf16[8,512], index: 3, kind: output, shape index: {}]  }
   0x1   :  { %s1324_s14 = smov 0   ;;  %s1326_s15 = smov 0  }
   0x2   :  { %s1328_s16 = smov 0   ;;  %s1330_s17 = smov 0  }
   0x3   :  { %s1332_s18 = smov 0  }
   0x4 LB: > { %s25_s19 = sadd.s32 1, %s1288_s16  ;;  %s28_s20 = sadd.s32 1, %s1292_s17  ;;  %s1296_s18 = sphi %s1332_s18, %s13_s18   ;;  %s1292_s17 = sphi %s1330_s17, %s1592_s17   ;;  %s1288_s16 = sphi %s1328_s16, %s1591_s16   ;;  %s1284_s15 = sphi %s1326_s15, %s1590_s15   ;;  %s1280_s14 = sphi %s1324_s14, %s1589_s14   ;;  %s1276_s13 = sphi %s1322_s13, %s1588_s13   ;;  %s1272_s12 = sphi %s1320_s12, %s1587_s12  }
   0x5   : > { %p26_p0 = scmp.ge.s32.totalorder %s25_s19, 6  ;;  %p76_p1 = scmp.ne.s32.totalorder %s1276_s13, %s1272_s12 }
   0x6   : > { %p77_p2 = scmp.eq.s32.totalorder %s1296_s18, 0  ;;  %s69_s24 = sadd.s32 1, %s1276_s13 }
   0x7   : > { %s1594_s19 = smov (%p26_p0, %s25_s19), 0  ;;  %s1596_s20 = smov (!%p26_p0, %s28_s20), %s1292_s17 }
   0x8   : > { %p78_p3 = por %p77_p2, %p76_p1  ;;  %p30_p4 = scmp.ge.s32.totalorder %s1596_s20, 2 }
   0x9   : > { %s64_s21 = ssub.s32 %s1288_s16, %s1594_s19  ;;  %p1040_p6 = scmp.ge.s32.totalorder %s1296_s18, 12 }
   0xa   : > { %s1598_s20 = smov (%p30_p4, %s1596_s20), 0 }
   0xb   : > { %s65_s22 = ssub.s32 %s1292_s17, %s1598_s20  ;;  %156 = sbr.rel (%p1040_p6) target bundleno = 48 (0x30), region = 16 }
   0xc   : > { %s66_s23 = sor.u32 %s65_s22, %s64_s21 }
   0xd   : > { %p67_p5 = scmp.eq.s32.totalorder %s66_s23, 0 }
   0xf   : > { %s1371_s25 = scalar_select %p67_p5, %s1276_s13, %s69_s24  }
  0x10   : > { %172 = sbr.rel (!%p78_p3) target bundleno = 48 (0x30), region = 24  ;;  %s174_s26 = sand.u32 (%p78_p3), 1, %s1276_s13  }
  0x11   : > { %s1107_s27 = smul.u32 (%p78_p3), 384, %s174_s26  ;;  %s1041_s28 = sshll.u32 (%p78_p3), %s1292_s17, 1 }
  0x12   : > { %s1105_s29 = smul.u32 (%p78_p3), 192, %s1288_s16 }
  0x13   : > { %s1385_s8 = scalar_lea.vmem (%p78_p3), [#allocation3], %s1107_s27 }
  0x14   : > { %s180_s30 = sadd.s32 (%p78_p3), %s1105_s29, %s1041_s28 }
  0x15   : > { %s1043_s4 = sshll.u32 %s180_s30, 2 }
  0x16   : > { %s1380_s7 = scalar_lea.vmem %s1584_s1, %s1043_s4 }
  0x17   : > { %v305_v0 = vld [vmem:[%s1380_s7] sm:$0xff]  ;;  %v307_v1 = vld [vmem:[%s1380_s7 + $0x10] sm:$0xff] }
  0x18   : > { %v309_v2 = vld [vmem:[%s1380_s7 + $0x20] sm:$0xff]  ;;  %306 = vst [vmem:[%s1385_s8] sm:$0xff] %v305_v0  ;;  %308 = vst [vmem:[%s1385_s8 + $0x8] sm:$0xff] %v307_v1  ;;  %v311_v3 = vld [vmem:[%s1380_s7 + $0x30] sm:$0xff] }
  0x19   : > { %310 = vst [vmem:[%s1385_s8 + $0x10] sm:$0xff] %v309_v2  ;;  %v313_v4 = vld [vmem:[%s1380_s7 + $0x40] sm:$0xff]  ;;  %v315_v5 = vld [vmem:[%s1380_s7 + $0x50] sm:$0xff]  ;;  %312 = vst [vmem:[%s1385_s8 + $0x18] sm:$0xff] %v311_v3 }
  0x1a   : > { %314 = vst [vmem:[%s1385_s8 + $0x20] sm:$0xff] %v313_v4  ;;  %316 = vst [vmem:[%s1385_s8 + $0x28] sm:$0xff] %v315_v5  ;;  %v317_v6 = vld [vmem:[%s1380_s7 + $0x60] sm:$0xff]  ;;  %v319_v7 = vld [vmem:[%s1380_s7 + $0x70] sm:$0xff] }
  0x1b   : > { %v321_v8 = vld [vmem:[%s1380_s7 + $0x80] sm:$0xff]  ;;  %318 = vst [vmem:[%s1385_s8 + $0x30] sm:$0xff] %v317_v6  ;;  %320 = vst [vmem:[%s1385_s8 + $0x38] sm:$0xff] %v319_v7  ;;  %v323_v9 = vld [vmem:[%s1380_s7 + $0x90] sm:$0xff] }
  0x1c   : > { %322 = vst [vmem:[%s1385_s8 + $0x40] sm:$0xff] %v321_v8  ;;  %v325_v10 = vld [vmem:[%s1380_s7 + $0xa0] sm:$0xff]  ;;  %v327_v11 = vld [vmem:[%s1380_s7 + $0xb0] sm:$0xff]  ;;  %324 = vst [vmem:[%s1385_s8 + $0x48] sm:$0xff] %v323_v9 }
  0x1d   : > { %326 = vst [vmem:[%s1385_s8 + $0x50] sm:$0xff] %v325_v10  ;;  %328 = vst [vmem:[%s1385_s8 + $0x58] sm:$0xff] %v327_v11  ;;  %v329_v12 = vld [vmem:[%s1380_s7 + $0xc0] sm:$0xff]  ;;  %v331_v13 = vld [vmem:[%s1380_s7 + $0xd0] sm:$0xff] }
  0x1e   : > { %v333_v14 = vld [vmem:[%s1380_s7 + $0xe0] sm:$0xff]  ;;  %330 = vst [vmem:[%s1385_s8 + $0x60] sm:$0xff] %v329_v12  ;;  %332 = vst [vmem:[%s1385_s8 + $0x68] sm:$0xff] %v331_v13  ;;  %v335_v15 = vld [vmem:[%s1380_s7 + $0xf0] sm:$0xff] }
  0x1f   : > { %334 = vst [vmem:[%s1385_s8 + $0x70] sm:$0xff] %v333_v14  ;;  %v337_v16 = vld [vmem:[%s1380_s7 + $0x100] sm:$0xff]  ;;  %v339_v17 = vld [vmem:[%s1380_s7 + $0x110] sm:$0xff]  ;;  %336 = vst [vmem:[%s1385_s8 + $0x78] sm:$0xff] %v335_v15 }
  0x20   : > { %338 = vst [vmem:[%s1385_s8 + $0x80] sm:$0xff] %v337_v16  ;;  %340 = vst [vmem:[%s1385_s8 + $0x88] sm:$0xff] %v339_v17  ;;  %v341_v18 = vld [vmem:[%s1380_s7 + $0x120] sm:$0xff]  ;;  %v343_v19 = vld [vmem:[%s1380_s7 + $0x130] sm:$0xff] }
  0x21   : > { %v345_v20 = vld [vmem:[%s1380_s7 + $0x140] sm:$0xff]  ;;  %342 = vst [vmem:[%s1385_s8 + $0x90] sm:$0xff] %v341_v18  ;;  %344 = vst [vmem:[%s1385_s8 + $0x98] sm:$0xff] %v343_v19  ;;  %v347_v21 = vld [vmem:[%s1380_s7 + $0x150] sm:$0xff] }
  0x22   : > { %346 = vst [vmem:[%s1385_s8 + $0xa0] sm:$0xff] %v345_v20  ;;  %v349_v22 = vld [vmem:[%s1380_s7 + $0x160] sm:$0xff]  ;;  %v351_v23 = vld [vmem:[%s1380_s7 + $0x170] sm:$0xff]  ;;  %348 = vst [vmem:[%s1385_s8 + $0xa8] sm:$0xff] %v347_v21 }
  0x23   : > { %350 = vst [vmem:[%s1385_s8 + $0xb0] sm:$0xff] %v349_v22  ;;  %352 = vst [vmem:[%s1385_s8 + $0xb8] sm:$0xff] %v351_v23  ;;  %v353_v24 = vld [vmem:[%s1380_s7 + $0x180] sm:$0xff]  ;;  %v355_v25 = vld [vmem:[%s1380_s7 + $0x190] sm:$0xff] }
  0x24   : > { %v357_v26 = vld [vmem:[%s1380_s7 + $0x1a0] sm:$0xff]  ;;  %354 = vst [vmem:[%s1385_s8 + $0xc0] sm:$0xff] %v353_v24  ;;  %356 = vst [vmem:[%s1385_s8 + $0xc8] sm:$0xff] %v355_v25  ;;  %v359_v27 = vld [vmem:[%s1380_s7 + $0x1b0] sm:$0xff] }
  0x25   : > { %358 = vst [vmem:[%s1385_s8 + $0xd0] sm:$0xff] %v357_v26  ;;  %v361_v28 = vld [vmem:[%s1380_s7 + $0x1c0] sm:$0xff]  ;;  %v363_v29 = vld [vmem:[%s1380_s7 + $0x1d0] sm:$0xff]  ;;  %360 = vst [vmem:[%s1385_s8 + $0xd8] sm:$0xff] %v359_v27 }
  0x26   : > { %362 = vst [vmem:[%s1385_s8 + $0xe0] sm:$0xff] %v361_v28  ;;  %364 = vst [vmem:[%s1385_s8 + $0xe8] sm:$0xff] %v363_v29  ;;  %v365_v30 = vld [vmem:[%s1380_s7 + $0x1e0] sm:$0xff]  ;;  %v367_v31 = vld [vmem:[%s1380_s7 + $0x1f0] sm:$0xff] }
  0x27   : > { %v369_v32 = vld [vmem:[%s1380_s7 + $0x200] sm:$0xff]  ;;  %366 = vst [vmem:[%s1385_s8 + $0xf0] sm:$0xff] %v365_v30  ;;  %368 = vst [vmem:[%s1385_s8 + $0xf8] sm:$0xff] %v367_v31  ;;  %v371_v33 = vld [vmem:[%s1380_s7 + $0x210] sm:$0xff] }
  0x28   : > { %370 = vst [vmem:[%s1385_s8 + $0x100] sm:$0xff] %v369_v32  ;;  %v373_v34 = vld [vmem:[%s1380_s7 + $0x220] sm:$0xff]  ;;  %v375_v35 = vld [vmem:[%s1380_s7 + $0x230] sm:$0xff]  ;;  %372 = vst [vmem:[%s1385_s8 + $0x108] sm:$0xff] %v371_v33 }
  0x29   : > { %374 = vst [vmem:[%s1385_s8 + $0x110] sm:$0xff] %v373_v34  ;;  %376 = vst [vmem:[%s1385_s8 + $0x118] sm:$0xff] %v375_v35  ;;  %v377_v36 = vld [vmem:[%s1380_s7 + $0x240] sm:$0xff]  ;;  %v379_v37 = vld [vmem:[%s1380_s7 + $0x250] sm:$0xff] }
  0x2a   : > { %v381_v38 = vld [vmem:[%s1380_s7 + $0x260] sm:$0xff]  ;;  %378 = vst [vmem:[%s1385_s8 + $0x120] sm:$0xff] %v377_v36  ;;  %380 = vst [vmem:[%s1385_s8 + $0x128] sm:$0xff] %v379_v37  ;;  %v383_v39 = vld [vmem:[%s1380_s7 + $0x270] sm:$0xff] }
  0x2b   : > { %382 = vst [vmem:[%s1385_s8 + $0x130] sm:$0xff] %v381_v38  ;;  %v385_v40 = vld [vmem:[%s1380_s7 + $0x280] sm:$0xff]  ;;  %v387_v41 = vld [vmem:[%s1380_s7 + $0x290] sm:$0xff]  ;;  %384 = vst [vmem:[%s1385_s8 + $0x138] sm:$0xff] %v383_v39 }
  0x2c   : > { %386 = vst [vmem:[%s1385_s8 + $0x140] sm:$0xff] %v385_v40  ;;  %388 = vst [vmem:[%s1385_s8 + $0x148] sm:$0xff] %v387_v41  ;;  %v389_v42 = vld [vmem:[%s1380_s7 + $0x2a0] sm:$0xff]  ;;  %v391_v43 = vld [vmem:[%s1380_s7 + $0x2b0] sm:$0xff] }
  0x2d   : > { %v393_v44 = vld [vmem:[%s1380_s7 + $0x2c0] sm:$0xff]  ;;  %390 = vst [vmem:[%s1385_s8 + $0x150] sm:$0xff] %v389_v42  ;;  %392 = vst [vmem:[%s1385_s8 + $0x158] sm:$0xff] %v391_v43  ;;  %v395_v45 = vld [vmem:[%s1380_s7 + $0x2d0] sm:$0xff] }
  0x2e   : > { %394 = vst [vmem:[%s1385_s8 + $0x160] sm:$0xff] %v393_v44  ;;  %v397_v46 = vld [vmem:[%s1380_s7 + $0x2e0] sm:$0xff]  ;;  %v399_v47 = vld [vmem:[%s1380_s7 + $0x2f0] sm:$0xff]  ;;  %396 = vst [vmem:[%s1385_s8 + $0x168] sm:$0xff] %v395_v45 }
  0x2f   : > { %398 = vst [vmem:[%s1385_s8 + $0x170] sm:$0xff] %v397_v46  ;;  %400 = vst [vmem:[%s1385_s8 + $0x178] sm:$0xff] %v399_v47 }
  0x30 PF: > { %p1044_p7 = scmp.ge.s32.totalorder %s1296_s18, 1  ;;  %p413_p8 = scmp.lt.s32.totalorder %s1296_s18, 13 }
  0x32   : > { %p414_p9 = pnand %p1044_p7, %p413_p8 }
  0x33   : > { %s420_s9 = sand.u32 (!%p414_p9), 1, %s1272_s12   ;;  %s460_s10 = smul.u32 (!%p414_p9), 3, %s1280_s14 }
  0x34   : > { %417 = sbr.rel (%p414_p9) target bundleno = 347 (0x15b), region = 66  ;;  %s1046_s21 = sshll.u32 (!%p414_p9), %s1284_s15, 1 }
  0x35   : > { %s1108_s11 = smul.u32 (!%p414_p9), 384, %s420_s9  ;;  %p463_p10 = scmp.lt.s32.totalorder (!%p414_p9), %s460_s10, 17 }
  0x36   : > { %p473_p11 = scmp.lt.s32.totalorder (!%p414_p9), %s1046_s21, 3  ;;  %p1049_p12 = scmp.ne.s32.totalorder (!%p414_p9), %s1280_s14, 0 }
  0x37   : > { %s1502_s5 = scalar_lea.vmem (!%p414_p9), [#allocation3], %s1108_s11 }
  0x39   : > { %s1600_s10 = smov (!%p463_p10, %s460_s10), 17  ;;  %s1602_s21 = smov (!%p473_p11, %s1046_s21), 3 }
  0x3a   : > { %s1045_s22 = sshll.u32 %s1600_s10, 2  ;;  %s475_s12 = scalar_lea.vmem %s1585_s2, %s1602_s21 }
  0x3b   : > { %s1490_s26 = scalar_lea.vmem %s1583_s0, %s1045_s22  ;;  %s1048_s29 = sshll.u32 %s1602_s21, 2 }
  0x3c   : > { %s1500_s4 = scalar_lea.vmem %s1586_s3, %s1048_s29  ;;  %491 = sbr.rel (%p1049_p12) target bundleno = 67 (0x43), region = 74 }
  0x41   : > { %v1298_v48 = vmov 0.0  }
  0x42   : > { %492 = vst [vmem:[#allocation2] sm:$0xff] %v1298_v48  ;;  %493 = vst [vmem:[#allocation2 + $0x8] sm:$0xff] %v1298_v48 }
  0x43 PF: > { %v1167_v49 = vld [vmem:[%s1502_s5 + $0x74] ss:$8 sps:$4 sm:$0xff]   ;;  %v1169_v50 = vld [vmem:[%s1502_s5 + $0x70] ss:$8 sps:$4 sm:$0xff]   ;;  %v1299_v51 = vmov 0   ;;  %p1101_p13 = scmp.ne.s32.totalorder %s1280_s14, 5 }
  0x44   : > { %870 = vmatprep.mubr.bf16.mxu1 %v1299_v51  ;;  %797 = vmatprep.subr.bf16.mxu0 %v1167_v49  ;;  %v1170_v52 = vld [vmem:[%s1502_s5 + $0x64] ss:$8 sps:$4 sm:$0xff]   ;;  %v1172_v53 = vld [vmem:[%s1502_s5 + $0x60] ss:$8 sps:$4 sm:$0xff]   ;;  %v1173_v54 = vld [vmem:[%s1502_s5 + $0x54] ss:$8 sps:$4 sm:$0xff]  }
  0x45   : > { %798 = vmatpush1.bf16.msra.mxu0 %v1169_v50  ;;  %v1175_v55 = vld [vmem:[%s1502_s5 + $0x50] ss:$8 sps:$4 sm:$0xff]   ;;  %v1176_v56 = vld [vmem:[%s1502_s5 + $0x44] ss:$8 sps:$4 sm:$0xff]   ;;  %v1188_v57 = vld [vmem:[%s1502_s5 + $0x174] ss:$8 sps:$4 sm:$0xff]  }
  0x46   : > { %799 = vmatprep.subr.bf16.mxu0 %v1170_v52  ;;  %v1190_v58 = vld [vmem:[%s1502_s5 + $0x170] ss:$8 sps:$4 sm:$0xff]   ;;  %v1178_v59 = vld [vmem:[%s1502_s5 + $0x40] ss:$8 sps:$4 sm:$0xff]   ;;  %v1179_v60 = vld [vmem:[%s1502_s5 + $0x34] ss:$8 sps:$4 sm:$0xff]   ;;  %838 = vmatprep.subr.bf16.mxu1 %v1188_v57 }
  0x47   : > { %v1194_v61 = vld [vmem:[%s1502_s5 + $0x164] ss:$8 sps:$4 sm:$0xff]   ;;  %839 = vmatpush1.bf16.msra.mxu1 %v1190_v58  ;;  %v1196_v62 = vld [vmem:[%s1502_s5 + $0x160] ss:$8 sps:$4 sm:$0xff]   ;;  %v1181_v63 = vld [vmem:[%s1502_s5 + $0x30] ss:$8 sps:$4 sm:$0xff]  }
  0x48   : > { %840 = vmatprep.subr.bf16.mxu1 %v1194_v61  ;;  %v1200_v0 = vld [vmem:[%s1502_s5 + $0x154] ss:$8 sps:$4 sm:$0xff]   ;;  %v1182_v1 = vld [vmem:[%s1502_s5 + $0x24] ss:$8 sps:$4 sm:$0xff]   ;;  %v1202_v2 = vld [vmem:[%s1502_s5 + $0x150] ss:$8 sps:$4 sm:$0xff]  }
  0x49   : > { %800 = vmatpush1.bf16.msra.mxu0 %v1172_v53  ;;  %v1206_v3 = vld [vmem:[%s1502_s5 + $0x144] ss:$8 sps:$4 sm:$0xff]   ;;  %v1184_v4 = vld [vmem:[%s1502_s5 + $0x20] ss:$8 sps:$4 sm:$0xff]   ;;  %v1185_v5 = vld [vmem:[%s1502_s5 + $0x14] ss:$8 sps:$4 sm:$0xff]  }
  0x4a   : > { %801 = vmatprep.subr.bf16.mxu0 %v1173_v54  ;;  %v1208_v6 = vld [vmem:[%s1502_s5 + $0x140] ss:$8 sps:$4 sm:$0xff]   ;;  %v1212_v7 = vld [vmem:[%s1502_s5 + $0x134] ss:$8 sps:$4 sm:$0xff]   ;;  %v1187_v8 = vld [vmem:[%s1502_s5 + $0x10] ss:$8 sps:$4 sm:$0xff]  }
  0x4b   : > { %841 = vmatpush1.bf16.msra.mxu1 %v1196_v62  ;;  %v1191_v9 = vld [vmem:[%s1502_s5 + $0x4] ss:$8 sps:$4 sm:$0xff]   ;;  %v1214_v10 = vld [vmem:[%s1502_s5 + $0x130] ss:$8 sps:$4 sm:$0xff]   ;;  %v1193_v12 = vld [vmem:[%s1502_s5] ss:$8 sps:$4 sm:$0xff]  }
  0x4c   : > { %842 = vmatprep.subr.bf16.mxu1 %v1200_v0  ;;  %v1218_v11 = vld [vmem:[%s1502_s5 + $0x124] ss:$8 sps:$4 sm:$0xff]   ;;  %v1197_v13 = vld [vmem:[%s1502_s5 + $0xf4] ss:$8 sps:$4 sm:$0xff]   ;;  %v1220_v14 = vld [vmem:[%s1502_s5 + $0x120] ss:$8 sps:$4 sm:$0xff]  }
  0x4d   : > { %802 = vmatpush1.bf16.msra.mxu0 %v1175_v55  ;;  %v1224_v15 = vld [vmem:[%s1502_s5 + $0x114] ss:$8 sps:$4 sm:$0xff]   ;;  %v1199_v16 = vld [vmem:[%s1502_s5 + $0xf0] ss:$8 sps:$4 sm:$0xff]   ;;  %v1203_v17 = vld [vmem:[%s1502_s5 + $0xe4] ss:$8 sps:$4 sm:$0xff]  }
  0x4e   : > { %803 = vmatprep.subr.bf16.mxu0 %v1176_v56  ;;  %v496_v18 = vld [vmem:[%s1490_s26] sm:$0xff]  ;;  %v1230_v21 = vld [vmem:[%s1502_s5 + $0x104] ss:$8 sps:$4 sm:$0xff]   ;;  %v1205_v22 = vld [vmem:[%s1502_s5 + $0xe0] ss:$8 sps:$4 sm:$0xff]  }
  0x4f   : > { %843 = vmatpush1.bf16.msra.mxu1 %v1202_v2  ;;  %v1226_v19 = vld [vmem:[%s1502_s5 + $0x110] ss:$8 sps:$4 sm:$0xff]   ;;  %v1051_v20 = vcombine.high %v496_v18, %v496_v18  ;;  %v1209_v23 = vld [vmem:[%s1502_s5 + $0xd4] ss:$8 sps:$4 sm:$0xff]   ;;  %v1232_v24 = vld [vmem:[%s1502_s5 + $0x100] ss:$8 sps:$4 sm:$0xff]   ;;  %v1050_v37 = vcombine.low %v496_v18, %v496_v18 }
  0x50   : > { %844 = vmatprep.subr.bf16.mxu1 %v1206_v3  ;;  %v1211_v25 = vld [vmem:[%s1502_s5 + $0xd0] ss:$8 sps:$4 sm:$0xff]   ;;  %v1215_v26 = vld [vmem:[%s1502_s5 + $0xc4] ss:$8 sps:$4 sm:$0xff]   ;;  %v1217_v28 = vld [vmem:[%s1502_s5 + $0xc0] ss:$8 sps:$4 sm:$0xff]  }
  0x51   : > { %804 = vmatpush1.bf16.msra.mxu0 %v1178_v59  ;;  %829 = vmatprep.mubr.bf16.mxu0 %v1051_v20  ;;  %v1236_v27 = vld [vmem:[%s1490_s26 + $0x8] ss:$0 sps:$4 sm:$0xff]   ;;  %v1221_v29 = vld [vmem:[%s1502_s5 + $0xb4] ss:$8 sps:$4 sm:$0xff]   ;;  %v1227_v31 = vld [vmem:[%s1502_s5 + $0xa4] ss:$8 sps:$4 sm:$0xff]  }
  0x52   : > { %805 = vmatprep.subr.bf16.mxu0 %v1179_v60  ;;  %v1223_v30 = vld [vmem:[%s1502_s5 + $0xb0] ss:$8 sps:$4 sm:$0xff]   ;;  %v1229_v32 = vld [vmem:[%s1502_s5 + $0xa0] ss:$8 sps:$4 sm:$0xff]   ;;  %v1233_v33 = vld [vmem:[%s1502_s5 + $0x94] ss:$8 sps:$4 sm:$0xff]  }
  0x53   : > { %845 = vmatpush1.bf16.msra.mxu1 %v1208_v6  ;;  %v1235_v34 = vld [vmem:[%s1502_s5 + $0x90] ss:$8 sps:$4 sm:$0xff]   ;;  %v1237_v35 = vld [vmem:[%s1502_s5 + $0x84] ss:$8 sps:$4 sm:$0xff]   ;;  %v1239_v36 = vld [vmem:[%s1502_s5 + $0x80] ss:$8 sps:$4 sm:$0xff]  }
  0x54   : > { %846 = vmatprep.subr.bf16.mxu1 %v1212_v7  ;;  %v494_v42 = vld [vmem:[#allocation2] sm:$0xff]  ;;  %v495_v45 = vld [vmem:[#allocation2 + $0x8] sm:$0xff] }
  0x55   : > { %806 = vmatpush1.bf16.msra.mxu0 %v1181_v63 }
  0x56   : > { %807 = vmatprep.subr.bf16.mxu0 %v1182_v1 }
  0x57   : > { %847 = vmatpush1.bf16.msra.mxu1 %v1214_v10 }
  0x58   : > { %848 = vmatprep.subr.bf16.mxu1 %v1218_v11 }
  0x59   : > { %808 = vmatpush1.bf16.msra.mxu0 %v1184_v4 }
  0x5a   : > { %809 = vmatprep.subr.bf16.mxu0 %v1185_v5 }
  0x5b   : > { %849 = vmatpush1.bf16.msra.mxu1 %v1220_v14 }
  0x5c   : > { %850 = vmatprep.subr.bf16.mxu1 %v1224_v15 }
  0x5d   : > { %810 = vmatpush1.bf16.msra.mxu0 %v1187_v8 }
  0x5e   : > { %811 = vmatprep.subr.bf16.mxu0 %v1191_v9 }
  0x5f   : > { %851 = vmatpush1.bf16.msra.mxu1 %v1226_v19 }
  0x60   : > { %852 = vmatprep.subr.bf16.mxu1 %v1230_v21 }
  0x61   : > { %812 = vmatpush1.bf16.msra.mxu0 %v1193_v12 }
  0x62   : > { %813 = vmatprep.subr.bf16.mxu0 %v1197_v13 }
  0x63   : > { %853 = vmatpush1.bf16.msra.mxu1 %v1232_v24 }
  0x65   : > { %814 = vmatpush2.bf16.msra.mxu0 %v1199_v16 }
  0x66   : > { %815 = vmatprep.subr.bf16.mxu0 %v1203_v17  ;;  %871 = vmatmul.mubr.bf16.vlgmr.msra.gmra.mxu1 %v1236_v27 }
  0x69   : > { %816 = vmatpush2.bf16.msra.mxu0 %v1205_v22 }
  0x6a   : > { %817 = vmatprep.subr.bf16.mxu0 %v1209_v23 }
  0x6d   : > { %818 = vmatpush2.bf16.msra.mxu0 %v1211_v25 }
  0x6e   : > { %819 = vmatprep.subr.bf16.mxu0 %v1215_v26 }
  0x71   : > { %820 = vmatpush2.bf16.msra.mxu0 %v1217_v28 }
  0x72   : > { %821 = vmatprep.subr.bf16.mxu0 %v1221_v29 }
  0x75   : > { %822 = vmatpush2.bf16.msra.mxu0 %v1223_v30 }
  0x76   : > { %823 = vmatprep.subr.bf16.mxu0 %v1227_v31 }
  0x79   : > { %824 = vmatpush2.bf16.msra.mxu0 %v1229_v32 }
  0x7a   : > { %825 = vmatprep.subr.bf16.mxu0 %v1233_v33 }
  0x7d   : > { %826 = vmatpush2.bf16.msra.mxu0 %v1235_v34 }
  0x7e   : > { %827 = vmatprep.subr.bf16.mxu0 %v1237_v35 }
  0x81   : > { %828 = vmatpush2.bf16.msra.mxu0 %v1239_v36 }
  0x84   : > { %830 = vmatmul.mubr.bf16.vlgmr.msra.gmra.mxu0 %v1050_v37 }
 0x126   : > { %v872_v38 = vpop.f32.mrf.mxu1 }
 0x128   : > { %v874_v39 = vpop.f32.mrf.mxu1 }
 0x12a   : > { %v876_v40 = vpop.f32.mrf.mxu1 }
 0x12c   : > { %v877_v41 = vpop.f32.mrf.mxu1 }
 0x144   : > { %v831_v43 = vpop.f32.mrf.mxu0 }
 0x145   : > { %v873_v44 = vadd.f32 %v872_v38, %v831_v43 }
 0x146   : > { %v833_v46 = vpop.f32.mrf.mxu0 }
 0x147   : > { %v879_v47 = vadd.f32 %v873_v44, %v494_v42  ;;  %v875_v48 = vadd.f32 %v874_v39, %v833_v46  ;;  %886 = sbr.rel (%p1101_p13) target bundleno = 347 (0x15b), region = 78 }
 0x148   : > { %v835_v49 = vpop.f32.mrf.mxu0 }
 0x149   : > { %881 = vst [vmem:[#allocation2] sm:$0xff] %v879_v47  ;;  %v880_v50 = vadd.f32 %v875_v48, %v495_v45 }
 0x14a   : > { %v836_v51 = vpop.f32.mrf.mxu0 }
 0x14b   : > { %882 = vst [vmem:[#allocation2 + $0x8] sm:$0xff] %v880_v50 }
 0x14c   : > { %v891_v52 = vlaneseq  ;;  %v889_v54 = vld [vmem:[%s475_s12] sm:$0x3] }
 0x14e   : > { %v892_v53 = vshrl.u32 %v891_v52, 7 }
 0x150   : > { %v893_v55 = vsub.s32 0, %v892_v53  ;;  %v897_v56 = vsub.s32 1, %v892_v53  ;;  %v887_v57 = vld [vmem:[#allocation2] sm:$0xff] }
 0x152   : > { %v888_v58 = vld [vmem:[#allocation2 + $0x8] sm:$0xff]  ;;  %v894_v59 = vrot.slane %v889_v54, %v893_v55  ;;  %v898_v60 = vrot.slane %v889_v54, %v897_v56 }
 0x154   : > { %v901_v61 = vadd.f32 %v894_v59, %v887_v57  ;;  %v902_v62 = vadd.f32 %v898_v60, %v888_v58 }
 0x156   : > { %v903_v63 = vmax.f32 %v901_v61, 0.0  ;;  %v904_v0 = vmax.f32 %v902_v62, 0.0 }
 0x158   : > { %v1106_v1 = vpack.c.bf16 %v904_v0, %v903_v63 }
 0x15a   : > { %913 = vst [vmem:[%s1500_s4] sm:$0xff] %v1106_v1 }
 0x15b PF: > { %s13_s18 = sadd.s32 1, %s1296_s18   ;;  %s1587_s12 = smov %s1276_s13 }
 0x15c   : > { %p10_p0 = scmp.ge.s32.totalorder %s13_s18, 14   ;;  %s1588_s13 = smov %s1371_s25 }
 0x15d   : > { %s1589_s14 = smov %s1288_s16  ;;  %s1590_s15 = smov %s1292_s17 }
 0x15e   : > { %s1591_s16 = smov %s1594_s19  ;;  %s1592_s17 = smov %s1598_s20 }
 0x15f   :  { %12 = sbr.rel (!%p10_p0) target bundleno = 4 (0x4), region = 119 }

</bundles_post_ra>
